<compile_context>
chip_gen: v6e
topology: v6e:2x2x1
jax: 0.10.0
libtpu: 0.0.40
codegen_flags: <defaults>
</compile_context>

<pallas_src>
import functools
import math

import jax
import jax.numpy as jnp
from jax.experimental import pallas as pl
from jax.experimental.pallas import tpu as pltpu

_BF16 = jnp.bfloat16
_VMEM_LIMIT = 48 * 1024 * 1024   # headroom below v7x's 64 MiB physical VMEM


# ------------------------------ in-kernel helpers ----------------------------

def _layernorm_f32(y, g, b, eps):
    mu = jnp.mean(y, axis=-1, keepdims=True)
    var = jnp.mean(jnp.square(y - mu), axis=-1, keepdims=True)
    return (y - mu) * jax.lax.rsqrt(var + eps) * g + b


def _mha_out_ln(q, k, v, res, wo, bo, g, bln, *, nhead, eps):
    """Head-sliced attention + out-proj + residual + layernorm, in-register.

    q, k, v: post-projection f32 [L*, D] (1/sqrt(dh) already folded into Wq).
    Heads use static lane slices -> each head contracts only dh lanes (no masks,
    no redundant full-D MXU work).
    """
    d = q.shape[-1]
    dh = d // nhead
    qb = q.astype(_BF16)
    kb = k.astype(_BF16)
    vb = v.astype(_BF16)
    outs = []
    for h in range(nhead):
        lo = h * dh
        qh = qb[:, lo:lo + dh]                              # [Lq, dh]
        kh = kb[:, lo:lo + dh]                              # [Lk, dh]
        vh = vb[:, lo:lo + dh]                              # [Lk, dh]
        s = jax.lax.dot_general(qh, kh, (((1,), (1,)), ((), ())),
                                preferred_element_type=jnp.float32)   # [Lq, Lk]
        s = s - jnp.max(s, axis=-1, keepdims=True)
        p = jnp.exp(s)
        p = p * pl.reciprocal(jnp.sum(p, axis=-1, keepdims=True), approx=True)
        outs.append(jnp.dot(p.astype(_BF16), vh,
                            preferred_element_type=jnp.float32))      # [Lq, dh]
    attn = jnp.concatenate(outs, axis=-1)                             # [Lq, D]
    o = jnp.dot(attn.astype(_BF16), wo, preferred_element_type=jnp.float32) + bo
    return _layernorm_f32(res + o, g, bln, eps)


# ------------------------------ Pallas kernels -------------------------------

def _self_attn_ln_kernel(xq_ref, xf_ref, posq_ref, posf_ref, wqkv_ref, bqkv_ref,
                         wo_ref, bo_ref, g_ref, b_ref, o_ref, *, nhead, eps):
    # TODO(synk): key-padding mask not applied (all-valid for same-size batch).
    xq = xq_ref[0]                                   # [tq, D] f32 (query rows)
    xf = xf_ref[0]                                   # [L,  D] f32 (K/V source)
    q = jnp.dot((xq + posq_ref[...]).astype(_BF16), wqkv_ref[0],
                preferred_element_type=jnp.float32) + bqkv_ref[0]
    k = jnp.dot((xf + posf_ref[...]).astype(_BF16), wqkv_ref[1],
                preferred_element_type=jnp.float32) + bqkv_ref[1]
    v = jnp.dot(xf.astype(_BF16), wqkv_ref[2],
                preferred_element_type=jnp.float32) + bqkv_ref[2]
    out = _mha_out_ln(q, k, v, xq, wo_ref[...], bo_ref[...],
                      g_ref[...], b_ref[...], nhead=nhead, eps=eps)
    o_ref[0] = out.astype(o_ref.dtype)


def _cross_attn_ln_kernel(xq_ref, qpos_ref, mem_ref, mpos_ref, wqkv_ref, bqkv_ref,
                          wo_ref, bo_ref, g_ref, b_ref, o_ref, *, nhead, eps):
    xq = xq_ref[0]                                   # [tq, D] (tgt query rows)
    mem = mem_ref[0]                                 # [Lk, D] (encoder memory)
    q = jnp.dot((xq + qpos_ref[...]).astype(_BF16), wqkv_ref[0],
                preferred_element_type=jnp.float32) + bqkv_ref[0]
    k = jnp.dot((mem + mpos_ref[...]).astype(_BF16), wqkv_ref[1],
                preferred_element_type=jnp.float32) + bqkv_ref[1]
    v = jnp.dot(mem.astype(_BF16), wqkv_ref[2],
                preferred_element_type=jnp.float32) + bqkv_ref[2]
    out = _mha_out_ln(q, k, v, xq, wo_ref[...], bo_ref[...],
                      g_ref[...], b_ref[...], nhead=nhead, eps=eps)
    o_ref[0] = out.astype(o_ref.dtype)


def _ffn_ln_kernel(x_ref, w1_ref, b1_ref, w2_ref, b2_ref, g_ref, b_ref, o_ref, *, eps):
    x = x_ref[...]                                   # [tm, D] f32
    h = jnp.dot(x.astype(_BF16), w1_ref[...],
                preferred_element_type=jnp.float32) + b1_ref[...]
    h = jnp.maximum(h, 0.0)
    y = x + jnp.dot(h.astype(_BF16), w2_ref[...],
                    preferred_element_type=jnp.float32) + b2_ref[...]
    o_ref[...] = _layernorm_f32(y, g_ref[...], b_ref[...], eps).astype(o_ref.dtype)


def _backbone_proj_kernel(x_ref, wb_ref, bb_ref, wp_ref, bp_ref, o_ref):
    # Synthetic backbone (1x1 conv + ReLU) fused with DETR's input_proj 1x1 conv.
    # TODO(synk): real ResNet-50 backbone (strided convs / batchnorm) has no clean
    # tiny-kernel equivalent; replaced by this deterministic stub.
    feat = jnp.dot(x_ref[...].astype(_BF16), wb_ref[...],
                   preferred_element_type=jnp.float32) + bb_ref[...]
    feat = jnp.maximum(feat, 0.0)
    o_ref[...] = (jnp.dot(feat.astype(_BF16), wp_ref[...],
                          preferred_element_type=jnp.float32)
                  + bp_ref[...]).astype(o_ref.dtype)


def _heads_kernel(x_ref, g_ref, bn_ref, wc_ref, bc_ref,
                  w1_ref, b1_ref, w2_ref, b2_ref, w3_ref, b3_ref,
                  cls_ref, box_ref, *, eps):
    # Final decoder norm + class_emb Linear + bbox MLP(3 layers) + sigmoid, fused.
    x = _layernorm_f32(x_ref[...], g_ref[...], bn_ref[...], eps)
    xb = x.astype(_BF16)
    cls_ref[...] = (jnp.dot(xb, wc_ref[...], preferred_element_type=jnp.float32)
                    + bc_ref[...]).astype(cls_ref.dtype)
    h = jnp.maximum(jnp.dot(xb, w1_ref[...],
                            preferred_element_type=jnp.float32) + b1_ref[...], 0.0)
    h = jnp.maximum(jnp.dot(h.astype(_BF16), w2_ref[...],
                            preferred_element_type=jnp.float32) + b2_ref[...], 0.0)
    box = jnp.dot(h.astype(_BF16), w3_ref[...],
                  preferred_element_type=jnp.float32) + b3_ref[...]
    box_ref[...] = jax.nn.sigmoid(box).astype(box_ref.dtype)


# ------------------------------ tiling helpers --------------------------------

def _div_tile(n, target):
    """Largest divisor of n that is a multiple of 8 and <= target (else n)."""
    if n <= target:
        return n
    t = target - (target % 8)
    while t >= 8:
        if n % t == 0:
            return t
        t -= 8
    return n


# ------------------------------ wrappers --------------------------------------

def self_attention_block(p, x, pos, nhead, eps=1e-5, q_block=128):
    """x: [B, L, D]; pos: [L, D] (shared across batch, fetched once)."""
    B, L, D = x.shape
    tq = _div_tile(L, q_block)      # ~256-512 is the sweet spot at real DETR L
    nq = L // tq
    return pl.pallas_call(
        functools.partial(_self_attn_ln_kernel, nhead=nhead, eps=eps),
        out_shape=jax.ShapeDtypeStruct((B, L, D), x.dtype),
        grid=(B, nq),
        in_specs=[
            pl.BlockSpec((1, tq, D), lambda b, q: (b, q, 0)),     # x (query rows)
            pl.BlockSpec((1, L, D), lambda b, q: (b, 0, 0)),      # x (full K/V src)
            pl.BlockSpec((tq, D), lambda b, q: (q, 0)),           # pos (query rows)
            pl.BlockSpec((L, D), lambda b, q: (0, 0)),            # pos (full)
            pl.BlockSpec((3, D, D), lambda b, q: (0, 0, 0)),      # wqkv bf16 (packed)
            pl.BlockSpec((3, 1, D), lambda b, q: (0, 0, 0)),      # bqkv f32
            pl.BlockSpec((D, D), lambda b, q: (0, 0)),            # wo bf16
            pl.BlockSpec((1, D), lambda b, q: (0, 0)),            # bo
            pl.BlockSpec((1, D), lambda b, q: (0, 0)),            # ln gamma
            pl.BlockSpec((1, D), lambda b, q: (0, 0)),            # ln beta
        ],
        out_specs=pl.BlockSpec((1, tq, D), lambda b, q: (b, q, 0)),
        compiler_params=pltpu.CompilerParams(
            dimension_semantics=("parallel", "parallel"),
            vmem_limit_bytes=_VMEM_LIMIT),
    )(x, x, pos, pos, p["wqkv"], p["bqkv"], p["wo"], p["bo"], p["ln_g"], p["ln_b"])


def cross_attention_block(p, x, qpos, mem, mpos, nhead, eps=1e-5, q_block=128):
    """x: [B, Lq, D]; qpos: [Lq, D]; mem: [B, Lk, D]; mpos: [Lk, D]."""
    B, Lq, D = x.shape
    Lk = mem.shape[1]
    tq = _div_tile(Lq, q_block)
    nq = Lq // tq
    return pl.pallas_call(
        functools.partial(_cross_attn_ln_kernel, nhead=nhead, eps=eps),
        out_shape=jax.ShapeDtypeStruct((B, Lq, D), x.dtype),
        grid=(B, nq),
        in_specs=[
            pl.BlockSpec((1, tq, D), lambda b, q: (b, q, 0)),     # tgt (query rows)
            pl.BlockSpec((tq, D), lambda b, q: (q, 0)),           # query pos
            pl.BlockSpec((1, Lk, D), lambda b, q: (b, 0, 0)),     # memory
            pl.BlockSpec((Lk, D), lambda b, q: (0, 0)),           # memory pos
            pl.BlockSpec((3, D, D), lambda b, q: (0, 0, 0)),
            pl.BlockSpec((3, 1, D), lambda b, q: (0, 0, 0)),
            pl.BlockSpec((D, D), lambda b, q: (0, 0)),
            pl.BlockSpec((1, D), lambda b, q: (0, 0)),
            pl.BlockSpec((1, D), lambda b, q: (0, 0)),
            pl.BlockSpec((1, D), lambda b, q: (0, 0)),
        ],
        out_specs=pl.BlockSpec((1, tq, D), lambda b, q: (b, q, 0)),
        compiler_params=pltpu.CompilerParams(
            dimension_semantics=("parallel", "parallel"),
            vmem_limit_bytes=_VMEM_LIMIT),
    )(x, qpos, mem, mpos, p["wqkv"], p["bqkv"], p["wo"], p["bo"], p["ln_g"], p["ln_b"])


def ffn_block(p, x, eps=1e-5, row_block=256):
    B, L, D = x.shape
    M = B * L
    Dff = p["w1"].shape[1]
    tm = _div_tile(M, row_block)   # capped so the [tm, Dff] f32 ReLU stays small
    y = pl.pallas_call(
        functools.partial(_ffn_ln_kernel, eps=eps),
        out_shape=jax.ShapeDtypeStruct((M, D), x.dtype),
        grid=(M // tm,),
        in_specs=[
            pl.BlockSpec((tm, D), lambda i: (i, 0)),
            pl.BlockSpec((D, Dff), lambda i: (0, 0)),             # w1 bf16
            pl.BlockSpec((1, Dff), lambda i: (0, 0)),
            pl.BlockSpec((Dff, D), lambda i: (0, 0)),             # w2 bf16
            pl.BlockSpec((1, D), lambda i: (0, 0)),
            pl.BlockSpec((1, D), lambda i: (0, 0)),
            pl.BlockSpec((1, D), lambda i: (0, 0)),
        ],
        out_specs=pl.BlockSpec((tm, D), lambda i: (i, 0)),
        compiler_params=pltpu.CompilerParams(
            dimension_semantics=("parallel",),
            vmem_limit_bytes=_VMEM_LIMIT),
    )(x.reshape(M, D), p["w1"], p["b1"], p["w2"], p["b2"], p["ln_g"], p["ln_b"])
    return y.reshape(B, L, D)


def backbone_and_input_proj(pb, pp, tokens, row_block=256):
    M, C = tokens.shape
    Cb = pb["w"].shape[1]
    D = pp["w"].shape[1]
    tm = _div_tile(M, row_block)
    return pl.pallas_call(
        _backbone_proj_kernel,
        out_shape=jax.ShapeDtypeStruct((M, D), tokens.dtype),
        grid=(M // tm,),
        in_specs=[
            pl.BlockSpec((tm, C), lambda i: (i, 0)),
            pl.BlockSpec((C, Cb), lambda i: (0, 0)),              # wb bf16
            pl.BlockSpec((1, Cb), lambda i: (0, 0)),
            pl.BlockSpec((Cb, D), lambda i: (0, 0)),              # wp bf16
            pl.BlockSpec((1, D), lambda i: (0, 0)),
        ],
        out_specs=pl.BlockSpec((tm, D), lambda i: (i, 0)),
        compiler_params=pltpu.CompilerParams(
            dimension_semantics=("parallel",),
            vmem_limit_bytes=_VMEM_LIMIT),
    )(tokens, pb["w"], pb["b"], pp["w"], pp["b"])


def prediction_heads(params, dec_norm, hs, eps=1e-5):
    M, D = hs.shape
    n_cls = params["class_emb"]["w"].shape[1]
    return pl.pallas_call(
        functools.partial(_heads_kernel, eps=eps),
        out_shape=(jax.ShapeDtypeStruct((M, n_cls), hs.dtype),
                   jax.ShapeDtypeStruct((M, 4), hs.dtype)),
        grid=(1,),
        in_specs=[
            pl.BlockSpec((M, D), lambda i: (0, 0)),
            pl.BlockSpec((1, D), lambda i: (0, 0)),
            pl.BlockSpec((1, D), lambda i: (0, 0)),
            pl.BlockSpec((D, n_cls), lambda i: (0, 0)),
            pl.BlockSpec((1, n_cls), lambda i: (0, 0)),
            pl.BlockSpec((D, D), lambda i: (0, 0)),
            pl.BlockSpec((1, D), lambda i: (0, 0)),
            pl.BlockSpec((D, D), lambda i: (0, 0)),
            pl.BlockSpec((1, D), lambda i: (0, 0)),
            pl.BlockSpec((D, 4), lambda i: (0, 0)),
            pl.BlockSpec((1, 4), lambda i: (0, 0)),
        ],
        out_specs=(pl.BlockSpec((M, n_cls), lambda i: (0, 0)),
                   pl.BlockSpec((M, 4), lambda i: (0, 0))),
        compiler_params=pltpu.CompilerParams(
            dimension_semantics=("arbitrary",),
            vmem_limit_bytes=_VMEM_LIMIT),
    )(hs, dec_norm["g"], dec_norm["b"],
      params["class_emb"]["w"], params["class_emb"]["b"],
      params["bbox_emb"][0]["w"], params["bbox_emb"][0]["b"],
      params["bbox_emb"][1]["w"], params["bbox_emb"][1]["b"],
      params["bbox_emb"][2]["w"], params["bbox_emb"][2]["b"])


# ------------------------- positional embedding (host JAX) --------------------

def sine_position_embedding(H, W, d_model):
    """Returns a single [H*W, d_model] table (batch-invariant; no broadcast)."""
    num_pos_feats = d_model // 2
    scale = 2.0 * math.pi
    eps = 1e-6
    y_embed = jnp.arange(1, H + 1, dtype=jnp.float32)[:, None] * jnp.ones((1, W), jnp.float32)
    x_embed = jnp.arange(1, W + 1, dtype=jnp.float32)[None, :] * jnp.ones((H, 1), jnp.float32)
    y_embed = y_embed / (y_embed[-1:, :] + eps) * scale
    x_embed = x_embed / (x_embed[:, -1:] + eps) * scale
    dim_t = jnp.arange(num_pos_feats, dtype=jnp.float32)
    dim_t = 10000.0 ** (2.0 * jnp.floor(dim_t / 2.0) / num_pos_feats)
    pos_x = x_embed[:, :, None] / dim_t
    pos_y = y_embed[:, :, None] / dim_t
    pos_x = jnp.stack([jnp.sin(pos_x[:, :, 0::2]), jnp.cos(pos_x[:, :, 1::2])],
                      axis=3).reshape(H, W, num_pos_feats)
    pos_y = jnp.stack([jnp.sin(pos_y[:, :, 0::2]), jnp.cos(pos_y[:, :, 1::2])],
                      axis=3).reshape(H, W, num_pos_feats)
    pos = jnp.concatenate([pos_y, pos_x], axis=-1)  # [H, W, d_model]
    return pos.reshape(H * W, d_model)


# ------------------------------ DETR forward ----------------------------------

def detr_forward(params, images, *, d_model, nhead):
    """images: [B, 3, H, W] (NCHW as in PyTorch)."""
    B, C, H, W = images.shape
    tokens = jnp.transpose(images, (0, 2, 3, 1)).reshape(B * H * W, C)

    # NestedTensor mask: all images same size -> no padding -> mask all False
    # (attention kernels therefore skip key-padding masking).

    src = backbone_and_input_proj(params["backbone"], params["input_proj"], tokens)
    src = src.reshape(B, H * W, d_model)
    pos = sine_position_embedding(H, W, d_model)            # [H*W, D], shared per batch

    tp = params["transformer"]

    # Encoder
    memory = src
    for lp in tp["enc_layers"]:
        memory = self_attention_block(lp["sa"], memory, pos, nhead)
        memory = ffn_block(lp["ffn"], memory)

    # Decoder
    Q = params["query_emb"].shape[0]
    query_pos = params["query_emb"]                         # [Q, D], shared per batch
    tgt = jnp.zeros((B, Q, d_model), src.dtype)
    for lp in tp["dec_layers"]:
        tgt = self_attention_block(lp["sa"], tgt, query_pos, nhead)
        tgt = cross_attention_block(lp["ca"], tgt, query_pos, memory, pos, nhead)
        tgt = ffn_block(lp["ffn"], tgt)

    # aux_loss=False -> heads on the last decoder layer only (final decoder norm
    # is fused into the heads kernel).
    hs_last = tgt.reshape(B * Q, d_model)
    logits, boxes = prediction_heads(params, tp["dec_norm"], hs_last)
    return {"pred_logits": logits.reshape(B, Q, -1),
            "pred_boxes": boxes.reshape(B, Q, 4)}


# ------------------------------ parameter init ---------------------------------

def init_params(key, *, in_ch, backbone_ch, d_model, dim_ff,
                n_enc, n_dec, n_queries, n_classes, nhead):
    keys = iter(jax.random.split(key, 512))

    def lin_f32(n_in, n_out):
        bound = 1.0 / math.sqrt(n_in)
        w = jax.random.uniform(next(keys), (n_in, n_out), jnp.float32, -bound, bound)
        b = jax.random.uniform(next(keys), (1, n_out), jnp.float32, -bound, bound)
        return w, b

    def lin(n_in, n_out):
        w, b = lin_f32(n_in, n_out)
        return {"w": w.astype(_BF16), "b": b}        # weights pre-cast to bf16

    def ln_gb():
        return (jnp.ones((1, d_model), jnp.float32),
                jnp.zeros((1, d_model), jnp.float32))

    qscale = 1.0 / math.sqrt(d_model // nhead)        # folded into Wq / bq

    def attn_p():
        wq, bq = lin_f32(d_model, d_model)
        wk, bk = lin_f32(d_model, d_model)
        wv, bv = lin_f32(d_model, d_model)
        wo, bo = lin_f32(d_model, d_model)
        g, b = ln_gb()
        return {
            "wqkv": jnp.stack([wq * qscale, wk, wv], axis=0).astype(_BF16),  # [3,D,D] bf16
            "bqkv": jnp.stack([bq * qscale, bk, bv], axis=0),                # [3,1,D] f32
            "wo": wo.astype(_BF16), "bo": bo,
            "ln_g": g, "ln_b": b,
        }

    def ffn_p():
        l1, l2 = lin(d_model, dim_ff), lin(dim_ff, d_model)
        g, b = ln_gb()
        return {"w1": l1["w"], "b1": l1["b"], "w2": l2["w"], "b2": l2["b"],
                "ln_g": g, "ln_b": b}

    def enc_layer_p():
        return {"sa": attn_p(), "ffn": ffn_p()}

    def dec_layer_p():
        return {"sa": attn_p(), "ca": attn_p(), "ffn": ffn_p()}

    g, b = ln_gb()
    return {
        "backbone": lin(in_ch, backbone_ch),
        "input_proj": lin(backbone_ch, d_model),
        "query_emb": jax.random.normal(next(keys), (n_queries, d_model), jnp.float32),
        "transformer": {
            "enc_layers": [enc_layer_p() for _ in range(n_enc)],
            "dec_layers": [dec_layer_p() for _ in range(n_dec)],
            "dec_norm": {"g": g, "b": b},
        },
        "class_emb": lin(d_model, n_classes + 1),
        "bbox_emb": [lin(d_model, d_model), lin(d_model, d_model), lin(d_model, 4)],
    }


# ----------------------------------- main --------------------------------------

if __name__ == "__main__":
    B, C, H, W = 2, 3, 16, 16
    backbone_ch = 8
    d_model, nhead, dim_ff = 32, 4, 64
    n_enc, n_dec = 1, 2
    n_queries, n_classes = 8, 4

    key = jax.random.PRNGKey(0)
    pkey, xkey = jax.random.split(key)
    params = init_params(pkey, in_ch=C, backbone_ch=backbone_ch, d_model=d_model,
                         dim_ff=dim_ff, n_enc=n_enc, n_dec=n_dec,
                         n_queries=n_queries, n_classes=n_classes, nhead=nhead)
    images = jax.random.normal(xkey, (B, C, H, W), jnp.float32)  # NCHW like PyTorch

    fwd = jax.jit(functools.partial(detr_forward, d_model=d_model, nhead=nhead))
    out = fwd(params, images)
    jax.block_until_ready(out)

    assert out["pred_logits"].shape == (B, n_queries, n_classes + 1)
    assert out["pred_boxes"].shape == (B, n_queries, 4)
    assert bool(jnp.all(jnp.isfinite(out["pred_logits"])))
    assert bool(jnp.all(jnp.isfinite(out["pred_boxes"])))
    assert bool(jnp.all((out["pred_boxes"] >= 0.0) & (out["pred_boxes"] <= 1.0)))
    print("KERNEL_OK")
</pallas_src>

<mosaic_0001>
module attributes {stable_mosaic.version = 11 : i64} {
  func.func @_backbone_proj_kernel(%arg0: i32, %arg1: memref<256x3xf32, #tpu.memory_space<vmem>>, %arg2: memref<3x8xbf16, #tpu.memory_space<vmem>>, %arg3: memref<1x8xf32, #tpu.memory_space<vmem>>, %arg4: memref<8x32xbf16, #tpu.memory_space<vmem>>, %arg5: memref<1x32xf32, #tpu.memory_space<vmem>>, %arg6: memref<256x32xf32, #tpu.memory_space<vmem>>) attributes {dimension_semantics = [#tpu.dimension_semantics<parallel>], iteration_bounds = array<i64: 2>, scalar_prefetch = 0 : i64, scratch_operands = 0 : i64, tpu.core_type = #tpu.core_type<tc>, window_params = [{transform_indices = @transform_0, window_bounds = array<i64: 256, 3>}, {pipeline_mode = #tpu.pipeline_mode<synchronous>, transform_indices = @transform_1, window_bounds = array<i64: 3, 8>}, {pipeline_mode = #tpu.pipeline_mode<synchronous>, transform_indices = @transform_2, window_bounds = array<i64: 1, 8>}, {pipeline_mode = #tpu.pipeline_mode<synchronous>, transform_indices = @transform_3, window_bounds = array<i64: 8, 32>}, {pipeline_mode = #tpu.pipeline_mode<synchronous>, transform_indices = @transform_4, window_bounds = array<i64: 1, 32>}, {transform_indices = @transform_5, window_bounds = array<i64: 256, 32>}]} {
    %c0 = arith.constant 0 : index
    %c0_0 = arith.constant 0 : index
    %0 = vector.load %arg1[%c0, %c0_0] : memref<256x3xf32, #tpu.memory_space<vmem>>, vector<256x3xf32>
    %1 = arith.truncf %0 : vector<256x3xf32> to vector<256x3xbf16>
    %c0_1 = arith.constant 0 : index
    %c0_2 = arith.constant 0 : index
    %2 = vector.load %arg2[%c0_1, %c0_2] : memref<3x8xbf16, #tpu.memory_space<vmem>>, vector<3x8xbf16>
    %cst = arith.constant dense<0.000000e+00> : vector<256x8xf32>
    %3 = tpu.matmul %1, %2, %cst {dimension_numbers = #tpu.dot_dimension_numbers<[1], [0], [0], [1], [0, 0, 1, 1], [], []>} : vector<256x3xbf16>, vector<3x8xbf16>, vector<256x8xf32> -> vector<256x8xf32>
    %c0_3 = arith.constant 0 : index
    %c0_4 = arith.constant 0 : index
    %4 = vector.load %arg3[%c0_3, %c0_4] : memref<1x8xf32, #tpu.memory_space<vmem>>, vector<1x8xf32>
    %5 = vector.broadcast %4 : vector<1x8xf32> to vector<256x8xf32>
    %6 = arith.addf %3, %5 : vector<256x8xf32>
    %cst_5 = arith.constant 0.000000e+00 : f32
    %7 = vector.broadcast %cst_5 : f32 to vector<256x8xf32>
    %8 = arith.maximumf %6, %7 : vector<256x8xf32>
    %9 = arith.truncf %8 : vector<256x8xf32> to vector<256x8xbf16>
    %c0_6 = arith.constant 0 : index
    %c0_7 = arith.constant 0 : index
    %10 = vector.load %arg4[%c0_6, %c0_7] : memref<8x32xbf16, #tpu.memory_space<vmem>>, vector<8x32xbf16>
    %cst_8 = arith.constant dense<0.000000e+00> : vector<256x32xf32>
    %11 = tpu.matmul %9, %10, %cst_8 {dimension_numbers = #tpu.dot_dimension_numbers<[1], [0], [0], [1], [0, 0, 1, 1], [], []>} : vector<256x8xbf16>, vector<8x32xbf16>, vector<256x32xf32> -> vector<256x32xf32>
    %c0_9 = arith.constant 0 : index
    %c0_10 = arith.constant 0 : index
    %12 = vector.load %arg5[%c0_9, %c0_10] : memref<1x32xf32, #tpu.memory_space<vmem>>, vector<1x32xf32>
    %13 = vector.broadcast %12 : vector<1x32xf32> to vector<256x32xf32>
    %14 = arith.addf %11, %13 : vector<256x32xf32>
    %c0_11 = arith.constant 0 : index
    %c0_12 = arith.constant 0 : index
    %15 = vector.load %arg6[%c0_11, %c0_12] : memref<256x32xf32, #tpu.memory_space<vmem>>, vector<256x32xf32>
    tpu.vector_store %arg6[%c0_11, %c0_12], %14 {strides = array<i32>} : memref<256x32xf32, #tpu.memory_space<vmem>>, vector<256x32xf32>,
    return
  }
  func.func @transform_0(%arg0: i32) -> (i32, i32) {
    %c0_i32 = arith.constant 0 : i32
    %c0_i32_0 = arith.constant 0 : i32
    return %arg0, %c0_i32 : i32, i32
  }
  func.func @transform_1(%arg0: i32) -> (i32, i32) {
    %c0_i32 = arith.constant 0 : i32
    %c0_i32_0 = arith.constant 0 : i32
    %c0_i32_1 = arith.constant 0 : i32
    return %c0_i32, %c0_i32_0 : i32, i32
  }
  func.func @transform_2(%arg0: i32) -> (i32, i32) {
    %c0_i32 = arith.constant 0 : i32
    %c0_i32_0 = arith.constant 0 : i32
    %c0_i32_1 = arith.constant 0 : i32
    return %c0_i32, %c0_i32_0 : i32, i32
  }
  func.func @transform_3(%arg0: i32) -> (i32, i32) {
    %c0_i32 = arith.constant 0 : i32
    %c0_i32_0 = arith.constant 0 : i32
    %c0_i32_1 = arith.constant 0 : i32
    return %c0_i32, %c0_i32_0 : i32, i32
  }
  func.func @transform_4(%arg0: i32) -> (i32, i32) {
    %c0_i32 = arith.constant 0 : i32
    %c0_i32_0 = arith.constant 0 : i32
    %c0_i32_1 = arith.constant 0 : i32
    return %c0_i32, %c0_i32_0 : i32, i32
  }
  func.func @transform_5(%arg0: i32) -> (i32, i32) {
    %c0_i32 = arith.constant 0 : i32
    %c0_i32_0 = arith.constant 0 : i32
    return %arg0, %c0_i32 : i32, i32
  }
}

module attributes {stable_mosaic.version = 11 : i64} {
  func.func @_self_attn_ln_kernel(%arg0: i32, %arg1: i32, %arg2: memref<1x128x32xf32, #tpu.memory_space<vmem>>, %arg3: memref<1x256x32xf32, #tpu.memory_space<vmem>>, %arg4: memref<128x32xf32, #tpu.memory_space<vmem>>, %arg5: memref<256x32xf32, #tpu.memory_space<vmem>>, %arg6: memref<3x32x32xbf16, #tpu.memory_space<vmem>>, %arg7: memref<3x1x32xf32, #tpu.memory_space<vmem>>, %arg8: memref<32x32xbf16, #tpu.memory_space<vmem>>, %arg9: memref<1x32xf32, #tpu.memory_space<vmem>>, %arg10: memref<1x32xf32, #tpu.memory_space<vmem>>, %arg11: memref<1x32xf32, #tpu.memory_space<vmem>>, %arg12: memref<1x128x32xf32, #tpu.memory_space<vmem>>) attributes {dimension_semantics = [#tpu.dimension_semantics<parallel>, #tpu.dimension_semantics<parallel>], iteration_bounds = array<i64: 2, 2>, scalar_prefetch = 0 : i64, scratch_operands = 0 : i64, tpu.core_type = #tpu.core_type<tc>, window_params = [{transform_indices = @transform_0, window_bounds = array<i64: 1, 128, 32>}, {transform_indices = @transform_1, window_bounds = array<i64: 1, 256, 32>}, {transform_indices = @transform_2, window_bounds = array<i64: 128, 32>}, {pipeline_mode = #tpu.pipeline_mode<synchronous>, transform_indices = @transform_3, window_bounds = array<i64: 256, 32>}, {pipeline_mode = #tpu.pipeline_mode<synchronous>, transform_indices = @transform_4, window_bounds = array<i64: 3, 32, 32>}, {pipeline_mode = #tpu.pipeline_mode<synchronous>, transform_indices = @transform_5, window_bounds = array<i64: 3, 1, 32>}, {pipeline_mode = #tpu.pipeline_mode<synchronous>, transform_indices = @transform_6, window_bounds = array<i64: 32, 32>}, {pipeline_mode = #tpu.pipeline_mode<synchronous>, transform_indices = @transform_7, window_bounds = array<i64: 1, 32>}, {pipeline_mode = #tpu.pipeline_mode<synchronous>, transform_indices = @transform_8, window_bounds = array<i64: 1, 32>}, {pipeline_mode = #tpu.pipeline_mode<synchronous>, transform_indices = @transform_9, window_bounds = array<i64: 1, 32>}, {transform_indices = @transform_10, window_bounds = array<i64: 1, 128, 32>}]} {
    %c0 = arith.constant 0 : index
    %c0_0 = arith.constant 0 : index
    %c0_1 = arith.constant 0 : index
    %0 = vector.load %arg2[%c0, %c0_0, %c0_1] : memref<1x128x32xf32, #tpu.memory_space<vmem>>, vector<1x128x32xf32>
    %1 = vector.shape_cast %0 : vector<1x128x32xf32> to vector<128x32xf32>
    %c0_2 = arith.constant 0 : index
    %c0_3 = arith.constant 0 : index
    %c0_4 = arith.constant 0 : index
    %2 = vector.load %arg3[%c0_2, %c0_3, %c0_4] : memref<1x256x32xf32, #tpu.memory_space<vmem>>, vector<1x256x32xf32>
    %3 = vector.shape_cast %2 : vector<1x256x32xf32> to vector<256x32xf32>
    %c0_5 = arith.constant 0 : index
    %c0_6 = arith.constant 0 : index
    %4 = vector.load %arg4[%c0_5, %c0_6] : memref<128x32xf32, #tpu.memory_space<vmem>>, vector<128x32xf32>
    %5 = arith.addf %1, %4 : vector<128x32xf32>
    %6 = arith.truncf %5 : vector<128x32xf32> to vector<128x32xbf16>
    %c0_7 = arith.constant 0 : index
    %c0_8 = arith.constant 0 : index
    %c0_9 = arith.constant 0 : index
    %7 = vector.load %arg6[%c0_7, %c0_8, %c0_9] : memref<3x32x32xbf16, #tpu.memory_space<vmem>>, vector<1x32x32xbf16>
    %8 = vector.shape_cast %7 : vector<1x32x32xbf16> to vector<32x32xbf16>
    %cst = arith.constant dense<0.000000e+00> : vector<128x32xf32>
    %9 = tpu.matmul %6, %8, %cst {dimension_numbers = #tpu.dot_dimension_numbers<[1], [0], [0], [1], [0, 0, 1, 1], [], []>} : vector<128x32xbf16>, vector<32x32xbf16>, vector<128x32xf32> -> vector<128x32xf32>
    %c0_10 = arith.constant 0 : index
    %c0_11 = arith.constant 0 : index
    %c0_12 = arith.constant 0 : index
    %10 = vector.load %arg7[%c0_10, %c0_11, %c0_12] : memref<3x1x32xf32, #tpu.memory_space<vmem>>, vector<1x1x32xf32>
    %11 = vector.shape_cast %10 : vector<1x1x32xf32> to vector<1x32xf32>
    %12 = vector.broadcast %11 : vector<1x32xf32> to vector<128x32xf32>
    %13 = arith.addf %9, %12 : vector<128x32xf32>
    %c0_13 = arith.constant 0 : index
    %c0_14 = arith.constant 0 : index
    %14 = vector.load %arg5[%c0_13, %c0_14] : memref<256x32xf32, #tpu.memory_space<vmem>>, vector<256x32xf32>
    %15 = arith.addf %3, %14 : vector<256x32xf32>
    %16 = arith.truncf %15 : vector<256x32xf32> to vector<256x32xbf16>
    %c1 = arith.constant 1 : index
    %c0_15 = arith.constant 0 : index
    %c0_16 = arith.constant 0 : index
    %17 = vector.load %arg6[%c1, %c0_15, %c0_16] : memref<3x32x32xbf16, #tpu.memory_space<vmem>>, vector<1x32x32xbf16>
    %18 = vector.shape_cast %17 : vector<1x32x32xbf16> to vector<32x32xbf16>
    %cst_17 = arith.constant dense<0.000000e+00> : vector<256x32xf32>
    %19 = tpu.matmul %16, %18, %cst_17 {dimension_numbers = #tpu.dot_dimension_numbers<[1], [0], [0], [1], [0, 0, 1, 1], [], []>} : vector<256x32xbf16>, vector<32x32xbf16>, vector<256x32xf32> -> vector<256x32xf32>
    %c1_18 = arith.constant 1 : index
    %c0_19 = arith.constant 0 : index
    %c0_20 = arith.constant 0 : index
    %20 = vector.load %arg7[%c1_18, %c0_19, %c0_20] : memref<3x1x32xf32, #tpu.memory_space<vmem>>, vector<1x1x32xf32>
    %21 = vector.shape_cast %20 : vector<1x1x32xf32> to vector<1x32xf32>
    %22 = vector.broadcast %21 : vector<1x32xf32> to vector<256x32xf32>
    %23 = arith.addf %19, %22 : vector<256x32xf32>
    %24 = arith.truncf %3 : vector<256x32xf32> to vector<256x32xbf16>
    %c2 = arith.constant 2 : index
    %c0_21 = arith.constant 0 : index
    %c0_22 = arith.constant 0 : index
    %25 = vector.load %arg6[%c2, %c0_21, %c0_22] : memref<3x32x32xbf16, #tpu.memory_space<vmem>>, vector<1x32x32xbf16>
    %26 = vector.shape_cast %25 : vector<1x32x32xbf16> to vector<32x32xbf16>
    %cst_23 = arith.constant dense<0.000000e+00> : vector<256x32xf32>
    %27 = tpu.matmul %24, %26, %cst_23 {dimension_numbers = #tpu.dot_dimension_numbers<[1], [0], [0], [1], [0, 0, 1, 1], [], []>} : vector<256x32xbf16>, vector<32x32xbf16>, vector<256x32xf32> -> vector<256x32xf32>
    %c2_24 = arith.constant 2 : index
    %c0_25 = arith.constant 0 : index
    %c0_26 = arith.constant 0 : index
    %28 = vector.load %arg7[%c2_24, %c0_25, %c0_26] : memref<3x1x32xf32, #tpu.memory_space<vmem>>, vector<1x1x32xf32>
    %29 = vector.shape_cast %28 : vector<1x1x32xf32> to vector<1x32xf32>
    %30 = vector.broadcast %29 : vector<1x32xf32> to vector<256x32xf32>
    %31 = arith.addf %27, %30 : vector<256x32xf32>
    %c0_27 = arith.constant 0 : index
    %c0_28 = arith.constant 0 : index
    %32 = vector.load %arg8[%c0_27, %c0_28] : memref<32x32xbf16, #tpu.memory_space<vmem>>, vector<32x32xbf16>
    %c0_29 = arith.constant 0 : index
    %c0_30 = arith.constant 0 : index
    %33 = vector.load %arg9[%c0_29, %c0_30] : memref<1x32xf32, #tpu.memory_space<vmem>>, vector<1x32xf32>
    %c0_31 = arith.constant 0 : index
    %c0_32 = arith.constant 0 : index
    %34 = vector.load %arg10[%c0_31, %c0_32] : memref<1x32xf32, #tpu.memory_space<vmem>>, vector<1x32xf32>
    %c0_33 = arith.constant 0 : index
    %c0_34 = arith.constant 0 : index
    %35 = vector.load %arg11[%c0_33, %c0_34] : memref<1x32xf32, #tpu.memory_space<vmem>>, vector<1x32xf32>
    %36 = arith.truncf %13 : vector<128x32xf32> to vector<128x32xbf16>
    %37 = arith.truncf %23 : vector<256x32xf32> to vector<256x32xbf16>
    %38 = arith.truncf %31 : vector<256x32xf32> to vector<256x32xbf16>
    %39 = vector.extract_strided_slice %36 {offsets = [0, 0], sizes = [128, 8], strides = [1, 1]} : vector<128x32xbf16> to vector<128x8xbf16>
    %40 = vector.extract_strided_slice %37 {offsets = [0, 0], sizes = [256, 8], strides = [1, 1]} : vector<256x32xbf16> to vector<256x8xbf16>
    %41 = vector.extract_strided_slice %38 {offsets = [0, 0], sizes = [256, 8], strides = [1, 1]} : vector<256x32xbf16> to vector<256x8xbf16>
    %cst_35 = arith.constant dense<0.000000e+00> : vector<128x256xf32>
    %42 = tpu.matmul %39, %40, %cst_35 {dimension_numbers = #tpu.dot_dimension_numbers<[1], [1], [0], [0], [0, 0, 1, 0], [], []>} : vector<128x8xbf16>, vector<256x8xbf16>, vector<128x256xf32> -> vector<128x256xf32>
    %cst_36 = arith.constant dense<0xFF800000> : vector<128xf32>
    %43 = vector.multi_reduction <maximumf>, %42, %cst_36 [1] : vector<128x256xf32> to vector<128xf32>
    %44 = vector.shape_cast %43 : vector<128xf32> to vector<128x1xf32>
    %45 = vector.broadcast %44 : vector<128x1xf32> to vector<128x256xf32>
    %46 = arith.subf %42, %45 : vector<128x256xf32>
    %47 = math.exp %46 : vector<128x256xf32>
    %cst_37 = arith.constant dense<0.000000e+00> : vector<128xf32>
    %48 = vector.multi_reduction <add>, %47, %cst_37 [1] : vector<128x256xf32> to vector<128xf32>
    %49 = vector.shape_cast %48 : vector<128xf32> to vector<128x1xf32>
    %50 = tpu.reciprocal %49 {approx = true} : vector<128x1xf32> -> vector<128x1xf32>
    %51 = vector.broadcast %50 : vector<128x1xf32> to vector<128x256xf32>
    %52 = arith.mulf %47, %51 : vector<128x256xf32>
    %53 = arith.truncf %52 : vector<128x256xf32> to vector<128x256xbf16>
    %cst_38 = arith.constant dense<0.000000e+00> : vector<128x8xf32>
    %54 = tpu.matmul %53, %41, %cst_38 {dimension_numbers = #tpu.dot_dimension_numbers<[1], [0], [0], [1], [0, 0, 1, 1], [], []>} : vector<128x256xbf16>, vector<256x8xbf16>, vector<128x8xf32> -> vector<128x8xf32>
    %55 = vector.extract_strided_slice %36 {offsets = [0, 8], sizes = [128, 8], strides = [1, 1]} : vector<128x32xbf16> to vector<128x8xbf16>
    %56 = vector.extract_strided_slice %37 {offsets = [0, 8], sizes = [256, 8], strides = [1, 1]} : vector<256x32xbf16> to vector<256x8xbf16>
    %57 = vector.extract_strided_slice %38 {offsets = [0, 8], sizes = [256, 8], strides = [1, 1]} : vector<256x32xbf16> to vector<256x8xbf16>
    %cst_39 = arith.constant dense<0.000000e+00> : vector<128x256xf32>
    %58 = tpu.matmul %55, %56, %cst_39 {dimension_numbers = #tpu.dot_dimension_numbers<[1], [1], [0], [0], [0, 0, 1, 0], [], []>} : vector<128x8xbf16>, vector<256x8xbf16>, vector<128x256xf32> -> vector<128x256xf32>
    %cst_40 = arith.constant dense<0xFF800000> : vector<128xf32>
    %59 = vector.multi_reduction <maximumf>, %58, %cst_40 [1] : vector<128x256xf32> to vector<128xf32>
    %60 = vector.shape_cast %59 : vector<128xf32> to vector<128x1xf32>
    %61 = vector.broadcast %60 : vector<128x1xf32> to vector<128x256xf32>
    %62 = arith.subf %58, %61 : vector<128x256xf32>
    %63 = math.exp %62 : vector<128x256xf32>
    %cst_41 = arith.constant dense<0.000000e+00> : vector<128xf32>
    %64 = vector.multi_reduction <add>, %63, %cst_41 [1] : vector<128x256xf32> to vector<128xf32>
    %65 = vector.shape_cast %64 : vector<128xf32> to vector<128x1xf32>
    %66 = tpu.reciprocal %65 {approx = true} : vector<128x1xf32> -> vector<128x1xf32>
    %67 = vector.broadcast %66 : vector<128x1xf32> to vector<128x256xf32>
    %68 = arith.mulf %63, %67 : vector<128x256xf32>
    %69 = arith.truncf %68 : vector<128x256xf32> to vector<128x256xbf16>
    %cst_42 = arith.constant dense<0.000000e+00> : vector<128x8xf32>
    %70 = tpu.matmul %69, %57, %cst_42 {dimension_numbers = #tpu.dot_dimension_numbers<[1], [0], [0], [1], [0, 0, 1, 1], [], []>} : vector<128x256xbf16>, vector<256x8xbf16>, vector<128x8xf32> -> vector<128x8xf32>
    %71 = vector.extract_strided_slice %36 {offsets = [0, 16], sizes = [128, 8], strides = [1, 1]} : vector<128x32xbf16> to vector<128x8xbf16>
    %72 = vector.extract_strided_slice %37 {offsets = [0, 16], sizes = [256, 8], strides = [1, 1]} : vector<256x32xbf16> to vector<256x8xbf16>
    %73 = vector.extract_strided_slice %38 {offsets = [0, 16], sizes = [256, 8], strides = [1, 1]} : vector<256x32xbf16> to vector<256x8xbf16>
    %cst_43 = arith.constant dense<0.000000e+00> : vector<128x256xf32>
    %74 = tpu.matmul %71, %72, %cst_43 {dimension_numbers = #tpu.dot_dimension_numbers<[1], [1], [0], [0], [0, 0, 1, 0], [], []>} : vector<128x8xbf16>, vector<256x8xbf16>, vector<128x256xf32> -> vector<128x256xf32>
    %cst_44 = arith.constant dense<0xFF800000> : vector<128xf32>
    %75 = vector.multi_reduction <maximumf>, %74, %cst_44 [1] : vector<128x256xf32> to vector<128xf32>
    %76 = vector.shape_cast %75 : vector<128xf32> to vector<128x1xf32>
    %77 = vector.broadcast %76 : vector<128x1xf32> to vector<128x256xf32>
    %78 = arith.subf %74, %77 : vector<128x256xf32>
    %79 = math.exp %78 : vector<128x256xf32>
    %cst_45 = arith.constant dense<0.000000e+00> : vector<128xf32>
    %80 = vector.multi_reduction <add>, %79, %cst_45 [1] : vector<128x256xf32> to vector<128xf32>
    %81 = vector.shape_cast %80 : vector<128xf32> to vector<128x1xf32>
    %82 = tpu.reciprocal %81 {approx = true} : vector<128x1xf32> -> vector<128x1xf32>
    %83 = vector.broadcast %82 : vector<128x1xf32> to vector<128x256xf32>
    %84 = arith.mulf %79, %83 : vector<128x256xf32>
    %85 = arith.truncf %84 : vector<128x256xf32> to vector<128x256xbf16>
    %cst_46 = arith.constant dense<0.000000e+00> : vector<128x8xf32>
    %86 = tpu.matmul %85, %73, %cst_46 {dimension_numbers = #tpu.dot_dimension_numbers<[1], [0], [0], [1], [0, 0, 1, 1], [], []>} : vector<128x256xbf16>, vector<256x8xbf16>, vector<128x8xf32> -> vector<128x8xf32>
    %87 = vector.extract_strided_slice %36 {offsets = [0, 24], sizes = [128, 8], strides = [1, 1]} : vector<128x32xbf16> to vector<128x8xbf16>
    %88 = vector.extract_strided_slice %37 {offsets = [0, 24], sizes = [256, 8], strides = [1, 1]} : vector<256x32xbf16> to vector<256x8xbf16>
    %89 = vector.extract_strided_slice %38 {offsets = [0, 24], sizes = [256, 8], strides = [1, 1]} : vector<256x32xbf16> to vector<256x8xbf16>
    %cst_47 = arith.constant dense<0.000000e+00> : vector<128x256xf32>
    %90 = tpu.matmul %87, %88, %cst_47 {dimension_numbers = #tpu.dot_dimension_numbers<[1], [1], [0], [0], [0, 0, 1, 0], [], []>} : vector<128x8xbf16>, vector<256x8xbf16>, vector<128x256xf32> -> vector<128x256xf32>
    %cst_48 = arith.constant dense<0xFF800000> : vector<128xf32>
    %91 = vector.multi_reduction <maximumf>, %90, %cst_48 [1] : vector<128x256xf32> to vector<128xf32>
    %92 = vector.shape_cast %91 : vector<128xf32> to vector<128x1xf32>
    %93 = vector.broadcast %92 : vector<128x1xf32> to vector<128x256xf32>
    %94 = arith.subf %90, %93 : vector<128x256xf32>
    %95 = math.exp %94 : vector<128x256xf32>
    %cst_49 = arith.constant dense<0.000000e+00> : vector<128xf32>
    %96 = vector.multi_reduction <add>, %95, %cst_49 [1] : vector<128x256xf32> to vector<128xf32>
    %97 = vector.shape_cast %96 : vector<128xf32> to vector<128x1xf32>
    %98 = tpu.reciprocal %97 {approx = true} : vector<128x1xf32> -> vector<128x1xf32>
    %99 = vector.broadcast %98 : vector<128x1xf32> to vector<128x256xf32>
    %100 = arith.mulf %95, %99 : vector<128x256xf32>
    %101 = arith.truncf %100 : vector<128x256xf32> to vector<128x256xbf16>
    %cst_50 = arith.constant dense<0.000000e+00> : vector<128x8xf32>
    %102 = tpu.matmul %101, %89, %cst_50 {dimension_numbers = #tpu.dot_dimension_numbers<[1], [0], [0], [1], [0, 0, 1, 1], [], []>} : vector<128x256xbf16>, vector<256x8xbf16>, vector<128x8xf32> -> vector<128x8xf32>
    %103 = tpu.concatenate %54, %70, %86, %102 in 1 : vector<128x8xf32>, vector<128x8xf32>, vector<128x8xf32>, vector<128x8xf32> -> vector<128x32xf32>
    %104 = arith.truncf %103 : vector<128x32xf32> to vector<128x32xbf16>
    %cst_51 = arith.constant dense<0.000000e+00> : vector<128x32xf32>
    %105 = tpu.matmul %104, %32, %cst_51 {dimension_numbers = #tpu.dot_dimension_numbers<[1], [0], [0], [1], [0, 0, 1, 1], [], []>} : vector<128x32xbf16>, vector<32x32xbf16>, vector<128x32xf32> -> vector<128x32xf32>
    %106 = vector.broadcast %33 : vector<1x32xf32> to vector<128x32xf32>
    %107 = arith.addf %105, %106 : vector<128x32xf32>
    %108 = arith.addf %1, %107 : vector<128x32xf32>
    %cst_52 = arith.constant dense<0.000000e+00> : vector<128xf32>
    %109 = vector.multi_reduction <add>, %108, %cst_52 [1] : vector<128x32xf32> to vector<128xf32>
    %110 = vector.shape_cast %109 : vector<128xf32> to vector<128x1xf32>
    %cst_53 = arith.constant 3.200000e+01 : f32
    %111 = vector.broadcast %cst_53 : f32 to vector<128x1xf32>
    %112 = arith.divf %110, %111 : vector<128x1xf32>
    %113 = vector.broadcast %112 : vector<128x1xf32> to vector<128x32xf32>
    %114 = arith.subf %108, %113 : vector<128x32xf32>
    %115 = arith.mulf %114, %114 : vector<128x32xf32>
    %cst_54 = arith.constant dense<0.000000e+00> : vector<128xf32>
    %116 = vector.multi_reduction <add>, %115, %cst_54 [1] : vector<128x32xf32> to vector<128xf32>
    %117 = vector.shape_cast %116 : vector<128xf32> to vector<128x1xf32>
    %cst_55 = arith.constant 3.200000e+01 : f32
    %118 = vector.broadcast %cst_55 : f32 to vector<128x1xf32>
    %119 = arith.divf %117, %118 : vector<128x1xf32>
    %120 = vector.broadcast %112 : vector<128x1xf32> to vector<128x32xf32>
    %121 = arith.subf %108, %120 : vector<128x32xf32>
    %cst_56 = arith.constant 9.99999974E-6 : f32
    %122 = vector.broadcast %cst_56 : f32 to vector<128x1xf32>
    %123 = arith.addf %119, %122 : vector<128x1xf32>
    %124 = math.rsqrt %123 : vector<128x1xf32>
    %125 = vector.broadcast %124 : vector<128x1xf32> to vector<128x32xf32>
    %126 = arith.mulf %121, %125 : vector<128x32xf32>
    %127 = vector.broadcast %34 : vector<1x32xf32> to vector<128x32xf32>
    %128 = arith.mulf %126, %127 : vector<128x32xf32>
    %129 = vector.broadcast %35 : vector<1x32xf32> to vector<128x32xf32>
    %130 = arith.addf %128, %129 : vector<128x32xf32>
    %c0_57 = arith.constant 0 : index
    %c0_58 = arith.constant 0 : index
    %c0_59 = arith.constant 0 : index
    %131 = vector.load %arg12[%c0_57, %c0_58, %c0_59] : memref<1x128x32xf32, #tpu.memory_space<vmem>>, vector<1x128x32xf32>
    %132 = vector.shape_cast %131 : vector<1x128x32xf32> to vector<128x32xf32>
    %133 = vector.shape_cast %130 : vector<128x32xf32> to vector<1x128x32xf32>
    tpu.vector_store %arg12[%c0_57, %c0_58, %c0_59], %133 {strides = array<i32>} : memref<1x128x32xf32, #tpu.memory_space<vmem>>, vector<1x128x32xf32>,
    return
  }
  func.func @transform_0(%arg0: i32, %arg1: i32) -> (i32, i32, i32) {
    %c0_i32 = arith.constant 0 : i32
    %c0_i32_0 = arith.constant 0 : i32
    return %arg0, %arg1, %c0_i32 : i32, i32, i32
  }
  func.func @transform_1(%arg0: i32, %arg1: i32) -> (i32, i32, i32) {
    %c0_i32 = arith.constant 0 : i32
    %c0_i32_0 = arith.constant 0 : i32
    %c0_i32_1 = arith.constant 0 : i32
    return %arg0, %c0_i32, %c0_i32_0 : i32, i32, i32
  }
  func.func @transform_2(%arg0: i32, %arg1: i32) -> (i32, i32) {
    %c0_i32 = arith.constant 0 : i32
    %c0_i32_0 = arith.constant 0 : i32
    return %arg1, %c0_i32 : i32, i32
  }
  func.func @transform_3(%arg0: i32, %arg1: i32) -> (i32, i32) {
    %c0_i32 = arith.constant 0 : i32
    %c0_i32_0 = arith.constant 0 : i32
    %c0_i32_1 = arith.constant 0 : i32
    return %c0_i32, %c0_i32_0 : i32, i32
  }
  func.func @transform_4(%arg0: i32, %arg1: i32) -> (i32, i32, i32) {
    %c0_i32 = arith.constant 0 : i32
    %c0_i32_0 = arith.constant 0 : i32
    %c0_i32_1 = arith.constant 0 : i32
    %c0_i32_2 = arith.constant 0 : i32
    return %c0_i32, %c0_i32_0, %c0_i32_1 : i32, i32, i32
  }
  func.func @transform_5(%arg0: i32, %arg1: i32) -> (i32, i32, i32) {
    %c0_i32 = arith.constant 0 : i32
    %c0_i32_0 = arith.constant 0 : i32
    %c0_i32_1 = arith.constant 0 : i32
    %c0_i32_2 = arith.constant 0 : i32
    return %c0_i32, %c0_i32_0, %c0_i32_1 : i32, i32, i32
  }
  func.func @transform_6(%arg0: i32, %arg1: i32) -> (i32, i32) {
    %c0_i32 = arith.constant 0 : i32
    %c0_i32_0 = arith.constant 0 : i32
    %c0_i32_1 = arith.constant 0 : i32
    return %c0_i32, %c0_i32_0 : i32, i32
  }
  func.func @transform_7(%arg0: i32, %arg1: i32) -> (i32, i32) {
    %c0_i32 = arith.constant 0 : i32
    %c0_i32_0 = arith.constant 0 : i32
    %c0_i32_1 = arith.constant 0 : i32
    return %c0_i32, %c0_i32_0 : i32, i32
  }
  func.func @transform_8(%arg0: i32, %arg1: i32) -> (i32, i32) {
    %c0_i32 = arith.constant 0 : i32
    %c0_i32_0 = arith.constant 0 : i32
    %c0_i32_1 = arith.constant 0 : i32
    return %c0_i32, %c0_i32_0 : i32, i32
  }
  func.func @transform_9(%arg0: i32, %arg1: i32) -> (i32, i32) {
    %c0_i32 = arith.constant 0 : i32
    %c0_i32_0 = arith.constant 0 : i32
    %c0_i32_1 = arith.constant 0 : i32
    return %c0_i32, %c0_i32_0 : i32, i32
  }
  func.func @transform_10(%arg0: i32, %arg1: i32) -> (i32, i32, i32) {
    %c0_i32 = arith.constant 0 : i32
    %c0_i32_0 = arith.constant 0 : i32
    return %arg0, %arg1, %c0_i32 : i32, i32, i32
  }
}

module attributes {stable_mosaic.version = 11 : i64} {
  func.func @_ffn_ln_kernel(%arg0: i32, %arg1: memref<256x32xf32, #tpu.memory_space<vmem>>, %arg2: memref<32x64xbf16, #tpu.memory_space<vmem>>, %arg3: memref<1x64xf32, #tpu.memory_space<vmem>>, %arg4: memref<64x32xbf16, #tpu.memory_space<vmem>>, %arg5: memref<1x32xf32, #tpu.memory_space<vmem>>, %arg6: memref<1x32xf32, #tpu.memory_space<vmem>>, %arg7: memref<1x32xf32, #tpu.memory_space<vmem>>, %arg8: memref<256x32xf32, #tpu.memory_space<vmem>>) attributes {dimension_semantics = [#tpu.dimension_semantics<parallel>], iteration_bounds = array<i64: 2>, scalar_prefetch = 0 : i64, scratch_operands = 0 : i64, tpu.core_type = #tpu.core_type<tc>, window_params = [{transform_indices = @transform_0, window_bounds = array<i64: 256, 32>}, {pipeline_mode = #tpu.pipeline_mode<synchronous>, transform_indices = @transform_1, window_bounds = array<i64: 32, 64>}, {pipeline_mode = #tpu.pipeline_mode<synchronous>, transform_indices = @transform_2, window_bounds = array<i64: 1, 64>}, {pipeline_mode = #tpu.pipeline_mode<synchronous>, transform_indices = @transform_3, window_bounds = array<i64: 64, 32>}, {pipeline_mode = #tpu.pipeline_mode<synchronous>, transform_indices = @transform_4, window_bounds = array<i64: 1, 32>}, {pipeline_mode = #tpu.pipeline_mode<synchronous>, transform_indices = @transform_5, window_bounds = array<i64: 1, 32>}, {pipeline_mode = #tpu.pipeline_mode<synchronous>, transform_indices = @transform_6, window_bounds = array<i64: 1, 32>}, {transform_indices = @transform_7, window_bounds = array<i64: 256, 32>}]} {
    %c0 = arith.constant 0 : index
    %c0_0 = arith.constant 0 : index
    %0 = vector.load %arg1[%c0, %c0_0] : memref<256x32xf32, #tpu.memory_space<vmem>>, vector<256x32xf32>
    %1 = arith.truncf %0 : vector<256x32xf32> to vector<256x32xbf16>
    %c0_1 = arith.constant 0 : index
    %c0_2 = arith.constant 0 : index
    %2 = vector.load %arg2[%c0_1, %c0_2] : memref<32x64xbf16, #tpu.memory_space<vmem>>, vector<32x64xbf16>
    %cst = arith.constant dense<0.000000e+00> : vector<256x64xf32>
    %3 = tpu.matmul %1, %2, %cst {dimension_numbers = #tpu.dot_dimension_numbers<[1], [0], [0], [1], [0, 0, 1, 1], [], []>} : vector<256x32xbf16>, vector<32x64xbf16>, vector<256x64xf32> -> vector<256x64xf32>
    %c0_3 = arith.constant 0 : index
    %c0_4 = arith.constant 0 : index
    %4 = vector.load %arg3[%c0_3, %c0_4] : memref<1x64xf32, #tpu.memory_space<vmem>>, vector<1x64xf32>
    %5 = vector.broadcast %4 : vector<1x64xf32> to vector<256x64xf32>
    %6 = arith.addf %3, %5 : vector<256x64xf32>
    %cst_5 = arith.constant 0.000000e+00 : f32
    %7 = vector.broadcast %cst_5 : f32 to vector<256x64xf32>
    %8 = arith.maximumf %6, %7 : vector<256x64xf32>
    %9 = arith.truncf %8 : vector<256x64xf32> to vector<256x64xbf16>
    %c0_6 = arith.constant 0 : index
    %c0_7 = arith.constant 0 : index
    %10 = vector.load %arg4[%c0_6, %c0_7] : memref<64x32xbf16, #tpu.memory_space<vmem>>, vector<64x32xbf16>
    %cst_8 = arith.constant dense<0.000000e+00> : vector<256x32xf32>
    %11 = tpu.matmul %9, %10, %cst_8 {dimension_numbers = #tpu.dot_dimension_numbers<[1], [0], [0], [1], [0, 0, 1, 1], [], []>} : vector<256x64xbf16>, vector<64x32xbf16>, vector<256x32xf32> -> vector<256x32xf32>
    %12 = arith.addf %0, %11 : vector<256x32xf32>
    %c0_9 = arith.constant 0 : index
    %c0_10 = arith.constant 0 : index
    %13 = vector.load %arg5[%c0_9, %c0_10] : memref<1x32xf32, #tpu.memory_space<vmem>>, vector<1x32xf32>
    %14 = vector.broadcast %13 : vector<1x32xf32> to vector<256x32xf32>
    %15 = arith.addf %12, %14 : vector<256x32xf32>
    %c0_11 = arith.constant 0 : index
    %c0_12 = arith.constant 0 : index
    %16 = vector.load %arg6[%c0_11, %c0_12] : memref<1x32xf32, #tpu.memory_space<vmem>>, vector<1x32xf32>
    %c0_13 = arith.constant 0 : index
    %c0_14 = arith.constant 0 : index
    %17 = vector.load %arg7[%c0_13, %c0_14] : memref<1x32xf32, #tpu.memory_space<vmem>>, vector<1x32xf32>
    %cst_15 = arith.constant dense<0.000000e+00> : vector<256xf32>
    %18 = vector.multi_reduction <add>, %15, %cst_15 [1] : vector<256x32xf32> to vector<256xf32>
    %19 = vector.shape_cast %18 : vector<256xf32> to vector<256x1xf32>
    %cst_16 = arith.constant 3.200000e+01 : f32
    %20 = vector.broadcast %cst_16 : f32 to vector<256x1xf32>
    %21 = arith.divf %19, %20 : vector<256x1xf32>
    %22 = vector.broadcast %21 : vector<256x1xf32> to vector<256x32xf32>
    %23 = arith.subf %15, %22 : vector<256x32xf32>
    %24 = arith.mulf %23, %23 : vector<256x32xf32>
    %cst_17 = arith.constant dense<0.000000e+00> : vector<256xf32>
    %25 = vector.multi_reduction <add>, %24, %cst_17 [1] : vector<256x32xf32> to vector<256xf32>
    %26 = vector.shape_cast %25 : vector<256xf32> to vector<256x1xf32>
    %cst_18 = arith.constant 3.200000e+01 : f32
    %27 = vector.broadcast %cst_18 : f32 to vector<256x1xf32>
    %28 = arith.divf %26, %27 : vector<256x1xf32>
    %29 = vector.broadcast %21 : vector<256x1xf32> to vector<256x32xf32>
    %30 = arith.subf %15, %29 : vector<256x32xf32>
    %cst_19 = arith.constant 9.99999974E-6 : f32
    %31 = vector.broadcast %cst_19 : f32 to vector<256x1xf32>
    %32 = arith.addf %28, %31 : vector<256x1xf32>
    %33 = math.rsqrt %32 : vector<256x1xf32>
    %34 = vector.broadcast %33 : vector<256x1xf32> to vector<256x32xf32>
    %35 = arith.mulf %30, %34 : vector<256x32xf32>
    %36 = vector.broadcast %16 : vector<1x32xf32> to vector<256x32xf32>
    %37 = arith.mulf %35, %36 : vector<256x32xf32>
    %38 = vector.broadcast %17 : vector<1x32xf32> to vector<256x32xf32>
    %39 = arith.addf %37, %38 : vector<256x32xf32>
    %c0_20 = arith.constant 0 : index
    %c0_21 = arith.constant 0 : index
    %40 = vector.load %arg8[%c0_20, %c0_21] : memref<256x32xf32, #tpu.memory_space<vmem>>, vector<256x32xf32>
    tpu.vector_store %arg8[%c0_20, %c0_21], %39 {strides = array<i32>} : memref<256x32xf32, #tpu.memory_space<vmem>>, vector<256x32xf32>,
    return
  }
  func.func @transform_0(%arg0: i32) -> (i32, i32) {
    %c0_i32 = arith.constant 0 : i32
    %c0_i32_0 = arith.constant 0 : i32
    return %arg0, %c0_i32 : i32, i32
  }
  func.func @transform_1(%arg0: i32) -> (i32, i32) {
    %c0_i32 = arith.constant 0 : i32
    %c0_i32_0 = arith.constant 0 : i32
    %c0_i32_1 = arith.constant 0 : i32
    return %c0_i32, %c0_i32_0 : i32, i32
  }
  func.func @transform_2(%arg0: i32) -> (i32, i32) {
    %c0_i32 = arith.constant 0 : i32
    %c0_i32_0 = arith.constant 0 : i32
    %c0_i32_1 = arith.constant 0 : i32
    return %c0_i32, %c0_i32_0 : i32, i32
  }
  func.func @transform_3(%arg0: i32) -> (i32, i32) {
    %c0_i32 = arith.constant 0 : i32
    %c0_i32_0 = arith.constant 0 : i32
    %c0_i32_1 = arith.constant 0 : i32
    return %c0_i32, %c0_i32_0 : i32, i32
  }
  func.func @transform_4(%arg0: i32) -> (i32, i32) {
    %c0_i32 = arith.constant 0 : i32
    %c0_i32_0 = arith.constant 0 : i32
    %c0_i32_1 = arith.constant 0 : i32
    return %c0_i32, %c0_i32_0 : i32, i32
  }
  func.func @transform_5(%arg0: i32) -> (i32, i32) {
    %c0_i32 = arith.constant 0 : i32
    %c0_i32_0 = arith.constant 0 : i32
    %c0_i32_1 = arith.constant 0 : i32
    return %c0_i32, %c0_i32_0 : i32, i32
  }
  func.func @transform_6(%arg0: i32) -> (i32, i32) {
    %c0_i32 = arith.constant 0 : i32
    %c0_i32_0 = arith.constant 0 : i32
    %c0_i32_1 = arith.constant 0 : i32
    return %c0_i32, %c0_i32_0 : i32, i32
  }
  func.func @transform_7(%arg0: i32) -> (i32, i32) {
    %c0_i32 = arith.constant 0 : i32
    %c0_i32_0 = arith.constant 0 : i32
    return %arg0, %c0_i32 : i32, i32
  }
}

module attributes {stable_mosaic.version = 11 : i64} {
  func.func @_self_attn_ln_kernel(%arg0: i32, %arg1: i32, %arg2: memref<1x8x32xf32, #tpu.memory_space<vmem>>, %arg3: memref<1x8x32xf32, #tpu.memory_space<vmem>>, %arg4: memref<8x32xf32, #tpu.memory_space<vmem>>, %arg5: memref<8x32xf32, #tpu.memory_space<vmem>>, %arg6: memref<3x32x32xbf16, #tpu.memory_space<vmem>>, %arg7: memref<3x1x32xf32, #tpu.memory_space<vmem>>, %arg8: memref<32x32xbf16, #tpu.memory_space<vmem>>, %arg9: memref<1x32xf32, #tpu.memory_space<vmem>>, %arg10: memref<1x32xf32, #tpu.memory_space<vmem>>, %arg11: memref<1x32xf32, #tpu.memory_space<vmem>>, %arg12: memref<1x8x32xf32, #tpu.memory_space<vmem>>) attributes {dimension_semantics = [#tpu.dimension_semantics<parallel>, #tpu.dimension_semantics<parallel>], iteration_bounds = array<i64: 2, 1>, scalar_prefetch = 0 : i64, scratch_operands = 0 : i64, tpu.core_type = #tpu.core_type<tc>, window_params = [{transform_indices = @transform_0, window_bounds = array<i64: 1, 8, 32>}, {transform_indices = @transform_1, window_bounds = array<i64: 1, 8, 32>}, {transform_indices = @transform_2, window_bounds = array<i64: 8, 32>}, {pipeline_mode = #tpu.pipeline_mode<synchronous>, transform_indices = @transform_3, window_bounds = array<i64: 8, 32>}, {pipeline_mode = #tpu.pipeline_mode<synchronous>, transform_indices = @transform_4, window_bounds = array<i64: 3, 32, 32>}, {pipeline_mode = #tpu.pipeline_mode<synchronous>, transform_indices = @transform_5, window_bounds = array<i64: 3, 1, 32>}, {pipeline_mode = #tpu.pipeline_mode<synchronous>, transform_indices = @transform_6, window_bounds = array<i64: 32, 32>}, {pipeline_mode = #tpu.pipeline_mode<synchronous>, transform_indices = @transform_7, window_bounds = array<i64: 1, 32>}, {pipeline_mode = #tpu.pipeline_mode<synchronous>, transform_indices = @transform_8, window_bounds = array<i64: 1, 32>}, {pipeline_mode = #tpu.pipeline_mode<synchronous>, transform_indices = @transform_9, window_bounds = array<i64: 1, 32>}, {transform_indices = @transform_10, window_bounds = array<i64: 1, 8, 32>}]} {
    %c0 = arith.constant 0 : index
    %c0_0 = arith.constant 0 : index
    %c0_1 = arith.constant 0 : index
    %0 = vector.load %arg2[%c0, %c0_0, %c0_1] : memref<1x8x32xf32, #tpu.memory_space<vmem>>, vector<1x8x32xf32>
    %1 = vector.shape_cast %0 : vector<1x8x32xf32> to vector<8x32xf32>
    %c0_2 = arith.constant 0 : index
    %c0_3 = arith.constant 0 : index
    %c0_4 = arith.constant 0 : index
    %2 = vector.load %arg3[%c0_2, %c0_3, %c0_4] : memref<1x8x32xf32, #tpu.memory_space<vmem>>, vector<1x8x32xf32>
    %3 = vector.shape_cast %2 : vector<1x8x32xf32> to vector<8x32xf32>
    %c0_5 = arith.constant 0 : index
    %c0_6 = arith.constant 0 : index
    %4 = vector.load %arg4[%c0_5, %c0_6] : memref<8x32xf32, #tpu.memory_space<vmem>>, vector<8x32xf32>
    %5 = arith.addf %1, %4 : vector<8x32xf32>
    %6 = arith.truncf %5 : vector<8x32xf32> to vector<8x32xbf16>
    %c0_7 = arith.constant 0 : index
    %c0_8 = arith.constant 0 : index
    %c0_9 = arith.constant 0 : index
    %7 = vector.load %arg6[%c0_7, %c0_8, %c0_9] : memref<3x32x32xbf16, #tpu.memory_space<vmem>>, vector<1x32x32xbf16>
    %8 = vector.shape_cast %7 : vector<1x32x32xbf16> to vector<32x32xbf16>
    %cst = arith.constant dense<0.000000e+00> : vector<8x32xf32>
    %9 = tpu.matmul %6, %8, %cst {dimension_numbers = #tpu.dot_dimension_numbers<[1], [0], [0], [1], [0, 0, 1, 1], [], []>} : vector<8x32xbf16>, vector<32x32xbf16>, vector<8x32xf32> -> vector<8x32xf32>
    %c0_10 = arith.constant 0 : index
    %c0_11 = arith.constant 0 : index
    %c0_12 = arith.constant 0 : index
    %10 = vector.load %arg7[%c0_10, %c0_11, %c0_12] : memref<3x1x32xf32, #tpu.memory_space<vmem>>, vector<1x1x32xf32>
    %11 = vector.shape_cast %10 : vector<1x1x32xf32> to vector<1x32xf32>
    %12 = vector.broadcast %11 : vector<1x32xf32> to vector<8x32xf32>
    %13 = arith.addf %9, %12 : vector<8x32xf32>
    %c0_13 = arith.constant 0 : index
    %c0_14 = arith.constant 0 : index
    %14 = vector.load %arg5[%c0_13, %c0_14] : memref<8x32xf32, #tpu.memory_space<vmem>>, vector<8x32xf32>
    %15 = arith.addf %3, %14 : vector<8x32xf32>
    %16 = arith.truncf %15 : vector<8x32xf32> to vector<8x32xbf16>
    %c1 = arith.constant 1 : index
    %c0_15 = arith.constant 0 : index
    %c0_16 = arith.constant 0 : index
    %17 = vector.load %arg6[%c1, %c0_15, %c0_16] : memref<3x32x32xbf16, #tpu.memory_space<vmem>>, vector<1x32x32xbf16>
    %18 = vector.shape_cast %17 : vector<1x32x32xbf16> to vector<32x32xbf16>
    %cst_17 = arith.constant dense<0.000000e+00> : vector<8x32xf32>
    %19 = tpu.matmul %16, %18, %cst_17 {dimension_numbers = #tpu.dot_dimension_numbers<[1], [0], [0], [1], [0, 0, 1, 1], [], []>} : vector<8x32xbf16>, vector<32x32xbf16>, vector<8x32xf32> -> vector<8x32xf32>
    %c1_18 = arith.constant 1 : index
    %c0_19 = arith.constant 0 : index
    %c0_20 = arith.constant 0 : index
    %20 = vector.load %arg7[%c1_18, %c0_19, %c0_20] : memref<3x1x32xf32, #tpu.memory_space<vmem>>, vector<1x1x32xf32>
    %21 = vector.shape_cast %20 : vector<1x1x32xf32> to vector<1x32xf32>
    %22 = vector.broadcast %21 : vector<1x32xf32> to vector<8x32xf32>
    %23 = arith.addf %19, %22 : vector<8x32xf32>
    %24 = arith.truncf %3 : vector<8x32xf32> to vector<8x32xbf16>
    %c2 = arith.constant 2 : index
    %c0_21 = arith.constant 0 : index
    %c0_22 = arith.constant 0 : index
    %25 = vector.load %arg6[%c2, %c0_21, %c0_22] : memref<3x32x32xbf16, #tpu.memory_space<vmem>>, vector<1x32x32xbf16>
    %26 = vector.shape_cast %25 : vector<1x32x32xbf16> to vector<32x32xbf16>
    %cst_23 = arith.constant dense<0.000000e+00> : vector<8x32xf32>
    %27 = tpu.matmul %24, %26, %cst_23 {dimension_numbers = #tpu.dot_dimension_numbers<[1], [0], [0], [1], [0, 0, 1, 1], [], []>} : vector<8x32xbf16>, vector<32x32xbf16>, vector<8x32xf32> -> vector<8x32xf32>
    %c2_24 = arith.constant 2 : index
    %c0_25 = arith.constant 0 : index
    %c0_26 = arith.constant 0 : index
    %28 = vector.load %arg7[%c2_24, %c0_25, %c0_26] : memref<3x1x32xf32, #tpu.memory_space<vmem>>, vector<1x1x32xf32>
    %29 = vector.shape_cast %28 : vector<1x1x32xf32> to vector<1x32xf32>
    %30 = vector.broadcast %29 : vector<1x32xf32> to vector<8x32xf32>
    %31 = arith.addf %27, %30 : vector<8x32xf32>
    %c0_27 = arith.constant 0 : index
    %c0_28 = arith.constant 0 : index
    %32 = vector.load %arg8[%c0_27, %c0_28] : memref<32x32xbf16, #tpu.memory_space<vmem>>, vector<32x32xbf16>
    %c0_29 = arith.constant 0 : index
    %c0_30 = arith.constant 0 : index
    %33 = vector.load %arg9[%c0_29, %c0_30] : memref<1x32xf32, #tpu.memory_space<vmem>>, vector<1x32xf32>
    %c0_31 = arith.constant 0 : index
    %c0_32 = arith.constant 0 : index
    %34 = vector.load %arg10[%c0_31, %c0_32] : memref<1x32xf32, #tpu.memory_space<vmem>>, vector<1x32xf32>
    %c0_33 = arith.constant 0 : index
    %c0_34 = arith.constant 0 : index
    %35 = vector.load %arg11[%c0_33, %c0_34] : memref<1x32xf32, #tpu.memory_space<vmem>>, vector<1x32xf32>
    %36 = arith.truncf %13 : vector<8x32xf32> to vector<8x32xbf16>
    %37 = arith.truncf %23 : vector<8x32xf32> to vector<8x32xbf16>
    %38 = arith.truncf %31 : vector<8x32xf32> to vector<8x32xbf16>
    %39 = vector.extract_strided_slice %36 {offsets = [0, 0], sizes = [8, 8], strides = [1, 1]} : vector<8x32xbf16> to vector<8x8xbf16>
    %40 = vector.extract_strided_slice %37 {offsets = [0, 0], sizes = [8, 8], strides = [1, 1]} : vector<8x32xbf16> to vector<8x8xbf16>
    %41 = vector.extract_strided_slice %38 {offsets = [0, 0], sizes = [8, 8], strides = [1, 1]} : vector<8x32xbf16> to vector<8x8xbf16>
    %cst_35 = arith.constant dense<0.000000e+00> : vector<8x8xf32>
    %42 = tpu.matmul %39, %40, %cst_35 {dimension_numbers = #tpu.dot_dimension_numbers<[1], [1], [0], [0], [0, 0, 1, 0], [], []>} : vector<8x8xbf16>, vector<8x8xbf16>, vector<8x8xf32> -> vector<8x8xf32>
    %cst_36 = arith.constant dense<0xFF800000> : vector<8xf32>
    %43 = vector.multi_reduction <maximumf>, %42, %cst_36 [1] : vector<8x8xf32> to vector<8xf32>
    %44 = vector.shape_cast %43 : vector<8xf32> to vector<8x1xf32>
    %45 = vector.broadcast %44 : vector<8x1xf32> to vector<8x8xf32>
    %46 = arith.subf %42, %45 : vector<8x8xf32>
    %47 = math.exp %46 : vector<8x8xf32>
    %cst_37 = arith.constant dense<0.000000e+00> : vector<8xf32>
    %48 = vector.multi_reduction <add>, %47, %cst_37 [1] : vector<8x8xf32> to vector<8xf32>
    %49 = vector.shape_cast %48 : vector<8xf32> to vector<8x1xf32>
    %50 = tpu.reciprocal %49 {approx = true} : vector<8x1xf32> -> vector<8x1xf32>
    %51 = vector.broadcast %50 : vector<8x1xf32> to vector<8x8xf32>
    %52 = arith.mulf %47, %51 : vector<8x8xf32>
    %53 = arith.truncf %52 : vector<8x8xf32> to vector<8x8xbf16>
    %cst_38 = arith.constant dense<0.000000e+00> : vector<8x8xf32>
    %54 = tpu.matmul %53, %41, %cst_38 {dimension_numbers = #tpu.dot_dimension_numbers<[1], [0], [0], [1], [0, 0, 1, 1], [], []>} : vector<8x8xbf16>, vector<8x8xbf16>, vector<8x8xf32> -> vector<8x8xf32>
    %55 = vector.extract_strided_slice %36 {offsets = [0, 8], sizes = [8, 8], strides = [1, 1]} : vector<8x32xbf16> to vector<8x8xbf16>
    %56 = vector.extract_strided_slice %37 {offsets = [0, 8], sizes = [8, 8], strides = [1, 1]} : vector<8x32xbf16> to vector<8x8xbf16>
    %57 = vector.extract_strided_slice %38 {offsets = [0, 8], sizes = [8, 8], strides = [1, 1]} : vector<8x32xbf16> to vector<8x8xbf16>
    %cst_39 = arith.constant dense<0.000000e+00> : vector<8x8xf32>
    %58 = tpu.matmul %55, %56, %cst_39 {dimension_numbers = #tpu.dot_dimension_numbers<[1], [1], [0], [0], [0, 0, 1, 0], [], []>} : vector<8x8xbf16>, vector<8x8xbf16>, vector<8x8xf32> -> vector<8x8xf32>
    %cst_40 = arith.constant dense<0xFF800000> : vector<8xf32>
    %59 = vector.multi_reduction <maximumf>, %58, %cst_40 [1] : vector<8x8xf32> to vector<8xf32>
    %60 = vector.shape_cast %59 : vector<8xf32> to vector<8x1xf32>
    %61 = vector.broadcast %60 : vector<8x1xf32> to vector<8x8xf32>
    %62 = arith.subf %58, %61 : vector<8x8xf32>
    %63 = math.exp %62 : vector<8x8xf32>
    %cst_41 = arith.constant dense<0.000000e+00> : vector<8xf32>
    %64 = vector.multi_reduction <add>, %63, %cst_41 [1] : vector<8x8xf32> to vector<8xf32>
    %65 = vector.shape_cast %64 : vector<8xf32> to vector<8x1xf32>
    %66 = tpu.reciprocal %65 {approx = true} : vector<8x1xf32> -> vector<8x1xf32>
    %67 = vector.broadcast %66 : vector<8x1xf32> to vector<8x8xf32>
    %68 = arith.mulf %63, %67 : vector<8x8xf32>
    %69 = arith.truncf %68 : vector<8x8xf32> to vector<8x8xbf16>
    %cst_42 = arith.constant dense<0.000000e+00> : vector<8x8xf32>
    %70 = tpu.matmul %69, %57, %cst_42 {dimension_numbers = #tpu.dot_dimension_numbers<[1], [0], [0], [1], [0, 0, 1, 1], [], []>} : vector<8x8xbf16>, vector<8x8xbf16>, vector<8x8xf32> -> vector<8x8xf32>
    %71 = vector.extract_strided_slice %36 {offsets = [0, 16], sizes = [8, 8], strides = [1, 1]} : vector<8x32xbf16> to vector<8x8xbf16>
    %72 = vector.extract_strided_slice %37 {offsets = [0, 16], sizes = [8, 8], strides = [1, 1]} : vector<8x32xbf16> to vector<8x8xbf16>
    %73 = vector.extract_strided_slice %38 {offsets = [0, 16], sizes = [8, 8], strides = [1, 1]} : vector<8x32xbf16> to vector<8x8xbf16>
    %cst_43 = arith.constant dense<0.000000e+00> : vector<8x8xf32>
    %74 = tpu.matmul %71, %72, %cst_43 {dimension_numbers = #tpu.dot_dimension_numbers<[1], [1], [0], [0], [0, 0, 1, 0], [], []>} : vector<8x8xbf16>, vector<8x8xbf16>, vector<8x8xf32> -> vector<8x8xf32>
    %cst_44 = arith.constant dense<0xFF800000> : vector<8xf32>
    %75 = vector.multi_reduction <maximumf>, %74, %cst_44 [1] : vector<8x8xf32> to vector<8xf32>
    %76 = vector.shape_cast %75 : vector<8xf32> to vector<8x1xf32>
    %77 = vector.broadcast %76 : vector<8x1xf32> to vector<8x8xf32>
    %78 = arith.subf %74, %77 : vector<8x8xf32>
    %79 = math.exp %78 : vector<8x8xf32>
    %cst_45 = arith.constant dense<0.000000e+00> : vector<8xf32>
    %80 = vector.multi_reduction <add>, %79, %cst_45 [1] : vector<8x8xf32> to vector<8xf32>
    %81 = vector.shape_cast %80 : vector<8xf32> to vector<8x1xf32>
    %82 = tpu.reciprocal %81 {approx = true} : vector<8x1xf32> -> vector<8x1xf32>
    %83 = vector.broadcast %82 : vector<8x1xf32> to vector<8x8xf32>
    %84 = arith.mulf %79, %83 : vector<8x8xf32>
    %85 = arith.truncf %84 : vector<8x8xf32> to vector<8x8xbf16>
    %cst_46 = arith.constant dense<0.000000e+00> : vector<8x8xf32>
    %86 = tpu.matmul %85, %73, %cst_46 {dimension_numbers = #tpu.dot_dimension_numbers<[1], [0], [0], [1], [0, 0, 1, 1], [], []>} : vector<8x8xbf16>, vector<8x8xbf16>, vector<8x8xf32> -> vector<8x8xf32>
    %87 = vector.extract_strided_slice %36 {offsets = [0, 24], sizes = [8, 8], strides = [1, 1]} : vector<8x32xbf16> to vector<8x8xbf16>
    %88 = vector.extract_strided_slice %37 {offsets = [0, 24], sizes = [8, 8], strides = [1, 1]} : vector<8x32xbf16> to vector<8x8xbf16>
    %89 = vector.extract_strided_slice %38 {offsets = [0, 24], sizes = [8, 8], strides = [1, 1]} : vector<8x32xbf16> to vector<8x8xbf16>
    %cst_47 = arith.constant dense<0.000000e+00> : vector<8x8xf32>
    %90 = tpu.matmul %87, %88, %cst_47 {dimension_numbers = #tpu.dot_dimension_numbers<[1], [1], [0], [0], [0, 0, 1, 0], [], []>} : vector<8x8xbf16>, vector<8x8xbf16>, vector<8x8xf32> -> vector<8x8xf32>
    %cst_48 = arith.constant dense<0xFF800000> : vector<8xf32>
    %91 = vector.multi_reduction <maximumf>, %90, %cst_48 [1] : vector<8x8xf32> to vector<8xf32>
    %92 = vector.shape_cast %91 : vector<8xf32> to vector<8x1xf32>
    %93 = vector.broadcast %92 : vector<8x1xf32> to vector<8x8xf32>
    %94 = arith.subf %90, %93 : vector<8x8xf32>
    %95 = math.exp %94 : vector<8x8xf32>
    %cst_49 = arith.constant dense<0.000000e+00> : vector<8xf32>
    %96 = vector.multi_reduction <add>, %95, %cst_49 [1] : vector<8x8xf32> to vector<8xf32>
    %97 = vector.shape_cast %96 : vector<8xf32> to vector<8x1xf32>
    %98 = tpu.reciprocal %97 {approx = true} : vector<8x1xf32> -> vector<8x1xf32>
    %99 = vector.broadcast %98 : vector<8x1xf32> to vector<8x8xf32>
    %100 = arith.mulf %95, %99 : vector<8x8xf32>
    %101 = arith.truncf %100 : vector<8x8xf32> to vector<8x8xbf16>
    %cst_50 = arith.constant dense<0.000000e+00> : vector<8x8xf32>
    %102 = tpu.matmul %101, %89, %cst_50 {dimension_numbers = #tpu.dot_dimension_numbers<[1], [0], [0], [1], [0, 0, 1, 1], [], []>} : vector<8x8xbf16>, vector<8x8xbf16>, vector<8x8xf32> -> vector<8x8xf32>
    %103 = tpu.concatenate %54, %70, %86, %102 in 1 : vector<8x8xf32>, vector<8x8xf32>, vector<8x8xf32>, vector<8x8xf32> -> vector<8x32xf32>
    %104 = arith.truncf %103 : vector<8x32xf32> to vector<8x32xbf16>
    %cst_51 = arith.constant dense<0.000000e+00> : vector<8x32xf32>
    %105 = tpu.matmul %104, %32, %cst_51 {dimension_numbers = #tpu.dot_dimension_numbers<[1], [0], [0], [1], [0, 0, 1, 1], [], []>} : vector<8x32xbf16>, vector<32x32xbf16>, vector<8x32xf32> -> vector<8x32xf32>
    %106 = vector.broadcast %33 : vector<1x32xf32> to vector<8x32xf32>
    %107 = arith.addf %105, %106 : vector<8x32xf32>
    %108 = arith.addf %1, %107 : vector<8x32xf32>
    %cst_52 = arith.constant dense<0.000000e+00> : vector<8xf32>
    %109 = vector.multi_reduction <add>, %108, %cst_52 [1] : vector<8x32xf32> to vector<8xf32>
    %110 = vector.shape_cast %109 : vector<8xf32> to vector<8x1xf32>
    %cst_53 = arith.constant 3.200000e+01 : f32
    %111 = vector.broadcast %cst_53 : f32 to vector<8x1xf32>
    %112 = arith.divf %110, %111 : vector<8x1xf32>
    %113 = vector.broadcast %112 : vector<8x1xf32> to vector<8x32xf32>
    %114 = arith.subf %108, %113 : vector<8x32xf32>
    %115 = arith.mulf %114, %114 : vector<8x32xf32>
    %cst_54 = arith.constant dense<0.000000e+00> : vector<8xf32>
    %116 = vector.multi_reduction <add>, %115, %cst_54 [1] : vector<8x32xf32> to vector<8xf32>
    %117 = vector.shape_cast %116 : vector<8xf32> to vector<8x1xf32>
    %cst_55 = arith.constant 3.200000e+01 : f32
    %118 = vector.broadcast %cst_55 : f32 to vector<8x1xf32>
    %119 = arith.divf %117, %118 : vector<8x1xf32>
    %120 = vector.broadcast %112 : vector<8x1xf32> to vector<8x32xf32>
    %121 = arith.subf %108, %120 : vector<8x32xf32>
    %cst_56 = arith.constant 9.99999974E-6 : f32
    %122 = vector.broadcast %cst_56 : f32 to vector<8x1xf32>
    %123 = arith.addf %119, %122 : vector<8x1xf32>
    %124 = math.rsqrt %123 : vector<8x1xf32>
    %125 = vector.broadcast %124 : vector<8x1xf32> to vector<8x32xf32>
    %126 = arith.mulf %121, %125 : vector<8x32xf32>
    %127 = vector.broadcast %34 : vector<1x32xf32> to vector<8x32xf32>
    %128 = arith.mulf %126, %127 : vector<8x32xf32>
    %129 = vector.broadcast %35 : vector<1x32xf32> to vector<8x32xf32>
    %130 = arith.addf %128, %129 : vector<8x32xf32>
    %c0_57 = arith.constant 0 : index
    %c0_58 = arith.constant 0 : index
    %c0_59 = arith.constant 0 : index
    %131 = vector.load %arg12[%c0_57, %c0_58, %c0_59] : memref<1x8x32xf32, #tpu.memory_space<vmem>>, vector<1x8x32xf32>
    %132 = vector.shape_cast %131 : vector<1x8x32xf32> to vector<8x32xf32>
    %133 = vector.shape_cast %130 : vector<8x32xf32> to vector<1x8x32xf32>
    tpu.vector_store %arg12[%c0_57, %c0_58, %c0_59], %133 {strides = array<i32>} : memref<1x8x32xf32, #tpu.memory_space<vmem>>, vector<1x8x32xf32>,
    return
  }
  func.func @transform_0(%arg0: i32, %arg1: i32) -> (i32, i32, i32) {
    %c0_i32 = arith.constant 0 : i32
    %c0_i32_0 = arith.constant 0 : i32
    return %arg0, %arg1, %c0_i32 : i32, i32, i32
  }
  func.func @transform_1(%arg0: i32, %arg1: i32) -> (i32, i32, i32) {
    %c0_i32 = arith.constant 0 : i32
    %c0_i32_0 = arith.constant 0 : i32
    %c0_i32_1 = arith.constant 0 : i32
    return %arg0, %c0_i32, %c0_i32_0 : i32, i32, i32
  }
  func.func @transform_2(%arg0: i32, %arg1: i32) -> (i32, i32) {
    %c0_i32 = arith.constant 0 : i32
    %c0_i32_0 = arith.constant 0 : i32
    return %arg1, %c0_i32 : i32, i32
  }
  func.func @transform_3(%arg0: i32, %arg1: i32) -> (i32, i32) {
    %c0_i32 = arith.constant 0 : i32
    %c0_i32_0 = arith.constant 0 : i32
    %c0_i32_1 = arith.constant 0 : i32
    return %c0_i32, %c0_i32_0 : i32, i32
  }
  func.func @transform_4(%arg0: i32, %arg1: i32) -> (i32, i32, i32) {
    %c0_i32 = arith.constant 0 : i32
    %c0_i32_0 = arith.constant 0 : i32
    %c0_i32_1 = arith.constant 0 : i32
    %c0_i32_2 = arith.constant 0 : i32
    return %c0_i32, %c0_i32_0, %c0_i32_1 : i32, i32, i32
  }
  func.func @transform_5(%arg0: i32, %arg1: i32) -> (i32, i32, i32) {
    %c0_i32 = arith.constant 0 : i32
    %c0_i32_0 = arith.constant 0 : i32
    %c0_i32_1 = arith.constant 0 : i32
    %c0_i32_2 = arith.constant 0 : i32
    return %c0_i32, %c0_i32_0, %c0_i32_1 : i32, i32, i32
  }
  func.func @transform_6(%arg0: i32, %arg1: i32) -> (i32, i32) {
    %c0_i32 = arith.constant 0 : i32
    %c0_i32_0 = arith.constant 0 : i32
    %c0_i32_1 = arith.constant 0 : i32
    return %c0_i32, %c0_i32_0 : i32, i32
  }
  func.func @transform_7(%arg0: i32, %arg1: i32) -> (i32, i32) {
    %c0_i32 = arith.constant 0 : i32
    %c0_i32_0 = arith.constant 0 : i32
    %c0_i32_1 = arith.constant 0 : i32
    return %c0_i32, %c0_i32_0 : i32, i32
  }
  func.func @transform_8(%arg0: i32, %arg1: i32) -> (i32, i32) {
    %c0_i32 = arith.constant 0 : i32
    %c0_i32_0 = arith.constant 0 : i32
    %c0_i32_1 = arith.constant 0 : i32
    return %c0_i32, %c0_i32_0 : i32, i32
  }
  func.func @transform_9(%arg0: i32, %arg1: i32) -> (i32, i32) {
    %c0_i32 = arith.constant 0 : i32
    %c0_i32_0 = arith.constant 0 : i32
    %c0_i32_1 = arith.constant 0 : i32
    return %c0_i32, %c0_i32_0 : i32, i32
  }
  func.func @transform_10(%arg0: i32, %arg1: i32) -> (i32, i32, i32) {
    %c0_i32 = arith.constant 0 : i32
    %c0_i32_0 = arith.constant 0 : i32
    return %arg0, %arg1, %c0_i32 : i32, i32, i32
  }
}

module attributes {stable_mosaic.version = 11 : i64} {
  func.func @_cross_attn_ln_kernel(%arg0: i32, %arg1: i32, %arg2: memref<1x8x32xf32, #tpu.memory_space<vmem>>, %arg3: memref<8x32xf32, #tpu.memory_space<vmem>>, %arg4: memref<1x256x32xf32, #tpu.memory_space<vmem>>, %arg5: memref<256x32xf32, #tpu.memory_space<vmem>>, %arg6: memref<3x32x32xbf16, #tpu.memory_space<vmem>>, %arg7: memref<3x1x32xf32, #tpu.memory_space<vmem>>, %arg8: memref<32x32xbf16, #tpu.memory_space<vmem>>, %arg9: memref<1x32xf32, #tpu.memory_space<vmem>>, %arg10: memref<1x32xf32, #tpu.memory_space<vmem>>, %arg11: memref<1x32xf32, #tpu.memory_space<vmem>>, %arg12: memref<1x8x32xf32, #tpu.memory_space<vmem>>) attributes {dimension_semantics = [#tpu.dimension_semantics<parallel>, #tpu.dimension_semantics<parallel>], iteration_bounds = array<i64: 2, 1>, scalar_prefetch = 0 : i64, scratch_operands = 0 : i64, tpu.core_type = #tpu.core_type<tc>, window_params = [{transform_indices = @transform_0, window_bounds = array<i64: 1, 8, 32>}, {transform_indices = @transform_1, window_bounds = array<i64: 8, 32>}, {transform_indices = @transform_2, window_bounds = array<i64: 1, 256, 32>}, {pipeline_mode = #tpu.pipeline_mode<synchronous>, transform_indices = @transform_3, window_bounds = array<i64: 256, 32>}, {pipeline_mode = #tpu.pipeline_mode<synchronous>, transform_indices = @transform_4, window_bounds = array<i64: 3, 32, 32>}, {pipeline_mode = #tpu.pipeline_mode<synchronous>, transform_indices = @transform_5, window_bounds = array<i64: 3, 1, 32>}, {pipeline_mode = #tpu.pipeline_mode<synchronous>, transform_indices = @transform_6, window_bounds = array<i64: 32, 32>}, {pipeline_mode = #tpu.pipeline_mode<synchronous>, transform_indices = @transform_7, window_bounds = array<i64: 1, 32>}, {pipeline_mode = #tpu.pipeline_mode<synchronous>, transform_indices = @transform_8, window_bounds = array<i64: 1, 32>}, {pipeline_mode = #tpu.pipeline_mode<synchronous>, transform_indices = @transform_9, window_bounds = array<i64: 1, 32>}, {transform_indices = @transform_10, window_bounds = array<i64: 1, 8, 32>}]} {
    %c0 = arith.constant 0 : index
    %c0_0 = arith.constant 0 : index
    %c0_1 = arith.constant 0 : index
    %0 = vector.load %arg2[%c0, %c0_0, %c0_1] : memref<1x8x32xf32, #tpu.memory_space<vmem>>, vector<1x8x32xf32>
    %1 = vector.shape_cast %0 : vector<1x8x32xf32> to vector<8x32xf32>
    %c0_2 = arith.constant 0 : index
    %c0_3 = arith.constant 0 : index
    %c0_4 = arith.constant 0 : index
    %2 = vector.load %arg4[%c0_2, %c0_3, %c0_4] : memref<1x256x32xf32, #tpu.memory_space<vmem>>, vector<1x256x32xf32>
    %3 = vector.shape_cast %2 : vector<1x256x32xf32> to vector<256x32xf32>
    %c0_5 = arith.constant 0 : index
    %c0_6 = arith.constant 0 : index
    %4 = vector.load %arg3[%c0_5, %c0_6] : memref<8x32xf32, #tpu.memory_space<vmem>>, vector<8x32xf32>
    %5 = arith.addf %1, %4 : vector<8x32xf32>
    %6 = arith.truncf %5 : vector<8x32xf32> to vector<8x32xbf16>
    %c0_7 = arith.constant 0 : index
    %c0_8 = arith.constant 0 : index
    %c0_9 = arith.constant 0 : index
    %7 = vector.load %arg6[%c0_7, %c0_8, %c0_9] : memref<3x32x32xbf16, #tpu.memory_space<vmem>>, vector<1x32x32xbf16>
    %8 = vector.shape_cast %7 : vector<1x32x32xbf16> to vector<32x32xbf16>
    %cst = arith.constant dense<0.000000e+00> : vector<8x32xf32>
    %9 = tpu.matmul %6, %8, %cst {dimension_numbers = #tpu.dot_dimension_numbers<[1], [0], [0], [1], [0, 0, 1, 1], [], []>} : vector<8x32xbf16>, vector<32x32xbf16>, vector<8x32xf32> -> vector<8x32xf32>
    %c0_10 = arith.constant 0 : index
    %c0_11 = arith.constant 0 : index
    %c0_12 = arith.constant 0 : index
    %10 = vector.load %arg7[%c0_10, %c0_11, %c0_12] : memref<3x1x32xf32, #tpu.memory_space<vmem>>, vector<1x1x32xf32>
    %11 = vector.shape_cast %10 : vector<1x1x32xf32> to vector<1x32xf32>
    %12 = vector.broadcast %11 : vector<1x32xf32> to vector<8x32xf32>
    %13 = arith.addf %9, %12 : vector<8x32xf32>
    %c0_13 = arith.constant 0 : index
    %c0_14 = arith.constant 0 : index
    %14 = vector.load %arg5[%c0_13, %c0_14] : memref<256x32xf32, #tpu.memory_space<vmem>>, vector<256x32xf32>
    %15 = arith.addf %3, %14 : vector<256x32xf32>
    %16 = arith.truncf %15 : vector<256x32xf32> to vector<256x32xbf16>
    %c1 = arith.constant 1 : index
    %c0_15 = arith.constant 0 : index
    %c0_16 = arith.constant 0 : index
    %17 = vector.load %arg6[%c1, %c0_15, %c0_16] : memref<3x32x32xbf16, #tpu.memory_space<vmem>>, vector<1x32x32xbf16>
    %18 = vector.shape_cast %17 : vector<1x32x32xbf16> to vector<32x32xbf16>
    %cst_17 = arith.constant dense<0.000000e+00> : vector<256x32xf32>
    %19 = tpu.matmul %16, %18, %cst_17 {dimension_numbers = #tpu.dot_dimension_numbers<[1], [0], [0], [1], [0, 0, 1, 1], [], []>} : vector<256x32xbf16>, vector<32x32xbf16>, vector<256x32xf32> -> vector<256x32xf32>
    %c1_18 = arith.constant 1 : index
    %c0_19 = arith.constant 0 : index
    %c0_20 = arith.constant 0 : index
    %20 = vector.load %arg7[%c1_18, %c0_19, %c0_20] : memref<3x1x32xf32, #tpu.memory_space<vmem>>, vector<1x1x32xf32>
    %21 = vector.shape_cast %20 : vector<1x1x32xf32> to vector<1x32xf32>
    %22 = vector.broadcast %21 : vector<1x32xf32> to vector<256x32xf32>
    %23 = arith.addf %19, %22 : vector<256x32xf32>
    %24 = arith.truncf %3 : vector<256x32xf32> to vector<256x32xbf16>
    %c2 = arith.constant 2 : index
    %c0_21 = arith.constant 0 : index
    %c0_22 = arith.constant 0 : index
    %25 = vector.load %arg6[%c2, %c0_21, %c0_22] : memref<3x32x32xbf16, #tpu.memory_space<vmem>>, vector<1x32x32xbf16>
    %26 = vector.shape_cast %25 : vector<1x32x32xbf16> to vector<32x32xbf16>
    %cst_23 = arith.constant dense<0.000000e+00> : vector<256x32xf32>
    %27 = tpu.matmul %24, %26, %cst_23 {dimension_numbers = #tpu.dot_dimension_numbers<[1], [0], [0], [1], [0, 0, 1, 1], [], []>} : vector<256x32xbf16>, vector<32x32xbf16>, vector<256x32xf32> -> vector<256x32xf32>
    %c2_24 = arith.constant 2 : index
    %c0_25 = arith.constant 0 : index
    %c0_26 = arith.constant 0 : index
    %28 = vector.load %arg7[%c2_24, %c0_25, %c0_26] : memref<3x1x32xf32, #tpu.memory_space<vmem>>, vector<1x1x32xf32>
    %29 = vector.shape_cast %28 : vector<1x1x32xf32> to vector<1x32xf32>
    %30 = vector.broadcast %29 : vector<1x32xf32> to vector<256x32xf32>
    %31 = arith.addf %27, %30 : vector<256x32xf32>
    %c0_27 = arith.constant 0 : index
    %c0_28 = arith.constant 0 : index
    %32 = vector.load %arg8[%c0_27, %c0_28] : memref<32x32xbf16, #tpu.memory_space<vmem>>, vector<32x32xbf16>
    %c0_29 = arith.constant 0 : index
    %c0_30 = arith.constant 0 : index
    %33 = vector.load %arg9[%c0_29, %c0_30] : memref<1x32xf32, #tpu.memory_space<vmem>>, vector<1x32xf32>
    %c0_31 = arith.constant 0 : index
    %c0_32 = arith.constant 0 : index
    %34 = vector.load %arg10[%c0_31, %c0_32] : memref<1x32xf32, #tpu.memory_space<vmem>>, vector<1x32xf32>
    %c0_33 = arith.constant 0 : index
    %c0_34 = arith.constant 0 : index
    %35 = vector.load %arg11[%c0_33, %c0_34] : memref<1x32xf32, #tpu.memory_space<vmem>>, vector<1x32xf32>
    %36 = arith.truncf %13 : vector<8x32xf32> to vector<8x32xbf16>
    %37 = arith.truncf %23 : vector<256x32xf32> to vector<256x32xbf16>
    %38 = arith.truncf %31 : vector<256x32xf32> to vector<256x32xbf16>
    %39 = vector.extract_strided_slice %36 {offsets = [0, 0], sizes = [8, 8], strides = [1, 1]} : vector<8x32xbf16> to vector<8x8xbf16>
    %40 = vector.extract_strided_slice %37 {offsets = [0, 0], sizes = [256, 8], strides = [1, 1]} : vector<256x32xbf16> to vector<256x8xbf16>
    %41 = vector.extract_strided_slice %38 {offsets = [0, 0], sizes = [256, 8], strides = [1, 1]} : vector<256x32xbf16> to vector<256x8xbf16>
    %cst_35 = arith.constant dense<0.000000e+00> : vector<8x256xf32>
    %42 = tpu.matmul %39, %40, %cst_35 {dimension_numbers = #tpu.dot_dimension_numbers<[1], [1], [0], [0], [0, 0, 1, 0], [], []>} : vector<8x8xbf16>, vector<256x8xbf16>, vector<8x256xf32> -> vector<8x256xf32>
    %cst_36 = arith.constant dense<0xFF800000> : vector<8xf32>
    %43 = vector.multi_reduction <maximumf>, %42, %cst_36 [1] : vector<8x256xf32> to vector<8xf32>
    %44 = vector.shape_cast %43 : vector<8xf32> to vector<8x1xf32>
    %45 = vector.broadcast %44 : vector<8x1xf32> to vector<8x256xf32>
    %46 = arith.subf %42, %45 : vector<8x256xf32>
    %47 = math.exp %46 : vector<8x256xf32>
    %cst_37 = arith.constant dense<0.000000e+00> : vector<8xf32>
    %48 = vector.multi_reduction <add>, %47, %cst_37 [1] : vector<8x256xf32> to vector<8xf32>
    %49 = vector.shape_cast %48 : vector<8xf32> to vector<8x1xf32>
    %50 = tpu.reciprocal %49 {approx = true} : vector<8x1xf32> -> vector<8x1xf32>
    %51 = vector.broadcast %50 : vector<8x1xf32> to vector<8x256xf32>
    %52 = arith.mulf %47, %51 : vector<8x256xf32>
    %53 = arith.truncf %52 : vector<8x256xf32> to vector<8x256xbf16>
    %cst_38 = arith.constant dense<0.000000e+00> : vector<8x8xf32>
    %54 = tpu.matmul %53, %41, %cst_38 {dimension_numbers = #tpu.dot_dimension_numbers<[1], [0], [0], [1], [0, 0, 1, 1], [], []>} : vector<8x256xbf16>, vector<256x8xbf16>, vector<8x8xf32> -> vector<8x8xf32>
    %55 = vector.extract_strided_slice %36 {offsets = [0, 8], sizes = [8, 8], strides = [1, 1]} : vector<8x32xbf16> to vector<8x8xbf16>
    %56 = vector.extract_strided_slice %37 {offsets = [0, 8], sizes = [256, 8], strides = [1, 1]} : vector<256x32xbf16> to vector<256x8xbf16>
    %57 = vector.extract_strided_slice %38 {offsets = [0, 8], sizes = [256, 8], strides = [1, 1]} : vector<256x32xbf16> to vector<256x8xbf16>
    %cst_39 = arith.constant dense<0.000000e+00> : vector<8x256xf32>
    %58 = tpu.matmul %55, %56, %cst_39 {dimension_numbers = #tpu.dot_dimension_numbers<[1], [1], [0], [0], [0, 0, 1, 0], [], []>} : vector<8x8xbf16>, vector<256x8xbf16>, vector<8x256xf32> -> vector<8x256xf32>
    %cst_40 = arith.constant dense<0xFF800000> : vector<8xf32>
    %59 = vector.multi_reduction <maximumf>, %58, %cst_40 [1] : vector<8x256xf32> to vector<8xf32>
    %60 = vector.shape_cast %59 : vector<8xf32> to vector<8x1xf32>
    %61 = vector.broadcast %60 : vector<8x1xf32> to vector<8x256xf32>
    %62 = arith.subf %58, %61 : vector<8x256xf32>
    %63 = math.exp %62 : vector<8x256xf32>
    %cst_41 = arith.constant dense<0.000000e+00> : vector<8xf32>
    %64 = vector.multi_reduction <add>, %63, %cst_41 [1] : vector<8x256xf32> to vector<8xf32>
    %65 = vector.shape_cast %64 : vector<8xf32> to vector<8x1xf32>
    %66 = tpu.reciprocal %65 {approx = true} : vector<8x1xf32> -> vector<8x1xf32>
    %67 = vector.broadcast %66 : vector<8x1xf32> to vector<8x256xf32>
    %68 = arith.mulf %63, %67 : vector<8x256xf32>
    %69 = arith.truncf %68 : vector<8x256xf32> to vector<8x256xbf16>
    %cst_42 = arith.constant dense<0.000000e+00> : vector<8x8xf32>
    %70 = tpu.matmul %69, %57, %cst_42 {dimension_numbers = #tpu.dot_dimension_numbers<[1], [0], [0], [1], [0, 0, 1, 1], [], []>} : vector<8x256xbf16>, vector<256x8xbf16>, vector<8x8xf32> -> vector<8x8xf32>
    %71 = vector.extract_strided_slice %36 {offsets = [0, 16], sizes = [8, 8], strides = [1, 1]} : vector<8x32xbf16> to vector<8x8xbf16>
    %72 = vector.extract_strided_slice %37 {offsets = [0, 16], sizes = [256, 8], strides = [1, 1]} : vector<256x32xbf16> to vector<256x8xbf16>
    %73 = vector.extract_strided_slice %38 {offsets = [0, 16], sizes = [256, 8], strides = [1, 1]} : vector<256x32xbf16> to vector<256x8xbf16>
    %cst_43 = arith.constant dense<0.000000e+00> : vector<8x256xf32>
    %74 = tpu.matmul %71, %72, %cst_43 {dimension_numbers = #tpu.dot_dimension_numbers<[1], [1], [0], [0], [0, 0, 1, 0], [], []>} : vector<8x8xbf16>, vector<256x8xbf16>, vector<8x256xf32> -> vector<8x256xf32>
    %cst_44 = arith.constant dense<0xFF800000> : vector<8xf32>
    %75 = vector.multi_reduction <maximumf>, %74, %cst_44 [1] : vector<8x256xf32> to vector<8xf32>
    %76 = vector.shape_cast %75 : vector<8xf32> to vector<8x1xf32>
    %77 = vector.broadcast %76 : vector<8x1xf32> to vector<8x256xf32>
    %78 = arith.subf %74, %77 : vector<8x256xf32>
    %79 = math.exp %78 : vector<8x256xf32>
    %cst_45 = arith.constant dense<0.000000e+00> : vector<8xf32>
    %80 = vector.multi_reduction <add>, %79, %cst_45 [1] : vector<8x256xf32> to vector<8xf32>
    %81 = vector.shape_cast %80 : vector<8xf32> to vector<8x1xf32>
    %82 = tpu.reciprocal %81 {approx = true} : vector<8x1xf32> -> vector<8x1xf32>
    %83 = vector.broadcast %82 : vector<8x1xf32> to vector<8x256xf32>
    %84 = arith.mulf %79, %83 : vector<8x256xf32>
    %85 = arith.truncf %84 : vector<8x256xf32> to vector<8x256xbf16>
    %cst_46 = arith.constant dense<0.000000e+00> : vector<8x8xf32>
    %86 = tpu.matmul %85, %73, %cst_46 {dimension_numbers = #tpu.dot_dimension_numbers<[1], [0], [0], [1], [0, 0, 1, 1], [], []>} : vector<8x256xbf16>, vector<256x8xbf16>, vector<8x8xf32> -> vector<8x8xf32>
    %87 = vector.extract_strided_slice %36 {offsets = [0, 24], sizes = [8, 8], strides = [1, 1]} : vector<8x32xbf16> to vector<8x8xbf16>
    %88 = vector.extract_strided_slice %37 {offsets = [0, 24], sizes = [256, 8], strides = [1, 1]} : vector<256x32xbf16> to vector<256x8xbf16>
    %89 = vector.extract_strided_slice %38 {offsets = [0, 24], sizes = [256, 8], strides = [1, 1]} : vector<256x32xbf16> to vector<256x8xbf16>
    %cst_47 = arith.constant dense<0.000000e+00> : vector<8x256xf32>
    %90 = tpu.matmul %87, %88, %cst_47 {dimension_numbers = #tpu.dot_dimension_numbers<[1], [1], [0], [0], [0, 0, 1, 0], [], []>} : vector<8x8xbf16>, vector<256x8xbf16>, vector<8x256xf32> -> vector<8x256xf32>
    %cst_48 = arith.constant dense<0xFF800000> : vector<8xf32>
    %91 = vector.multi_reduction <maximumf>, %90, %cst_48 [1] : vector<8x256xf32> to vector<8xf32>
    %92 = vector.shape_cast %91 : vector<8xf32> to vector<8x1xf32>
    %93 = vector.broadcast %92 : vector<8x1xf32> to vector<8x256xf32>
    %94 = arith.subf %90, %93 : vector<8x256xf32>
    %95 = math.exp %94 : vector<8x256xf32>
    %cst_49 = arith.constant dense<0.000000e+00> : vector<8xf32>
    %96 = vector.multi_reduction <add>, %95, %cst_49 [1] : vector<8x256xf32> to vector<8xf32>
    %97 = vector.shape_cast %96 : vector<8xf32> to vector<8x1xf32>
    %98 = tpu.reciprocal %97 {approx = true} : vector<8x1xf32> -> vector<8x1xf32>
    %99 = vector.broadcast %98 : vector<8x1xf32> to vector<8x256xf32>
    %100 = arith.mulf %95, %99 : vector<8x256xf32>
    %101 = arith.truncf %100 : vector<8x256xf32> to vector<8x256xbf16>
    %cst_50 = arith.constant dense<0.000000e+00> : vector<8x8xf32>
    %102 = tpu.matmul %101, %89, %cst_50 {dimension_numbers = #tpu.dot_dimension_numbers<[1], [0], [0], [1], [0, 0, 1, 1], [], []>} : vector<8x256xbf16>, vector<256x8xbf16>, vector<8x8xf32> -> vector<8x8xf32>
    %103 = tpu.concatenate %54, %70, %86, %102 in 1 : vector<8x8xf32>, vector<8x8xf32>, vector<8x8xf32>, vector<8x8xf32> -> vector<8x32xf32>
    %104 = arith.truncf %103 : vector<8x32xf32> to vector<8x32xbf16>
    %cst_51 = arith.constant dense<0.000000e+00> : vector<8x32xf32>
    %105 = tpu.matmul %104, %32, %cst_51 {dimension_numbers = #tpu.dot_dimension_numbers<[1], [0], [0], [1], [0, 0, 1, 1], [], []>} : vector<8x32xbf16>, vector<32x32xbf16>, vector<8x32xf32> -> vector<8x32xf32>
    %106 = vector.broadcast %33 : vector<1x32xf32> to vector<8x32xf32>
    %107 = arith.addf %105, %106 : vector<8x32xf32>
    %108 = arith.addf %1, %107 : vector<8x32xf32>
    %cst_52 = arith.constant dense<0.000000e+00> : vector<8xf32>
    %109 = vector.multi_reduction <add>, %108, %cst_52 [1] : vector<8x32xf32> to vector<8xf32>
    %110 = vector.shape_cast %109 : vector<8xf32> to vector<8x1xf32>
    %cst_53 = arith.constant 3.200000e+01 : f32
    %111 = vector.broadcast %cst_53 : f32 to vector<8x1xf32>
    %112 = arith.divf %110, %111 : vector<8x1xf32>
    %113 = vector.broadcast %112 : vector<8x1xf32> to vector<8x32xf32>
    %114 = arith.subf %108, %113 : vector<8x32xf32>
    %115 = arith.mulf %114, %114 : vector<8x32xf32>
    %cst_54 = arith.constant dense<0.000000e+00> : vector<8xf32>
    %116 = vector.multi_reduction <add>, %115, %cst_54 [1] : vector<8x32xf32> to vector<8xf32>
    %117 = vector.shape_cast %116 : vector<8xf32> to vector<8x1xf32>
    %cst_55 = arith.constant 3.200000e+01 : f32
    %118 = vector.broadcast %cst_55 : f32 to vector<8x1xf32>
    %119 = arith.divf %117, %118 : vector<8x1xf32>
    %120 = vector.broadcast %112 : vector<8x1xf32> to vector<8x32xf32>
    %121 = arith.subf %108, %120 : vector<8x32xf32>
    %cst_56 = arith.constant 9.99999974E-6 : f32
    %122 = vector.broadcast %cst_56 : f32 to vector<8x1xf32>
    %123 = arith.addf %119, %122 : vector<8x1xf32>
    %124 = math.rsqrt %123 : vector<8x1xf32>
    %125 = vector.broadcast %124 : vector<8x1xf32> to vector<8x32xf32>
    %126 = arith.mulf %121, %125 : vector<8x32xf32>
    %127 = vector.broadcast %34 : vector<1x32xf32> to vector<8x32xf32>
    %128 = arith.mulf %126, %127 : vector<8x32xf32>
    %129 = vector.broadcast %35 : vector<1x32xf32> to vector<8x32xf32>
    %130 = arith.addf %128, %129 : vector<8x32xf32>
    %c0_57 = arith.constant 0 : index
    %c0_58 = arith.constant 0 : index
    %c0_59 = arith.constant 0 : index
    %131 = vector.load %arg12[%c0_57, %c0_58, %c0_59] : memref<1x8x32xf32, #tpu.memory_space<vmem>>, vector<1x8x32xf32>
    %132 = vector.shape_cast %131 : vector<1x8x32xf32> to vector<8x32xf32>
    %133 = vector.shape_cast %130 : vector<8x32xf32> to vector<1x8x32xf32>
    tpu.vector_store %arg12[%c0_57, %c0_58, %c0_59], %133 {strides = array<i32>} : memref<1x8x32xf32, #tpu.memory_space<vmem>>, vector<1x8x32xf32>,
    return
  }
  func.func @transform_0(%arg0: i32, %arg1: i32) -> (i32, i32, i32) {
    %c0_i32 = arith.constant 0 : i32
    %c0_i32_0 = arith.constant 0 : i32
    return %arg0, %arg1, %c0_i32 : i32, i32, i32
  }
  func.func @transform_1(%arg0: i32, %arg1: i32) -> (i32, i32) {
    %c0_i32 = arith.constant 0 : i32
    %c0_i32_0 = arith.constant 0 : i32
    return %arg1, %c0_i32 : i32, i32
  }
  func.func @transform_2(%arg0: i32, %arg1: i32) -> (i32, i32, i32) {
    %c0_i32 = arith.constant 0 : i32
    %c0_i32_0 = arith.constant 0 : i32
    %c0_i32_1 = arith.constant 0 : i32
    return %arg0, %c0_i32, %c0_i32_0 : i32, i32, i32
  }
  func.func @transform_3(%arg0: i32, %arg1: i32) -> (i32, i32) {
    %c0_i32 = arith.constant 0 : i32
    %c0_i32_0 = arith.constant 0 : i32
    %c0_i32_1 = arith.constant 0 : i32
    return %c0_i32, %c0_i32_0 : i32, i32
  }
  func.func @transform_4(%arg0: i32, %arg1: i32) -> (i32, i32, i32) {
    %c0_i32 = arith.constant 0 : i32
    %c0_i32_0 = arith.constant 0 : i32
    %c0_i32_1 = arith.constant 0 : i32
    %c0_i32_2 = arith.constant 0 : i32
    return %c0_i32, %c0_i32_0, %c0_i32_1 : i32, i32, i32
  }
  func.func @transform_5(%arg0: i32, %arg1: i32) -> (i32, i32, i32) {
    %c0_i32 = arith.constant 0 : i32
    %c0_i32_0 = arith.constant 0 : i32
    %c0_i32_1 = arith.constant 0 : i32
    %c0_i32_2 = arith.constant 0 : i32
    return %c0_i32, %c0_i32_0, %c0_i32_1 : i32, i32, i32
  }
  func.func @transform_6(%arg0: i32, %arg1: i32) -> (i32, i32) {
    %c0_i32 = arith.constant 0 : i32
    %c0_i32_0 = arith.constant 0 : i32
    %c0_i32_1 = arith.constant 0 : i32
    return %c0_i32, %c0_i32_0 : i32, i32
  }
  func.func @transform_7(%arg0: i32, %arg1: i32) -> (i32, i32) {
    %c0_i32 = arith.constant 0 : i32
    %c0_i32_0 = arith.constant 0 : i32
    %c0_i32_1 = arith.constant 0 : i32
    return %c0_i32, %c0_i32_0 : i32, i32
  }
  func.func @transform_8(%arg0: i32, %arg1: i32) -> (i32, i32) {
    %c0_i32 = arith.constant 0 : i32
    %c0_i32_0 = arith.constant 0 : i32
    %c0_i32_1 = arith.constant 0 : i32
    return %c0_i32, %c0_i32_0 : i32, i32
  }
  func.func @transform_9(%arg0: i32, %arg1: i32) -> (i32, i32) {
    %c0_i32 = arith.constant 0 : i32
    %c0_i32_0 = arith.constant 0 : i32
    %c0_i32_1 = arith.constant 0 : i32
    return %c0_i32, %c0_i32_0 : i32, i32
  }
  func.func @transform_10(%arg0: i32, %arg1: i32) -> (i32, i32, i32) {
    %c0_i32 = arith.constant 0 : i32
    %c0_i32_0 = arith.constant 0 : i32
    return %arg0, %arg1, %c0_i32 : i32, i32, i32
  }
}

module attributes {stable_mosaic.version = 11 : i64} {
  func.func @_ffn_ln_kernel(%arg0: i32, %arg1: memref<16x32xf32, #tpu.memory_space<vmem>>, %arg2: memref<32x64xbf16, #tpu.memory_space<vmem>>, %arg3: memref<1x64xf32, #tpu.memory_space<vmem>>, %arg4: memref<64x32xbf16, #tpu.memory_space<vmem>>, %arg5: memref<1x32xf32, #tpu.memory_space<vmem>>, %arg6: memref<1x32xf32, #tpu.memory_space<vmem>>, %arg7: memref<1x32xf32, #tpu.memory_space<vmem>>, %arg8: memref<16x32xf32, #tpu.memory_space<vmem>>) attributes {dimension_semantics = [#tpu.dimension_semantics<parallel>], iteration_bounds = array<i64: 1>, scalar_prefetch = 0 : i64, scratch_operands = 0 : i64, tpu.core_type = #tpu.core_type<tc>, window_params = [{transform_indices = @transform_0, window_bounds = array<i64: 16, 32>}, {pipeline_mode = #tpu.pipeline_mode<synchronous>, transform_indices = @transform_1, window_bounds = array<i64: 32, 64>}, {pipeline_mode = #tpu.pipeline_mode<synchronous>, transform_indices = @transform_2, window_bounds = array<i64: 1, 64>}, {pipeline_mode = #tpu.pipeline_mode<synchronous>, transform_indices = @transform_3, window_bounds = array<i64: 64, 32>}, {pipeline_mode = #tpu.pipeline_mode<synchronous>, transform_indices = @transform_4, window_bounds = array<i64: 1, 32>}, {pipeline_mode = #tpu.pipeline_mode<synchronous>, transform_indices = @transform_5, window_bounds = array<i64: 1, 32>}, {pipeline_mode = #tpu.pipeline_mode<synchronous>, transform_indices = @transform_6, window_bounds = array<i64: 1, 32>}, {transform_indices = @transform_7, window_bounds = array<i64: 16, 32>}]} {
    %c0 = arith.constant 0 : index
    %c0_0 = arith.constant 0 : index
    %0 = vector.load %arg1[%c0, %c0_0] : memref<16x32xf32, #tpu.memory_space<vmem>>, vector<16x32xf32>
    %1 = arith.truncf %0 : vector<16x32xf32> to vector<16x32xbf16>
    %c0_1 = arith.constant 0 : index
    %c0_2 = arith.constant 0 : index
    %2 = vector.load %arg2[%c0_1, %c0_2] : memref<32x64xbf16, #tpu.memory_space<vmem>>, vector<32x64xbf16>
    %cst = arith.constant dense<0.000000e+00> : vector<16x64xf32>
    %3 = tpu.matmul %1, %2, %cst {dimension_numbers = #tpu.dot_dimension_numbers<[1], [0], [0], [1], [0, 0, 1, 1], [], []>} : vector<16x32xbf16>, vector<32x64xbf16>, vector<16x64xf32> -> vector<16x64xf32>
    %c0_3 = arith.constant 0 : index
    %c0_4 = arith.constant 0 : index
    %4 = vector.load %arg3[%c0_3, %c0_4] : memref<1x64xf32, #tpu.memory_space<vmem>>, vector<1x64xf32>
    %5 = vector.broadcast %4 : vector<1x64xf32> to vector<16x64xf32>
    %6 = arith.addf %3, %5 : vector<16x64xf32>
    %cst_5 = arith.constant 0.000000e+00 : f32
    %7 = vector.broadcast %cst_5 : f32 to vector<16x64xf32>
    %8 = arith.maximumf %6, %7 : vector<16x64xf32>
    %9 = arith.truncf %8 : vector<16x64xf32> to vector<16x64xbf16>
    %c0_6 = arith.constant 0 : index
    %c0_7 = arith.constant 0 : index
    %10 = vector.load %arg4[%c0_6, %c0_7] : memref<64x32xbf16, #tpu.memory_space<vmem>>, vector<64x32xbf16>
    %cst_8 = arith.constant dense<0.000000e+00> : vector<16x32xf32>
    %11 = tpu.matmul %9, %10, %cst_8 {dimension_numbers = #tpu.dot_dimension_numbers<[1], [0], [0], [1], [0, 0, 1, 1], [], []>} : vector<16x64xbf16>, vector<64x32xbf16>, vector<16x32xf32> -> vector<16x32xf32>
    %12 = arith.addf %0, %11 : vector<16x32xf32>
    %c0_9 = arith.constant 0 : index
    %c0_10 = arith.constant 0 : index
    %13 = vector.load %arg5[%c0_9, %c0_10] : memref<1x32xf32, #tpu.memory_space<vmem>>, vector<1x32xf32>
    %14 = vector.broadcast %13 : vector<1x32xf32> to vector<16x32xf32>
    %15 = arith.addf %12, %14 : vector<16x32xf32>
    %c0_11 = arith.constant 0 : index
    %c0_12 = arith.constant 0 : index
    %16 = vector.load %arg6[%c0_11, %c0_12] : memref<1x32xf32, #tpu.memory_space<vmem>>, vector<1x32xf32>
    %c0_13 = arith.constant 0 : index
    %c0_14 = arith.constant 0 : index
    %17 = vector.load %arg7[%c0_13, %c0_14] : memref<1x32xf32, #tpu.memory_space<vmem>>, vector<1x32xf32>
    %cst_15 = arith.constant dense<0.000000e+00> : vector<16xf32>
    %18 = vector.multi_reduction <add>, %15, %cst_15 [1] : vector<16x32xf32> to vector<16xf32>
    %19 = vector.shape_cast %18 : vector<16xf32> to vector<16x1xf32>
    %cst_16 = arith.constant 3.200000e+01 : f32
    %20 = vector.broadcast %cst_16 : f32 to vector<16x1xf32>
    %21 = arith.divf %19, %20 : vector<16x1xf32>
    %22 = vector.broadcast %21 : vector<16x1xf32> to vector<16x32xf32>
    %23 = arith.subf %15, %22 : vector<16x32xf32>
    %24 = arith.mulf %23, %23 : vector<16x32xf32>
    %cst_17 = arith.constant dense<0.000000e+00> : vector<16xf32>
    %25 = vector.multi_reduction <add>, %24, %cst_17 [1] : vector<16x32xf32> to vector<16xf32>
    %26 = vector.shape_cast %25 : vector<16xf32> to vector<16x1xf32>
    %cst_18 = arith.constant 3.200000e+01 : f32
    %27 = vector.broadcast %cst_18 : f32 to vector<16x1xf32>
    %28 = arith.divf %26, %27 : vector<16x1xf32>
    %29 = vector.broadcast %21 : vector<16x1xf32> to vector<16x32xf32>
    %30 = arith.subf %15, %29 : vector<16x32xf32>
    %cst_19 = arith.constant 9.99999974E-6 : f32
    %31 = vector.broadcast %cst_19 : f32 to vector<16x1xf32>
    %32 = arith.addf %28, %31 : vector<16x1xf32>
    %33 = math.rsqrt %32 : vector<16x1xf32>
    %34 = vector.broadcast %33 : vector<16x1xf32> to vector<16x32xf32>
    %35 = arith.mulf %30, %34 : vector<16x32xf32>
    %36 = vector.broadcast %16 : vector<1x32xf32> to vector<16x32xf32>
    %37 = arith.mulf %35, %36 : vector<16x32xf32>
    %38 = vector.broadcast %17 : vector<1x32xf32> to vector<16x32xf32>
    %39 = arith.addf %37, %38 : vector<16x32xf32>
    %c0_20 = arith.constant 0 : index
    %c0_21 = arith.constant 0 : index
    %40 = vector.load %arg8[%c0_20, %c0_21] : memref<16x32xf32, #tpu.memory_space<vmem>>, vector<16x32xf32>
    tpu.vector_store %arg8[%c0_20, %c0_21], %39 {strides = array<i32>} : memref<16x32xf32, #tpu.memory_space<vmem>>, vector<16x32xf32>,
    return
  }
  func.func @transform_0(%arg0: i32) -> (i32, i32) {
    %c0_i32 = arith.constant 0 : i32
    %c0_i32_0 = arith.constant 0 : i32
    return %arg0, %c0_i32 : i32, i32
  }
  func.func @transform_1(%arg0: i32) -> (i32, i32) {
    %c0_i32 = arith.constant 0 : i32
    %c0_i32_0 = arith.constant 0 : i32
    %c0_i32_1 = arith.constant 0 : i32
    return %c0_i32, %c0_i32_0 : i32, i32
  }
  func.func @transform_2(%arg0: i32) -> (i32, i32) {
    %c0_i32 = arith.constant 0 : i32
    %c0_i32_0 = arith.constant 0 : i32
    %c0_i32_1 = arith.constant 0 : i32
    return %c0_i32, %c0_i32_0 : i32, i32
  }
  func.func @transform_3(%arg0: i32) -> (i32, i32) {
    %c0_i32 = arith.constant 0 : i32
    %c0_i32_0 = arith.constant 0 : i32
    %c0_i32_1 = arith.constant 0 : i32
    return %c0_i32, %c0_i32_0 : i32, i32
  }
  func.func @transform_4(%arg0: i32) -> (i32, i32) {
    %c0_i32 = arith.constant 0 : i32
    %c0_i32_0 = arith.constant 0 : i32
    %c0_i32_1 = arith.constant 0 : i32
    return %c0_i32, %c0_i32_0 : i32, i32
  }
  func.func @transform_5(%arg0: i32) -> (i32, i32) {
    %c0_i32 = arith.constant 0 : i32
    %c0_i32_0 = arith.constant 0 : i32
    %c0_i32_1 = arith.constant 0 : i32
    return %c0_i32, %c0_i32_0 : i32, i32
  }
  func.func @transform_6(%arg0: i32) -> (i32, i32) {
    %c0_i32 = arith.constant 0 : i32
    %c0_i32_0 = arith.constant 0 : i32
    %c0_i32_1 = arith.constant 0 : i32
    return %c0_i32, %c0_i32_0 : i32, i32
  }
  func.func @transform_7(%arg0: i32) -> (i32, i32) {
    %c0_i32 = arith.constant 0 : i32
    %c0_i32_0 = arith.constant 0 : i32
    return %arg0, %c0_i32 : i32, i32
  }
}

module attributes {stable_mosaic.version = 11 : i64} {
  func.func @_heads_kernel(%arg0: i32, %arg1: memref<16x32xf32, #tpu.memory_space<vmem>>, %arg2: memref<1x32xf32, #tpu.memory_space<vmem>>, %arg3: memref<1x32xf32, #tpu.memory_space<vmem>>, %arg4: memref<32x5xbf16, #tpu.memory_space<vmem>>, %arg5: memref<1x5xf32, #tpu.memory_space<vmem>>, %arg6: memref<32x32xbf16, #tpu.memory_space<vmem>>, %arg7: memref<1x32xf32, #tpu.memory_space<vmem>>, %arg8: memref<32x32xbf16, #tpu.memory_space<vmem>>, %arg9: memref<1x32xf32, #tpu.memory_space<vmem>>, %arg10: memref<32x4xbf16, #tpu.memory_space<vmem>>, %arg11: memref<1x4xf32, #tpu.memory_space<vmem>>, %arg12: memref<16x5xf32, #tpu.memory_space<vmem>>, %arg13: memref<16x4xf32, #tpu.memory_space<vmem>>) attributes {dimension_semantics = [#tpu.dimension_semantics<arbitrary>], iteration_bounds = array<i64: 1>, scalar_prefetch = 0 : i64, scratch_operands = 0 : i64, tpu.core_type = #tpu.core_type<tc>, window_params = [{pipeline_mode = #tpu.pipeline_mode<synchronous>, transform_indices = @transform_0, window_bounds = array<i64: 16, 32>}, {pipeline_mode = #tpu.pipeline_mode<synchronous>, transform_indices = @transform_1, window_bounds = array<i64: 1, 32>}, {pipeline_mode = #tpu.pipeline_mode<synchronous>, transform_indices = @transform_2, window_bounds = array<i64: 1, 32>}, {pipeline_mode = #tpu.pipeline_mode<synchronous>, transform_indices = @transform_3, window_bounds = array<i64: 32, 5>}, {pipeline_mode = #tpu.pipeline_mode<synchronous>, transform_indices = @transform_4, window_bounds = array<i64: 1, 5>}, {pipeline_mode = #tpu.pipeline_mode<synchronous>, transform_indices = @transform_5, window_bounds = array<i64: 32, 32>}, {pipeline_mode = #tpu.pipeline_mode<synchronous>, transform_indices = @transform_6, window_bounds = array<i64: 1, 32>}, {pipeline_mode = #tpu.pipeline_mode<synchronous>, transform_indices = @transform_7, window_bounds = array<i64: 32, 32>}, {pipeline_mode = #tpu.pipeline_mode<synchronous>, transform_indices = @transform_8, window_bounds = array<i64: 1, 32>}, {pipeline_mode = #tpu.pipeline_mode<synchronous>, transform_indices = @transform_9, window_bounds = array<i64: 32, 4>}, {pipeline_mode = #tpu.pipeline_mode<synchronous>, transform_indices = @transform_10, window_bounds = array<i64: 1, 4>}, {pipeline_mode = #tpu.pipeline_mode<synchronous>, transform_indices = @transform_11, window_bounds = array<i64: 16, 5>}, {pipeline_mode = #tpu.pipeline_mode<synchronous>, transform_indices = @transform_12, window_bounds = array<i64: 16, 4>}]} {
    %c0 = arith.constant 0 : index
    %c0_0 = arith.constant 0 : index
    %0 = vector.load %arg1[%c0, %c0_0] : memref<16x32xf32, #tpu.memory_space<vmem>>, vector<16x32xf32>
    %c0_1 = arith.constant 0 : index
    %c0_2 = arith.constant 0 : index
    %1 = vector.load %arg2[%c0_1, %c0_2] : memref<1x32xf32, #tpu.memory_space<vmem>>, vector<1x32xf32>
    %c0_3 = arith.constant 0 : index
    %c0_4 = arith.constant 0 : index
    %2 = vector.load %arg3[%c0_3, %c0_4] : memref<1x32xf32, #tpu.memory_space<vmem>>, vector<1x32xf32>
    %cst = arith.constant dense<0.000000e+00> : vector<16xf32>
    %3 = vector.multi_reduction <add>, %0, %cst [1] : vector<16x32xf32> to vector<16xf32>
    %4 = vector.shape_cast %3 : vector<16xf32> to vector<16x1xf32>
    %cst_5 = arith.constant 3.200000e+01 : f32
    %5 = vector.broadcast %cst_5 : f32 to vector<16x1xf32>
    %6 = arith.divf %4, %5 : vector<16x1xf32>
    %7 = vector.broadcast %6 : vector<16x1xf32> to vector<16x32xf32>
    %8 = arith.subf %0, %7 : vector<16x32xf32>
    %9 = arith.mulf %8, %8 : vector<16x32xf32>
    %cst_6 = arith.constant dense<0.000000e+00> : vector<16xf32>
    %10 = vector.multi_reduction <add>, %9, %cst_6 [1] : vector<16x32xf32> to vector<16xf32>
    %11 = vector.shape_cast %10 : vector<16xf32> to vector<16x1xf32>
    %cst_7 = arith.constant 3.200000e+01 : f32
    %12 = vector.broadcast %cst_7 : f32 to vector<16x1xf32>
    %13 = arith.divf %11, %12 : vector<16x1xf32>
    %14 = vector.broadcast %6 : vector<16x1xf32> to vector<16x32xf32>
    %15 = arith.subf %0, %14 : vector<16x32xf32>
    %cst_8 = arith.constant 9.99999974E-6 : f32
    %16 = vector.broadcast %cst_8 : f32 to vector<16x1xf32>
    %17 = arith.addf %13, %16 : vector<16x1xf32>
    %18 = math.rsqrt %17 : vector<16x1xf32>
    %19 = vector.broadcast %18 : vector<16x1xf32> to vector<16x32xf32>
    %20 = arith.mulf %15, %19 : vector<16x32xf32>
    %21 = vector.broadcast %1 : vector<1x32xf32> to vector<16x32xf32>
    %22 = arith.mulf %20, %21 : vector<16x32xf32>
    %23 = vector.broadcast %2 : vector<1x32xf32> to vector<16x32xf32>
    %24 = arith.addf %22, %23 : vector<16x32xf32>
    %25 = arith.truncf %24 : vector<16x32xf32> to vector<16x32xbf16>
    %c0_9 = arith.constant 0 : index
    %c0_10 = arith.constant 0 : index
    %26 = vector.load %arg4[%c0_9, %c0_10] : memref<32x5xbf16, #tpu.memory_space<vmem>>, vector<32x5xbf16>
    %cst_11 = arith.constant dense<0.000000e+00> : vector<16x5xf32>
    %27 = tpu.matmul %25, %26, %cst_11 {dimension_numbers = #tpu.dot_dimension_numbers<[1], [0], [0], [1], [0, 0, 1, 1], [], []>} : vector<16x32xbf16>, vector<32x5xbf16>, vector<16x5xf32> -> vector<16x5xf32>
    %c0_12 = arith.constant 0 : index
    %c0_13 = arith.constant 0 : index
    %28 = vector.load %arg5[%c0_12, %c0_13] : memref<1x5xf32, #tpu.memory_space<vmem>>, vector<1x5xf32>
    %29 = vector.broadcast %28 : vector<1x5xf32> to vector<16x5xf32>
    %30 = arith.addf %27, %29 : vector<16x5xf32>
    %c0_14 = arith.constant 0 : index
    %c0_15 = arith.constant 0 : index
    %31 = vector.load %arg12[%c0_14, %c0_15] : memref<16x5xf32, #tpu.memory_space<vmem>>, vector<16x5xf32>
    tpu.vector_store %arg12[%c0_14, %c0_15], %30 {strides = array<i32>} : memref<16x5xf32, #tpu.memory_space<vmem>>, vector<16x5xf32>,
    %c0_16 = arith.constant 0 : index
    %c0_17 = arith.constant 0 : index
    %32 = vector.load %arg6[%c0_16, %c0_17] : memref<32x32xbf16, #tpu.memory_space<vmem>>, vector<32x32xbf16>
    %cst_18 = arith.constant dense<0.000000e+00> : vector<16x32xf32>
    %33 = tpu.matmul %25, %32, %cst_18 {dimension_numbers = #tpu.dot_dimension_numbers<[1], [0], [0], [1], [0, 0, 1, 1], [], []>} : vector<16x32xbf16>, vector<32x32xbf16>, vector<16x32xf32> -> vector<16x32xf32>
    %c0_19 = arith.constant 0 : index
    %c0_20 = arith.constant 0 : index
    %34 = vector.load %arg7[%c0_19, %c0_20] : memref<1x32xf32, #tpu.memory_space<vmem>>, vector<1x32xf32>
    %35 = vector.broadcast %34 : vector<1x32xf32> to vector<16x32xf32>
    %36 = arith.addf %33, %35 : vector<16x32xf32>
    %cst_21 = arith.constant 0.000000e+00 : f32
    %37 = vector.broadcast %cst_21 : f32 to vector<16x32xf32>
    %38 = arith.maximumf %36, %37 : vector<16x32xf32>
    %39 = arith.truncf %38 : vector<16x32xf32> to vector<16x32xbf16>
    %c0_22 = arith.constant 0 : index
    %c0_23 = arith.constant 0 : index
    %40 = vector.load %arg8[%c0_22, %c0_23] : memref<32x32xbf16, #tpu.memory_space<vmem>>, vector<32x32xbf16>
    %cst_24 = arith.constant dense<0.000000e+00> : vector<16x32xf32>
    %41 = tpu.matmul %39, %40, %cst_24 {dimension_numbers = #tpu.dot_dimension_numbers<[1], [0], [0], [1], [0, 0, 1, 1], [], []>} : vector<16x32xbf16>, vector<32x32xbf16>, vector<16x32xf32> -> vector<16x32xf32>
    %c0_25 = arith.constant 0 : index
    %c0_26 = arith.constant 0 : index
    %42 = vector.load %arg9[%c0_25, %c0_26] : memref<1x32xf32, #tpu.memory_space<vmem>>, vector<1x32xf32>
    %43 = vector.broadcast %42 : vector<1x32xf32> to vector<16x32xf32>
    %44 = arith.addf %41, %43 : vector<16x32xf32>
    %cst_27 = arith.constant 0.000000e+00 : f32
    %45 = vector.broadcast %cst_27 : f32 to vector<16x32xf32>
    %46 = arith.maximumf %44, %45 : vector<16x32xf32>
    %47 = arith.truncf %46 : vector<16x32xf32> to vector<16x32xbf16>
    %c0_28 = arith.constant 0 : index
    %c0_29 = arith.constant 0 : index
    %48 = vector.load %arg10[%c0_28, %c0_29] : memref<32x4xbf16, #tpu.memory_space<vmem>>, vector<32x4xbf16>
    %cst_30 = arith.constant dense<0.000000e+00> : vector<16x4xf32>
    %49 = tpu.matmul %47, %48, %cst_30 {dimension_numbers = #tpu.dot_dimension_numbers<[1], [0], [0], [1], [0, 0, 1, 1], [], []>} : vector<16x32xbf16>, vector<32x4xbf16>, vector<16x4xf32> -> vector<16x4xf32>
    %c0_31 = arith.constant 0 : index
    %c0_32 = arith.constant 0 : index
    %50 = vector.load %arg11[%c0_31, %c0_32] : memref<1x4xf32, #tpu.memory_space<vmem>>, vector<1x4xf32>
    %51 = vector.broadcast %50 : vector<1x4xf32> to vector<16x4xf32>
    %52 = arith.addf %49, %51 : vector<16x4xf32>
    %53 = arith.negf %52 : vector<16x4xf32>
    %54 = math.exp %53 : vector<16x4xf32>
    %cst_33 = arith.constant 1.000000e+00 : f32
    %55 = vector.broadcast %cst_33 : f32 to vector<16x4xf32>
    %56 = arith.addf %55, %54 : vector<16x4xf32>
    %57 = arith.divf %55, %56 : vector<16x4xf32>
    %c0_34 = arith.constant 0 : index
    %c0_35 = arith.constant 0 : index
    %58 = vector.load %arg13[%c0_34, %c0_35] : memref<16x4xf32, #tpu.memory_space<vmem>>, vector<16x4xf32>
    tpu.vector_store %arg13[%c0_34, %c0_35], %57 {strides = array<i32>} : memref<16x4xf32, #tpu.memory_space<vmem>>, vector<16x4xf32>,
    return
  }
  func.func @transform_0(%arg0: i32) -> (i32, i32) {
    %c0_i32 = arith.constant 0 : i32
    %c0_i32_0 = arith.constant 0 : i32
    %c0_i32_1 = arith.constant 0 : i32
    return %c0_i32, %c0_i32_0 : i32, i32
  }
  func.func @transform_1(%arg0: i32) -> (i32, i32) {
    %c0_i32 = arith.constant 0 : i32
    %c0_i32_0 = arith.constant 0 : i32
    %c0_i32_1 = arith.constant 0 : i32
    return %c0_i32, %c0_i32_0 : i32, i32
  }
  func.func @transform_2(%arg0: i32) -> (i32, i32) {
    %c0_i32 = arith.constant 0 : i32
    %c0_i32_0 = arith.constant 0 : i32
    %c0_i32_1 = arith.constant 0 : i32
    return %c0_i32, %c0_i32_0 : i32, i32
  }
  func.func @transform_3(%arg0: i32) -> (i32, i32) {
    %c0_i32 = arith.constant 0 : i32
    %c0_i32_0 = arith.constant 0 : i32
    %c0_i32_1 = arith.constant 0 : i32
    return %c0_i32, %c0_i32_0 : i32, i32
  }
  func.func @transform_4(%arg0: i32) -> (i32, i32) {
    %c0_i32 = arith.constant 0 : i32
    %c0_i32_0 = arith.constant 0 : i32
    %c0_i32_1 = arith.constant 0 : i32
    return %c0_i32, %c0_i32_0 : i32, i32
  }
  func.func @transform_5(%arg0: i32) -> (i32, i32) {
    %c0_i32 = arith.constant 0 : i32
    %c0_i32_0 = arith.constant 0 : i32
    %c0_i32_1 = arith.constant 0 : i32
    return %c0_i32, %c0_i32_0 : i32, i32
  }
  func.func @transform_6(%arg0: i32) -> (i32, i32) {
    %c0_i32 = arith.constant 0 : i32
    %c0_i32_0 = arith.constant 0 : i32
    %c0_i32_1 = arith.constant 0 : i32
    return %c0_i32, %c0_i32_0 : i32, i32
  }
  func.func @transform_7(%arg0: i32) -> (i32, i32) {
    %c0_i32 = arith.constant 0 : i32
    %c0_i32_0 = arith.constant 0 : i32
    %c0_i32_1 = arith.constant 0 : i32
    return %c0_i32, %c0_i32_0 : i32, i32
  }
  func.func @transform_8(%arg0: i32) -> (i32, i32) {
    %c0_i32 = arith.constant 0 : i32
    %c0_i32_0 = arith.constant 0 : i32
    %c0_i32_1 = arith.constant 0 : i32
    return %c0_i32, %c0_i32_0 : i32, i32
  }
  func.func @transform_9(%arg0: i32) -> (i32, i32) {
    %c0_i32 = arith.constant 0 : i32
    %c0_i32_0 = arith.constant 0 : i32
    %c0_i32_1 = arith.constant 0 : i32
    return %c0_i32, %c0_i32_0 : i32, i32
  }
  func.func @transform_10(%arg0: i32) -> (i32, i32) {
    %c0_i32 = arith.constant 0 : i32
    %c0_i32_0 = arith.constant 0 : i32
    %c0_i32_1 = arith.constant 0 : i32
    return %c0_i32, %c0_i32_0 : i32, i32
  }
  func.func @transform_11(%arg0: i32) -> (i32, i32) {
    %c0_i32 = arith.constant 0 : i32
    %c0_i32_0 = arith.constant 0 : i32
    %c0_i32_1 = arith.constant 0 : i32
    return %c0_i32, %c0_i32_0 : i32, i32
  }
  func.func @transform_12(%arg0: i32) -> (i32, i32) {
    %c0_i32 = arith.constant 0 : i32
    %c0_i32_0 = arith.constant 0 : i32
    %c0_i32_1 = arith.constant 0 : i32
    return %c0_i32, %c0_i32_0 : i32, i32
  }
}

</mosaic_0001>

<bundles_post_ra>
// kernel: detr_forward.10
= control target key start
LH: loop header
LB: loop body
LE: loop exit
PB: predicated region body
PF: predicated region fallthrough
CT: control target
= control target key end

     0   :  { %s1057_s18 = smov 0   ;;  %s1293_s0 = inlined_call_operand.vmem [shape: f32[512,3], index: 0, kind: input, shape index: {}]   ;;  %s1294_s1 = inlined_call_operand.vmem [shape: bf16[3,8], index: 1, kind: input, shape index: {}]   ;;  %s1295_s2 = inlined_call_operand.vmem [shape: f32[1,8], index: 2, kind: input, shape index: {}]   ;;  %s1296_s3 = inlined_call_operand.vmem [shape: bf16[8,32], index: 3, kind: input, shape index: {}]   ;;  %s1297_s4 = inlined_call_operand.vmem [shape: f32[1,32], index: 4, kind: input, shape index: {}]   ;;  %s1298_s5 = inlined_call_operand.vmem [shape: f32[512,32], index: 5, kind: output, shape index: {}]  }
   0x1 LB: > { %s861_s19 = sadd.s32 4294967295, %s1024_s18   ;;  %p865_p0 = scmp.ge.s32.totalorder %s1024_s18, 1  ;;  %s1024_s18 = sphi %s1057_s18, %s15_s18  }
   0x2   : > { %p188_p1 = scmp.lt.s32.totalorder %s1024_s18, 3 }
   0x4   : > { %p189_p2 = pnand %p865_p0, %p188_p1 }
   0x5   : > { %s866_s22 = sshll.u32 (!%p189_p2), %s861_s19, 5 }
   0x6   : > { %192 = sbr.rel (%p189_p2) target bundleno = 484 (0x1e4), region = 40  ;;  %p217_p3 = scmp.lt.s32.totalorder (!%p189_p2), %s866_s22, 63 }
   0xb   : > { %v277_v0 = vld [vmem:[%s1294_s1] sm:$0x3]  ;;  %vm334_vm0 = vcmask 1040384   ;;  %vm335_vm1 = vcmask 1041408   ;;  %v1026_v1 = vmov 65535   ;;  %s1300_s22 = smov (!%p217_p3, %s866_s22), 63 }
   0xc   : > { %v336_v2 = vsel %vm334_vm0, 4294967295, %v1026_v1  ;;  %s867_s23 = sshll.u32 %s1300_s22, 3  ;;  %vm285_vm2 = vcmask 23552   ;;  %v550_v53 = vld [vmem:[%s1296_s3] sm:$0xf]  ;;  %vm607_vm3 = vcmask 1043456  }
   0xd   : > { %v337_v3 = vsel %vm335_vm1, %v336_v2, 0  ;;  %s1076_s26 = scalar_lea.vmem %s1293_s0, %s867_s23  ;;  %1008 = vmatprep.subr.msk.bf16.mxu1 %vm607_vm3, %v550_v53  ;;  %v609_v54 = vsel %vm607_vm3, %v550_v53, 0  ;;  %v1132_v57 = vld [vmem:[%s1295_s2] ss:$0 sm:$0xff]  ;;  %vm558_vm4 = vcmask 64512   ;;  %s1192_s10 = scalar_lea.vmem %s1298_s5, %s867_s23  ;;  %vm772_vm5 = vcmask 261120  }
   0xe   : > { %v339_v4 = vand.u32 %v337_v3, %v277_v0  ;;  %v229_v5 = vld [vmem:[%s1076_s26] sm:$0xff]  ;;  %v230_v6 = vld [vmem:[%s1076_s26 + $0x8] sm:$0xff]  ;;  %v231_v7 = vld [vmem:[%s1076_s26 + $0x10] sm:$0xff]  ;;  %975 = vmatpush3.bf16.msra.mxu1 %v609_v54 }
   0xf   : > { %v261_v8 = vpack.c.bf16 %v230_v6, %v229_v5  ;;  %v232_v9 = vld [vmem:[%s1076_s26 + $0x18] sm:$0xff]  ;;  %v233_v10 = vld [vmem:[%s1076_s26 + $0x20] sm:$0xff]  ;;  %v234_v11 = vld [vmem:[%s1076_s26 + $0x28] sm:$0xff] }
  0x10   : > { %940 = vmatprep.subr.bf16.mxu0 %v339_v4  ;;  %v262_v12 = vpack.c.bf16 %v232_v9, %v231_v7  ;;  %v263_v13 = vpack.c.bf16 %v234_v11, %v233_v10  ;;  %v235_v14 = vld [vmem:[%s1076_s26 + $0x30] sm:$0xff]  ;;  %v236_v15 = vld [vmem:[%s1076_s26 + $0x38] sm:$0xff]  ;;  %v237_v16 = vld [vmem:[%s1076_s26 + $0x40] sm:$0xff] }
  0x11   : > { %941 = vmatpush3.bf16.msra.mxu0 %v339_v4  ;;  %942 = vmatprep.mubr.msk.bf16.mxu0 %vm285_vm2, %v261_v8  ;;  %v238_v17 = vld [vmem:[%s1076_s26 + $0x48] sm:$0xff]  ;;  %v264_v18 = vpack.c.bf16 %v236_v15, %v235_v14  ;;  %v239_v20 = vld [vmem:[%s1076_s26 + $0x50] sm:$0xff]  ;;  %v240_v21 = vld [vmem:[%s1076_s26 + $0x58] sm:$0xff] }
  0x12   : > { %v265_v19 = vpack.c.bf16 %v238_v17, %v237_v16  ;;  %v241_v22 = vld [vmem:[%s1076_s26 + $0x60] sm:$0xff]  ;;  %v242_v23 = vld [vmem:[%s1076_s26 + $0x68] sm:$0xff]  ;;  %v266_v24 = vpack.c.bf16 %v240_v21, %v239_v20  ;;  %v243_v26 = vld [vmem:[%s1076_s26 + $0x70] sm:$0xff] }
  0x13   : > { %v267_v25 = vpack.c.bf16 %v242_v23, %v241_v22  ;;  %v244_v27 = vld [vmem:[%s1076_s26 + $0x78] sm:$0xff]  ;;  %v245_v28 = vld [vmem:[%s1076_s26 + $0x80] sm:$0xff]  ;;  %v246_v29 = vld [vmem:[%s1076_s26 + $0x88] sm:$0xff] }
  0x14   : > { %943 = vmatmul.mubr.msk.bf16.vlgmr.msra.gmra.mxu0 %vm285_vm2, %v262_v12  ;;  %v268_v30 = vpack.c.bf16 %v244_v27, %v243_v26  ;;  %v269_v31 = vpack.c.bf16 %v246_v29, %v245_v28  ;;  %v247_v32 = vld [vmem:[%s1076_s26 + $0x90] sm:$0xff]  ;;  %v248_v33 = vld [vmem:[%s1076_s26 + $0x98] sm:$0xff]  ;;  %v249_v34 = vld [vmem:[%s1076_s26 + $0xa0] sm:$0xff] }
  0x15   : > { %946 = vmatprep.mubr.msk.bf16.mxu0 %vm285_vm2, %v263_v13  ;;  %v250_v35 = vld [vmem:[%s1076_s26 + $0xa8] sm:$0xff]  ;;  %v270_v36 = vpack.c.bf16 %v248_v33, %v247_v32  ;;  %v251_v38 = vld [vmem:[%s1076_s26 + $0xb0] sm:$0xff]  ;;  %v252_v39 = vld [vmem:[%s1076_s26 + $0xb8] sm:$0xff] }
  0x16   : > { %v271_v37 = vpack.c.bf16 %v250_v35, %v249_v34  ;;  %v253_v40 = vld [vmem:[%s1076_s26 + $0xc0] sm:$0xff]  ;;  %v254_v41 = vld [vmem:[%s1076_s26 + $0xc8] sm:$0xff]  ;;  %v272_v42 = vpack.c.bf16 %v252_v39, %v251_v38  ;;  %v255_v44 = vld [vmem:[%s1076_s26 + $0xd0] sm:$0xff] }
  0x17   : > { %v273_v43 = vpack.c.bf16 %v254_v41, %v253_v40  ;;  %v256_v45 = vld [vmem:[%s1076_s26 + $0xd8] sm:$0xff]  ;;  %v257_v46 = vld [vmem:[%s1076_s26 + $0xe0] sm:$0xff]  ;;  %v258_v47 = vld [vmem:[%s1076_s26 + $0xe8] sm:$0xff] }
  0x18   : > { %v274_v48 = vpack.c.bf16 %v256_v45, %v255_v44  ;;  %v275_v49 = vpack.c.bf16 %v258_v47, %v257_v46  ;;  %v259_v50 = vld [vmem:[%s1076_s26 + $0xf0] sm:$0xff]  ;;  %v260_v51 = vld [vmem:[%s1076_s26 + $0xf8] sm:$0xff] }
  0x19   : > { %v276_v52 = vpack.c.bf16 %v260_v51, %v259_v50 }
  0x1c   : > { %947 = vmatmul.mubr.msk.bf16.gmra.mxu0 %vm285_vm2, %v264_v18 }
  0x1d   : > { %950 = vmatprep.mubr.msk.bf16.mxu0 %vm285_vm2, %v265_v19 }
  0x24   : > { %951 = vmatmul.mubr.msk.bf16.gmra.mxu0 %vm285_vm2, %v266_v24 }
  0x25   : > { %954 = vmatprep.mubr.msk.bf16.mxu0 %vm285_vm2, %v267_v25 }
  0x2c   : > { %955 = vmatmul.mubr.msk.bf16.gmra.mxu0 %vm285_vm2, %v268_v30 }
  0x2d   : > { %958 = vmatprep.mubr.msk.bf16.mxu0 %vm285_vm2, %v269_v31 }
  0x34   : > { %959 = vmatmul.mubr.msk.bf16.gmra.mxu0 %vm285_vm2, %v270_v36 }
  0x35   : > { %962 = vmatprep.mubr.msk.bf16.mxu0 %vm285_vm2, %v271_v37 }
  0x3c   : > { %963 = vmatmul.mubr.msk.bf16.gmra.mxu0 %vm285_vm2, %v272_v42 }
  0x3d   : > { %966 = vmatprep.mubr.msk.bf16.mxu0 %vm285_vm2, %v273_v43 }
  0x44   : > { %967 = vmatmul.mubr.msk.bf16.gmra.mxu0 %vm285_vm2, %v274_v48 }
  0x45   : > { %970 = vmatprep.mubr.msk.bf16.mxu0 %vm285_vm2, %v275_v49 }
  0x4c   : > { %971 = vmatmul.mubr.msk.bf16.gmra.mxu0 %vm285_vm2, %v276_v52 }
  0xd4   : > { %v944_v55 = vpop.f32.mrf.mxu0 }
  0xd5   : > { %v384_v61 = vadd.f32 %v944_v55, %v1132_v57 }
  0xd6   : > { %v375_v56 = vpop.f32.mrf.mxu0 }
  0xd7   : > { %v376_v59 = vadd.f32 %v1132_v57, %v375_v56  ;;  %v504_v4 = vmax.f32 %v384_v61, 0.0 }
  0xd8   : > { %v945_v58 = vpop.f32.mrf.mxu0 }
  0xd9   : > { %v387_v60 = vadd.f32 %v945_v58, %v1132_v57  ;;  %v502_v2 = vmax.f32 %v376_v59, 0.0 }
  0xda   : > { %v378_v62 = vpop.f32.mrf.mxu0 }
  0xdb   : > { %v379_v63 = vadd.f32 %v1132_v57, %v378_v62  ;;  %v505_v0 = vmax.f32 %v387_v60, 0.0 }
  0xdc   : > { %v948_v1 = vpop.f32.mrf.mxu0 }
  0xdd   : > { %v503_v3 = vmax.f32 %v379_v63, 0.0  ;;  %v535_v7 = vpack.c.bf16 %v505_v0, %v504_v4  ;;  %v400_v11 = vadd.f32 %v948_v1, %v1132_v57 }
  0xde   : > { %v391_v5 = vpop.f32.mrf.mxu0 }
  0xdf   : > { %v534_v6 = vpack.c.bf16 %v503_v3, %v502_v2  ;;  %v392_v9 = vadd.f32 %v1132_v57, %v391_v5  ;;  %v508_v18 = vmax.f32 %v400_v11, 0.0 }
  0xe0   : > { %v949_v8 = vpop.f32.mrf.mxu0 }
  0xe1   : > { %v403_v10 = vadd.f32 %v949_v8, %v1132_v57  ;;  %976 = vmatprep.mubr.msk.bf16.mxu1 %vm558_vm4, %v534_v6  ;;  %v506_v16 = vmax.f32 %v392_v9, 0.0 }
  0xe2   : > { %v394_v12 = vpop.f32.mrf.mxu0  ;;  %977 = vmatmul.mubr.msk.bf16.vlgmr.msra.gmra.mxu1 %vm558_vm4, %v535_v7 }
  0xe3   : > { %v395_v13 = vadd.f32 %v1132_v57, %v394_v12  ;;  %v509_v14 = vmax.f32 %v403_v10, 0.0 }
  0xe4   : > { %v952_v15 = vpop.f32.mrf.mxu0 }
  0xe5   : > { %v507_v17 = vmax.f32 %v395_v13, 0.0  ;;  %v537_v21 = vpack.c.bf16 %v509_v14, %v508_v18  ;;  %v416_v25 = vadd.f32 %v952_v15, %v1132_v57 }
  0xe6   : > { %v407_v19 = vpop.f32.mrf.mxu0 }
  0xe7   : > { %v536_v20 = vpack.c.bf16 %v507_v17, %v506_v16  ;;  %v408_v23 = vadd.f32 %v1132_v57, %v407_v19  ;;  %v512_v32 = vmax.f32 %v416_v25, 0.0 }
  0xe8   : > { %v953_v22 = vpop.f32.mrf.mxu0 }
  0xe9   : > { %v419_v24 = vadd.f32 %v953_v22, %v1132_v57  ;;  %980 = vmatprep.mubr.msk.bf16.mxu1 %vm558_vm4, %v536_v20  ;;  %v510_v30 = vmax.f32 %v408_v23, 0.0 }
  0xea   : > { %v410_v26 = vpop.f32.mrf.mxu0  ;;  %981 = vmatmul.mubr.msk.bf16.gmra.mxu1 %vm558_vm4, %v537_v21 }
  0xeb   : > { %v411_v27 = vadd.f32 %v1132_v57, %v410_v26  ;;  %v513_v28 = vmax.f32 %v419_v24, 0.0 }
  0xec   : > { %v956_v29 = vpop.f32.mrf.mxu0 }
  0xed   : > { %v511_v31 = vmax.f32 %v411_v27, 0.0  ;;  %v539_v35 = vpack.c.bf16 %v513_v28, %v512_v32  ;;  %v432_v39 = vadd.f32 %v956_v29, %v1132_v57 }
  0xee   : > { %v423_v33 = vpop.f32.mrf.mxu0 }
  0xef   : > { %v538_v34 = vpack.c.bf16 %v511_v31, %v510_v30  ;;  %v424_v37 = vadd.f32 %v1132_v57, %v423_v33  ;;  %v516_v46 = vmax.f32 %v432_v39, 0.0 }
  0xf0   : > { %v957_v36 = vpop.f32.mrf.mxu0 }
  0xf1   : > { %v435_v38 = vadd.f32 %v957_v36, %v1132_v57  ;;  %984 = vmatprep.mubr.msk.bf16.mxu1 %vm558_vm4, %v538_v34  ;;  %v514_v44 = vmax.f32 %v424_v37, 0.0 }
  0xf2   : > { %v426_v40 = vpop.f32.mrf.mxu0  ;;  %985 = vmatmul.mubr.msk.bf16.gmra.mxu1 %vm558_vm4, %v539_v35 }
  0xf3   : > { %v427_v41 = vadd.f32 %v1132_v57, %v426_v40  ;;  %v517_v42 = vmax.f32 %v435_v38, 0.0 }
  0xf4   : > { %v960_v43 = vpop.f32.mrf.mxu0 }
  0xf5   : > { %v515_v45 = vmax.f32 %v427_v41, 0.0  ;;  %v541_v49 = vpack.c.bf16 %v517_v42, %v516_v46  ;;  %v448_v53 = vadd.f32 %v960_v43, %v1132_v57  ;;  %v1185_v41 = vld [vmem:[%s1297_s4] ss:$0 sm:$0xff] }
  0xf6   : > { %v439_v47 = vpop.f32.mrf.mxu0 }
  0xf7   : > { %v540_v48 = vpack.c.bf16 %v515_v45, %v514_v44  ;;  %v440_v51 = vadd.f32 %v1132_v57, %v439_v47  ;;  %v520_v61 = vmax.f32 %v448_v53, 0.0 }
  0xf8   : > { %v961_v50 = vpop.f32.mrf.mxu0 }
  0xf9   : > { %v451_v52 = vadd.f32 %v961_v50, %v1132_v57  ;;  %988 = vmatprep.mubr.msk.bf16.mxu1 %vm558_vm4, %v540_v48  ;;  %v518_v59 = vmax.f32 %v440_v51, 0.0 }
  0xfa   : > { %v442_v54 = vpop.f32.mrf.mxu0  ;;  %989 = vmatmul.mubr.msk.bf16.gmra.mxu1 %vm558_vm4, %v541_v49 }
  0xfb   : > { %v443_v55 = vadd.f32 %v1132_v57, %v442_v54  ;;  %v521_v56 = vmax.f32 %v451_v52, 0.0 }
  0xfc   : > { %v964_v58 = vpop.f32.mrf.mxu0 }
  0xfd   : > { %v519_v60 = vmax.f32 %v443_v55, 0.0  ;;  %v543_v0 = vpack.c.bf16 %v521_v56, %v520_v61  ;;  %v464_v4 = vadd.f32 %v964_v58, %v1132_v57 }
  0xfe   : > { %v455_v62 = vpop.f32.mrf.mxu0 }
  0xff   : > { %v542_v63 = vpack.c.bf16 %v519_v60, %v518_v59  ;;  %v456_v2 = vadd.f32 %v1132_v57, %v455_v62  ;;  %v524_v11 = vmax.f32 %v464_v4, 0.0 }
 0x100   : > { %v965_v1 = vpop.f32.mrf.mxu0 }
 0x101   : > { %v467_v3 = vadd.f32 %v965_v1, %v1132_v57  ;;  %992 = vmatprep.mubr.msk.bf16.mxu1 %vm558_vm4, %v542_v63  ;;  %v522_v9 = vmax.f32 %v456_v2, 0.0 }
 0x102   : > { %v458_v5 = vpop.f32.mrf.mxu0  ;;  %993 = vmatmul.mubr.msk.bf16.gmra.mxu1 %vm558_vm4, %v543_v0 }
 0x103   : > { %v459_v6 = vadd.f32 %v1132_v57, %v458_v5  ;;  %v525_v7 = vmax.f32 %v467_v3, 0.0 }
 0x104   : > { %v968_v8 = vpop.f32.mrf.mxu0 }
 0x105   : > { %v523_v10 = vmax.f32 %v459_v6, 0.0  ;;  %v545_v14 = vpack.c.bf16 %v525_v7, %v524_v11  ;;  %v480_v18 = vadd.f32 %v968_v8, %v1132_v57 }
 0x106   : > { %v471_v12 = vpop.f32.mrf.mxu0 }
 0x107   : > { %v544_v13 = vpack.c.bf16 %v523_v10, %v522_v9  ;;  %v472_v16 = vadd.f32 %v1132_v57, %v471_v12  ;;  %v528_v25 = vmax.f32 %v480_v18, 0.0 }
 0x108   : > { %v969_v15 = vpop.f32.mrf.mxu0 }
 0x109   : > { %v483_v17 = vadd.f32 %v969_v15, %v1132_v57  ;;  %996 = vmatprep.mubr.msk.bf16.mxu1 %vm558_vm4, %v544_v13  ;;  %v526_v23 = vmax.f32 %v472_v16, 0.0 }
 0x10a   : > { %v474_v19 = vpop.f32.mrf.mxu0  ;;  %997 = vmatmul.mubr.msk.bf16.gmra.mxu1 %vm558_vm4, %v545_v14 }
 0x10b   : > { %v475_v20 = vadd.f32 %v1132_v57, %v474_v19  ;;  %v529_v21 = vmax.f32 %v483_v17, 0.0 }
 0x10c   : > { %v972_v22 = vpop.f32.mrf.mxu0 }
 0x10d   : > { %v527_v24 = vmax.f32 %v475_v20, 0.0  ;;  %v547_v28 = vpack.c.bf16 %v529_v21, %v528_v25  ;;  %v496_v32 = vadd.f32 %v972_v22, %v1132_v57 }
 0x10e   : > { %v487_v26 = vpop.f32.mrf.mxu0 }
 0x10f   : > { %v546_v27 = vpack.c.bf16 %v527_v24, %v526_v23  ;;  %v488_v30 = vadd.f32 %v1132_v57, %v487_v26  ;;  %v532_v38 = vmax.f32 %v496_v32, 0.0 }
 0x110   : > { %v973_v29 = vpop.f32.mrf.mxu0 }
 0x111   : > { %v499_v31 = vadd.f32 %v973_v29, %v1132_v57  ;;  %1000 = vmatprep.mubr.msk.bf16.mxu1 %vm558_vm4, %v546_v27  ;;  %v530_v36 = vmax.f32 %v488_v30, 0.0 }
 0x112   : > { %v490_v33 = vpop.f32.mrf.mxu0  ;;  %1001 = vmatmul.mubr.msk.bf16.gmra.mxu1 %vm558_vm4, %v547_v28 }
 0x113   : > { %v491_v34 = vadd.f32 %v1132_v57, %v490_v33  ;;  %v533_v35 = vmax.f32 %v499_v31, 0.0 }
 0x115   : > { %v531_v37 = vmax.f32 %v491_v34, 0.0  ;;  %v549_v40 = vpack.c.bf16 %v533_v35, %v532_v38 }
 0x117   : > { %v548_v39 = vpack.c.bf16 %v531_v37, %v530_v36 }
 0x119   : > { %1004 = vmatprep.mubr.msk.bf16.mxu1 %vm558_vm4, %v548_v39 }
 0x11a   : > { %1005 = vmatmul.mubr.msk.bf16.gmra.mxu1 %vm558_vm4, %v549_v40 }
 0x1a2   : > { %v978_v57 = vpop.f32.mrf.mxu1 }
 0x1a3   : > { %v654_v42 = vadd.f32 %v978_v57, %v1185_v41 }
 0x1a4   : > { %v645_v43 = vpop.f32.mrf.mxu1 }
 0x1a5   : > { %775 = vst.msk [vmem:[%s1192_s10 + $0x10] sm:$0xff] %vm772_vm5, %v654_v42  ;;  %v646_v44 = vadd.f32 %v1185_v41, %v645_v43 }
 0x1a6   : > { %v979_v45 = vpop.f32.mrf.mxu1 }
 0x1a7   : > { %773 = vst.msk [vmem:[%s1192_s10] sm:$0xff] %vm772_vm5, %v646_v44  ;;  %v657_v46 = vadd.f32 %v979_v45, %v1185_v41 }
 0x1a8   : > { %v648_v47 = vpop.f32.mrf.mxu1 }
 0x1a9   : > { %776 = vst.msk [vmem:[%s1192_s10 + $0x18] sm:$0xff] %vm772_vm5, %v657_v46  ;;  %v649_v48 = vadd.f32 %v1185_v41, %v648_v47 }
 0x1aa   : > { %v982_v49 = vpop.f32.mrf.mxu1 }
 0x1ab   : > { %774 = vst.msk [vmem:[%s1192_s10 + $0x8] sm:$0xff] %vm772_vm5, %v649_v48  ;;  %v670_v50 = vadd.f32 %v982_v49, %v1185_v41 }
 0x1ac   : > { %v661_v51 = vpop.f32.mrf.mxu1 }
 0x1ad   : > { %779 = vst.msk [vmem:[%s1192_s10 + $0x30] sm:$0xff] %vm772_vm5, %v670_v50  ;;  %v662_v52 = vadd.f32 %v1185_v41, %v661_v51 }
 0x1ae   : > { %v983_v53 = vpop.f32.mrf.mxu1 }
 0x1af   : > { %777 = vst.msk [vmem:[%s1192_s10 + $0x20] sm:$0xff] %vm772_vm5, %v662_v52  ;;  %v673_v54 = vadd.f32 %v983_v53, %v1185_v41 }
 0x1b0   : > { %v664_v55 = vpop.f32.mrf.mxu1 }
 0x1b1   : > { %780 = vst.msk [vmem:[%s1192_s10 + $0x38] sm:$0xff] %vm772_vm5, %v673_v54  ;;  %v665_v56 = vadd.f32 %v1185_v41, %v664_v55 }
 0x1b2   : > { %v986_v58 = vpop.f32.mrf.mxu1 }
 0x1b3   : > { %778 = vst.msk [vmem:[%s1192_s10 + $0x28] sm:$0xff] %vm772_vm5, %v665_v56  ;;  %v686_v59 = vadd.f32 %v986_v58, %v1185_v41 }
 0x1b4   : > { %v677_v60 = vpop.f32.mrf.mxu1 }
 0x1b5   : > { %783 = vst.msk [vmem:[%s1192_s10 + $0x50] sm:$0xff] %vm772_vm5, %v686_v59  ;;  %v678_v61 = vadd.f32 %v1185_v41, %v677_v60 }
 0x1b6   : > { %v987_v62 = vpop.f32.mrf.mxu1 }
 0x1b7   : > { %781 = vst.msk [vmem:[%s1192_s10 + $0x40] sm:$0xff] %vm772_vm5, %v678_v61  ;;  %v689_v63 = vadd.f32 %v987_v62, %v1185_v41 }
 0x1b8   : > { %v680_v0 = vpop.f32.mrf.mxu1 }
 0x1b9   : > { %784 = vst.msk [vmem:[%s1192_s10 + $0x58] sm:$0xff] %vm772_vm5, %v689_v63  ;;  %v681_v1 = vadd.f32 %v1185_v41, %v680_v0 }
 0x1ba   : > { %v990_v2 = vpop.f32.mrf.mxu1 }
 0x1bb   : > { %782 = vst.msk [vmem:[%s1192_s10 + $0x48] sm:$0xff] %vm772_vm5, %v681_v1  ;;  %v702_v3 = vadd.f32 %v990_v2, %v1185_v41 }
 0x1bc   : > { %v693_v4 = vpop.f32.mrf.mxu1 }
 0x1bd   : > { %787 = vst.msk [vmem:[%s1192_s10 + $0x70] sm:$0xff] %vm772_vm5, %v702_v3  ;;  %v694_v5 = vadd.f32 %v1185_v41, %v693_v4 }
 0x1be   : > { %v991_v6 = vpop.f32.mrf.mxu1 }
 0x1bf   : > { %785 = vst.msk [vmem:[%s1192_s10 + $0x60] sm:$0xff] %vm772_vm5, %v694_v5  ;;  %v705_v7 = vadd.f32 %v991_v6, %v1185_v41 }
 0x1c0   : > { %v696_v8 = vpop.f32.mrf.mxu1 }
 0x1c1   : > { %788 = vst.msk [vmem:[%s1192_s10 + $0x78] sm:$0xff] %vm772_vm5, %v705_v7  ;;  %v697_v9 = vadd.f32 %v1185_v41, %v696_v8 }
 0x1c2   : > { %v994_v10 = vpop.f32.mrf.mxu1 }
 0x1c3   : > { %786 = vst.msk [vmem:[%s1192_s10 + $0x68] sm:$0xff] %vm772_vm5, %v697_v9  ;;  %v718_v11 = vadd.f32 %v994_v10, %v1185_v41 }
 0x1c4   : > { %v709_v12 = vpop.f32.mrf.mxu1 }
 0x1c5   : > { %791 = vst.msk [vmem:[%s1192_s10 + $0x90] sm:$0xff] %vm772_vm5, %v718_v11  ;;  %v710_v13 = vadd.f32 %v1185_v41, %v709_v12 }
 0x1c6   : > { %v995_v14 = vpop.f32.mrf.mxu1 }
 0x1c7   : > { %789 = vst.msk [vmem:[%s1192_s10 + $0x80] sm:$0xff] %vm772_vm5, %v710_v13  ;;  %v721_v15 = vadd.f32 %v995_v14, %v1185_v41 }
 0x1c8   : > { %v712_v16 = vpop.f32.mrf.mxu1 }
 0x1c9   : > { %792 = vst.msk [vmem:[%s1192_s10 + $0x98] sm:$0xff] %vm772_vm5, %v721_v15  ;;  %v713_v17 = vadd.f32 %v1185_v41, %v712_v16 }
 0x1ca   : > { %v998_v18 = vpop.f32.mrf.mxu1 }
 0x1cb   : > { %790 = vst.msk [vmem:[%s1192_s10 + $0x88] sm:$0xff] %vm772_vm5, %v713_v17  ;;  %v734_v19 = vadd.f32 %v998_v18, %v1185_v41 }
 0x1cc   : > { %v725_v20 = vpop.f32.mrf.mxu1 }
 0x1cd   : > { %795 = vst.msk [vmem:[%s1192_s10 + $0xb0] sm:$0xff] %vm772_vm5, %v734_v19  ;;  %v726_v21 = vadd.f32 %v1185_v41, %v725_v20 }
 0x1ce   : > { %v999_v22 = vpop.f32.mrf.mxu1 }
 0x1cf   : > { %793 = vst.msk [vmem:[%s1192_s10 + $0xa0] sm:$0xff] %vm772_vm5, %v726_v21  ;;  %v737_v23 = vadd.f32 %v999_v22, %v1185_v41 }
 0x1d0   : > { %v728_v24 = vpop.f32.mrf.mxu1 }
 0x1d1   : > { %796 = vst.msk [vmem:[%s1192_s10 + $0xb8] sm:$0xff] %vm772_vm5, %v737_v23  ;;  %v729_v25 = vadd.f32 %v1185_v41, %v728_v24 }
 0x1d2   : > { %v1002_v26 = vpop.f32.mrf.mxu1 }
 0x1d3   : > { %794 = vst.msk [vmem:[%s1192_s10 + $0xa8] sm:$0xff] %vm772_vm5, %v729_v25  ;;  %v750_v27 = vadd.f32 %v1002_v26, %v1185_v41 }
 0x1d4   : > { %v741_v28 = vpop.f32.mrf.mxu1 }
 0x1d5   : > { %799 = vst.msk [vmem:[%s1192_s10 + $0xd0] sm:$0xff] %vm772_vm5, %v750_v27  ;;  %v742_v29 = vadd.f32 %v1185_v41, %v741_v28 }
 0x1d6   : > { %v1003_v30 = vpop.f32.mrf.mxu1 }
 0x1d7   : > { %797 = vst.msk [vmem:[%s1192_s10 + $0xc0] sm:$0xff] %vm772_vm5, %v742_v29  ;;  %v753_v31 = vadd.f32 %v1003_v30, %v1185_v41 }
 0x1d8   : > { %v744_v32 = vpop.f32.mrf.mxu1 }
 0x1d9   : > { %800 = vst.msk [vmem:[%s1192_s10 + $0xd8] sm:$0xff] %vm772_vm5, %v753_v31  ;;  %v745_v33 = vadd.f32 %v1185_v41, %v744_v32 }
 0x1da   : > { %v1006_v34 = vpop.f32.mrf.mxu1 }
 0x1db   : > { %798 = vst.msk [vmem:[%s1192_s10 + $0xc8] sm:$0xff] %vm772_vm5, %v745_v33  ;;  %v766_v35 = vadd.f32 %v1006_v34, %v1185_v41 }
 0x1dc   : > { %v757_v36 = vpop.f32.mrf.mxu1 }
 0x1dd   : > { %803 = vst.msk [vmem:[%s1192_s10 + $0xf0] sm:$0xff] %vm772_vm5, %v766_v35  ;;  %v758_v37 = vadd.f32 %v1185_v41, %v757_v36 }
 0x1de   : > { %v1007_v38 = vpop.f32.mrf.mxu1 }
 0x1df   : > { %801 = vst.msk [vmem:[%s1192_s10 + $0xe0] sm:$0xff] %vm772_vm5, %v758_v37  ;;  %v769_v39 = vadd.f32 %v1007_v38, %v1185_v41 }
 0x1e0   : > { %v760_v40 = vpop.f32.mrf.mxu1 }
 0x1e1   : > { %804 = vst.msk [vmem:[%s1192_s10 + $0xf8] sm:$0xff] %vm772_vm5, %v769_v39  ;;  %v761_v57 = vadd.f32 %v1185_v41, %v760_v40 }
 0x1e3   : > { %802 = vst.msk [vmem:[%s1192_s10 + $0xe8] sm:$0xff] %vm772_vm5, %v761_v57 }
 0x1e4 PF: > { %s15_s18 = sadd.s32 1, %s1024_s18  }
 0x1e5   : > { %p12_p4 = scmp.ge.s32.totalorder %s15_s18, 4  }
 0x1e7   :  { %14 = sbr.rel (!%p12_p4) target bundleno = 1 (0x1), region = 70 }

// kernel: detr_forward.12
= control target key start
LH: loop header
LB: loop body
LE: loop exit
PB: predicated region body
PF: predicated region fallthrough
CT: control target
= control target key end

     0   :  { %s1801_s24 = smov 0   ;;  %s2603_s0 = inlined_call_operand.vmem [shape: f32[512,32], index: 0, kind: input, shape index: {}]   ;;  %s2604_s1 = inlined_call_operand.vmem [shape: bf16[32,64], index: 1, kind: input, shape index: {}]   ;;  %s2605_s2 = inlined_call_operand.vmem [shape: f32[1,64], index: 2, kind: input, shape index: {}]   ;;  %s2606_s3 = inlined_call_operand.vmem [shape: bf16[64,32], index: 3, kind: input, shape index: {}]   ;;  %s2607_s4 = inlined_call_operand.vmem [shape: f32[1,32], index: 4, kind: input, shape index: {}]   ;;  %s2608_s5 = inlined_call_operand.vmem [shape: f32[1,32], index: 5, kind: input, shape index: {}]   ;;  %s2609_s6 = inlined_call_operand.vmem [shape: f32[1,32], index: 6, kind: input, shape index: {}]   ;;  %s2610_s7 = inlined_call_operand.vmem [shape: f32[512,32], index: 7, kind: output, shape index: {}]  }
   0x1 LB: > { %s1508_s25 = sadd.s32 4294967295, %s1759_s24   ;;  %p1512_p0 = scmp.ge.s32.totalorder %s1759_s24, 1  ;;  %s1759_s24 = sphi %s1801_s24, %s17_s24  }
   0x2   : > { %p238_p1 = scmp.lt.s32.totalorder %s1759_s24, 3 }
   0x4   : > { %p239_p2 = pnand %p1512_p0, %p238_p1 }
   0x5   : > { %s1513_s28 = sshll.u32 (!%p239_p2), %s1508_s25, 5 }
   0x6   : > { %242 = sbr.rel (%p239_p2) target bundleno = 799 (0x31f), region = 48  ;;  %p271_p3 = scmp.lt.s32.totalorder (!%p239_p2), %s1513_s28, 63 }
   0xb   : > { %v1683_v0 = vld [vmem:[%s2604_s1 + $0x8] sm:$0xff]   ;;  %v1684_v1 = vld [vmem:[%s2604_s1] sm:$0xff]   ;;  %v1685_v2 = vld [vmem:[%s2606_s3 + $0x18] sm:$0xff]   ;;  %s2612_s28 = smov (!%p271_p3, %s1513_s28), 63  ;;  %vm354_vm0 = vcmask 261120   ;;  %vm644_vm1 = vcmask 523264  }
   0xc   : > { %1599 = vmatprep.subr.bf16.mxu0 %v1683_v0  ;;  %1635 = vmatprep.subr.bf16.mxu1 %v1685_v2  ;;  %s1514_s10 = sshll.u32 %s2612_s28, 3  ;;  %v1686_v51 = vld [vmem:[%s2606_s3 + $0x10] sm:$0xff]   ;;  %v1687_v52 = vld [vmem:[%s2606_s3 + $0x8] sm:$0xff]   ;;  %v1688_v53 = vld [vmem:[%s2606_s3] sm:$0xff]  }
   0xd   : > { %1600 = vmatpush3.bf16.msra.mxu0 %v1683_v0  ;;  %1636 = vmatpush3.bf16.msra.mxu1 %v1685_v2  ;;  %s1826_s13 = scalar_lea.vmem %s2603_s0, %s1514_s10  ;;  %v1984_v56 = vld [vmem:[%s2605_s2] ss:$0 sm:$0xff]  ;;  %s2440_s9 = scalar_lea.vmem %s2610_s7, %s1514_s10 }
   0xe   : > { %1601 = vmatprep.subr.bf16.mxu0 %v1684_v1  ;;  %v1829_v3 = vld [vmem:[%s1826_s13] sm:$0xff]  ;;  %v1832_v4 = vld [vmem:[%s1826_s13 + $0x8] sm:$0xff]  ;;  %v1835_v5 = vld [vmem:[%s1826_s13 + $0x10] sm:$0xff]  ;;  %1637 = vmatprep.subr.bf16.mxu1 %v1686_v51 }
   0xf   : > { %v315_v6 = vpack.c.bf16 %v1832_v4, %v1829_v3  ;;  %v1840_v7 = vld [vmem:[%s1826_s13 + $0x18] sm:$0xff]  ;;  %v1843_v8 = vld [vmem:[%s1826_s13 + $0x20] sm:$0xff]  ;;  %v1846_v9 = vld [vmem:[%s1826_s13 + $0x28] sm:$0xff] }
  0x10   : > { %v316_v10 = vpack.c.bf16 %v1840_v7, %v1835_v5  ;;  %v317_v11 = vpack.c.bf16 %v1846_v9, %v1843_v8  ;;  %v1856_v12 = vld [vmem:[%s1826_s13 + $0x30] sm:$0xff]  ;;  %v1859_v13 = vld [vmem:[%s1826_s13 + $0x38] sm:$0xff]  ;;  %v1862_v14 = vld [vmem:[%s1826_s13 + $0x40] sm:$0xff] }
  0x11   : > { %1602 = vmatpush3.bf16.msra.mxu0 %v1684_v1  ;;  %1603 = vmatprep.mubr.msk.bf16.mxu0 %vm354_vm0, %v315_v6  ;;  %v1865_v15 = vld [vmem:[%s1826_s13 + $0x48] sm:$0xff]  ;;  %v318_v16 = vpack.c.bf16 %v1859_v13, %v1856_v12  ;;  %v1874_v18 = vld [vmem:[%s1826_s13 + $0x50] sm:$0xff]  ;;  %v1877_v19 = vld [vmem:[%s1826_s13 + $0x58] sm:$0xff] }
  0x12   : > { %v319_v17 = vpack.c.bf16 %v1865_v15, %v1862_v14  ;;  %v1880_v20 = vld [vmem:[%s1826_s13 + $0x60] sm:$0xff]  ;;  %v1883_v21 = vld [vmem:[%s1826_s13 + $0x68] sm:$0xff]  ;;  %v320_v22 = vpack.c.bf16 %v1877_v19, %v1874_v18  ;;  %v1892_v24 = vld [vmem:[%s1826_s13 + $0x70] sm:$0xff]  ;;  %1638 = vmatpush3.bf16.msra.mxu1 %v1686_v51 }
  0x13   : > { %v321_v23 = vpack.c.bf16 %v1883_v21, %v1880_v20  ;;  %v1895_v25 = vld [vmem:[%s1826_s13 + $0x78] sm:$0xff]  ;;  %v1898_v26 = vld [vmem:[%s1826_s13 + $0x80] sm:$0xff]  ;;  %v1901_v27 = vld [vmem:[%s1826_s13 + $0x88] sm:$0xff]  ;;  %1639 = vmatprep.subr.bf16.mxu1 %v1687_v52 }
  0x14   : > { %1604 = vmatmul.mubr.msk.bf16.vlgmr.msra.gmra.mxu0 %vm354_vm0, %v316_v10  ;;  %v322_v28 = vpack.c.bf16 %v1895_v25, %v1892_v24  ;;  %v323_v29 = vpack.c.bf16 %v1901_v27, %v1898_v26  ;;  %v1910_v30 = vld [vmem:[%s1826_s13 + $0x90] sm:$0xff]  ;;  %v1913_v31 = vld [vmem:[%s1826_s13 + $0x98] sm:$0xff]  ;;  %v1916_v32 = vld [vmem:[%s1826_s13 + $0xa0] sm:$0xff] }
  0x15   : > { %1607 = vmatprep.mubr.msk.bf16.mxu0 %vm354_vm0, %v317_v11  ;;  %v1919_v33 = vld [vmem:[%s1826_s13 + $0xa8] sm:$0xff]  ;;  %v324_v34 = vpack.c.bf16 %v1913_v31, %v1910_v30  ;;  %v1928_v36 = vld [vmem:[%s1826_s13 + $0xb0] sm:$0xff]  ;;  %v1931_v37 = vld [vmem:[%s1826_s13 + $0xb8] sm:$0xff] }
  0x16   : > { %v325_v35 = vpack.c.bf16 %v1919_v33, %v1916_v32  ;;  %v1934_v38 = vld [vmem:[%s1826_s13 + $0xc0] sm:$0xff]  ;;  %v1937_v39 = vld [vmem:[%s1826_s13 + $0xc8] sm:$0xff]  ;;  %v326_v40 = vpack.c.bf16 %v1931_v37, %v1928_v36  ;;  %v1946_v42 = vld [vmem:[%s1826_s13 + $0xd0] sm:$0xff]  ;;  %1640 = vmatpush3.bf16.msra.mxu1 %v1687_v52 }
  0x17   : > { %v327_v41 = vpack.c.bf16 %v1937_v39, %v1934_v38  ;;  %v1949_v43 = vld [vmem:[%s1826_s13 + $0xd8] sm:$0xff]  ;;  %v1952_v44 = vld [vmem:[%s1826_s13 + $0xe0] sm:$0xff]  ;;  %v1955_v45 = vld [vmem:[%s1826_s13 + $0xe8] sm:$0xff]  ;;  %1641 = vmatprep.subr.bf16.mxu1 %v1688_v53 }
  0x18   : > { %v328_v46 = vpack.c.bf16 %v1949_v43, %v1946_v42  ;;  %v329_v47 = vpack.c.bf16 %v1955_v45, %v1952_v44  ;;  %v1964_v48 = vld [vmem:[%s1826_s13 + $0xf0] sm:$0xff]  ;;  %v1967_v49 = vld [vmem:[%s1826_s13 + $0xf8] sm:$0xff] }
  0x19   : > { %v330_v50 = vpack.c.bf16 %v1967_v49, %v1964_v48 }
  0x1a   : > { %1642 = vmatpush3.bf16.msra.mxu1 %v1688_v53 }
  0x1c   : > { %1608 = vmatmul.mubr.msk.bf16.gmra.mxu0 %vm354_vm0, %v318_v16 }
  0x1d   : > { %1611 = vmatprep.mubr.msk.bf16.mxu0 %vm354_vm0, %v319_v17 }
  0x24   : > { %1612 = vmatmul.mubr.msk.bf16.gmra.mxu0 %vm354_vm0, %v320_v22 }
  0x25   : > { %1615 = vmatprep.mubr.msk.bf16.mxu0 %vm354_vm0, %v321_v23 }
  0x2c   : > { %1616 = vmatmul.mubr.msk.bf16.gmra.mxu0 %vm354_vm0, %v322_v28 }
  0x2d   : > { %1619 = vmatprep.mubr.msk.bf16.mxu0 %vm354_vm0, %v323_v29 }
  0x34   : > { %1620 = vmatmul.mubr.msk.bf16.gmra.mxu0 %vm354_vm0, %v324_v34 }
  0x35   : > { %1623 = vmatprep.mubr.msk.bf16.mxu0 %vm354_vm0, %v325_v35 }
  0x3c   : > { %1624 = vmatmul.mubr.msk.bf16.gmra.mxu0 %vm354_vm0, %v326_v40 }
  0x3d   : > { %1627 = vmatprep.mubr.msk.bf16.mxu0 %vm354_vm0, %v327_v41 }
  0x44   : > { %1628 = vmatmul.mubr.msk.bf16.gmra.mxu0 %vm354_vm0, %v328_v46 }
  0x45   : > { %1631 = vmatprep.mubr.msk.bf16.mxu0 %vm354_vm0, %v329_v47 }
  0x4c   : > { %1632 = vmatmul.mubr.msk.bf16.gmra.mxu0 %vm354_vm0, %v330_v50 }
  0xd4   : > { %v1605_v54 = vpop.f32.mrf.mxu0 }
  0xd5   : > { %v446_v60 = vadd.f32 %v1605_v54, %v1984_v56 }
  0xd6   : > { %v437_v55 = vpop.f32.mrf.mxu0 }
  0xd7   : > { %v438_v58 = vadd.f32 %v1984_v56, %v437_v55  ;;  %v566_v6 = vmax.f32 %v446_v60, 0.0 }
  0xd8   : > { %v1606_v57 = vpop.f32.mrf.mxu0 }
  0xd9   : > { %v449_v59 = vadd.f32 %v1606_v57, %v1984_v56  ;;  %v564_v1 = vmax.f32 %v438_v58, 0.0 }
  0xda   : > { %v440_v61 = vpop.f32.mrf.mxu0 }
  0xdb   : > { %v441_v62 = vadd.f32 %v1984_v56, %v440_v61  ;;  %v567_v63 = vmax.f32 %v449_v59, 0.0 }
  0xdc   : > { %v1609_v0 = vpop.f32.mrf.mxu0 }
  0xdd   : > { %v565_v2 = vmax.f32 %v441_v62, 0.0  ;;  %v597_v16 = vpack.c.bf16 %v567_v63, %v566_v6  ;;  %v462_v28 = vadd.f32 %v1609_v0, %v1984_v56 }
  0xde   : > { %v453_v10 = vpop.f32.mrf.mxu0 }
  0xdf   : > { %v596_v11 = vpack.c.bf16 %v565_v2, %v564_v1  ;;  %v454_v22 = vadd.f32 %v1984_v56, %v453_v10  ;;  %v570_v47 = vmax.f32 %v462_v28, 0.0 }
  0xe0   : > { %v1610_v17 = vpop.f32.mrf.mxu0 }
  0xe1   : > { %v465_v23 = vadd.f32 %v1610_v17, %v1984_v56  ;;  %1643 = vmatprep.mubr.msk.bf16.mxu1 %vm644_vm1, %v596_v11  ;;  %v568_v41 = vmax.f32 %v454_v22, 0.0 }
  0xe2   : > { %v456_v29 = vpop.f32.mrf.mxu0  ;;  %1644 = vmatmul.mubr.msk.bf16.vlgmr.msra.gmra.mxu1 %vm644_vm1, %v597_v16 }
  0xe3   : > { %v457_v34 = vadd.f32 %v1984_v56, %v456_v29  ;;  %v571_v35 = vmax.f32 %v465_v23, 0.0 }
  0xe4   : > { %v1613_v40 = vpop.f32.mrf.mxu0 }
  0xe5   : > { %v569_v46 = vmax.f32 %v457_v34, 0.0  ;;  %v599_v52 = vpack.c.bf16 %v571_v35, %v570_v47  ;;  %v478_v57 = vadd.f32 %v1613_v40, %v1984_v56 }
  0xe6   : > { %v469_v50 = vpop.f32.mrf.mxu0 }
  0xe7   : > { %v598_v51 = vpack.c.bf16 %v569_v46, %v568_v41  ;;  %v470_v54 = vadd.f32 %v1984_v56, %v469_v50  ;;  %v574_v0 = vmax.f32 %v478_v57, 0.0 }
  0xe8   : > { %v1614_v53 = vpop.f32.mrf.mxu0 }
  0xe9   : > { %v481_v55 = vadd.f32 %v1614_v53, %v1984_v56  ;;  %1647 = vmatprep.mubr.msk.bf16.mxu1 %vm644_vm1, %v598_v51  ;;  %v572_v62 = vmax.f32 %v470_v54, 0.0 }
  0xea   : > { %v472_v58 = vpop.f32.mrf.mxu0  ;;  %1648 = vmatmul.mubr.msk.bf16.gmra.mxu1 %vm644_vm1, %v599_v52 }
  0xeb   : > { %v473_v59 = vadd.f32 %v1984_v56, %v472_v58  ;;  %v575_v60 = vmax.f32 %v481_v55, 0.0 }
  0xec   : > { %v1617_v61 = vpop.f32.mrf.mxu0 }
  0xed   : > { %v573_v63 = vmax.f32 %v473_v59, 0.0  ;;  %v601_v6 = vpack.c.bf16 %v575_v60, %v574_v0  ;;  %v494_v17 = vadd.f32 %v1617_v61, %v1984_v56 }
  0xee   : > { %v485_v1 = vpop.f32.mrf.mxu0 }
  0xef   : > { %v600_v2 = vpack.c.bf16 %v573_v63, %v572_v62  ;;  %v486_v11 = vadd.f32 %v1984_v56, %v485_v1  ;;  %v578_v40 = vmax.f32 %v494_v17, 0.0 }
  0xf0   : > { %v1618_v10 = vpop.f32.mrf.mxu0 }
  0xf1   : > { %v497_v16 = vadd.f32 %v1618_v10, %v1984_v56  ;;  %1651 = vmatprep.mubr.msk.bf16.mxu1 %vm644_vm1, %v600_v2  ;;  %v576_v34 = vmax.f32 %v486_v11, 0.0 }
  0xf2   : > { %v488_v22 = vpop.f32.mrf.mxu0  ;;  %1652 = vmatmul.mubr.msk.bf16.gmra.mxu1 %vm644_vm1, %v601_v6 }
  0xf3   : > { %v489_v23 = vadd.f32 %v1984_v56, %v488_v22  ;;  %v579_v28 = vmax.f32 %v497_v16, 0.0 }
  0xf4   : > { %v1621_v29 = vpop.f32.mrf.mxu0 }
  0xf5   : > { %v577_v35 = vmax.f32 %v489_v23, 0.0  ;;  %v603_v47 = vpack.c.bf16 %v579_v28, %v578_v40  ;;  %v510_v53 = vadd.f32 %v1621_v29, %v1984_v56 }
  0xf6   : > { %v501_v41 = vpop.f32.mrf.mxu0 }
  0xf7   : > { %v602_v46 = vpack.c.bf16 %v577_v35, %v576_v34  ;;  %v502_v51 = vadd.f32 %v1984_v56, %v501_v41  ;;  %v582_v61 = vmax.f32 %v510_v53, 0.0 }
  0xf8   : > { %v1622_v50 = vpop.f32.mrf.mxu0 }
  0xf9   : > { %v513_v52 = vadd.f32 %v1622_v50, %v1984_v56  ;;  %1655 = vmatprep.mubr.msk.bf16.mxu1 %vm644_vm1, %v602_v46  ;;  %v580_v59 = vmax.f32 %v502_v51, 0.0 }
  0xfa   : > { %v504_v54 = vpop.f32.mrf.mxu0  ;;  %1656 = vmatmul.mubr.msk.bf16.gmra.mxu1 %vm644_vm1, %v603_v47 }
  0xfb   : > { %v505_v55 = vadd.f32 %v1984_v56, %v504_v54  ;;  %v583_v57 = vmax.f32 %v513_v52, 0.0 }
  0xfc   : > { %v1625_v58 = vpop.f32.mrf.mxu0 }
  0xfd   : > { %v581_v60 = vmax.f32 %v505_v55, 0.0  ;;  %v605_v0 = vpack.c.bf16 %v583_v57, %v582_v61  ;;  %v526_v10 = vadd.f32 %v1625_v58, %v1984_v56 }
  0xfe   : > { %v517_v62 = vpop.f32.mrf.mxu0 }
  0xff   : > { %v604_v63 = vpack.c.bf16 %v581_v60, %v580_v59  ;;  %v518_v2 = vadd.f32 %v1984_v56, %v517_v62  ;;  %v586_v29 = vmax.f32 %v526_v10, 0.0 }
 0x100   : > { %v1626_v1 = vpop.f32.mrf.mxu0 }
 0x101   : > { %v529_v6 = vadd.f32 %v1626_v1, %v1984_v56  ;;  %1659 = vmatprep.mubr.msk.bf16.mxu1 %vm644_vm1, %v604_v63  ;;  %v584_v23 = vmax.f32 %v518_v2, 0.0 }
 0x102   : > { %v520_v11 = vpop.f32.mrf.mxu0  ;;  %1660 = vmatmul.mubr.msk.bf16.gmra.mxu1 %vm644_vm1, %v605_v0 }
 0x103   : > { %v521_v16 = vadd.f32 %v1984_v56, %v520_v11  ;;  %v587_v17 = vmax.f32 %v529_v6, 0.0 }
 0x104   : > { %v1629_v22 = vpop.f32.mrf.mxu0 }
 0x105   : > { %v585_v28 = vmax.f32 %v521_v16, 0.0  ;;  %v607_v40 = vpack.c.bf16 %v587_v17, %v586_v29  ;;  %v542_v50 = vadd.f32 %v1629_v22, %v1984_v56  ;;  %v2037_v29 = vld [vmem:[%s2607_s4] ss:$0 sm:$0xff] }
 0x106   : > { %v533_v34 = vpop.f32.mrf.mxu0 }
 0x107   : > { %v606_v35 = vpack.c.bf16 %v585_v28, %v584_v23  ;;  %v534_v46 = vadd.f32 %v1984_v56, %v533_v34  ;;  %v590_v58 = vmax.f32 %v542_v50, 0.0 }
 0x108   : > { %v1630_v41 = vpop.f32.mrf.mxu0 }
 0x109   : > { %v545_v47 = vadd.f32 %v1630_v41, %v1984_v56  ;;  %1663 = vmatprep.mubr.msk.bf16.mxu1 %vm644_vm1, %v606_v35  ;;  %v588_v55 = vmax.f32 %v534_v46, 0.0 }
 0x10a   : > { %v536_v51 = vpop.f32.mrf.mxu0  ;;  %1664 = vmatmul.mubr.msk.bf16.gmra.mxu1 %vm644_vm1, %v607_v40 }
 0x10b   : > { %v537_v52 = vadd.f32 %v1984_v56, %v536_v51  ;;  %v591_v53 = vmax.f32 %v545_v47, 0.0 }
 0x10c   : > { %v1633_v54 = vpop.f32.mrf.mxu0 }
 0x10d   : > { %v589_v57 = vmax.f32 %v537_v52, 0.0  ;;  %v609_v61 = vpack.c.bf16 %v591_v53, %v590_v58  ;;  %v558_v1 = vadd.f32 %v1633_v54, %v1984_v56 }
 0x10e   : > { %v549_v59 = vpop.f32.mrf.mxu0 }
 0x10f   : > { %v608_v60 = vpack.c.bf16 %v589_v57, %v588_v55  ;;  %v550_v63 = vadd.f32 %v1984_v56, %v549_v59  ;;  %v594_v17 = vmax.f32 %v558_v1, 0.0 }
 0x110   : > { %v1634_v62 = vpop.f32.mrf.mxu0 }
 0x111   : > { %v561_v0 = vadd.f32 %v1634_v62, %v1984_v56  ;;  %1667 = vmatprep.mubr.msk.bf16.mxu1 %vm644_vm1, %v608_v60  ;;  %v592_v11 = vmax.f32 %v550_v63, 0.0 }
 0x112   : > { %v552_v2 = vpop.f32.mrf.mxu0  ;;  %1668 = vmatmul.mubr.msk.bf16.gmra.mxu1 %vm644_vm1, %v609_v61 }
 0x113   : > { %v553_v6 = vadd.f32 %v1984_v56, %v552_v2  ;;  %v595_v10 = vmax.f32 %v561_v0, 0.0 }
 0x115   : > { %v593_v16 = vmax.f32 %v553_v6, 0.0  ;;  %v611_v23 = vpack.c.bf16 %v595_v10, %v594_v17 }
 0x117   : > { %v610_v22 = vpack.c.bf16 %v593_v16, %v592_v11 }
 0x119   : > { %1671 = vmatprep.mubr.msk.bf16.mxu1 %vm644_vm1, %v610_v22 }
 0x11a   : > { %1672 = vmatmul.mubr.msk.bf16.gmra.mxu1 %vm644_vm1, %v611_v23 }
 0x1a2   : > { %v1645_v28 = vpop.f32.mrf.mxu1 }
 0x1a3   : > { %v856_v34 = vadd.f32 %v1645_v28, %v1835_v5 }
 0x1a4   : > { %v727_v35 = vpop.f32.mrf.mxu1 }
 0x1a5   : > { %v854_v56 = vadd.f32 %v727_v35, %v1829_v3  ;;  %v2042_v40 = vadd.f32 %v2037_v29, %v856_v34 }
 0x1a6   : > { %v1646_v41 = vpop.f32.mrf.mxu1 }
 0x1a7   : > { %v857_v46 = vadd.f32 %v1646_v41, %v1840_v7  ;;  %v933_v47 = vsel %vm354_vm0, %v2042_v40, 0.0  ;;  %v2048_v50 = vadd.f32 %v2037_v29, %v854_v56 }
 0x1a8   : > { %934 = vadd.xlane.f32.xlu1 %v933_v47  ;;  %v730_v51 = vpop.f32.mrf.mxu1 }
 0x1a9   : > { %v855_v52 = vadd.f32 %v730_v51, %v1832_v4  ;;  %v927_v5 = vsel %vm354_vm0, %v2048_v50, 0.0  ;;  %v2054_v3 = vadd.f32 %v2037_v29, %v857_v46 }
 0x1aa   : > { %928 = vadd.xlane.f32.xlu0 %v927_v5  ;;  %v1649_v53 = vpop.f32.mrf.mxu1 }
 0x1ab   : > { %v860_v7 = vadd.f32 %v1649_v53, %v1856_v12  ;;  %v936_v54 = vsel %vm354_vm0, %v2054_v3, 0.0  ;;  %v2060_v55 = vadd.f32 %v2037_v29, %v855_v52 }
 0x1ac   : > { %937 = vadd.xlane.f32.xlu1 %v936_v54  ;;  %v743_v57 = vpop.f32.mrf.mxu1 }
 0x1ad   : > { %v858_v4 = vadd.f32 %v743_v57, %v1843_v8  ;;  %v930_v58 = vsel %vm354_vm0, %v2060_v55, 0.0  ;;  %v2066_v59 = vadd.f32 %v2037_v29, %v860_v7 }
 0x1ae   : > { %931 = vadd.xlane.f32.xlu0 %v930_v58  ;;  %v1650_v60 = vpop.f32.mrf.mxu1 }
 0x1af   : > { %v861_v12 = vadd.f32 %v1650_v60, %v1859_v13  ;;  %v945_v63 = vsel %vm354_vm0, %v2066_v59, 0.0  ;;  %v2076_v8 = vadd.f32 %v2037_v29, %v858_v4 }
 0x1b0   : > { %v746_v61 = vpop.f32.mrf.mxu1 }
 0x1b1   : > { %v859_v62 = vadd.f32 %v746_v61, %v1846_v9  ;;  %v2073_v0 = vadd.f32 %v2037_v29, %v861_v12  ;;  %v939_v11 = vsel %vm354_vm0, %v2076_v8, 0.0 }
 0x1b2   : > { %946 = vadd.xlane.f32.xlu0 %v945_v63  ;;  %v1653_v1 = vpop.f32.mrf.mxu1 }
 0x1b3   : > { %v864_v2 = vadd.f32 %v1653_v1, %v1874_v18  ;;  %v948_v6 = vsel %vm354_vm0, %v2073_v0, 0.0  ;;  %v2082_v13 = vadd.f32 %v2037_v29, %v859_v62 }
 0x1b4   : > { %949 = vadd.xlane.f32.xlu1 %v948_v6  ;;  %v759_v9 = vpop.f32.mrf.mxu1 }
 0x1b5   : > { %v862_v10 = vadd.f32 %v759_v9, %v1862_v14  ;;  %v2088_v16 = vadd.f32 %v2037_v29, %v864_v2  ;;  %v942_v22 = vsel %vm354_vm0, %v2082_v13, 0.0 }
 0x1b6   : > { %940 = vadd.xlane.f32.xlu0 %v939_v11  ;;  %v1654_v17 = vpop.f32.mrf.mxu1 }
 0x1b7   : > { %v865_v18 = vadd.f32 %v1654_v17, %v1877_v19  ;;  %v957_v14 = vsel %vm354_vm0, %v2088_v16, 0.0  ;;  %v2100_v35 = vadd.f32 %v2037_v29, %v862_v10 }
 0x1b8   : > { %943 = vadd.xlane.f32.xlu1 %v942_v22  ;;  %v762_v23 = vpop.f32.mrf.mxu1 }
 0x1b9   : > { %v863_v28 = vadd.f32 %v762_v23, %v1865_v15  ;;  %v2097_v34 = vadd.f32 %v2037_v29, %v865_v18  ;;  %v951_v51 = vsel %vm354_vm0, %v2100_v35, 0.0 }
 0x1ba   : > { %958 = vadd.xlane.f32.xlu0 %v957_v14  ;;  %v1657_v56 = vpop.f32.mrf.mxu1 }
 0x1bb   : > { %v868_v19 = vadd.f32 %v1657_v56, %v1892_v24  ;;  %v960_v41 = vsel %vm354_vm0, %v2097_v34, 0.0  ;;  %v2106_v46 = vadd.f32 %v2037_v29, %v863_v28 }
 0x1bc   : > { %961 = vadd.xlane.f32.xlu1 %v960_v41  ;;  %v775_v15 = vpop.f32.mrf.mxu1 }
 0x1bd   : > { %v866_v47 = vadd.f32 %v775_v15, %v1880_v20  ;;  %v2112_v52 = vadd.f32 %v2037_v29, %v868_v19  ;;  %v954_v53 = vsel %vm354_vm0, %v2106_v46, 0.0 }
 0x1be   : > { %952 = vadd.xlane.f32.xlu0 %v951_v51  ;;  %v1658_v5 = vpop.f32.mrf.mxu1 }
 0x1bf   : > { %v869_v24 = vadd.f32 %v1658_v5, %v1895_v25  ;;  %v969_v20 = vsel %vm354_vm0, %v2112_v52, 0.0  ;;  %v2124_v4 = vadd.f32 %v2037_v29, %v866_v47 }
 0x1c0   : > { %955 = vadd.xlane.f32.xlu1 %v954_v53  ;;  %v778_v7 = vpop.f32.mrf.mxu1 }
 0x1c1   : > { %v867_v54 = vadd.f32 %v778_v7, %v1883_v21  ;;  %v2121_v57 = vadd.f32 %v2037_v29, %v869_v24  ;;  %v963_v62 = vsel %vm354_vm0, %v2124_v4, 0.0 }
 0x1c2   : > { %970 = vadd.xlane.f32.xlu0 %v969_v20  ;;  %v1661_v58 = vpop.f32.mrf.mxu1 }
 0x1c3   : > { %v872_v25 = vadd.f32 %v1661_v58, %v1910_v30  ;;  %v972_v60 = vsel %vm354_vm0, %v2121_v57, 0.0  ;;  %v2130_v12 = vadd.f32 %v2037_v29, %v867_v54 }
 0x1c4   : > { %973 = vadd.xlane.f32.xlu1 %v972_v60  ;;  %v791_v21 = vpop.f32.mrf.mxu1 }
 0x1c5   : > { %v870_v61 = vadd.f32 %v791_v21, %v1898_v26  ;;  %v2136_v63 = vadd.f32 %v2037_v29, %v872_v25  ;;  %v966_v2 = vsel %vm354_vm0, %v2130_v12, 0.0 }
 0x1c6   : > { %964 = vadd.xlane.f32.xlu0 %v963_v62  ;;  %v1662_v1 = vpop.f32.mrf.mxu1 }
 0x1c7   : > { %v873_v30 = vadd.f32 %v1662_v1, %v1913_v31  ;;  %v981_v26 = vsel %vm354_vm0, %v2136_v63, 0.0  ;;  %v2148_v11 = vadd.f32 %v2037_v29, %v870_v61 }
 0x1c8   : > { %967 = vadd.xlane.f32.xlu1 %v966_v2  ;;  %v794_v6 = vpop.f32.mrf.mxu1 }
 0x1c9   : > { %v871_v9 = vadd.f32 %v794_v6, %v1901_v27  ;;  %v2145_v10 = vadd.f32 %v2037_v29, %v873_v30  ;;  %v975_v28 = vsel %vm354_vm0, %v2148_v11, 0.0 }
 0x1ca   : > { %982 = vadd.xlane.f32.xlu0 %v981_v26  ;;  %v1665_v17 = vpop.f32.mrf.mxu1 }
 0x1cb   : > { %v876_v31 = vadd.f32 %v1665_v17, %v1928_v36  ;;  %v984_v18 = vsel %vm354_vm0, %v2145_v10, 0.0  ;;  %v2154_v22 = vadd.f32 %v2037_v29, %v871_v9 }
 0x1cc   : > { %985 = vadd.xlane.f32.xlu1 %v984_v18  ;;  %v807_v27 = vpop.f32.mrf.mxu1 }
 0x1cd   : > { %v874_v23 = vadd.f32 %v807_v27, %v1916_v32  ;;  %v2160_v14 = vadd.f32 %v2037_v29, %v876_v31  ;;  %v978_v19 = vsel %vm354_vm0, %v2154_v22, 0.0 }
 0x1ce   : > { %976 = vadd.xlane.f32.xlu0 %v975_v28  ;;  %v1666_v56 = vpop.f32.mrf.mxu1 }
 0x1cf   : > { %v877_v36 = vadd.f32 %v1666_v56, %v1931_v37  ;;  %v993_v32 = vsel %vm354_vm0, %v2160_v14, 0.0  ;;  %v2172_v51 = vadd.f32 %v2037_v29, %v874_v23 }
 0x1d0   : > { %979 = vadd.xlane.f32.xlu1 %v978_v19  ;;  %v810_v41 = vpop.f32.mrf.mxu1 }
 0x1d1   : > { %v875_v15 = vadd.f32 %v810_v41, %v1919_v33  ;;  %v2169_v47 = vadd.f32 %v2037_v29, %v877_v36  ;;  %v987_v54 = vsel %vm354_vm0, %v2172_v51, 0.0 }
 0x1d2   : > { %994 = vadd.xlane.f32.xlu0 %v993_v32  ;;  %v1669_v5 = vpop.f32.mrf.mxu1 }
 0x1d3   : > { %v880_v37 = vadd.f32 %v1669_v5, %v1946_v42  ;;  %v996_v24 = vsel %vm354_vm0, %v2169_v47, 0.0  ;;  %v2178_v53 = vadd.f32 %v2037_v29, %v875_v15 }
 0x1d4   : > { %997 = vadd.xlane.f32.xlu1 %v996_v24  ;;  %v823_v33 = vpop.f32.mrf.mxu1 }
 0x1d5   : > { %v878_v7 = vadd.f32 %v823_v33, %v1934_v38  ;;  %v2184_v20 = vadd.f32 %v2037_v29, %v880_v37  ;;  %v990_v25 = vsel %vm354_vm0, %v2178_v53, 0.0 }
 0x1d6   : > { %988 = vadd.xlane.f32.xlu0 %v987_v54  ;;  %v1670_v58 = vpop.f32.mrf.mxu1 }
 0x1d7   : > { %v881_v42 = vadd.f32 %v1670_v58, %v1949_v43  ;;  %v1005_v38 = vsel %vm354_vm0, %v2184_v20, 0.0  ;;  %v2196_v62 = vadd.f32 %v2037_v29, %v878_v7 }
 0x1d8   : > { %991 = vadd.xlane.f32.xlu1 %v990_v25  ;;  %v826_v60 = vpop.f32.mrf.mxu1 }
 0x1d9   : > { %v879_v21 = vadd.f32 %v826_v60, %v1937_v39  ;;  %v2193_v61 = vadd.f32 %v2037_v29, %v881_v42  ;;  %v999_v9 = vsel %vm354_vm0, %v2196_v62, 0.0 }
 0x1da   : > { %1006 = vadd.xlane.f32.xlu0 %v1005_v38  ;;  %v1673_v1 = vpop.f32.mrf.mxu1 }
 0x1db   : > { %v1008_v43 = vsel %vm354_vm0, %v2193_v61, 0.0  ;;  %v2201_v30 = vadd.f32 %v2037_v29, %v879_v21  ;;  %v884_v39 = vadd.f32 %v1673_v1, %v1964_v48 }
 0x1dc   : > { %1009 = vadd.xlane.f32.xlu1 %v1008_v43  ;;  %v839_v2 = vpop.f32.mrf.mxu1 }
 0x1dd   : > { %v882_v6 = vadd.f32 %v839_v2, %v1952_v44  ;;  %v1002_v17 = vsel %vm354_vm0, %v2201_v30, 0.0  ;;  %v2217_v48 = vadd.f32 %v2037_v29, %v884_v39 }
 0x1de   : > { %1000 = vadd.xlane.f32.xlu0 %v999_v9  ;;  %v1674_v26 = vpop.f32.mrf.mxu1 }
 0x1df   : > { %v2210_v31 = vadd.f32 %v2037_v29, %v882_v6  ;;  %v885_v27 = vadd.f32 %v1674_v26, %v1967_v49  ;;  %v1017_v56 = vsel %vm354_vm0, %v2217_v48, 0.0 }
 0x1e0   : > { %1003 = vadd.xlane.f32.xlu1 %v1002_v17  ;;  %v842_v18 = vpop.f32.mrf.mxu1 }
 0x1e1   : > { %v883_v23 = vadd.f32 %v842_v18, %v1955_v45  ;;  %v1011_v44 = vsel %vm354_vm0, %v2210_v31, 0.0  ;;  %v2227_v49 = vadd.f32 %v2037_v29, %v885_v27 }
 0x1e2   : > { %1012 = vadd.xlane.f32.xlu0 %v1011_v44 }
 0x1e3   : > { %v2220_v28 = vadd.f32 %v2037_v29, %v883_v23  ;;  %v1020_v45 = vsel %vm354_vm0, %v2227_v49, 0.0 }
 0x1e5   : > { %v1014_v36 = vsel %vm354_vm0, %v2220_v28, 0.0 }
 0x1e6   : > { %1018 = vadd.xlane.f32.xlu0 %v1017_v56  ;;  %1015 = vadd.xlane.f32.xlu1 %v1014_v36 }
 0x1ea   : > { %1021 = vadd.xlane.f32.xlu1 %v1020_v45 }
 0x231   : > { %v935_v19 = vpop.xlane.xlu1 %934 }
 0x232   : > { %v1026_v41 = vmul.f32 0.03125, %v935_v19 }
 0x233   : > { %v929_v15 = vpop.xlane.xlu0 %928 }
 0x234   : > { %v2232_v32 = vsub.f32 %v2042_v40, %v1026_v41  ;;  %v1024_v5 = vmul.f32 0.03125, %v929_v15 }
 0x235   : > { %v938_v37 = vpop.xlane.xlu1 %937 }
 0x236   : > { %v2235_v24 = vsub.f32 %v2048_v50, %v1024_v5  ;;  %v1027_v33 = vmul.f32 0.03125, %v938_v37  ;;  %v1090_v29 = vmul.f32 %v2232_v32, %v2232_v32 }
 0x237   : > { %v932_v7 = vpop.xlane.xlu0 %931 }
 0x238   : > { %v2240_v54 = vsub.f32 %v2054_v3, %v1027_v33  ;;  %v1025_v58 = vmul.f32 0.03125, %v932_v7  ;;  %v1126_v42 = vsel %vm354_vm0, %v1090_v29, 0.0  ;;  %v1088_v40 = vmul.f32 %v2235_v24, %v2235_v24 }
 0x239   : > { %1127 = vadd.xlane.f32.xlu0 %v1126_v42 }
 0x23a   : > { %v2246_v25 = vsub.f32 %v2060_v55, %v1025_v58  ;;  %v1091_v50 = vmul.f32 %v2240_v54, %v2240_v54  ;;  %v1120_v38 = vsel %vm354_vm0, %v1088_v40, 0.0 }
 0x23b   : > { %v947_v60 = vpop.xlane.xlu0 %946 }
 0x23c   : > { %v1030_v21 = vmul.f32 0.03125, %v947_v60  ;;  %v1129_v3 = vsel %vm354_vm0, %v1091_v50, 0.0  ;;  %v1089_v1 = vmul.f32 %v2246_v25, %v2246_v25 }
 0x23d   : > { %v950_v43 = vpop.xlane.xlu1 %949  ;;  %1121 = vadd.xlane.f32.xlu0 %v1120_v38  ;;  %1130 = vadd.xlane.f32.xlu1 %v1129_v3 }
 0x23e   : > { %v2255_v2 = vsub.f32 %v2066_v59, %v1030_v21  ;;  %v1031_v55 = vmul.f32 0.03125, %v950_v43  ;;  %v1123_v26 = vsel %vm354_vm0, %v1089_v1, 0.0 }
 0x23f   : > { %v941_v39 = vpop.xlane.xlu0 %940 }
 0x240   : > { %v2258_v6 = vsub.f32 %v2073_v0, %v1031_v55  ;;  %v1028_v9 = vmul.f32 0.03125, %v941_v39  ;;  %v1094_v17 = vmul.f32 %v2255_v2, %v2255_v2 }
 0x241   : > { %v944_v18 = vpop.xlane.xlu1 %943  ;;  %1124 = vadd.xlane.f32.xlu1 %v1123_v26 }
 0x242   : > { %v2264_v27 = vsub.f32 %v2076_v8, %v1028_v9  ;;  %v1029_v23 = vmul.f32 0.03125, %v944_v18  ;;  %v1138_v59 = vsel %vm354_vm0, %v1094_v17, 0.0  ;;  %v1095_v44 = vmul.f32 %v2258_v6, %v2258_v6 }
 0x243   : > { %v959_v56 = vpop.xlane.xlu0 %958  ;;  %1139 = vadd.xlane.f32.xlu0 %v1138_v59 }
 0x244   : > { %v2270_v0 = vsub.f32 %v2082_v13, %v1029_v23  ;;  %v1034_v36 = vmul.f32 0.03125, %v959_v56  ;;  %v1141_v45 = vsel %vm354_vm0, %v1095_v44, 0.0  ;;  %v1092_v19 = vmul.f32 %v2264_v27, %v2264_v27 }
 0x245   : > { %v962_v41 = vpop.xlane.xlu1 %961  ;;  %1142 = vadd.xlane.f32.xlu1 %v1141_v45 }
 0x246   : > { %v2276_v8 = vsub.f32 %v2088_v16, %v1034_v36  ;;  %v1035_v15 = vmul.f32 0.03125, %v962_v41  ;;  %v1132_v5 = vsel %vm354_vm0, %v1092_v19, 0.0  ;;  %v1093_v37 = vmul.f32 %v2270_v0, %v2270_v0 }
 0x247   : > { %v953_v33 = vpop.xlane.xlu0 %952  ;;  %1133 = vadd.xlane.f32.xlu0 %v1132_v5 }
 0x248   : > { %v2282_v13 = vsub.f32 %v2097_v34, %v1035_v15  ;;  %v1032_v29 = vmul.f32 0.03125, %v953_v33  ;;  %v1135_v7 = vsel %vm354_vm0, %v1093_v37, 0.0  ;;  %v1098_v58 = vmul.f32 %v2276_v8, %v2276_v8 }
 0x249   : > { %v956_v42 = vpop.xlane.xlu1 %955  ;;  %1136 = vadd.xlane.f32.xlu1 %v1135_v7 }
 0x24a   : > { %v2288_v16 = vsub.f32 %v2100_v35, %v1032_v29  ;;  %v1033_v40 = vmul.f32 0.03125, %v956_v42  ;;  %v1150_v50 = vsel %vm354_vm0, %v1098_v58, 0.0  ;;  %v1099_v60 = vmul.f32 %v2282_v13, %v2282_v13 }
 0x24b   : > { %v971_v21 = vpop.xlane.xlu0 %970  ;;  %1151 = vadd.xlane.f32.xlu0 %v1150_v50 }
 0x24c   : > { %v2294_v34 = vsub.f32 %v2106_v46, %v1033_v40  ;;  %v1038_v38 = vmul.f32 0.03125, %v971_v21  ;;  %v1153_v3 = vsel %vm354_vm0, %v1099_v60, 0.0  ;;  %v1096_v1 = vmul.f32 %v2288_v16, %v2288_v16 }
 0x24d   : > { %v974_v43 = vpop.xlane.xlu1 %973  ;;  %1154 = vadd.xlane.f32.xlu1 %v1153_v3 }
 0x24e   : > { %v2300_v35 = vsub.f32 %v2112_v52, %v1038_v38  ;;  %v1039_v55 = vmul.f32 0.03125, %v974_v43  ;;  %v1144_v39 = vsel %vm354_vm0, %v1096_v1, 0.0  ;;  %v1097_v9 = vmul.f32 %v2294_v34, %v2294_v34 }
 0x24f   : > { %v965_v26 = vpop.xlane.xlu0 %964  ;;  %1145 = vadd.xlane.f32.xlu0 %v1144_v39 }
 0x250   : > { %v2306_v46 = vsub.f32 %v2121_v57, %v1039_v55  ;;  %v1036_v17 = vmul.f32 0.03125, %v965_v26  ;;  %v1147_v18 = vsel %vm354_vm0, %v1097_v9, 0.0  ;;  %v1102_v23 = vmul.f32 %v2300_v35, %v2300_v35 }
 0x251   : > { %v968_v59 = vpop.xlane.xlu1 %967  ;;  %1148 = vadd.xlane.f32.xlu1 %v1147_v18 }
 0x252   : > { %v2312_v52 = vsub.f32 %v2124_v4, %v1036_v17  ;;  %v1037_v44 = vmul.f32 0.03125, %v968_v59  ;;  %v1162_v56 = vsel %vm354_vm0, %v1102_v23, 0.0  ;;  %v1103_v36 = vmul.f32 %v2306_v46, %v2306_v46 }
 0x253   : > { %v983_v45 = vpop.xlane.xlu0 %982  ;;  %1163 = vadd.xlane.f32.xlu0 %v1162_v56 }
 0x254   : > { %v2318_v57 = vsub.f32 %v2130_v12, %v1037_v44  ;;  %v1042_v19 = vmul.f32 0.03125, %v983_v45  ;;  %v1165_v41 = vsel %vm354_vm0, %v1103_v36, 0.0  ;;  %v1100_v15 = vmul.f32 %v2312_v52, %v2312_v52 }
 0x255   : > { %v986_v5 = vpop.xlane.xlu1 %985  ;;  %1166 = vadd.xlane.f32.xlu1 %v1165_v41 }
 0x256   : > { %v2324_v4 = vsub.f32 %v2136_v63, %v1042_v19  ;;  %v1043_v37 = vmul.f32 0.03125, %v986_v5  ;;  %v1156_v33 = vsel %vm354_vm0, %v1100_v15, 0.0  ;;  %v1101_v29 = vmul.f32 %v2318_v57, %v2318_v57 }
 0x257   : > { %v977_v7 = vpop.xlane.xlu0 %976  ;;  %1157 = vadd.xlane.f32.xlu0 %v1156_v33 }
 0x258   : > { %v2330_v12 = vsub.f32 %v2145_v10, %v1043_v37  ;;  %v1040_v58 = vmul.f32 0.03125, %v977_v7  ;;  %v1159_v42 = vsel %vm354_vm0, %v1101_v29, 0.0  ;;  %v1106_v40 = vmul.f32 %v2324_v4, %v2324_v4 }
 0x259   : > { %v980_v50 = vpop.xlane.xlu1 %979  ;;  %1160 = vadd.xlane.f32.xlu1 %v1159_v42 }
 0x25a   : > { %v2336_v63 = vsub.f32 %v2148_v11, %v1040_v58  ;;  %v1041_v60 = vmul.f32 0.03125, %v980_v50  ;;  %v1174_v21 = vsel %vm354_vm0, %v1106_v40, 0.0  ;;  %v1107_v38 = vmul.f32 %v2330_v12, %v2330_v12 }
 0x25b   : > { %v995_v3 = vpop.xlane.xlu0 %994  ;;  %1175 = vadd.xlane.f32.xlu0 %v1174_v21 }
 0x25c   : > { %v2342_v10 = vsub.f32 %v2154_v22, %v1041_v60  ;;  %v1046_v1 = vmul.f32 0.03125, %v995_v3  ;;  %v1177_v43 = vsel %vm354_vm0, %v1107_v38, 0.0  ;;  %v1104_v55 = vmul.f32 %v2336_v63, %v2336_v63 }
 0x25d   : > { %v998_v39 = vpop.xlane.xlu1 %997  ;;  %1178 = vadd.xlane.f32.xlu1 %v1177_v43 }
 0x25e   : > { %v2348_v11 = vsub.f32 %v2160_v14, %v1046_v1  ;;  %v1047_v9 = vmul.f32 0.03125, %v998_v39  ;;  %v1168_v26 = vsel %vm354_vm0, %v1104_v55, 0.0  ;;  %v1105_v17 = vmul.f32 %v2342_v10, %v2342_v10 }
 0x25f   : > { %v989_v18 = vpop.xlane.xlu0 %988  ;;  %1169 = vadd.xlane.f32.xlu0 %v1168_v26 }
 0x260   : > { %v2354_v22 = vsub.f32 %v2169_v47, %v1047_v9  ;;  %v1044_v23 = vmul.f32 0.03125, %v989_v18  ;;  %v1171_v59 = vsel %vm354_vm0, %v1105_v17, 0.0  ;;  %v1110_v44 = vmul.f32 %v2348_v11, %v2348_v11 }
 0x261   : > { %v992_v56 = vpop.xlane.xlu1 %991  ;;  %1172 = vadd.xlane.f32.xlu1 %v1171_v59 }
 0x262   : > { %v2360_v14 = vsub.f32 %v2172_v51, %v1044_v23  ;;  %v1045_v36 = vmul.f32 0.03125, %v992_v56  ;;  %v1186_v45 = vsel %vm354_vm0, %v1110_v44, 0.0  ;;  %v1111_v19 = vmul.f32 %v2354_v22, %v2354_v22 }
 0x263   : > { %v1007_v41 = vpop.xlane.xlu0 %1006  ;;  %1187 = vadd.xlane.f32.xlu0 %v1186_v45 }
 0x264   : > { %v2366_v47 = vsub.f32 %v2178_v53, %v1045_v36  ;;  %v1050_v15 = vmul.f32 0.03125, %v1007_v41  ;;  %v1189_v5 = vsel %vm354_vm0, %v1111_v19, 0.0  ;;  %v1108_v37 = vmul.f32 %v2360_v14, %v2360_v14 }
 0x265   : > { %v1010_v33 = vpop.xlane.xlu1 %1009  ;;  %1190 = vadd.xlane.f32.xlu1 %v1189_v5 }
 0x266   : > { %v2372_v51 = vsub.f32 %v2184_v20, %v1050_v15  ;;  %v1051_v29 = vmul.f32 0.03125, %v1010_v33  ;;  %v1180_v7 = vsel %vm354_vm0, %v1108_v37, 0.0  ;;  %v1109_v58 = vmul.f32 %v2366_v47, %v2366_v47 }
 0x267   : > { %v1001_v42 = vpop.xlane.xlu0 %1000  ;;  %1181 = vadd.xlane.f32.xlu0 %v1180_v7 }
 0x268   : > { %v2378_v53 = vsub.f32 %v2193_v61, %v1051_v29  ;;  %v1048_v40 = vmul.f32 0.03125, %v1001_v42  ;;  %v1183_v50 = vsel %vm354_vm0, %v1109_v58, 0.0  ;;  %v1114_v60 = vmul.f32 %v2372_v51, %v2372_v51 }
 0x269   : > { %v1004_v21 = vpop.xlane.xlu1 %1003  ;;  %1184 = vadd.xlane.f32.xlu1 %v1183_v50 }
 0x26a   : > { %v2384_v20 = vsub.f32 %v2196_v62, %v1048_v40  ;;  %v1049_v38 = vmul.f32 0.03125, %v1004_v21  ;;  %v1198_v3 = vsel %vm354_vm0, %v1114_v60, 0.0  ;;  %v1115_v1 = vmul.f32 %v2378_v53, %v2378_v53 }
 0x26b   : > { %1199 = vadd.xlane.f32.xlu0 %v1198_v3  ;;  %v1013_v61 = vpop.xlane.xlu0 %1012 }
 0x26c   : > { %v2390_v43 = vsub.f32 %v2201_v30, %v1049_v38  ;;  %v1052_v55 = vmul.f32 0.03125, %v1013_v61  ;;  %v1201_v39 = vsel %vm354_vm0, %v1115_v1, 0.0  ;;  %v1112_v9 = vmul.f32 %v2384_v20, %v2384_v20 }
 0x26d   : > { %1202 = vadd.xlane.f32.xlu1 %v1201_v39 }
 0x26e   : > { %v2396_v62 = vsub.f32 %v2210_v31, %v1052_v55  ;;  %v1192_v26 = vsel %vm354_vm0, %v1112_v9, 0.0  ;;  %v1113_v17 = vmul.f32 %v2390_v43, %v2390_v43 }
 0x26f   : > { %1193 = vadd.xlane.f32.xlu0 %v1192_v26  ;;  %v1019_v18 = vpop.xlane.xlu0 %1018  ;;  %v1016_v23 = vpop.xlane.xlu1 %1015 }
 0x270   : > { %v1054_v30 = vmul.f32 0.03125, %v1019_v18  ;;  %v1053_v59 = vmul.f32 0.03125, %v1016_v23  ;;  %v1195_v44 = vsel %vm354_vm0, %v1113_v17, 0.0  ;;  %v1116_v56 = vmul.f32 %v2396_v62, %v2396_v62 }
 0x271   : > { %1196 = vadd.xlane.f32.xlu1 %v1195_v44 }
 0x272   : > { %v2405_v36 = vsub.f32 %v2217_v48, %v1054_v30  ;;  %v2408_v31 = vsub.f32 %v2220_v28, %v1053_v59  ;;  %v1204_v45 = vsel %vm354_vm0, %v1116_v56, 0.0 }
 0x273   : > { %1205 = vadd.xlane.f32.xlu0 %v1204_v45  ;;  %v1022_v19 = vpop.xlane.xlu1 %1021 }
 0x274   : > { %v1055_v41 = vmul.f32 0.03125, %v1022_v19  ;;  %v1118_v15 = vmul.f32 %v2405_v36, %v2405_v36  ;;  %v1117_v5 = vmul.f32 %v2408_v31, %v2408_v31  ;;  %v2426_v19 = vld [vmem:[%s2608_s5] ss:$0 sm:$0xff] }
 0x276   : > { %v2416_v37 = vsub.f32 %v2227_v49, %v1055_v41  ;;  %v1210_v48 = vsel %vm354_vm0, %v1118_v15, 0.0  ;;  %v1207_v33 = vsel %vm354_vm0, %v1117_v5, 0.0 }
 0x277   : > { %1211 = vadd.xlane.f32.xlu0 %v1210_v48  ;;  %1208 = vadd.xlane.f32.xlu1 %v1207_v33  ;;  %v2432_v33 = vld [vmem:[%s2609_s6] ss:$0 sm:$0xff] }
 0x278   : > { %v1119_v28 = vmul.f32 %v2416_v37, %v2416_v37 }
 0x27a   : > { %v1213_v29 = vsel %vm354_vm0, %v1119_v28, 0.0 }
 0x27b   : > { %1214 = vadd.xlane.f32.xlu1 %v1213_v29 }
 0x2c2   : > { %v1128_v7 = vpop.xlane.xlu0 %1127 }
 0x2c3   : > { %v1218_v58 = vmul.f32 0.03125, %v1128_v7 }
 0x2c5   : > { %v1250_v42 = vadd.f32 1e-05, %v1218_v58 }
 0x2c6   : > { %v1122_v40 = vpop.xlane.xlu0 %1121  ;;  %v1131_v50 = vpop.xlane.xlu1 %1130 }
 0x2c7   : > { %1689 = vrsqrt.f32 %v1250_v42  ;;  %v1216_v49 = vmul.f32 0.03125, %v1122_v40  ;;  %v1219_v60 = vmul.f32 0.03125, %v1131_v50 }
 0x2c9   : > { %v1248_v21 = vadd.f32 1e-05, %v1216_v49  ;;  %v1251_v38 = vadd.f32 1e-05, %v1219_v60 }
 0x2ca   : > { %v1125_v3 = vpop.xlane.xlu1 %1124 }
 0x2cb   : > { %1691 = vrsqrt.f32 %v1248_v21  ;;  %v1217_v1 = vmul.f32 0.03125, %v1125_v3 }
 0x2cc   : > { %1693 = vrsqrt.f32 %v1251_v38  ;;  %v1140_v61 = vpop.xlane.xlu0 %1139 }
 0x2cd   : > { %v1249_v55 = vadd.f32 1e-05, %v1217_v1  ;;  %v1222_v39 = vmul.f32 0.03125, %v1140_v61 }
 0x2ce   : > { %v1143_v9 = vpop.xlane.xlu1 %1142 }
 0x2cf   : > { %1695 = vrsqrt.f32 %v1249_v55  ;;  %v1254_v26 = vadd.f32 1e-05, %v1222_v39  ;;  %v1223_v17 = vmul.f32 0.03125, %v1143_v9 }
 0x2d0   : > { %v1134_v18 = vpop.xlane.xlu0 %1133 }
 0x2d1   : > { %1697 = vrsqrt.f32 %v1254_v26  ;;  %v1255_v23 = vadd.f32 1e-05, %v1223_v17  ;;  %v1220_v30 = vmul.f32 0.03125, %v1134_v18 }
 0x2d2   : > { %v1137_v59 = vpop.xlane.xlu1 %1136 }
 0x2d3   : > { %1699 = vrsqrt.f32 %v1255_v23  ;;  %v1252_v44 = vadd.f32 1e-05, %v1220_v30  ;;  %v1221_v56 = vmul.f32 0.03125, %v1137_v59 }
 0x2d4   : > { %v1690_v45 = vpop.eup %1689  ;;  %v1152_v41 = vpop.xlane.xlu0 %1151 }
 0x2d5   : > { %v1314_v15 = vmul.f32 %v1690_v45, %v2232_v32  ;;  %1701 = vrsqrt.f32 %v1252_v44  ;;  %v1253_v5 = vadd.f32 1e-05, %v1221_v56  ;;  %v1226_v48 = vmul.f32 0.03125, %v1152_v41 }
 0x2d6   : > { %v1155_v28 = vpop.xlane.xlu1 %1154 }
 0x2d7   : > { %v1352_v29 = vmul.f32 %v2426_v19, %v1314_v15  ;;  %1703 = vrsqrt.f32 %v1253_v5  ;;  %v1258_v7 = vadd.f32 1e-05, %v1226_v48  ;;  %v1227_v58 = vmul.f32 0.03125, %v1155_v28 }
 0x2d8   : > { %v1692_v42 = vpop.eup %1691  ;;  %v1146_v32 = vpop.xlane.xlu0 %1145 }
 0x2d9   : > { %v1694_v40 = vpop.eup %1693  ;;  %v1390_v50 = vadd.f32 %v2432_v33, %v1352_v29  ;;  %v1312_v49 = vmul.f32 %v1692_v42, %v2235_v24  ;;  %1705 = vrsqrt.f32 %v1258_v7  ;;  %v1259_v60 = vadd.f32 1e-05, %v1227_v58 }
 0x2da   : > { %v1315_v21 = vmul.f32 %v1694_v40, %v2240_v54  ;;  %v1224_v38 = vmul.f32 0.03125, %v1146_v32  ;;  %v1149_v3 = vpop.xlane.xlu1 %1148 }
 0x2db   : > { %1422 = vst.msk [vmem:[%s2440_s9 + $0x10] sm:$0xff] %vm354_vm0, %v1390_v50  ;;  %v1350_v1 = vmul.f32 %v2426_v19, %v1312_v49  ;;  %1707 = vrsqrt.f32 %v1259_v60  ;;  %v1225_v61 = vmul.f32 0.03125, %v1149_v3 }
 0x2dc   : > { %v1696_v55 = vpop.eup %1695  ;;  %v1353_v39 = vmul.f32 %v2426_v19, %v1315_v21  ;;  %v1256_v9 = vadd.f32 1e-05, %v1224_v38  ;;  %v1164_v26 = vpop.xlane.xlu0 %1163 }
 0x2dd   : > { %v1388_v24 = vadd.f32 %v2432_v33, %v1350_v1  ;;  %v1313_v17 = vmul.f32 %v1696_v55, %v2246_v25  ;;  %v1257_v54 = vadd.f32 1e-05, %v1225_v61  ;;  %v1230_v18 = vmul.f32 0.03125, %v1164_v26 }
 0x2de   : > { %v1698_v23 = vpop.eup %1697  ;;  %v1391_v30 = vadd.f32 %v2432_v33, %v1353_v39  ;;  %1709 = vrsqrt.f32 %v1256_v9  ;;  %v1167_v59 = vpop.xlane.xlu1 %1166 }
 0x2df   : > { %1420 = vst.msk [vmem:[%s2440_s9] sm:$0xff] %vm354_vm0, %v1388_v24  ;;  %v1351_v44 = vmul.f32 %v2426_v19, %v1313_v17  ;;  %v1318_v56 = vmul.f32 %v1698_v23, %v2255_v2  ;;  %1711 = vrsqrt.f32 %v1257_v54  ;;  %v1262_v45 = vadd.f32 1e-05, %v1230_v18 }
 0x2e0   : > { %v1700_v41 = vpop.eup %1699  ;;  %1423 = vst.msk [vmem:[%s2440_s9 + $0x18] sm:$0xff] %vm354_vm0, %v1391_v30  ;;  %v1231_v25 = vmul.f32 0.03125, %v1167_v59  ;;  %v1158_v15 = vpop.xlane.xlu0 %1157 }
 0x2e1   : > { %v1389_v5 = vadd.f32 %v2432_v33, %v1351_v44  ;;  %v1356_v48 = vmul.f32 %v2426_v19, %v1318_v56  ;;  %v1319_v28 = vmul.f32 %v1700_v41, %v2258_v6  ;;  %1713 = vrsqrt.f32 %v1262_v45 }
 0x2e2   : > { %v1702_v29 = vpop.eup %1701  ;;  %v1263_v7 = vadd.f32 1e-05, %v1231_v25  ;;  %v1228_v58 = vmul.f32 0.03125, %v1158_v15  ;;  %v1161_v42 = vpop.xlane.xlu1 %1160 }
 0x2e3   : > { %1421 = vst.msk [vmem:[%s2440_s9 + $0x8] sm:$0xff] %vm354_vm0, %v1389_v5  ;;  %v1394_v2 = vadd.f32 %v2432_v33, %v1356_v48  ;;  %v1357_v32 = vmul.f32 %v2426_v19, %v1319_v28  ;;  %v1316_v40 = vmul.f32 %v1702_v29, %v2264_v27  ;;  %v1229_v50 = vmul.f32 0.03125, %v1161_v42 }
 0x2e4   : > { %v1704_v49 = vpop.eup %1703  ;;  %1715 = vrsqrt.f32 %v1263_v7  ;;  %v1260_v60 = vadd.f32 1e-05, %v1228_v58  ;;  %v1176_v21 = vpop.xlane.xlu0 %1175 }
 0x2e5   : > { %1426 = vst.msk [vmem:[%s2440_s9 + $0x30] sm:$0xff] %vm354_vm0, %v1394_v2  ;;  %v1395_v6 = vadd.f32 %v2432_v33, %v1357_v32  ;;  %v1354_v38 = vmul.f32 %v2426_v19, %v1316_v40  ;;  %v1317_v3 = vmul.f32 %v1704_v49, %v2270_v0  ;;  %v1261_v1 = vadd.f32 1e-05, %v1229_v50 }
 0x2e6   : > { %v1706_v61 = vpop.eup %1705  ;;  %1717 = vrsqrt.f32 %v1260_v60  ;;  %v1234_v55 = vmul.f32 0.03125, %v1176_v21  ;;  %v1179_v39 = vpop.xlane.xlu1 %1178 }
 0x2e7   : > { %1427 = vst.msk [vmem:[%s2440_s9 + $0x38] sm:$0xff] %vm354_vm0, %v1395_v6  ;;  %v1392_v27 = vadd.f32 %v2432_v33, %v1354_v38  ;;  %v1355_v9 = vmul.f32 %v2426_v19, %v1317_v3  ;;  %v1322_v26 = vmul.f32 %v1706_v61, %v2276_v8  ;;  %1719 = vrsqrt.f32 %v1261_v1 }
 0x2e8   : > { %v1708_v24 = vpop.eup %1707  ;;  %v1266_v17 = vadd.f32 1e-05, %v1234_v55  ;;  %v1235_v54 = vmul.f32 0.03125, %v1179_v39  ;;  %v1170_v18 = vpop.xlane.xlu0 %1169 }
 0x2e9   : > { %1424 = vst.msk [vmem:[%s2440_s9 + $0x20] sm:$0xff] %vm354_vm0, %v1392_v27  ;;  %v1393_v0 = vadd.f32 %v2432_v33, %v1355_v9  ;;  %v1360_v23 = vmul.f32 %v2426_v19, %v1322_v26  ;;  %v1323_v30 = vmul.f32 %v1708_v24, %v2282_v13  ;;  %v1232_v59 = vmul.f32 0.03125, %v1170_v18 }
 0x2ea   : > { %1721 = vrsqrt.f32 %v1266_v17  ;;  %v1267_v44 = vadd.f32 1e-05, %v1235_v54  ;;  %v1173_v56 = vpop.xlane.xlu1 %1172 }
 0x2eb   : > { %v1710_v45 = vpop.eup %1709  ;;  %1425 = vst.msk [vmem:[%s2440_s9 + $0x28] sm:$0xff] %vm354_vm0, %v1393_v0  ;;  %v1398_v8 = vadd.f32 %v2432_v33, %v1360_v23  ;;  %v1361_v41 = vmul.f32 %v2426_v19, %v1323_v30  ;;  %v1264_v25 = vadd.f32 1e-05, %v1232_v59  ;;  %v1233_v15 = vmul.f32 0.03125, %v1173_v56 }
 0x2ec   : > { %v1712_v5 = vpop.eup %1711  ;;  %v1320_v48 = vmul.f32 %v1710_v45, %v2288_v16  ;;  %1723 = vrsqrt.f32 %v1267_v44  ;;  %v1188_v28 = vpop.xlane.xlu0 %1187 }
 0x2ed   : > { %1430 = vst.msk [vmem:[%s2440_s9 + $0x50] sm:$0xff] %vm354_vm0, %v1398_v8  ;;  %v1399_v13 = vadd.f32 %v2432_v33, %v1361_v41  ;;  %v1321_v29 = vmul.f32 %v1712_v5, %v2294_v34  ;;  %1725 = vrsqrt.f32 %v1264_v25  ;;  %v1265_v7 = vadd.f32 1e-05, %v1233_v15 }
 0x2ee   : > { %v1714_v58 = vpop.eup %1713  ;;  %v1358_v42 = vmul.f32 %v2426_v19, %v1320_v48  ;;  %v1238_v2 = vmul.f32 0.03125, %v1188_v28  ;;  %v1191_v32 = vpop.xlane.xlu1 %1190 }
 0x2ef   : > { %1431 = vst.msk [vmem:[%s2440_s9 + $0x58] sm:$0xff] %vm354_vm0, %v1399_v13  ;;  %v1359_v16 = vmul.f32 %v2426_v19, %v1321_v29  ;;  %v1326_v40 = vmul.f32 %v1714_v58, %v2300_v35  ;;  %1727 = vrsqrt.f32 %v1265_v7  ;;  %v1239_v50 = vmul.f32 0.03125, %v1191_v32 }
 0x2f0   : > { %v1396_v49 = vadd.f32 %v2432_v33, %v1358_v42  ;;  %v1270_v34 = vadd.f32 1e-05, %v1238_v2  ;;  %v1182_v60 = vpop.xlane.xlu0 %1181 }
 0x2f1   : > { %v1716_v21 = vpop.eup %1715  ;;  %v1397_v6 = vadd.f32 %v2432_v33, %v1359_v16  ;;  %v1364_v38 = vmul.f32 %v2426_v19, %v1326_v40  ;;  %v1271_v3 = vadd.f32 1e-05, %v1239_v50  ;;  %v1236_v1 = vmul.f32 0.03125, %v1182_v60 }
 0x2f2   : > { %1428 = vst.msk [vmem:[%s2440_s9 + $0x40] sm:$0xff] %vm354_vm0, %v1396_v49  ;;  %v1327_v61 = vmul.f32 %v1716_v21, %v2306_v46  ;;  %1729 = vrsqrt.f32 %v1270_v34  ;;  %v1185_v35 = vpop.xlane.xlu1 %1184 }
 0x2f3   : > { %v1718_v55 = vpop.eup %1717  ;;  %1429 = vst.msk [vmem:[%s2440_s9 + $0x48] sm:$0xff] %vm354_vm0, %v1397_v6  ;;  %v1402_v39 = vadd.f32 %v2432_v33, %v1364_v38  ;;  %1731 = vrsqrt.f32 %v1271_v3  ;;  %v1268_v27 = vadd.f32 1e-05, %v1236_v1  ;;  %v1237_v9 = vmul.f32 0.03125, %v1185_v35 }
 0x2f4   : > { %v1720_v26 = vpop.eup %1719  ;;  %v1365_v24 = vmul.f32 %v2426_v19, %v1327_v61  ;;  %v1324_v17 = vmul.f32 %v1718_v55, %v2312_v52  ;;  %v1200_v54 = vpop.xlane.xlu0 %1199 }
 0x2f5   : > { %1434 = vst.msk [vmem:[%s2440_s9 + $0x70] sm:$0xff] %vm354_vm0, %v1402_v39  ;;  %v1325_v46 = vmul.f32 %v1720_v26, %v2318_v57  ;;  %1733 = vrsqrt.f32 %v1268_v27  ;;  %v1269_v18 = vadd.f32 1e-05, %v1237_v9  ;;  %v1242_v0 = vmul.f32 0.03125, %v1200_v54 }
 0x2f6   : > { %v1403_v23 = vadd.f32 %v2432_v33, %v1365_v24  ;;  %v1362_v30 = vmul.f32 %v2426_v19, %v1324_v17  ;;  %v1203_v59 = vpop.xlane.xlu1 %1202 }
 0x2f7   : > { %v1722_v44 = vpop.eup %1721  ;;  %v1363_v56 = vmul.f32 %v2426_v19, %v1325_v46  ;;  %1735 = vrsqrt.f32 %v1269_v18  ;;  %v1274_v45 = vadd.f32 1e-05, %v1242_v0  ;;  %v1243_v52 = vmul.f32 0.03125, %v1203_v59 }
 0x2f8   : > { %1435 = vst.msk [vmem:[%s2440_s9 + $0x78] sm:$0xff] %vm354_vm0, %v1403_v23  ;;  %v1400_v57 = vadd.f32 %v2432_v33, %v1362_v30  ;;  %v1330_v8 = vmul.f32 %v1722_v44, %v2324_v4  ;;  %v1194_v41 = vpop.xlane.xlu0 %1193 }
 0x2f9   : > { %v1724_v25 = vpop.eup %1723  ;;  %v1401_v15 = vadd.f32 %v2432_v33, %v1363_v56  ;;  %1737 = vrsqrt.f32 %v1274_v45  ;;  %v1275_v5 = vadd.f32 1e-05, %v1243_v52  ;;  %v1240_v48 = vmul.f32 0.03125, %v1194_v41 }
 0x2fa   : > { %v1726_v28 = vpop.eup %1725  ;;  %1432 = vst.msk [vmem:[%s2440_s9 + $0x60] sm:$0xff] %vm354_vm0, %v1400_v57  ;;  %v1368_v13 = vmul.f32 %v2426_v19, %v1330_v8  ;;  %v1331_v29 = vmul.f32 %v1724_v25, %v2330_v12  ;;  %v1197_v7 = vpop.xlane.xlu1 %1196 }
 0x2fb   : > { %1433 = vst.msk [vmem:[%s2440_s9 + $0x68] sm:$0xff] %vm354_vm0, %v1401_v15  ;;  %v1328_v4 = vmul.f32 %v1726_v28, %v2336_v63  ;;  %1739 = vrsqrt.f32 %v1275_v5  ;;  %v1272_v58 = vadd.f32 1e-05, %v1240_v48  ;;  %v1241_v42 = vmul.f32 0.03125, %v1197_v7 }
 0x2fc   : > { %v1728_v2 = vpop.eup %1727  ;;  %v1406_v32 = vadd.f32 %v2432_v33, %v1368_v13  ;;  %v1369_v16 = vmul.f32 %v2426_v19, %v1331_v29  ;;  %v1206_v40 = vpop.xlane.xlu0 %1205 }
 0x2fd   : > { %v1366_v50 = vmul.f32 %v2426_v19, %v1328_v4  ;;  %v1329_v49 = vmul.f32 %v1728_v2, %v2342_v10  ;;  %1741 = vrsqrt.f32 %v1272_v58  ;;  %v1273_v12 = vadd.f32 1e-05, %v1241_v42 }
 0x2fe   : > { %1438 = vst.msk [vmem:[%s2440_s9 + $0x90] sm:$0xff] %vm354_vm0, %v1406_v32  ;;  %v1407_v63 = vadd.f32 %v2432_v33, %v1369_v16  ;;  %v1244_v34 = vmul.f32 0.03125, %v1206_v40 }
 0x2ff   : > { %v1730_v60 = vpop.eup %1729  ;;  %v1404_v21 = vadd.f32 %v2432_v33, %v1366_v50  ;;  %v1367_v6 = vmul.f32 %v2426_v19, %v1329_v49  ;;  %1743 = vrsqrt.f32 %v1273_v12 }
 0x300   : > { %v1732_v38 = vpop.eup %1731  ;;  %1439 = vst.msk [vmem:[%s2440_s9 + $0x98] sm:$0xff] %vm354_vm0, %v1407_v63  ;;  %v1334_v10 = vmul.f32 %v1730_v60, %v2348_v11  ;;  %v1276_v3 = vadd.f32 1e-05, %v1244_v34  ;;  %v1212_v1 = vpop.xlane.xlu0 %1211 }
 0x301   : > { %v1209_v61 = vpop.xlane.xlu1 %1208  ;;  %1436 = vst.msk [vmem:[%s2440_s9 + $0x80] sm:$0xff] %vm354_vm0, %v1404_v21  ;;  %v1405_v35 = vadd.f32 %v2432_v33, %v1367_v6  ;;  %v1335_v55 = vmul.f32 %v1732_v38, %v2354_v22  ;;  %v1246_v39 = vmul.f32 0.03125, %v1212_v1 }
 0x302   : > { %v1245_v27 = vmul.f32 0.03125, %v1209_v61  ;;  %v1734_v9 = vpop.eup %1733  ;;  %v1372_v26 = vmul.f32 %v2426_v19, %v1334_v10  ;;  %1745 = vrsqrt.f32 %v1276_v3 }
 0x303   : > { %1437 = vst.msk [vmem:[%s2440_s9 + $0x88] sm:$0xff] %vm354_vm0, %v1405_v35  ;;  %v1373_v11 = vmul.f32 %v2426_v19, %v1335_v55  ;;  %v1332_v24 = vmul.f32 %v1734_v9, %v2360_v14  ;;  %v1278_v17 = vadd.f32 1e-05, %v1246_v39 }
 0x304   : > { %v1277_v54 = vadd.f32 1e-05, %v1245_v27  ;;  %v1736_v46 = vpop.eup %1735  ;;  %v1410_v18 = vadd.f32 %v2432_v33, %v1372_v26 }
 0x305   : > { %v1215_v22 = vpop.xlane.xlu1 %1214  ;;  %v1411_v0 = vadd.f32 %v2432_v33, %v1373_v11  ;;  %v1370_v23 = vmul.f32 %v2426_v19, %v1332_v24  ;;  %v1333_v30 = vmul.f32 %v1736_v46, %v2366_v47  ;;  %1747 = vrsqrt.f32 %v1278_v17 }
 0x306   : > { %v1738_v59 = vpop.eup %1737  ;;  %1442 = vst.msk [vmem:[%s2440_s9 + $0xb0] sm:$0xff] %vm354_vm0, %v1410_v18  ;;  %1749 = vrsqrt.f32 %v1277_v54  ;;  %v1247_v14 = vmul.f32 0.03125, %v1215_v22 }
 0x307   : > { %1443 = vst.msk [vmem:[%s2440_s9 + $0xb8] sm:$0xff] %vm354_vm0, %v1411_v0  ;;  %v1408_v44 = vadd.f32 %v2432_v33, %v1370_v23  ;;  %v1371_v56 = vmul.f32 %v2426_v19, %v1333_v30  ;;  %v1338_v45 = vmul.f32 %v1738_v59, %v2372_v51 }
 0x308   : > { %v1740_v52 = vpop.eup %1739  ;;  %v1279_v57 = vadd.f32 1e-05, %v1247_v14 }
 0x309   : > { %1440 = vst.msk [vmem:[%s2440_s9 + $0xa0] sm:$0xff] %vm354_vm0, %v1408_v44  ;;  %v1409_v47 = vadd.f32 %v2432_v33, %v1371_v56  ;;  %v1376_v8 = vmul.f32 %v2426_v19, %v1338_v45  ;;  %v1339_v41 = vmul.f32 %v1740_v52, %v2378_v53 }
 0x30a   : > { %v1742_v25 = vpop.eup %1741  ;;  %1751 = vrsqrt.f32 %v1279_v57 }
 0x30b   : > { %1441 = vst.msk [vmem:[%s2440_s9 + $0xa8] sm:$0xff] %vm354_vm0, %v1409_v47  ;;  %v1414_v15 = vadd.f32 %v2432_v33, %v1376_v8  ;;  %v1377_v51 = vmul.f32 %v2426_v19, %v1339_v41  ;;  %v1336_v5 = vmul.f32 %v1742_v25, %v2384_v20 }
 0x30c   : > { %v1744_v48 = vpop.eup %1743 }
 0x30d   : > { %1446 = vst.msk [vmem:[%s2440_s9 + $0xd0] sm:$0xff] %vm354_vm0, %v1414_v15  ;;  %v1415_v28 = vadd.f32 %v2432_v33, %v1377_v51  ;;  %v1374_v13 = vmul.f32 %v2426_v19, %v1336_v5  ;;  %v1337_v53 = vmul.f32 %v1744_v48, %v2390_v43 }
 0x30f   : > { %v1746_v29 = vpop.eup %1745  ;;  %1447 = vst.msk [vmem:[%s2440_s9 + $0xd8] sm:$0xff] %vm354_vm0, %v1415_v28  ;;  %v1412_v7 = vadd.f32 %v2432_v33, %v1374_v13  ;;  %v1375_v4 = vmul.f32 %v2426_v19, %v1337_v53 }
 0x310   : > { %v1340_v20 = vmul.f32 %v1746_v29, %v2396_v62 }
 0x311   : > { %1444 = vst.msk [vmem:[%s2440_s9 + $0xc0] sm:$0xff] %vm354_vm0, %v1412_v7  ;;  %v1413_v58 = vadd.f32 %v2432_v33, %v1375_v4 }
 0x312   : > { %v1748_v42 = vpop.eup %1747  ;;  %v1378_v2 = vmul.f32 %v2426_v19, %v1340_v20 }
 0x313   : > { %v1750_v43 = vpop.eup %1749  ;;  %1445 = vst.msk [vmem:[%s2440_s9 + $0xc8] sm:$0xff] %vm354_vm0, %v1413_v58  ;;  %v1342_v32 = vmul.f32 %v1748_v42, %v2405_v36 }
 0x314   : > { %v1416_v16 = vadd.f32 %v2432_v33, %v1378_v2  ;;  %v1341_v40 = vmul.f32 %v1750_v43, %v2408_v31 }
 0x315   : > { %v1380_v62 = vmul.f32 %v2426_v19, %v1342_v32 }
 0x316   : > { %1448 = vst.msk [vmem:[%s2440_s9 + $0xe0] sm:$0xff] %vm354_vm0, %v1416_v16  ;;  %v1379_v50 = vmul.f32 %v2426_v19, %v1341_v40 }
 0x317   : > { %v1752_v49 = vpop.eup %1751  ;;  %v1418_v12 = vadd.f32 %v2432_v33, %v1380_v62 }
 0x318   : > { %v1417_v63 = vadd.f32 %v2432_v33, %v1379_v50  ;;  %v1343_v34 = vmul.f32 %v1752_v49, %v2416_v37 }
 0x319   : > { %1450 = vst.msk [vmem:[%s2440_s9 + $0xf0] sm:$0xff] %vm354_vm0, %v1418_v12 }
 0x31a   : > { %1449 = vst.msk [vmem:[%s2440_s9 + $0xe8] sm:$0xff] %vm354_vm0, %v1417_v63  ;;  %v1381_v36 = vmul.f32 %v2426_v19, %v1343_v34 }
 0x31c   : > { %v1419_v31 = vadd.f32 %v2432_v33, %v1381_v36 }
 0x31e   : > { %1451 = vst.msk [vmem:[%s2440_s9 + $0xf8] sm:$0xff] %vm354_vm0, %v1419_v31 }
 0x31f PF: > { %s17_s24 = sadd.s32 1, %s1759_s24  }
 0x320   : > { %p14_p4 = scmp.ge.s32.totalorder %s17_s24, 4  }
 0x322   :  { %16 = sbr.rel (!%p14_p4) target bundleno = 1 (0x1), region = 78 }

// kernel: detr_forward.13
= control target key start
LH: loop header
LB: loop body
LE: loop exit
PB: predicated region body
PF: predicated region fallthrough
CT: control target
= control target key end

     0   :  { %s1593_s13 = smov 0   ;;  %s1595_s14 = smov 0   ;;  %s1767_s0 = inlined_call_operand.vmem [shape: f32[2,8,32], index: 0, kind: input, shape index: {}, may-alias: {0,1}]   ;;  %s1768_s1 = inlined_call_operand.vmem [shape: f32[2,8,32], index: 1, kind: input, shape index: {}, may-alias: {0,1}]   ;;  %s1769_s2 = inlined_call_operand.vmem [shape: f32[8,32], index: 2, kind: input, shape index: {}, may-alias: {2,3}]   ;;  %s1770_s3 = inlined_call_operand.vmem [shape: f32[8,32], index: 3, kind: input, shape index: {}, may-alias: {2,3}]   ;;  %s1771_s4 = inlined_call_operand.vmem [shape: bf16[3,32,32], index: 4, kind: input, shape index: {}]   ;;  %s1772_s5 = inlined_call_operand.vmem [shape: f32[3,1,32], index: 5, kind: input, shape index: {}]   ;;  %s1773_s6 = inlined_call_operand.vmem [shape: bf16[32,32], index: 6, kind: input, shape index: {}]   ;;  %s1774_s7 = inlined_call_operand.vmem [shape: f32[1,32], index: 7, kind: input, shape index: {}]   ;;  %s1775_s8 = inlined_call_operand.vmem [shape: f32[1,32], index: 8, kind: input, shape index: {}]   ;;  %s1776_s9 = inlined_call_operand.vmem [shape: f32[1,32], index: 9, kind: input, shape index: {}]   ;;  %s1777_s10 = inlined_call_operand.vmem [shape: f32[2,8,32], index: 10, kind: output, shape index: {}]  }
   0x1   :  { %s1597_s15 = smov 0  }
   0x2 LB: > { %s32_s16 = sadd.s32 1, %s1524_s14  ;;  %p1298_p0 = scmp.ge.s32.totalorder %s1528_s15, 1  ;;  %s1528_s15 = sphi %s1597_s15, %s20_s15   ;;  %s1524_s14 = sphi %s1595_s14, %s1779_s14   ;;  %s1520_s13 = sphi %s1593_s13, %s1778_s13  }
   0x3   : > { %p34_p1 = scmp.ge.s32.totalorder %s32_s16, 2  ;;  %p348_p2 = scmp.lt.s32.totalorder %s1528_s15, 3 }
   0x5   : > { %s1781_s16 = smov (%p34_p1, %s32_s16), 0  ;;  %p349_p3 = pnand %p1298_p0, %p348_p2 }
   0x6   : > { %p398_p4 = scmp.lt.s32.totalorder (!%p349_p3), %s1520_s13, 1  ;;  %s1532_s23 = smov (!%p349_p3), 112  }
   0x7   : > { %352 = sbr.rel (%p349_p3) target bundleno = 1681 (0x691), region = 60  ;;  %s1533_s24 = smov (!%p349_p3), 120  }
   0x8   : > { %s1534_s25 = smov (!%p349_p3), 104   ;;  %s1536_s21 = smov (!%p349_p3), 16  }
   0x9   : > { %s1537_s22 = smov (!%p349_p3), 24  }
   0xc   : > { %v1480_v0 = vld [vmem:[%s1771_s4 + $0x18] sm:$0xff]   ;;  %v1530_v1 = vmov 0.0   ;;  %v1481_v2 = vld [vmem:[%s1771_s4 + $0x8] sm:$0xff]   ;;  %v1482_v3 = vld [vmem:[%s1771_s4 + $0x10] sm:$0xff]   ;;  %vm1531_vm0 = vmmov 0   ;;  %s1783_s13 = smov (!%p398_p4, %s1520_s13), 1 }
   0xd   : > { %1376 = vmatprep.subr.bf16.mxu1 %v1530_v1  ;;  %1368 = vmatprep.subr.bf16.mxu0 %v1530_v1  ;;  %v1483_v4 = vld [vmem:[%s1771_s4] sm:$0xff]   ;;  %s1634_s27 = sshll.u32 %s1783_s13, 3  ;;  %vm449_vm1 = vcmask 261120   ;;  %vm643_vm2 = vcmask 64512   ;;  %v1484_v28 = vld [vmem:[%s1771_s4 + $0x28] sm:$0xff]   ;;  %vm705_vm3 = vcmask 1043456  }
   0xe   : > { %1377 = vmatpush3.bf16.msra.mxu1 %v1480_v0  ;;  %1380 = vmatprep.mubr.msk.bf16.mxu1 %vm1531_vm0, %v1530_v1  ;;  %v493_v5 = vld [vmem:[%s1770_s3] sm:$0xff]  ;;  %s408_s12 = scalar_lea.vmem %s1768_s1, %s1634_s27  ;;  %s404_s19 = scalar_lea.vmem %s1767_s0, %s1634_s27  ;;  %vm1095_vm4 = vcmask 130048   ;;  %vm1097_vm5 = vcmask 195584  }
   0xf   : > { %1369 = vmatpush3.bf16.msra.mxu0 %v1481_v2  ;;  %1378 = vmatprep.subr.bf16.mxu1 %v1530_v1  ;;  %v423_v6 = vld [vmem:[%s1769_s2] sm:$0xff] }
  0x10   : > { %1370 = vmatprep.subr.bf16.mxu0 %v1530_v1  ;;  %1372 = vmatprep.mubr.msk.bf16.mxu0 %vm1531_vm0, %v1530_v1  ;;  %v422_v7 = vld [vmem:[%s408_s12] sm:$0xff]  ;;  %s419_s12 = scalar_lea.vmem %s1777_s10, %s1634_s27 }
  0x11   : > { %v494_v8 = vadd.f32 %v493_v5, %v422_v7  ;;  %v1649_v9 = vld [vmem:[%s404_s19] sm:$0xff]  ;;  %v564_v30 = vpack.c.bf16 %v422_v7, %v422_v7  ;;  %s1535_s19 = smov 8  }
  0x12   : > { %1379 = vmatpush3.bf16.msra.mxu1 %v1482_v3  ;;  %v424_v10 = vadd.f32 %v423_v6, %v1649_v9  ;;  %v1311_v13 = vld [vmem:[%s1772_s5 + $0x1] ss:$0 sm:$0xff]  ;;  %v1302_v14 = vld [vmem:[%s1772_s5] ss:$0 sm:$0xff]  ;;  %v1320_v45 = vld [vmem:[%s1772_s5 + $0x2] ss:$0 sm:$0xff] }
  0x13   : > { %1371 = vmatpush3.bf16.msra.mxu0 %v1483_v4  ;;  %1392 = vmatprep.subr.bf16.mxu1 %v1530_v1  ;;  %v495_v11 = vpack.c.bf16 %v494_v8, %v494_v8  ;;  %v1485_v29 = vld [vmem:[%s1771_s4 + $0x20] sm:$0xff]  }
  0x14   : > { %1384 = vmatprep.subr.bf16.mxu0 %v1530_v1  ;;  %v425_v12 = vpack.c.bf16 %v424_v10, %v424_v10 }
  0x15   : > { %1381 = vmatmul.mubr.msk.bf16.vlgmr.msra.gmra.mxu1 %vm449_vm1, %v495_v11 }
  0x16   : > { %1373 = vmatmul.mubr.msk.bf16.vlgmr.msra.gmra.mxu0 %vm449_vm1, %v425_v12  ;;  %1394 = vmatprep.mubr.msk.bf16.mxu1 %vm1531_vm0, %v1530_v1 }
  0x17   : > { %1388 = vmatprep.mubr.msk.bf16.mxu0 %vm1531_vm0, %v1530_v1  ;;  %1385 = vmatpush3.bf16.msra.mxu0 %v1484_v28 }
  0x18   : > { %1386 = vmatprep.subr.bf16.mxu0 %v1530_v1 }
  0x1b   : > { %1387 = vmatpush3.bf16.msra.mxu0 %v1485_v29 }
  0x1c   : > { %1398 = vmatprep.subr.bf16.mxu0 %v1530_v1 }
  0x1e   : > { %1389 = vmatmul.mubr.msk.bf16.vlgmr.msra.gmra.mxu0 %vm449_vm1, %v564_v30 }
  0x1f   : > { %1400 = vmatprep.mubr.msk.bf16.mxu0 %vm1531_vm0, %v1530_v1 }
  0xd5   : > { %v558_v15 = vpop.f32.mrf.mxu1 }
  0xd6   : > { %v559_v16 = vadd.f32 %v1311_v13, %v558_v15  ;;  %v487_v17 = vpop.f32.mrf.mxu0 }
  0xd7   : > { %v488_v18 = vadd.f32 %v1302_v14, %v487_v17  ;;  %v1382_v19 = vpop.f32.mrf.mxu1 }
  0xd8   : > { %v641_v20 = vpack.c.bf16 %v559_v16, %v559_v16  ;;  %v1374_v21 = vpop.f32.mrf.mxu0 }
  0xd9   : > { %v561_v22 = vpop.f32.mrf.mxu1  ;;  %v640_v23 = vpack.c.bf16 %v488_v18, %v488_v18 }
  0xda   : > { %864 = vrot.lane.b32.xlu1 %v641_v20, %s1532_s23  ;;  %753 = vrot.lane.b32.xlu0 %v641_v20, %s1533_s24  ;;  %v490_v24 = vpop.f32.mrf.mxu0  ;;  %v648_v25 = vsel %vm643_vm2, %v641_v20, 0 }
  0xdb   : > { %v1383_v26 = vpop.f32.mrf.mxu1  ;;  %1393 = vmatpush3.bf16.xpose.msra.mxu1 %v648_v25 }
  0xdc   : > { %v1375_v27 = vpop.f32.mrf.mxu0  ;;  %1404 = vmatprep.subr.bf16.mxu1 %v1530_v1 }
  0xde   : > { %862 = vrot.lane.b32.xlu1 %v640_v23, %s1532_s23  ;;  %750 = vrot.lane.b32.xlu0 %v640_v23, %s1533_s24  ;;  %v627_v46 = vpop.f32.mrf.mxu0 }
  0xdf   : > { %v628_v47 = vadd.f32 %v1320_v45, %v627_v46 }
  0xe0   : > { %v1390_v48 = vpop.f32.mrf.mxu0 }
  0xe1   : > { %v642_v49 = vpack.c.bf16 %v628_v47, %v628_v47 }
  0xe2   : > { %972 = vrot.lane.b32.xlu1 %v640_v23, %s1534_s25  ;;  %974 = vrot.lane.b32.xlu0 %v641_v20, %s1534_s25  ;;  %v630_v50 = vpop.f32.mrf.mxu0 }
  0xe3   : > { %1395 = vmatmul.mubr.msk.bf16.vlgmr.msra.gmra.mxu1 %vm643_vm2, %v640_v23  ;;  %v707_v51 = vsel %vm705_vm3, %v642_v49, 0 }
  0xe4   : > { %1406 = vmatprep.mubr.msk.bf16.mxu1 %vm1531_vm0, %v1530_v1  ;;  %v1391_v52 = vpop.f32.mrf.mxu0  ;;  %1399 = vmatpush3.bf16.msra.mxu0 %v707_v51 }
  0xe5   : > { %1410 = vmatprep.subr.bf16.mxu0 %v1530_v1  ;;  %v1486_v52 = vld [vmem:[%s1773_s6 + $0x8] sm:$0xff]  }
 0x14c   : > { %v754_v31 = vpop.permute.xlu0 %753  ;;  %v865_v33 = vpop.permute.xlu1 %864 }
 0x14d   : > { %v759_v32 = vsel %vm643_vm2, %v754_v31, 0  ;;  %v870_v35 = vsel %vm643_vm2, %v865_v33, 0 }
 0x14e   : > { %1405 = vmatpush3.bf16.xpose.msra.mxu1 %v759_v32 }
 0x14f   : > { %1416 = vmatprep.subr.bf16.mxu1 %v1530_v1 }
 0x150   : > { %v751_v34 = vpop.permute.xlu0 %750  ;;  %v863_v37 = vpop.permute.xlu1 %862 }
 0x154   : > { %v975_v36 = vpop.permute.xlu0 %974  ;;  %v973_v39 = vpop.permute.xlu1 %972 }
 0x155   : > { %1407 = vmatmul.mubr.msk.bf16.vlgmr.msra.gmra.mxu1 %vm643_vm2, %v751_v34  ;;  %v980_v38 = vsel %vm643_vm2, %v975_v36, 0 }
 0x156   : > { %1417 = vmatpush3.bf16.xpose.msra.mxu1 %v870_v35  ;;  %1418 = vmatprep.mubr.msk.bf16.mxu1 %vm1531_vm0, %v1530_v1 }
 0x157   : > { %1428 = vmatprep.subr.bf16.mxu1 %v1530_v1 }
 0x15d   : > { %1419 = vmatmul.mubr.msk.bf16.vlgmr.msra.gmra.mxu1 %vm643_vm2, %v863_v37 }
 0x15e   : > { %1429 = vmatpush3.bf16.xpose.msra.mxu1 %v980_v38  ;;  %1430 = vmatprep.mubr.msk.bf16.mxu1 %vm1531_vm0, %v1530_v1 }
 0x15f   : > { %1440 = vmatprep.subr.bf16.mxu1 %v1530_v1 }
 0x165   : > { %1431 = vmatmul.mubr.msk.bf16.vlgmr.msra.gmra.mxu1 %vm643_vm2, %v973_v39 }
 0x166   : > { %1444 = vmatprep.mubr.msk.bf16.mxu1 %vm1531_vm0, %v1530_v1  ;;  %1441 = vmatpush3.bf16.msra.mxu1 %v1486_v52 }
 0x167   : > { %1442 = vmatprep.subr.bf16.mxu1 %v1530_v1 }
 0x1a3   : > { %v684_v40 = vpop.f32.mrf.mxu1 }
 0x1a4   : > { %v690_v41 = vsel %vm643_vm2, %v684_v40, -inf }
 0x1a5   : > { %691 = vmax.xlane.f32.xlu0 %v690_v41  ;;  %v1396_v42 = vpop.f32.mrf.mxu1 }
 0x1a7   : > { %v687_v43 = vpop.f32.mrf.mxu1 }
 0x1a9   : > { %v1397_v44 = vpop.f32.mrf.mxu1 }
 0x215   : > { %v795_v53 = vpop.f32.mrf.mxu1 }
 0x216   : > { %v801_v54 = vsel %vm643_vm2, %v795_v53, -inf }
 0x217   : > { %802 = vmax.xlane.f32.xlu1 %v801_v54  ;;  %v1408_v55 = vpop.f32.mrf.mxu1 }
 0x218   : > { %v1487_v55 = vld [vmem:[%s1773_s6] sm:$0xff]  }
 0x219   : > { %v798_v56 = vpop.f32.mrf.mxu1  ;;  %1443 = vmatpush3.bf16.msra.mxu1 %v1487_v55 }
 0x21b   : > { %v1409_v57 = vpop.f32.mrf.mxu1 }
 0x21d   : > { %v906_v58 = vpop.f32.mrf.mxu1 }
 0x21e   : > { %v912_v59 = vsel %vm643_vm2, %v906_v58, -inf }
 0x21f   : > { %913 = vmax.xlane.f32.xlu0 %v912_v59  ;;  %v1420_v60 = vpop.f32.mrf.mxu1 }
 0x221   : > { %v909_v61 = vpop.f32.mrf.mxu1 }
 0x223   : > { %v1421_v62 = vpop.f32.mrf.mxu1 }
 0x225   : > { %v1016_v63 = vpop.f32.mrf.mxu1 }
 0x226   : > { %v1022_v0 = vsel %vm643_vm2, %v1016_v63, -inf }
 0x227   : > { %1023 = vmax.xlane.f32.xlu0 %v1022_v0  ;;  %v1432_v2 = vpop.f32.mrf.mxu1 }
 0x229   : > { %v1019_v3 = vpop.f32.mrf.mxu1 }
 0x22b   : > { %v1433_v4 = vpop.f32.mrf.mxu1 }
 0x22e   : > { %v692_v5 = vpop.xlane.xlu0 %691 }
 0x22f   : > { %v693_v6 = vsub.f32 %v684_v40, %v692_v5 }
 0x231   : > { %v694_v7 = vmul.f32 1.442695, %v693_v6 }
 0x233   : > { %1488 = vpow2.f32 %v694_v7 }
 0x240   : > { %v1489_v8 = vpop.eup %1488 }
 0x241   : > { %v696_v10 = vsel %vm643_vm2, %v1489_v8, 0.0 }
 0x242   : > { %697 = vadd.xlane.f32.xlu1 %v696_v10  ;;  %v1332_v10 = vld [vmem:[%s1774_s7] ss:$0 sm:$0xff] }
 0x253   : > { %814 = vrot.lane.b32.xlu1 %v642_v49, %s1533_s24 }
 0x2a0   : > { %v803_v11 = vpop.xlane.xlu1 %802 }
 0x2a1   : > { %v804_v12 = vsub.f32 %v795_v53, %v803_v11 }
 0x2a3   : > { %v805_v13 = vmul.f32 1.442695, %v804_v12 }
 0x2a5   : > { %1490 = vpow2.f32 %v805_v13 }
 0x2a8   : > { %v914_v14 = vpop.xlane.xlu0 %913 }
 0x2a9   : > { %v915_v15 = vsub.f32 %v906_v58, %v914_v14 }
 0x2ab   : > { %v916_v16 = vmul.f32 1.442695, %v915_v15 }
 0x2ad   : > { %1492 = vpow2.f32 %v916_v16 }
 0x2b0   : > { %v1024_v17 = vpop.xlane.xlu0 %1023 }
 0x2b1   : > { %v1025_v18 = vsub.f32 %v1016_v63, %v1024_v17 }
 0x2b2   : > { %v1491_v19 = vpop.eup %1490 }
 0x2b3   : > { %v1026_v20 = vmul.f32 1.442695, %v1025_v18  ;;  %v807_v21 = vsel %vm643_vm2, %v1491_v19, 0.0 }
 0x2b4   : > { %808 = vadd.xlane.f32.xlu0 %v807_v21 }
 0x2b5   : > { %1494 = vpow2.f32 %v1026_v20 }
 0x2ba   : > { %v1493_v22 = vpop.eup %1492 }
 0x2bb   : > { %v918_v23 = vsel %vm643_vm2, %v1493_v22, 0.0 }
 0x2bc   : > { %919 = vadd.xlane.f32.xlu1 %v918_v23 }
 0x2c2   : > { %v1495_v24 = vpop.eup %1494 }
 0x2c3   : > { %v1028_v25 = vsel %vm643_vm2, %v1495_v24, 0.0 }
 0x2c4   : > { %1029 = vadd.xlane.f32.xlu0 %v1028_v25 }
 0x2cb   : > { %v698_v26 = vpop.xlane.xlu1 %697 }
 0x2cc   : > { %1496 = vrcp.f32 %v698_v26 }
 0x2cd   : > { %1034 = vrot.lane.b32.xlu1 %v642_v49, %s1534_s25 }
 0x2cf   : > { %v815_v28 = vpop.permute.xlu1 %814 }
 0x2d0   : > { %v820_v31 = vsel %vm705_vm3, %v815_v28, 0  ;;  %v1337_v28 = vld [vmem:[%s1776_s9] ss:$0 sm:$0xff] }
 0x2d9   : > { %v1497_v27 = vpop.eup %1496 }
 0x2da   : > { %924 = vrot.lane.b32.xlu0 %v642_v49, %s1532_s23  ;;  %v700_v29 = vmul.f32 %v1497_v27, %v1489_v8 }
 0x2dc   : > { %v701_v30 = vpack.c.bf16 %v700_v29, %v700_v29 }
 0x2de   : > { %1401 = vmatmul.mubr.msk.bf16.vlgmr.msra.gmra.mxu0 %vm643_vm2, %v701_v30 }
 0x2df   : > { %1411 = vmatpush3.bf16.msra.mxu0 %v820_v31  ;;  %1412 = vmatprep.mubr.msk.bf16.mxu0 %vm1531_vm0, %v1530_v1 }
 0x2e0   : > { %1422 = vmatprep.subr.bf16.mxu0 %v1530_v1 }
 0x33d   : > { %v809_v32 = vpop.xlane.xlu0 %808 }
 0x33e   : > { %1498 = vrcp.f32 %v809_v32 }
 0x345   : > { %v920_v33 = vpop.xlane.xlu1 %919 }
 0x346   : > { %1500 = vrcp.f32 %v920_v33 }
 0x349   : > { %v1035_v42 = vpop.permute.xlu1 %1034 }
 0x34a   : > { %v1040_v44 = vsel %vm705_vm3, %v1035_v42, 0 }
 0x34b   : > { %v1499_v34 = vpop.eup %1498 }
 0x34c   : > { %v811_v35 = vmul.f32 %v1499_v34, %v1491_v19 }
 0x34d   : > { %v1030_v36 = vpop.xlane.xlu0 %1029 }
 0x34e   : > { %1502 = vrcp.f32 %v1030_v36  ;;  %v812_v37 = vpack.c.bf16 %v811_v35, %v811_v35 }
 0x350   : > { %1413 = vmatmul.mubr.msk.bf16.vlgmr.msra.gmra.mxu0 %vm643_vm2, %v812_v37 }
 0x351   : > { %v925_v38 = vpop.permute.xlu0 %924  ;;  %1424 = vmatprep.mubr.msk.bf16.mxu0 %vm1531_vm0, %v1530_v1 }
 0x352   : > { %v930_v39 = vsel %vm705_vm3, %v925_v38, 0 }
 0x353   : > { %v1501_v40 = vpop.eup %1500  ;;  %1423 = vmatpush3.bf16.msra.mxu0 %v930_v39 }
 0x354   : > { %1434 = vmatprep.subr.bf16.mxu0 %v1530_v1  ;;  %v922_v41 = vmul.f32 %v1501_v40, %v1493_v22 }
 0x356   : > { %v923_v43 = vpack.c.bf16 %v922_v41, %v922_v41 }
 0x358   : > { %1425 = vmatmul.mubr.msk.bf16.vlgmr.msra.gmra.mxu0 %vm643_vm2, %v923_v43 }
 0x359   : > { %1435 = vmatpush3.bf16.msra.mxu0 %v1040_v44  ;;  %1436 = vmatprep.mubr.msk.bf16.mxu0 %vm1531_vm0, %v1530_v1 }
 0x35b   : > { %v1503_v45 = vpop.eup %1502 }
 0x35c   : > { %v1032_v46 = vmul.f32 %v1503_v45, %v1495_v24 }
 0x35e   : > { %v1033_v47 = vpack.c.bf16 %v1032_v46, %v1032_v46 }
 0x360   : > { %1437 = vmatmul.mubr.msk.bf16.vlgmr.msra.gmra.mxu0 %vm643_vm2, %v1033_v47 }
 0x39e   : > { %v743_v48 = vpop.f32.mrf.mxu0 }
 0x3a0   : > { %v1402_v49 = vpop.f32.mrf.mxu0 }
 0x3a2   : > { %v746_v50 = vpop.f32.mrf.mxu0 }
 0x3a4   : > { %v1403_v51 = vpop.f32.mrf.mxu0 }
 0x410   : > { %v856_v53 = vpop.f32.mrf.mxu0 }
 0x411   : > { %1083 = vrot.lane.b32.xlu1 %v856_v53, %s1535_s19 }
 0x412   : > { %v1414_v54 = vpop.f32.mrf.mxu0 }
 0x414   : > { %v859_v56 = vpop.f32.mrf.mxu0 }
 0x416   : > { %v1415_v57 = vpop.f32.mrf.mxu0 }
 0x418   : > { %v966_v58 = vpop.f32.mrf.mxu0 }
 0x419   : > { %1087 = vrot.lane.b32.xlu0 %v966_v58, %s1536_s21 }
 0x41a   : > { %v1426_v59 = vpop.f32.mrf.mxu0 }
 0x41c   : > { %v969_v60 = vpop.f32.mrf.mxu0 }
 0x41e   : > { %v1427_v61 = vpop.f32.mrf.mxu0 }
 0x420   : > { %v1076_v62 = vpop.f32.mrf.mxu0 }
 0x421   : > { %1091 = vrot.lane.b32.xlu1 %v1076_v62, %s1537_s22 }
 0x422   : > { %v1438_v1 = vpop.f32.mrf.mxu0 }
 0x424   : > { %v1079_v63 = vpop.f32.mrf.mxu0 }
 0x426   : > { %v1439_v0 = vpop.f32.mrf.mxu0 }
 0x483   : > { %v1084_v2 = vpop.permute.xlu1 %1083 }
 0x484   : > { %v1094_v4 = vsel %vm643_vm2, %v743_v48, %v1084_v2 }
 0x48b   : > { %v1088_v3 = vpop.permute.xlu0 %1087 }
 0x48c   : > { %v1096_v5 = vsel %vm1095_vm4, %v1094_v4, %v1088_v3 }
 0x493   : > { %v1092_v6 = vpop.permute.xlu1 %1091 }
 0x494   : > { %v1098_v7 = vsel %vm1097_vm5, %v1096_v5, %v1092_v6 }
 0x495   : > { %v1099_v8 = vpack.c.bf16 %v1098_v7, %v1098_v7 }
 0x497   : > { %1445 = vmatmul.mubr.msk.bf16.vlgmr.msra.gmra.mxu1 %vm449_vm1, %v1099_v8 }
 0x557   : > { %v1155_v11 = vpop.f32.mrf.mxu1 }
 0x558   : > { %v1156_v12 = vadd.f32 %v1332_v10, %v1155_v11 }
 0x559   : > { %v1446_v13 = vpop.f32.mrf.mxu1 }
 0x55a   : > { %v1161_v14 = vadd.f32 %v1156_v12, %v1649_v9  ;;  %v1336_v9 = vld [vmem:[%s1775_s8] ss:$0 sm:$0xff] }
 0x55b   : > { %v1158_v15 = vpop.f32.mrf.mxu1 }
 0x55c   : > { %v1162_v16 = vsel %vm449_vm1, %v1161_v14, 0.0 }
 0x55d   : > { %1163 = vadd.xlane.f32.xlu0 %v1162_v16  ;;  %v1447_v17 = vpop.f32.mrf.mxu1 }
 0x5e6   : > { %v1164_v18 = vpop.xlane.xlu0 %1163 }
 0x5e7   : > { %v1166_v19 = vmul.f32 0.03125, %v1164_v18 }
 0x5e9   : > { %v1167_v20 = vsub.f32 %v1161_v14, %v1166_v19 }
 0x5eb   : > { %v1168_v21 = vmul.f32 %v1167_v20, %v1167_v20 }
 0x5ed   : > { %v1169_v22 = vsel %vm449_vm1, %v1168_v21, 0.0 }
 0x5ee   : > { %1170 = vadd.xlane.f32.xlu1 %v1169_v22 }
 0x677   : > { %v1171_v23 = vpop.xlane.xlu1 %1170 }
 0x678   : > { %v1172_v24 = vmul.f32 0.03125, %v1171_v23 }
 0x67a   : > { %v1173_v25 = vadd.f32 1e-05, %v1172_v24 }
 0x67c   : > { %1504 = vrsqrt.f32 %v1173_v25 }
 0x689   : > { %v1505_v26 = vpop.eup %1504 }
 0x68a   : > { %v1175_v27 = vmul.f32 %v1505_v26, %v1167_v20 }
 0x68c   : > { %v1182_v29 = vmul.f32 %v1336_v9, %v1175_v27 }
 0x68e   : > { %v1189_v30 = vadd.f32 %v1337_v28, %v1182_v29 }
 0x690   : > { %1190 = vst.msk [vmem:[%s419_s12] sm:$0xff] %vm449_vm1, %v1189_v30 }
 0x691 PF: > { %s20_s15 = sadd.s32 1, %s1528_s15   ;;  %s1778_s13 = smov %s1524_s14 }
 0x692   : > { %p17_p5 = scmp.ge.s32.totalorder %s20_s15, 4   ;;  %s1779_s14 = smov %s1781_s16 }
 0x694   :  { %19 = sbr.rel (!%p17_p5) target bundleno = 2 (0x2), region = 100 }

// kernel: detr_forward.11
= control target key start
LH: loop header
LB: loop body
LE: loop exit
PB: predicated region body
PF: predicated region fallthrough
CT: control target
= control target key end

     0   :  { %s5968_s13 = smov 0   ;;  %s5970_s14 = smov 0   ;;  %s9057_s0 = inlined_call_operand.vmem [shape: f32[2,256,32], index: 0, kind: input, shape index: {}, may-alias: {0,1}]   ;;  %s9058_s1 = inlined_call_operand.vmem [shape: f32[2,256,32], index: 1, kind: input, shape index: {}, may-alias: {0,1}]   ;;  %s9059_s2 = inlined_call_operand.vmem [shape: f32[256,32], index: 2, kind: input, shape index: {}, may-alias: {2,3}]   ;;  %s9060_s3 = inlined_call_operand.vmem [shape: f32[256,32], index: 3, kind: input, shape index: {}, may-alias: {2,3}]   ;;  %s9061_s4 = inlined_call_operand.vmem [shape: bf16[3,32,32], index: 4, kind: input, shape index: {}]   ;;  %s9062_s5 = inlined_call_operand.vmem [shape: f32[3,1,32], index: 5, kind: input, shape index: {}]   ;;  %s9063_s6 = inlined_call_operand.vmem [shape: bf16[32,32], index: 6, kind: input, shape index: {}]   ;;  %s9064_s7 = inlined_call_operand.vmem [shape: f32[1,32], index: 7, kind: input, shape index: {}]   ;;  %s9065_s8 = inlined_call_operand.vmem [shape: f32[1,32], index: 8, kind: input, shape index: {}]   ;;  %s9066_s9 = inlined_call_operand.vmem [shape: f32[1,32], index: 9, kind: input, shape index: {}]   ;;  %s9067_s10 = inlined_call_operand.vmem [shape: f32[2,256,32], index: 10, kind: output, shape index: {}]  }
   0x1   :  { %s5972_s15 = smov 0   ;;  %s5974_s16 = smov 0  }
   0x2   :  { %s5976_s17 = smov 0  }
   0x3 LB: > { %s29_s18 = sadd.s32 1, %s5897_s15  ;;  %s32_s19 = sadd.s32 1, %s5901_s16  ;;  %s5905_s17 = sphi %s5976_s17, %s20_s17   ;;  %s5901_s16 = sphi %s5974_s16, %s9575_s16   ;;  %s5897_s15 = sphi %s5972_s15, %s9574_s15   ;;  %s5893_s14 = sphi %s5970_s14, %s9573_s14   ;;  %s5889_s13 = sphi %s5968_s13, %s9572_s13  }
   0x4   : > { %p30_p0 = scmp.ge.s32.totalorder %s29_s18, 2  ;;  %p4559_p1 = scmp.ge.s32.totalorder %s5905_s17, 1 }
   0x5   : > { %p354_p2 = scmp.lt.s32.totalorder %s5905_s17, 5 }
   0x6   : > { %s9577_s18 = smov (%p30_p0, %s29_s18), 0  ;;  %s9579_s19 = smov (!%p30_p0, %s32_s19), %s5901_s16 }
   0x7   : > { %p355_p3 = pnand %p4559_p1, %p354_p2  ;;  %p34_p4 = scmp.ge.s32.totalorder %s9579_s19, 2 }
   0x9   : > { %s9581_s19 = smov (%p34_p4, %s9579_s19), 0  ;;  %358 = sbr.rel (%p355_p3) target bundleno = 2171 (0x87b), region = 60 }
   0xe   : > { %v5427_v0 = vld [vmem:[%s9061_s4 + $0x18] sm:$0xff]   ;;  %p411_p5 = scmp.lt.s32.totalorder %s5893_s14, 1  ;;  %v5428_v1 = vld [vmem:[%s9061_s4 + $0x8] sm:$0xff]   ;;  %v5429_v2 = vld [vmem:[%s9061_s4 + $0x10] sm:$0xff]   ;;  %s4560_s28 = sshll.u32 %s5889_s13, 4  ;;  %vm553_vm0 = vcmask 261120  }
   0xf   : > { %5137 = vmatprep.subr.bf16.mxu1 %v5427_v0  ;;  %5117 = vmatprep.subr.bf16.mxu0 %v5428_v1  ;;  %v5430_v3 = vld [vmem:[%s9061_s4] sm:$0xff]   ;;  %v676_v5 = vld [vmem:[%s9060_s3 + $0x8] sm:$0xff]  ;;  %v677_v6 = vld [vmem:[%s9060_s3 + $0x10] sm:$0xff]  ;;  %p413_p6 = scmp.lt.s32.totalorder %s4560_s28, 31  ;;  %s5907_s21 = smov 120   ;;  %vm1286_vm1 = vcmask 64512  }
  0x10   : > { %s9583_s14 = smov (!%p411_p5, %s5893_s14), 1  ;;  %5138 = vmatpush3.bf16.msra.mxu1 %v5427_v0  ;;  %5118 = vmatpush3.bf16.msra.mxu0 %v5428_v1  ;;  %v675_v4 = vld [vmem:[%s9060_s3] sm:$0xff]  ;;  %v678_v7 = vld [vmem:[%s9060_s3 + $0x18] sm:$0xff]  ;;  %v680_v9 = vld [vmem:[%s9060_s3 + $0x28] sm:$0xff]  ;;  %s5908_s22 = smov 112   ;;  %vm3975_vm2 = vcmask 130048  }
  0x11   : > { %5139 = vmatprep.subr.bf16.mxu1 %v5429_v2  ;;  %s4676_s29 = sshll.u32 %s9583_s14, 8  ;;  %5119 = vmatprep.subr.bf16.mxu0 %v5430_v3  ;;  %s4561_s27 = sshll.u32 %s9583_s14, 5  ;;  %v679_v8 = vld [vmem:[%s9060_s3 + $0x20] sm:$0xff]  ;;  %v681_v23 = vld [vmem:[%s9060_s3 + $0x30] sm:$0xff]  ;;  %v682_v26 = vld [vmem:[%s9060_s3 + $0x38] sm:$0xff]  ;;  %vm3992_vm3 = vcmask 195584  }
  0x12   : > { %s6028_s13 = scalar_lea.vmem %s9058_s1, %s4676_s29  ;;  %s9585_s28 = smov (!%p413_p6, %s4560_s28), 31  ;;  %v683_v57 = vld [vmem:[%s9060_s3 + $0x40] sm:$0xff]  ;;  %v684_v58 = vld [vmem:[%s9060_s3 + $0x48] sm:$0xff]  ;;  %v685_v1 = vld [vmem:[%s9060_s3 + $0x50] sm:$0xff] }
  0x13   : > { %v6041_v10 = vld [vmem:[%s6028_s13] sm:$0xff]  ;;  %v6044_v11 = vld [vmem:[%s6028_s13 + $0x8] sm:$0xff]  ;;  %v6047_v12 = vld [vmem:[%s6028_s13 + $0x10] sm:$0xff]  ;;  %s6062_s14 = sadd.s32 %s4561_s27, %s9585_s28  ;;  %s4566_s29 = sshll.u32 %s9585_s28, 3 }
  0x14   : > { %5140 = vmatpush3.bf16.msra.mxu1 %v5429_v2  ;;  %v707_v13 = vadd.f32 %v675_v4, %v6041_v10  ;;  %v708_v14 = vadd.f32 %v676_v5, %v6044_v11  ;;  %v6052_v15 = vld [vmem:[%s6028_s13 + $0x18] sm:$0xff]  ;;  %v709_v16 = vadd.f32 %v677_v6, %v6047_v12  ;;  %v6056_v17 = vld [vmem:[%s6028_s13 + $0x20] sm:$0xff]  ;;  %v6059_v18 = vld [vmem:[%s6028_s13 + $0x28] sm:$0xff]  ;;  %5120 = vmatpush3.bf16.msra.mxu0 %v5430_v3  ;;  %s4562_s23 = sshll.u32 %s6062_s14, 3  ;;  %s6076_s26 = scalar_lea.vmem %s9059_s2, %s4566_s29 }
  0x15   : > { %v710_v19 = vadd.f32 %v678_v7, %v6052_v15  ;;  %v711_v20 = vadd.f32 %v679_v8, %v6056_v17  ;;  %v712_v21 = vadd.f32 %v680_v9, %v6059_v18  ;;  %v6067_v22 = vld [vmem:[%s6028_s13 + $0x30] sm:$0xff]  ;;  %v6079_v25 = vld [vmem:[%s6028_s13 + $0x38] sm:$0xff]  ;;  %s6089_s12 = scalar_lea.vmem %s9057_s0, %s4562_s23  ;;  %v490_v28 = vld [vmem:[%s6076_s26] sm:$0xff]  ;;  %s5909_s28 = smov 104  }
  0x16   : > { %v739_v24 = vpack.c.bf16 %v708_v14, %v707_v13  ;;  %v491_v29 = vld [vmem:[%s6076_s26 + $0x8] sm:$0xff]  ;;  %v492_v30 = vld [vmem:[%s6076_s26 + $0x10] sm:$0xff]  ;;  %v442_v32 = vld [vmem:[%s6089_s12] sm:$0xff]  ;;  %v713_v35 = vadd.f32 %v681_v23, %v6067_v22  ;;  %v714_v43 = vadd.f32 %v682_v26, %v6079_v25  ;;  %s5910_s27 = smov 8   ;;  %s5911_s30 = smov 16  }
  0x17   : > { %v740_v27 = vpack.c.bf16 %v710_v19, %v709_v16  ;;  %v741_v31 = vpack.c.bf16 %v712_v21, %v711_v20  ;;  %v443_v33 = vld [vmem:[%s6089_s12 + $0x8] sm:$0xff]  ;;  %v444_v34 = vld [vmem:[%s6089_s12 + $0x10] sm:$0xff]  ;;  %v6100_v36 = vld [vmem:[%s6028_s13 + $0x40] sm:$0xff]  ;;  %v506_v38 = vadd.f32 %v490_v28, %v442_v32  ;;  %s8962_s11 = scalar_lea.vmem %s9067_s10, %s4562_s23 }
  0x18   : > { %5141 = vmatprep.mubr.msk.bf16.mxu1 %vm553_vm0, %v739_v24  ;;  %v6103_v37 = vld [vmem:[%s6028_s13 + $0x48] sm:$0xff]  ;;  %v507_v39 = vadd.f32 %v491_v29, %v443_v33  ;;  %v445_v40 = vld [vmem:[%s6089_s12 + $0x18] sm:$0xff]  ;;  %v508_v42 = vadd.f32 %v492_v30, %v444_v34  ;;  %v446_v44 = vld [vmem:[%s6089_s12 + $0x20] sm:$0xff]  ;;  %v742_v59 = vpack.c.bf16 %v714_v43, %v713_v35  ;;  %v715_v61 = vadd.f32 %v683_v57, %v6100_v36 }
  0x19   : > { %5142 = vmatmul.mubr.msk.bf16.vlgmr.msra.gmra.mxu1 %vm553_vm0, %v740_v27  ;;  %v493_v41 = vld [vmem:[%s6076_s26 + $0x18] sm:$0xff]  ;;  %v447_v46 = vld [vmem:[%s6089_s12 + $0x28] sm:$0xff]  ;;  %v494_v47 = vld [vmem:[%s6076_s26 + $0x20] sm:$0xff]  ;;  %v716_v62 = vadd.f32 %v684_v58, %v6103_v37 }
  0x1a   : > { %v509_v45 = vadd.f32 %v493_v41, %v445_v40  ;;  %5145 = vmatprep.mubr.msk.bf16.mxu1 %vm553_vm0, %v741_v31  ;;  %v495_v48 = vld [vmem:[%s6076_s26 + $0x28] sm:$0xff]  ;;  %v522_v49 = vpack.c.bf16 %v507_v39, %v506_v38  ;;  %v510_v50 = vadd.f32 %v494_v47, %v446_v44  ;;  %v448_v52 = vld [vmem:[%s6089_s12 + $0x30] sm:$0xff]  ;;  %v449_v53 = vld [vmem:[%s6089_s12 + $0x38] sm:$0xff] }
  0x1b   : > { %v511_v51 = vadd.f32 %v495_v48, %v447_v46  ;;  %v496_v54 = vld [vmem:[%s6076_s26 + $0x30] sm:$0xff]  ;;  %v497_v56 = vld [vmem:[%s6076_s26 + $0x38] sm:$0xff]  ;;  %v450_v5 = vld [vmem:[%s6089_s12 + $0x40] sm:$0xff]  ;;  %v743_v7 = vpack.c.bf16 %v716_v62, %v715_v61 }
  0x1c   : > { %v523_v55 = vpack.c.bf16 %v509_v45, %v508_v42  ;;  %5121 = vmatprep.mubr.msk.bf16.mxu0 %vm553_vm0, %v522_v49  ;;  %v6128_v63 = vld [vmem:[%s6028_s13 + $0x50] sm:$0xff]  ;;  %v6131_v0 = vld [vmem:[%s6028_s13 + $0x58] sm:$0xff]  ;;  %v512_v2 = vadd.f32 %v496_v54, %v448_v52  ;;  %v513_v3 = vadd.f32 %v497_v56, %v449_v53  ;;  %v451_v6 = vld [vmem:[%s6089_s12 + $0x48] sm:$0xff] }
  0x1d   : > { %v524_v60 = vpack.c.bf16 %v511_v51, %v510_v50  ;;  %v686_v4 = vld [vmem:[%s9060_s3 + $0x58] sm:$0xff]  ;;  %v498_v8 = vld [vmem:[%s6076_s26 + $0x40] sm:$0xff]  ;;  %v499_v9 = vld [vmem:[%s6076_s26 + $0x48] sm:$0xff]  ;;  %v717_v16 = vadd.f32 %v685_v1, %v6128_v63 }
  0x1e   : > { %5122 = vmatmul.mubr.msk.bf16.vlgmr.msra.gmra.mxu0 %vm553_vm0, %v523_v55  ;;  %v514_v13 = vadd.f32 %v498_v8, %v450_v5  ;;  %v515_v14 = vadd.f32 %v499_v9, %v451_v6  ;;  %v718_v19 = vadd.f32 %v686_v4, %v6131_v0  ;;  %v6149_v20 = vld [vmem:[%s6028_s13 + $0x60] sm:$0xff]  ;;  %v6152_v21 = vld [vmem:[%s6028_s13 + $0x68] sm:$0xff]  ;;  %v525_v24 = vpack.c.bf16 %v513_v3, %v512_v2  ;;  %v452_v26 = vld [vmem:[%s6089_s12 + $0x50] sm:$0xff] }
  0x1f   : > { %5125 = vmatprep.mubr.msk.bf16.mxu0 %vm553_vm0, %v524_v60  ;;  %v687_v23 = vld [vmem:[%s9060_s3 + $0x60] sm:$0xff]  ;;  %v688_v27 = vld [vmem:[%s9060_s3 + $0x68] sm:$0xff]  ;;  %v453_v30 = vld [vmem:[%s6089_s12 + $0x58] sm:$0xff] }
  0x20   : > { %v719_v28 = vadd.f32 %v687_v23, %v6149_v20  ;;  %v526_v29 = vpack.c.bf16 %v515_v14, %v514_v13  ;;  %v500_v31 = vld [vmem:[%s6076_s26 + $0x50] sm:$0xff]  ;;  %v501_v32 = vld [vmem:[%s6076_s26 + $0x58] sm:$0xff]  ;;  %v720_v33 = vadd.f32 %v688_v27, %v6152_v21  ;;  %v744_v34 = vpack.c.bf16 %v718_v19, %v717_v16  ;;  %v6181_v44 = vld [vmem:[%s6028_s13 + $0x80] sm:$0xff] }
  0x21   : > { %5146 = vmatmul.mubr.msk.bf16.gmra.mxu1 %vm553_vm0, %v742_v59  ;;  %v6168_v35 = vld [vmem:[%s6028_s13 + $0x70] sm:$0xff]  ;;  %v6171_v38 = vld [vmem:[%s6028_s13 + $0x78] sm:$0xff]  ;;  %v516_v39 = vadd.f32 %v500_v31, %v452_v26  ;;  %v517_v40 = vadd.f32 %v501_v32, %v453_v30  ;;  %v6185_v45 = vld [vmem:[%s6028_s13 + $0x88] sm:$0xff]  ;;  %v989_v31 = vpack.c.bf16 %v6044_v11, %v6041_v10 }
  0x22   : > { %5149 = vmatprep.mubr.msk.bf16.mxu1 %vm553_vm0, %v743_v7  ;;  %v745_v41 = vpack.c.bf16 %v720_v33, %v719_v28  ;;  %v689_v42 = vld [vmem:[%s9060_s3 + $0x70] sm:$0xff]  ;;  %v690_v43 = vld [vmem:[%s9060_s3 + $0x78] sm:$0xff]  ;;  %v691_v46 = vld [vmem:[%s9060_s3 + $0x80] sm:$0xff] }
  0x23   : > { %v692_v47 = vld [vmem:[%s9060_s3 + $0x88] sm:$0xff]  ;;  %v721_v48 = vadd.f32 %v689_v42, %v6168_v35  ;;  %v722_v49 = vadd.f32 %v690_v43, %v6171_v38  ;;  %v527_v50 = vpack.c.bf16 %v517_v40, %v516_v39  ;;  %v723_v51 = vadd.f32 %v691_v46, %v6181_v44  ;;  %v454_v53 = vld [vmem:[%s6089_s12 + $0x60] sm:$0xff]  ;;  %v6204_v57 = vld [vmem:[%s6028_s13 + $0x90] sm:$0xff] }
  0x24   : > { %v724_v52 = vadd.f32 %v692_v47, %v6185_v45  ;;  %v455_v54 = vld [vmem:[%s6089_s12 + $0x68] sm:$0xff]  ;;  %v502_v55 = vld [vmem:[%s6076_s26 + $0x60] sm:$0xff]  ;;  %v6207_v58 = vld [vmem:[%s6028_s13 + $0x98] sm:$0xff] }
  0x25   : > { %v503_v56 = vld [vmem:[%s6076_s26 + $0x68] sm:$0xff]  ;;  %v693_v59 = vld [vmem:[%s9060_s3 + $0x90] sm:$0xff]  ;;  %v694_v60 = vld [vmem:[%s9060_s3 + $0x98] sm:$0xff]  ;;  %v518_v61 = vadd.f32 %v502_v55, %v454_v53  ;;  %v746_v1 = vpack.c.bf16 %v722_v49, %v721_v48  ;;  %v990_v48 = vpack.c.bf16 %v6052_v15, %v6047_v12 }
  0x26   : > { %5126 = vmatmul.mubr.msk.bf16.gmra.mxu0 %vm553_vm0, %v525_v24  ;;  %v519_v62 = vadd.f32 %v503_v56, %v455_v54  ;;  %v6216_v2 = vld [vmem:[%s6028_s13 + $0xa0] sm:$0xff]  ;;  %v6219_v3 = vld [vmem:[%s6028_s13 + $0xa8] sm:$0xff]  ;;  %v456_v6 = vld [vmem:[%s6089_s12 + $0x70] sm:$0xff]  ;;  %v747_v9 = vpack.c.bf16 %v724_v52, %v723_v51  ;;  %v725_v26 = vadd.f32 %v693_v59, %v6204_v57  ;;  %v726_v27 = vadd.f32 %v694_v60, %v6207_v58 }
  0x27   : > { %5129 = vmatprep.mubr.msk.bf16.mxu0 %vm553_vm0, %v526_v29  ;;  %v695_v4 = vld [vmem:[%s9060_s3 + $0xa0] sm:$0xff]  ;;  %v696_v5 = vld [vmem:[%s9060_s3 + $0xa8] sm:$0xff]  ;;  %v457_v7 = vld [vmem:[%s6089_s12 + $0x78] sm:$0xff]  ;;  %v991_v51 = vpack.c.bf16 %v6059_v18, %v6056_v17 }
  0x28   : > { %v504_v8 = vld [vmem:[%s6076_s26 + $0x70] sm:$0xff]  ;;  %v528_v13 = vpack.c.bf16 %v519_v62, %v518_v61  ;;  %v505_v14 = vld [vmem:[%s6076_s26 + $0x78] sm:$0xff]  ;;  %v5431_v23 = vld [vmem:[%s9061_s4 + $0x28] sm:$0xff]   ;;  %v727_v28 = vadd.f32 %v695_v4, %v6216_v2  ;;  %v728_v29 = vadd.f32 %v696_v5, %v6219_v3  ;;  %v748_v32 = vpack.c.bf16 %v726_v27, %v725_v26  ;;  %s5912_s26 = smov 24  }
  0x29   : > { %5150 = vmatmul.mubr.msk.bf16.gmra.mxu1 %vm553_vm0, %v744_v34  ;;  %v520_v16 = vadd.f32 %v504_v8, %v456_v6  ;;  %v521_v19 = vadd.f32 %v505_v14, %v457_v7  ;;  %v5432_v24 = vld [vmem:[%s9061_s4 + $0x20] sm:$0xff]   ;;  %5173 = vmatprep.subr.bf16.mxu0 %v5431_v23  ;;  %v6248_v33 = vld [vmem:[%s6028_s13 + $0xb0] sm:$0xff]  ;;  %v6251_v34 = vld [vmem:[%s6028_s13 + $0xb8] sm:$0xff]  ;;  %v992_v4 = vpack.c.bf16 %v6079_v25, %v6067_v22 }
  0x2a   : > { %5153 = vmatprep.mubr.msk.bf16.mxu1 %vm553_vm0, %v745_v41  ;;  %5174 = vmatpush3.bf16.msra.mxu0 %v5431_v23  ;;  %v749_v39 = vpack.c.bf16 %v728_v29, %v727_v28  ;;  %v697_v40 = vld [vmem:[%s9060_s3 + $0xb0] sm:$0xff]  ;;  %v698_v41 = vld [vmem:[%s9060_s3 + $0xb8] sm:$0xff]  ;;  %v6260_v42 = vld [vmem:[%s6028_s13 + $0xc0] sm:$0xff]  ;;  %v993_v5 = vpack.c.bf16 %v6103_v37, %v6100_v36  ;;  %v994_v36 = vpack.c.bf16 %v6131_v0, %v6128_v63 }
  0x2b   : > { %v529_v30 = vpack.c.bf16 %v521_v19, %v520_v16  ;;  %5175 = vmatprep.subr.bf16.mxu0 %v5432_v24  ;;  %v6264_v10 = vld [vmem:[%s6028_s13 + $0xc8] sm:$0xff]  ;;  %v699_v11 = vld [vmem:[%s9060_s3 + $0xc0] sm:$0xff]  ;;  %v729_v46 = vadd.f32 %v697_v40, %v6248_v33  ;;  %v730_v47 = vadd.f32 %v698_v41, %v6251_v34  ;;  %v484_v53 = vld [vmem:[%s6028_s13 + $0xd0] sm:$0xff]  ;;  %v995_v37 = vpack.c.bf16 %v6152_v21, %v6149_v20 }
  0x2c   : > { %v700_v43 = vld [vmem:[%s9060_s3 + $0xc8] sm:$0xff]  ;;  %v731_v49 = vadd.f32 %v699_v11, %v6260_v42  ;;  %v485_v54 = vld [vmem:[%s6028_s13 + $0xd8] sm:$0xff]  ;;  %v701_v56 = vld [vmem:[%s9060_s3 + $0xd0] sm:$0xff]  ;;  %v996_v19 = vpack.c.bf16 %v6171_v38, %v6168_v35  ;;  %v997_v23 = vpack.c.bf16 %v6185_v45, %v6181_v44  ;;  %v998_v63 = vpack.c.bf16 %v6207_v58, %v6204_v57 }
  0x2d   : > { %v750_v52 = vpack.c.bf16 %v730_v47, %v729_v46  ;;  %v702_v12 = vld [vmem:[%s9060_s3 + $0xd8] sm:$0xff]  ;;  %v486_v15 = vld [vmem:[%s6028_s13 + $0xe0] sm:$0xff]  ;;  %v487_v59 = vld [vmem:[%s6028_s13 + $0xe8] sm:$0xff]  ;;  %v733_v60 = vadd.f32 %v701_v56, %v484_v53  ;;  %v999_v0 = vpack.c.bf16 %v6219_v3, %v6216_v2  ;;  %v1000_v20 = vpack.c.bf16 %v6251_v34, %v6248_v33 }
  0x2e   : > { %5130 = vmatmul.mubr.msk.bf16.gmra.mxu0 %vm553_vm0, %v527_v50  ;;  %v732_v50 = vadd.f32 %v700_v43, %v6264_v10  ;;  %v703_v17 = vld [vmem:[%s9060_s3 + $0xe0] sm:$0xff]  ;;  %v704_v18 = vld [vmem:[%s9060_s3 + $0xe8] sm:$0xff]  ;;  %v734_v61 = vadd.f32 %v702_v12, %v485_v54  ;;  %v488_v7 = vld [vmem:[%s6028_s13 + $0xf0] sm:$0xff]  ;;  %v1001_v21 = vpack.c.bf16 %v6264_v10, %v6260_v42  ;;  %v1002_v35 = vpack.c.bf16 %v485_v54, %v484_v53 }
  0x2f   : > { %5133 = vmatprep.mubr.msk.bf16.mxu0 %vm553_vm0, %v528_v13  ;;  %5176 = vmatpush3.bf16.msra.mxu0 %v5432_v24  ;;  %v735_v62 = vadd.f32 %v703_v17, %v486_v15  ;;  %v705_v13 = vld [vmem:[%s9060_s3 + $0xf0] sm:$0xff]  ;;  %v706_v14 = vld [vmem:[%s9060_s3 + $0xf8] sm:$0xff]  ;;  %v1003_v38 = vpack.c.bf16 %v487_v59, %v486_v15  ;;  %v6350_v57 = vld [vmem:[%s9062_s5 + $0x1] ss:$0 sm:$0xff] }
  0x30   : > { %v751_v55 = vpack.c.bf16 %v732_v50, %v731_v49  ;;  %v752_v6 = vpack.c.bf16 %v734_v61, %v733_v60  ;;  %v737_v22 = vadd.f32 %v705_v13, %v488_v7  ;;  %v6357_v28 = vld [vmem:[%s9062_s5] ss:$0 sm:$0xff] }
  0x31   : > { %5154 = vmatmul.mubr.msk.bf16.gmra.mxu1 %vm553_vm0, %v746_v1  ;;  %v736_v1 = vadd.f32 %v704_v18, %v487_v59 }
  0x32   : > { %5157 = vmatprep.mubr.msk.bf16.mxu1 %vm553_vm0, %v747_v9  ;;  %v489_v9 = vld [vmem:[%s6028_s13 + $0xf8] sm:$0xff] }
  0x33   : > { %v753_v8 = vpack.c.bf16 %v736_v1, %v735_v62  ;;  %v738_v25 = vadd.f32 %v706_v14, %v489_v9  ;;  %v1004_v44 = vpack.c.bf16 %v489_v9, %v488_v7 }
  0x35   : > { %v754_v16 = vpack.c.bf16 %v738_v25, %v737_v22 }
  0x36   : > { %5134 = vmatmul.mubr.msk.bf16.gmra.mxu0 %vm553_vm0, %v529_v30 }
  0x37   : > { %5177 = vmatprep.mubr.msk.bf16.mxu0 %vm553_vm0, %v989_v31 }
  0x39   : > { %5158 = vmatmul.mubr.msk.bf16.gmra.mxu1 %vm553_vm0, %v748_v32 }
  0x3a   : > { %5161 = vmatprep.mubr.msk.bf16.mxu1 %vm553_vm0, %v749_v39 }
  0x3e   : > { %5178 = vmatmul.mubr.msk.bf16.vlgmr.msra.gmra.mxu0 %vm553_vm0, %v990_v48 }
  0x3f   : > { %5181 = vmatprep.mubr.msk.bf16.mxu0 %vm553_vm0, %v991_v51 }
  0x41   : > { %5162 = vmatmul.mubr.msk.bf16.gmra.mxu1 %vm553_vm0, %v750_v52 }
  0x42   : > { %5165 = vmatprep.mubr.msk.bf16.mxu1 %vm553_vm0, %v751_v55 }
  0x46   : > { %5182 = vmatmul.mubr.msk.bf16.gmra.mxu0 %vm553_vm0, %v992_v4 }
  0x47   : > { %5185 = vmatprep.mubr.msk.bf16.mxu0 %vm553_vm0, %v993_v5 }
  0x49   : > { %5166 = vmatmul.mubr.msk.bf16.gmra.mxu1 %vm553_vm0, %v752_v6 }
  0x4a   : > { %5169 = vmatprep.mubr.msk.bf16.mxu1 %vm553_vm0, %v753_v8 }
  0x4e   : > { %5186 = vmatmul.mubr.msk.bf16.gmra.mxu0 %vm553_vm0, %v994_v36 }
  0x4f   : > { %5189 = vmatprep.mubr.msk.bf16.mxu0 %vm553_vm0, %v995_v37 }
  0x51   : > { %5170 = vmatmul.mubr.msk.bf16.gmra.mxu1 %vm553_vm0, %v754_v16 }
  0x56   : > { %5190 = vmatmul.mubr.msk.bf16.gmra.mxu0 %vm553_vm0, %v996_v19 }
  0x57   : > { %5193 = vmatprep.mubr.msk.bf16.mxu0 %vm553_vm0, %v997_v23 }
  0x5e   : > { %5194 = vmatmul.mubr.msk.bf16.gmra.mxu0 %vm553_vm0, %v998_v63 }
  0x5f   : > { %5197 = vmatprep.mubr.msk.bf16.mxu0 %vm553_vm0, %v999_v0 }
  0x66   : > { %5198 = vmatmul.mubr.msk.bf16.gmra.mxu0 %vm553_vm0, %v1000_v20 }
  0x67   : > { %5201 = vmatprep.mubr.msk.bf16.mxu0 %vm553_vm0, %v1001_v21 }
  0x6e   : > { %5202 = vmatmul.mubr.msk.bf16.gmra.mxu0 %vm553_vm0, %v1002_v35 }
  0x6f   : > { %5205 = vmatprep.mubr.msk.bf16.mxu0 %vm553_vm0, %v1003_v38 }
  0x76   : > { %5206 = vmatmul.mubr.msk.bf16.gmra.mxu0 %vm553_vm0, %v1004_v44 }
  0xd9   : > { %v5143_v45 = vpop.f32.mrf.mxu1 }
  0xda   : > { %v871_v3 = vadd.f32 %v5143_v45, %v6350_v57 }
  0xdb   : > { %v862_v58 = vpop.f32.mrf.mxu1 }
  0xdc   : > { %v863_v33 = vadd.f32 %v6350_v57, %v862_v58 }
  0xdd   : > { %v5144_v2 = vpop.f32.mrf.mxu1 }
  0xde   : > { %v5123_v24 = vpop.f32.mrf.mxu0  ;;  %v874_v26 = vadd.f32 %v5144_v2, %v6350_v57 }
  0xdf   : > { %v865_v27 = vpop.f32.mrf.mxu1  ;;  %v621_v39 = vadd.f32 %v5123_v24, %v6357_v28 }
  0xe0   : > { %v612_v29 = vpop.f32.mrf.mxu0  ;;  %v6359_v30 = vpack.c.bf16 %v874_v26, %v871_v3  ;;  %v866_v31 = vadd.f32 %v6350_v57, %v865_v27 }
  0xe1   : > { %v5147_v32 = vpop.f32.mrf.mxu1  ;;  %v613_v11 = vadd.f32 %v6357_v28, %v612_v29 }
  0xe2   : > { %v5124_v34 = vpop.f32.mrf.mxu0  ;;  %1867 = vrot.lane.b32.xlu0 %v6359_v30, %s5907_s21  ;;  %v6367_v42 = vpack.c.bf16 %v866_v31, %v863_v33  ;;  %v887_v48 = vadd.f32 %v5147_v32, %v6350_v57 }
  0xe3   : > { %v624_v40 = vadd.f32 %v5124_v34, %v6357_v28  ;;  %v878_v41 = vpop.f32.mrf.mxu1 }
  0xe4   : > { %v615_v10 = vpop.f32.mrf.mxu0  ;;  %v879_v62 = vadd.f32 %v6350_v57, %v878_v41 }
  0xe5   : > { %v6370_v43 = vpack.c.bf16 %v624_v40, %v621_v39  ;;  %v616_v46 = vadd.f32 %v6357_v28, %v615_v10  ;;  %v5148_v47 = vpop.f32.mrf.mxu1 }
  0xe6   : > { %v5127_v49 = vpop.f32.mrf.mxu0  ;;  %v890_v50 = vadd.f32 %v5148_v47, %v6350_v57  ;;  %1865 = vrot.lane.b32.xlu0 %v6367_v42, %s5907_s21 }
  0xe7   : > { %v6377_v51 = vpack.c.bf16 %v616_v46, %v613_v11  ;;  %1835 = vrot.lane.b32.xlu1 %v6370_v43, %s5907_s21  ;;  %v881_v52 = vpop.f32.mrf.mxu1  ;;  %v637_v12 = vadd.f32 %v5127_v49, %v6357_v28  ;;  %v6456_v46 = vld [vmem:[%s9062_s5 + $0x2] ss:$0 sm:$0xff] }
  0xe8   : > { %v628_v53 = vpop.f32.mrf.mxu0  ;;  %v6381_v54 = vpack.c.bf16 %v890_v50, %v887_v48  ;;  %v882_v17 = vadd.f32 %v6350_v57, %v881_v52 }
  0xe9   : > { %4739 = vmatprep.mubr.msk.bf16.mxu1 %vm1286_vm1, %v6377_v51  ;;  %v5151_v55 = vpop.f32.mrf.mxu1  ;;  %v629_v63 = vadd.f32 %v6357_v28, %v628_v53 }
  0xea   : > { %v5128_v56 = vpop.f32.mrf.mxu0  ;;  %1833 = vrot.lane.b32.xlu0 %v6377_v51, %s5907_s21  ;;  %v903_v1 = vadd.f32 %v5151_v55, %v6350_v57  ;;  %v6401_v7 = vpack.c.bf16 %v882_v17, %v879_v62 }
  0xeb   : > { %v640_v15 = vadd.f32 %v5128_v56, %v6357_v28  ;;  %2521 = vrot.lane.b32.xlu1 %v6381_v54, %s5908_s22  ;;  %v894_v59 = vpop.f32.mrf.mxu1 }
  0xec   : > { %v631_v18 = vpop.f32.mrf.mxu0  ;;  %v895_v33 = vadd.f32 %v6350_v57, %v894_v59 }
  0xed   : > { %v6392_v60 = vpack.c.bf16 %v640_v15, %v637_v12  ;;  %v5152_v61 = vpop.f32.mrf.mxu1  ;;  %v632_v37 = vadd.f32 %v6357_v28, %v631_v18 }
  0xee   : > { %v5131_v4 = vpop.f32.mrf.mxu0  ;;  %v906_v5 = vadd.f32 %v5152_v61, %v6350_v57  ;;  %1871 = vrot.lane.b32.xlu0 %v6381_v54, %s5907_s21 }
  0xef   : > { %1839 = vrot.lane.b32.xlu1 %v6392_v60, %s5907_s21  ;;  %v897_v6 = vpop.f32.mrf.mxu1  ;;  %v653_v22 = vadd.f32 %v5131_v4, %v6357_v28  ;;  %v6423_v38 = vpack.c.bf16 %v632_v37, %v629_v63 }
  0xf0   : > { %v644_v8 = vpop.f32.mrf.mxu0  ;;  %v6403_v9 = vpack.c.bf16 %v906_v5, %v903_v1  ;;  %v898_v27 = vadd.f32 %v6350_v57, %v897_v6 }
  0xf1   : > { %v5155_v13 = vpop.f32.mrf.mxu1  ;;  %v645_v61 = vadd.f32 %v6357_v28, %v644_v8 }
  0xf2   : > { %v5132_v14 = vpop.f32.mrf.mxu0  ;;  %1869 = vrot.lane.b32.xlu0 %v6401_v7, %s5907_s21  ;;  %v919_v0 = vadd.f32 %v5155_v13, %v6350_v57  ;;  %v6449_v10 = vpack.c.bf16 %v898_v27, %v895_v33 }
  0xf3   : > { %v656_v25 = vadd.f32 %v5132_v14, %v6357_v28  ;;  %2525 = vrot.lane.b32.xlu1 %v6403_v9, %s5908_s22  ;;  %v910_v36 = vpop.f32.mrf.mxu1 }
  0xf4   : > { %v647_v16 = vpop.f32.mrf.mxu0  ;;  %v911_v24 = vadd.f32 %v6350_v57, %v910_v36 }
  0xf5   : > { %v6412_v19 = vpack.c.bf16 %v656_v25, %v653_v22  ;;  %v5156_v23 = vpop.f32.mrf.mxu1  ;;  %v648_v12 = vadd.f32 %v6357_v28, %v647_v16 }
  0xf6   : > { %v922_v20 = vadd.f32 %v5156_v23, %v6350_v57  ;;  %2519 = vrot.lane.b32.xlu0 %v6401_v7, %s5908_s22  ;;  %v6419_v21 = vpop.f32.mrf.mxu0 }
  0xf7   : > { %1843 = vrot.lane.b32.xlu1 %v6412_v19, %s5907_s21  ;;  %v913_v35 = vpop.f32.mrf.mxu1  ;;  %v6482_v6 = vpack.c.bf16 %v648_v12, %v645_v61 }
  0xf8   : > { %v6425_v44 = vpack.c.bf16 %v922_v20, %v919_v0  ;;  %v6427_v45 = vpop.f32.mrf.mxu0  ;;  %v914_v58 = vadd.f32 %v6350_v57, %v913_v35 }
  0xf9   : > { %v5159_v2 = vpop.f32.mrf.mxu1 }
  0xfa   : > { %1837 = vrot.lane.b32.xlu0 %v6423_v38, %s5907_s21  ;;  %v6432_v3 = vpop.f32.mrf.mxu0  ;;  %v6440_v31 = vpack.c.bf16 %v914_v58, %v911_v24  ;;  %v935_v34 = vadd.f32 %v5159_v2, %v6350_v57 }
  0xfb   : > { %2529 = vrot.lane.b32.xlu1 %v6425_v44, %s5908_s22  ;;  %v926_v26 = vpop.f32.mrf.mxu1 }
  0xfc   : > { %v6438_v29 = vpop.f32.mrf.mxu0  ;;  %v927_v53 = vadd.f32 %v6350_v57, %v926_v26 }
  0xfd   : > { %v5160_v32 = vpop.f32.mrf.mxu1 }
  0xfe   : > { %v938_v39 = vadd.f32 %v5160_v32, %v6350_v57  ;;  %1875 = vrot.lane.b32.xlu0 %v6403_v9, %s5907_s21  ;;  %v5179_v40 = vpop.f32.mrf.mxu0 }
  0xff   : > { %1877 = vrot.lane.b32.xlu1 %v6440_v31, %s5907_s21  ;;  %v929_v41 = vpop.f32.mrf.mxu1  ;;  %v1121_v50 = vadd.f32 %v5179_v40, %v6456_v46 }
 0x100   : > { %v6451_v11 = vpack.c.bf16 %v938_v39, %v935_v34  ;;  %v6458_v47 = vpop.f32.mrf.mxu0  ;;  %v930_v48 = vadd.f32 %v6350_v57, %v929_v41 }
 0x101   : > { %v5163_v49 = vpop.f32.mrf.mxu1 }
 0x102   : > { %1873 = vrot.lane.b32.xlu0 %v6449_v10, %s5907_s21  ;;  %v5180_v52 = vpop.f32.mrf.mxu0  ;;  %v6471_v59 = vpack.c.bf16 %v930_v48, %v927_v53  ;;  %v951_v62 = vadd.f32 %v5163_v49, %v6350_v57 }
 0x103   : > { %1883 = vrot.lane.b32.xlu1 %v6451_v11, %s5907_s21  ;;  %v942_v55 = vpop.f32.mrf.mxu1  ;;  %v1124_v56 = vadd.f32 %v5180_v52, %v6456_v46 }
 0x104   : > { %v6469_v15 = vpop.f32.mrf.mxu0  ;;  %v943_v37 = vadd.f32 %v6350_v57, %v942_v55 }
 0x105   : > { %v5164_v17 = vpop.f32.mrf.mxu1  ;;  %v6473_v18 = vpack.c.bf16 %v1124_v56, %v1121_v50 }
 0x106   : > { %v954_v1 = vadd.f32 %v5164_v17, %v6350_v57  ;;  %2523 = vrot.lane.b32.xlu0 %v6449_v10, %s5908_s22  ;;  %v5183_v4 = vpop.f32.mrf.mxu0 }
 0x107   : > { %9204 = vst [vmem:[#allocation2_spill] sm:$0xff] %v6473_v18  ;;  %1881 = vrot.lane.b32.xlu1 %v6471_v59, %s5907_s21  ;;  %v945_v5 = vpop.f32.mrf.mxu1  ;;  %v1137_v25 = vadd.f32 %v5183_v4, %v6456_v46  ;;  %v664_v4 = vadd.f32 %v6357_v28, %v6438_v29 }
 0x108   : > { %v6484_v13 = vpack.c.bf16 %v954_v1, %v951_v62  ;;  %v6486_v14 = vpop.f32.mrf.mxu0  ;;  %v946_v8 = vadd.f32 %v6350_v57, %v945_v5  ;;  %v661_v1 = vadd.f32 %v6357_v28, %v6427_v45  ;;  %v1333_v5 = vsel %vm1286_vm1, %v6425_v44, 0 }
 0x109   : > { %v5167_v22 = vpop.f32.mrf.mxu1 }
 0x10a   : > { %1841 = vrot.lane.b32.xlu0 %v6482_v6, %s5907_s21  ;;  %v5184_v36 = vpop.f32.mrf.mxu0  ;;  %v6498_v0 = vpack.c.bf16 %v946_v8, %v943_v37  ;;  %v967_v26 = vadd.f32 %v5167_v22, %v6350_v57  ;;  %v6554_v29 = vpack.c.bf16 %v664_v4, %v661_v1  ;;  %v672_v37 = vadd.f32 %v6432_v3, %v6357_v28 }
 0x10b   : > { %1887 = vrot.lane.b32.xlu1 %v6484_v13, %s5907_s21  ;;  %v958_v16 = vpop.f32.mrf.mxu1  ;;  %v1140_v23 = vadd.f32 %v5184_v36, %v6456_v46  ;;  %v669_v36 = vadd.f32 %v6419_v21, %v6357_v28 }
 0x10c   : > { %v6496_v63 = vpop.f32.mrf.mxu0  ;;  %v959_v55 = vadd.f32 %v6350_v57, %v958_v16  ;;  %v1330_v16 = vsel %vm1286_vm1, %v6440_v31, 0 }
 0x10d   : > { %v5168_v20 = vpop.f32.mrf.mxu1  ;;  %v6500_v35 = vpack.c.bf16 %v1140_v23, %v1137_v25  ;;  %v6580_v21 = vpack.c.bf16 %v672_v37, %v669_v36 }
 0x10e   : > { %1879 = vrot.lane.b32.xlu0 %v6425_v44, %s5907_s21  ;;  %v6504_v58 = vpop.f32.mrf.mxu0  ;;  %v970_v27 = vadd.f32 %v5168_v20, %v6350_v57 }
 0x10f   : > { %9205 = vst [vmem:[#allocation3_spill] sm:$0xff] %v6500_v35  ;;  %1885 = vrot.lane.b32.xlu1 %v6498_v0, %s5907_s21  ;;  %v961_v2 = vpop.f32.mrf.mxu1 }
 0x110   : > { %v6508_v24 = vpop.f32.mrf.mxu0  ;;  %v6521_v41 = vpack.c.bf16 %v970_v27, %v967_v26  ;;  %v962_v48 = vadd.f32 %v6350_v57, %v961_v2  ;;  %v1327_v2 = vsel %vm1286_vm1, %v6403_v9, 0 }
 0x111   : > { %v5171_v32 = vpop.f32.mrf.mxu1 }
 0x112   : > { %2527 = vrot.lane.b32.xlu0 %v6440_v31, %s5908_s22  ;;  %v6514_v33 = vpop.f32.mrf.mxu0  ;;  %v983_v39 = vadd.f32 %v5171_v32, %v6350_v57  ;;  %v6536_v62 = vpack.c.bf16 %v962_v48, %v959_v55 }
 0x113   : > { %2535 = vrot.lane.b32.xlu1 %v6498_v0, %s5908_s22  ;;  %v974_v34 = vpop.f32.mrf.mxu1 }
 0x114   : > { %v6519_v40 = vpop.f32.mrf.mxu0  ;;  %v975_v50 = vadd.f32 %v6350_v57, %v974_v34 }
 0x115   : > { %v5172_v49 = vpop.f32.mrf.mxu1 }
 0x116   : > { %v986_v52 = vadd.f32 %v5172_v49, %v6350_v57  ;;  %2537 = vrot.lane.b32.xlu0 %v6484_v13, %s5908_s22  ;;  %v5191_v53 = vpop.f32.mrf.mxu0 }
 0x117   : > { %1891 = vrot.lane.b32.xlu1 %v6521_v41, %s5907_s21  ;;  %v977_v56 = vpop.f32.mrf.mxu1 }
 0x118   : > { %v6531_v12 = vpack.c.bf16 %v986_v52, %v983_v39  ;;  %v978_v17 = vadd.f32 %v6350_v57, %v977_v56  ;;  %v6534_v61 = vpop.f32.mrf.mxu0  ;;  %v1324_v39 = vsel %vm1286_vm1, %v6449_v10, 0  ;;  %v1321_v56 = vsel %vm1286_vm1, %v6381_v54, 0 }
 0x119   : > { %v1161_v1 = vadd.f32 %v6456_v46, %v6534_v61 }
 0x11a   : > { %5229 = vmatprep.subr.msk.bf16.mxu1 %vm1286_vm1, %v6531_v12  ;;  %2541 = vrot.lane.b32.xlu0 %v6521_v41, %s5908_s22  ;;  %v6548_v57 = vpack.c.bf16 %v978_v17, %v975_v50  ;;  %v5192_v8 = vpop.f32.mrf.mxu0 }
 0x11b   : > { %1889 = vrot.lane.b32.xlu1 %v6536_v62, %s5907_s21  ;;  %4724 = vmatpush3.bf16.xpose.msra.mxu1 %v1333_v5  ;;  %v1172_v50 = vadd.f32 %v5192_v8, %v6456_v46 }
 0x11c   : > { %5230 = vmatprep.subr.msk.bf16.mxu1 %vm1286_vm1, %v6548_v57  ;;  %v1163_v45 = vpop.f32.mrf.mxu0 }
 0x11d   : > { %v1164_v5 = vadd.f32 %v6456_v46, %v1163_v45  ;;  %v1153_v45 = vadd.f32 %v6504_v58, %v6456_v46  ;;  %v1318_v58 = vsel %vm1286_vm1, %v6401_v7, 0 }
 0x11e   : > { %1895 = vrot.lane.b32.xlu0 %v6531_v12, %s5907_s21  ;;  %v6558_v22 = vpop.f32.mrf.mxu0 }
 0x11f   : > { %2539 = vrot.lane.b32.xlu1 %v6536_v62, %s5908_s22 }
 0x120   : > { %v6562_v25 = vpop.f32.mrf.mxu0 }
 0x122   : > { %1845 = vrot.lane.b32.xlu0 %v6554_v29, %s5907_s21  ;;  %v6572_v23 = vpop.f32.mrf.mxu0 }
 0x123   : > { %2517 = vrot.lane.b32.xlu1 %v6359_v30, %s5908_s22  ;;  %4726 = vmatpush3.bf16.xpose.msra.mxu1 %v1330_v16 }
 0x124   : > { %5231 = vmatprep.subr.msk.bf16.mxu1 %vm1286_vm1, %v6521_v41  ;;  %v6578_v20 = vpop.f32.mrf.mxu0 }
 0x126   : > { %2533 = vrot.lane.b32.xlu0 %v6451_v11, %s5908_s22  ;;  %v6584_v28 = vpop.f32.mrf.mxu0 }
 0x127   : > { %1847 = vrot.lane.b32.xlu1 %v6580_v21, %s5907_s21 }
 0x128   : > { %v6588_v3 = vpop.f32.mrf.mxu0 }
 0x12a   : > { %2515 = vrot.lane.b32.xlu0 %v6367_v42, %s5908_s22  ;;  %v5200_v26 = vpop.f32.mrf.mxu0 }
 0x12b   : > { %2531 = vrot.lane.b32.xlu1 %v6471_v59, %s5908_s22  ;;  %4728 = vmatpush3.bf16.xpose.msra.mxu1 %v1327_v2  ;;  %v1156_v2 = vadd.f32 %v6514_v33, %v6456_v46  ;;  %v1145_v33 = vadd.f32 %v6456_v46, %v6508_v24 }
 0x12c   : > { %5232 = vmatprep.subr.msk.bf16.mxu1 %vm1286_vm1, %v6536_v62  ;;  %v6598_v27 = vpop.f32.mrf.mxu0 }
 0x12e   : > { %2499 = vrot.lane.b32.xlu0 %v6377_v51, %s5908_s22  ;;  %v5203_v32 = vpop.f32.mrf.mxu0 }
 0x12f   : > { %3163 = vrot.lane.b32.xlu1 %v6425_v44, %s5909_s28  ;;  %v1217_v8 = vadd.f32 %v5203_v32, %v6456_v46  ;;  %v6650_v32 = vpack.c.bf16 %v1164_v5, %v1161_v1 }
 0x130   : > { %v1208_v34 = vpop.f32.mrf.mxu0 }
 0x132   : > { %3161 = vrot.lane.b32.xlu0 %v6440_v31, %s5909_s28  ;;  %v5204_v48 = vpop.f32.mrf.mxu0  ;;  %v1169_v31 = vadd.f32 %v5191_v53, %v6456_v46 }
 0x133   : > { %2501 = vrot.lane.b32.xlu1 %v6370_v43, %s5908_s22  ;;  %4730 = vmatpush3.bf16.xpose.msra.mxu1 %v1324_v39  ;;  %v1220_v36 = vadd.f32 %v5204_v48, %v6456_v46  ;;  %v1209_v39 = vadd.f32 %v6456_v46, %v1208_v34  ;;  %v6666_v34 = vpack.c.bf16 %v1156_v2, %v1153_v45 }
 0x134   : > { %5233 = vmatprep.subr.msk.bf16.mxu1 %vm1286_vm1, %v6484_v13  ;;  %v1211_v49 = vpop.f32.mrf.mxu0  ;;  %v6629_v4 = vpack.c.bf16 %v1172_v50, %v1169_v31  ;;  %v1148_v48 = vadd.f32 %v6456_v46, %v6519_v40  ;;  %v1193_v40 = vadd.f32 %v6456_v46, %v6588_v3  ;;  %v1129_v3 = vadd.f32 %v6456_v46, %v6486_v14 }
 0x135   : > { %v1132_v31 = vadd.f32 %v6456_v46, %v6496_v63  ;;  %v1177_v63 = vadd.f32 %v6456_v46, %v6562_v25  ;;  %v1113_v25 = vadd.f32 %v6456_v46, %v6458_v47 }
 0x136   : > { %2503 = vrot.lane.b32.xlu0 %v6423_v38, %s5908_s22  ;;  %v5207_v44 = vpop.f32.mrf.mxu0  ;;  %v6683_v24 = vpack.c.bf16 %v1148_v48, %v1145_v33 }
 0x137   : > { %3159 = vrot.lane.b32.xlu1 %v6403_v9, %s5909_s28  ;;  %v1233_v55 = vadd.f32 %v5207_v44, %v6456_v46  ;;  %v1204_v44 = vadd.f32 %v5200_v26, %v6456_v46  ;;  %v1196_v26 = vadd.f32 %v6456_v46, %v6598_v27  ;;  %v1188_v27 = vadd.f32 %v6572_v23, %v6456_v46 }
 0x138   : > { %v1224_v52 = vpop.f32.mrf.mxu0  ;;  %9206 = vst [vmem:[#allocation4_spill] sm:$0xff] %v6683_v24  ;;  %v6717_v14 = vpack.c.bf16 %v1132_v31, %v1129_v3  ;;  %v1116_v23 = vadd.f32 %v6456_v46, %v6469_v15 }
 0x139   : > { %v1225_v9 = vadd.f32 %v6456_v46, %v1224_v52  ;;  %v6710_v50 = vpack.c.bf16 %v1196_v26, %v1193_v40 }
 0x13a   : > { %3175 = vrot.lane.b32.xlu0 %v6521_v41, %s5909_s28  ;;  %v5208_v17 = vpop.f32.mrf.mxu0  ;;  %9209 = vst [vmem:[#allocation7_spill] sm:$0xff] %v6717_v14 }
 0x13b   : > { %2505 = vrot.lane.b32.xlu1 %v6392_v60, %s5908_s22  ;;  %4732 = vmatpush3.bf16.xpose.msra.mxu1 %v1321_v56  ;;  %v1236_v53 = vadd.f32 %v5208_v17, %v6456_v46  ;;  %9208 = vst [vmem:[#allocation6_spill] sm:$0xff] %v6710_v50 }
 0x13c   : > { %5234 = vmatprep.subr.msk.bf16.mxu1 %vm1286_vm1, %v6498_v0  ;;  %v1227_v41 = vpop.f32.mrf.mxu0 }
 0x13d   : > { %v6636_v37 = vpack.c.bf16 %v1236_v53, %v1233_v55  ;;  %v1228_v16 = vadd.f32 %v6456_v46, %v1227_v41 }
 0x13e   : > { %3157 = vrot.lane.b32.xlu0 %v6449_v10, %s5909_s28  ;;  %v6654_v10 = vpack.c.bf16 %v1220_v36, %v1217_v8 }
 0x13f   : > { %3173 = vrot.lane.b32.xlu1 %v6536_v62, %s5909_s28  ;;  %v6643_v61 = vpack.c.bf16 %v1228_v16, %v1225_v9  ;;  %4755 = vmatprep.subr.bf16.mxu0 %v6636_v37  ;;  %v1212_v62 = vadd.f32 %v6456_v46, %v1211_v49  ;;  %v1201_v49 = vadd.f32 %v6584_v28, %v6456_v46 }
 0x140   : > { %4756 = vmatpush3.bf16.msra.mxu0 %v6629_v4 }
 0x141   : > { %4757 = vmatprep.subr.bf16.mxu0 %v6643_v61  ;;  %v6688_v28 = vpack.c.bf16 %v1204_v44, %v1201_v49 }
 0x142   : > { %2507 = vrot.lane.b32.xlu0 %v6482_v6, %s5908_s22 }
 0x143   : > { %3155 = vrot.lane.b32.xlu1 %v6381_v54, %s5909_s28  ;;  %4734 = vmatpush3.bf16.xpose.msra.mxu1 %v1318_v58  ;;  %v6676_v54 = vpack.c.bf16 %v1212_v62, %v1209_v39  ;;  %9207 = vst [vmem:[#allocation5_spill] sm:$0xff] %v6688_v28 }
 0x144   : > { %5235 = vmatprep.subr.msk.bf16.mxu1 %vm1286_vm1, %v6451_v11  ;;  %4758 = vmatpush3.bf16.msra.mxu0 %v6650_v32 }
 0x145   : > { %4759 = vmatprep.subr.bf16.mxu0 %v6654_v10 }
 0x146   : > { %3171 = vrot.lane.b32.xlu0 %v6484_v13, %s5909_s28  ;;  %v1315_v13 = vsel %vm1286_vm1, %v6359_v30, 0 }
 0x147   : > { %2509 = vrot.lane.b32.xlu1 %v6412_v19, %s5908_s22 }
 0x148   : > { %4760 = vmatpush3.bf16.msra.mxu0 %v6666_v34 }
 0x149   : > { %4761 = vmatprep.subr.bf16.mxu0 %v6676_v54 }
 0x14a   : > { %3153 = vrot.lane.b32.xlu0 %v6401_v7, %s5909_s28  ;;  %v1185_v7 = vadd.f32 %v6558_v22, %v6456_v46  ;;  %v1180_v22 = vadd.f32 %v6456_v46, %v6578_v20 }
 0x14b   : > { %3169 = vrot.lane.b32.xlu1 %v6498_v0, %s5909_s28  ;;  %4736 = vmatpush3.bf16.xpose.msra.mxu1 %v1315_v13 }
 0x14c   : > { %5236 = vmatprep.subr.msk.bf16.mxu1 %vm1286_vm1, %v6471_v59  ;;  %4762 = vmatpush3.bf16.msra.mxu0 %v6683_v24  ;;  %v6722_v0 = vpack.c.bf16 %v1188_v27, %v1185_v7  ;;  %v6740_v20 = vpack.c.bf16 %v1180_v22, %v1177_v63 }
 0x14d   : > { %4763 = vmatprep.subr.bf16.mxu0 %v6688_v28 }
 0x14e   : > { %2511 = vrot.lane.b32.xlu0 %v6554_v29, %s5908_s22  ;;  %9210 = vst [vmem:[#allocation8_spill] sm:$0xff] %v6722_v0  ;;  %9211 = vst [vmem:[#allocation9_spill] sm:$0xff] %v6740_v20 }
 0x14f   : > { %3151 = vrot.lane.b32.xlu1 %v6359_v30, %s5909_s28  ;;  %v1312_v30 = vsel %vm1286_vm1, %v6367_v42, 0 }
 0x150   : > { %4764 = vmatpush3.bf16.msra.mxu0 %v6500_v35 }
 0x151   : > { %4765 = vmatprep.subr.bf16.mxu0 %v6710_v50 }
 0x152   : > { %3167 = vrot.lane.b32.xlu0 %v6451_v11, %s5909_s28  ;;  %v6747_v11 = vpack.c.bf16 %v1116_v23, %v1113_v25 }
 0x153   : > { %1893 = vrot.lane.b32.xlu1 %v6548_v57, %s5907_s21  ;;  %4738 = vmatpush3.bf16.xpose.msra.mxu1 %v1312_v30 }
 0x154   : > { %v6737_v52 = vpop.permute.xlu0 %1867  ;;  %4766 = vmatpush3.bf16.msra.mxu0 %v6717_v14  ;;  %9212 = vst [vmem:[#allocation10_spill] sm:$0xff] %v6747_v11 }
 0x155   : > { %4767 = vmatprep.subr.bf16.mxu0 %v6722_v0 }
 0x156   : > { %2545 = vrot.lane.b32.xlu0 %v6531_v12, %s5908_s22 }
 0x157   : > { %2513 = vrot.lane.b32.xlu1 %v6580_v21, %s5908_s22 }
 0x158   : > { %v6749_v47 = vpop.permute.xlu0 %1865  ;;  %4768 = vmatpush3.bf16.msra.mxu0 %v6473_v18 }
 0x159   : > { %v6752_v46 = vpop.permute.xlu1 %1835  ;;  %4769 = vmatprep.subr.bf16.mxu0 %v6740_v20 }
 0x15a   : > { %3179 = vrot.lane.b32.xlu0 %v6531_v12, %s5909_s28  ;;  %4740 = vmatmul.mubr.msk.bf16.vlgmr.msra.gmra.mxu1 %vm1286_vm1, %v6377_v51 }
 0x15b   : > { %3165 = vrot.lane.b32.xlu1 %v6471_v59, %s5909_s28  ;;  %4741 = vmatprep.mubr.msk.bf16.mxu1 %vm1286_vm1, %v6370_v43 }
 0x15c   : > { %v6763_v15 = vpop.permute.xlu0 %1833  ;;  %4770 = vmatpush3.bf16.msra.mxu0 %v6747_v11 }
 0x15d   : > { %v6766_v55 = vpop.permute.xlu1 %2521 }
 0x15e   : > { %3149 = vrot.lane.b32.xlu0 %v6367_v42, %s5909_s28 }
 0x15f   : > { %3135 = vrot.lane.b32.xlu1 %v6370_v43, %s5909_s28 }
 0x160   : > { %v6772_v12 = vpop.permute.xlu0 %1871 }
 0x161   : > { %v6774_v56 = vpop.permute.xlu1 %1839 }
 0x162   : > { %3133 = vrot.lane.b32.xlu0 %v6377_v51, %s5909_s28  ;;  %4742 = vmatmul.mubr.msk.bf16.gmra.mxu1 %vm1286_vm1, %v6370_v43 }
 0x163   : > { %3139 = vrot.lane.b32.xlu1 %v6392_v60, %s5909_s28  ;;  %4743 = vmatprep.mubr.msk.bf16.mxu1 %vm1286_vm1, %v6423_v38 }
 0x164   : > { %v6784_v42 = vpop.permute.xlu0 %1869 }
 0x165   : > { %v6786_v59 = vpop.permute.xlu1 %2525 }
 0x166   : > { %3137 = vrot.lane.b32.xlu0 %v6423_v38, %s5909_s28 }
 0x167   : > { %3143 = vrot.lane.b32.xlu1 %v6412_v19, %s5909_s28 }
 0x168   : > { %v6792_v51 = vpop.permute.xlu0 %2519 }
 0x169   : > { %v6794_v17 = vpop.permute.xlu1 %1843 }
 0x16a   : > { %3141 = vrot.lane.b32.xlu0 %v6482_v6, %s5909_s28  ;;  %4744 = vmatmul.mubr.msk.bf16.gmra.mxu1 %vm1286_vm1, %v6423_v38 }
 0x16b   : > { %3147 = vrot.lane.b32.xlu1 %v6580_v21, %s5909_s28  ;;  %4745 = vmatprep.mubr.msk.bf16.mxu1 %vm1286_vm1, %v6392_v60 }
 0x16c   : > { %v6804_v43 = vpop.permute.xlu0 %1837 }
 0x16d   : > { %v6806_v9 = vpop.permute.xlu1 %2529 }
 0x16e   : > { %3145 = vrot.lane.b32.xlu0 %v6554_v29, %s5909_s28 }
 0x16f   : > { %2362 = vrot.lane.b32.xlu1 %v6683_v24, %s5907_s21 }
 0x170   : > { %v6812_v53 = vpop.permute.xlu0 %1875 }
 0x171   : > { %v6814_v1 = vpop.permute.xlu1 %1877 }
 0x172   : > { %2364 = vrot.lane.b32.xlu0 %v6666_v34, %s5907_s21  ;;  %4746 = vmatmul.mubr.msk.bf16.gmra.mxu1 %vm1286_vm1, %v6392_v60 }
 0x173   : > { %2358 = vrot.lane.b32.xlu1 %v6717_v14, %s5907_s21  ;;  %4747 = vmatprep.mubr.msk.bf16.mxu1 %vm1286_vm1, %v6482_v6 }
 0x174   : > { %v6824_v38 = vpop.permute.xlu0 %1873 }
 0x175   : > { %v6826_v5 = vpop.permute.xlu1 %1883 }
 0x176   : > { %2360 = vrot.lane.b32.xlu0 %v6500_v35, %s5907_s21 }
 0x177   : > { %2354 = vrot.lane.b32.xlu1 %v6747_v11, %s5907_s21 }
 0x178   : > { %v6832_v41 = vpop.permute.xlu0 %2523 }
 0x179   : > { %v6834_v8 = vpop.permute.xlu1 %1881 }
 0x17a   : > { %2356 = vrot.lane.b32.xlu0 %v6473_v18, %s5907_s21  ;;  %4748 = vmatmul.mubr.msk.bf16.gmra.mxu1 %vm1286_vm1, %v6482_v6 }
 0x17b   : > { %2543 = vrot.lane.b32.xlu1 %v6548_v57, %s5908_s22  ;;  %4749 = vmatprep.mubr.msk.bf16.mxu1 %vm1286_vm1, %v6412_v19 }
 0x17c   : > { %v6844_v60 = vpop.permute.xlu0 %1841 }
 0x17d   : > { %v6846_v36 = vpop.permute.xlu1 %1887 }
 0x17e   : > { %2368 = vrot.lane.b32.xlu0 %v6629_v4, %s5907_s21 }
 0x17f   : > { %3177 = vrot.lane.b32.xlu1 %v6548_v57, %s5909_s28 }
 0x180   : > { %v1880_v16 = vpop.permute.xlu0 %1879 }
 0x181   : > { %v6852_v45 = vpop.permute.xlu1 %1885 }
 0x182   : > { %3002 = vrot.lane.b32.xlu0 %v6629_v4, %s5908_s22  ;;  %4750 = vmatmul.mubr.msk.bf16.gmra.mxu1 %vm1286_vm1, %v6412_v19 }
 0x183   : > { %2996 = vrot.lane.b32.xlu1 %v6683_v24, %s5908_s22  ;;  %4751 = vmatprep.mubr.msk.bf16.mxu1 %vm1286_vm1, %v6554_v29 }
 0x184   : > { %v6862_v6 = vpop.permute.xlu0 %2527 }
 0x185   : > { %v6864_v2 = vpop.permute.xlu1 %2535 }
 0x186   : > { %2998 = vrot.lane.b32.xlu0 %v6666_v34, %s5908_s22 }
 0x187   : > { %2366 = vrot.lane.b32.xlu1 %v6650_v32, %s5907_s21 }
 0x188   : > { %v6870_v57 = vpop.permute.xlu0 %2537 }
 0x189   : > { %v1892_v39 = vpop.permute.xlu1 %1891 }
 0x18a   : > { %2994 = vrot.lane.b32.xlu0 %v6500_v35, %s5908_s22  ;;  %4752 = vmatmul.mubr.msk.bf16.gmra.mxu1 %vm1286_vm1, %v6554_v29  ;;  %v1943_v29 = vsel %vm1286_vm1, %v1880_v16, 0  ;;  %v1940_v16 = vsel %vm1286_vm1, %v6814_v1, 0  ;;  %v1937_v1 = vsel %vm1286_vm1, %v6812_v53, 0 }
 0x18b   : > { %3000 = vrot.lane.b32.xlu1 %v6650_v32, %s5908_s22  ;;  %4753 = vmatprep.mubr.msk.bf16.mxu1 %vm1286_vm1, %v6580_v21 }
 0x18c   : > { %v6880_v19 = vpop.permute.xlu0 %2541 }
 0x18d   : > { %v1890_v62 = vpop.permute.xlu1 %1889 }
 0x18e   : > { %2990 = vrot.lane.b32.xlu0 %v6473_v18, %s5908_s22 }
 0x18f   : > { %2372 = vrot.lane.b32.xlu1 %v6722_v0, %s5907_s21 }
 0x190   : > { %v1896_v58 = vpop.permute.xlu0 %1895 }
 0x191   : > { %v6886_v33 = vpop.permute.xlu1 %2539  ;;  %5237 = vmatprep.subr.msk.bf16.mxu1 %vm1286_vm1, %v1896_v58 }
 0x192   : > { %3636 = vrot.lane.b32.xlu0 %v6629_v4, %s5909_s28  ;;  %4754 = vmatmul.mubr.msk.bf16.gmra.mxu1 %vm1286_vm1, %v6580_v21 }
 0x193   : > { %2370 = vrot.lane.b32.xlu1 %v6740_v20, %s5907_s21  ;;  %4820 = vmatpush3.bf16.xpose.msra.mxu1 %v1943_v29 }
 0x194   : > { %4835 = vmatprep.mubr.msk.bf16.mxu1 %vm1286_vm1, %v6763_v15 }
 0x195   : > { %v6898_v48 = vpop.permute.xlu1 %2517 }
 0x196   : > { %3632 = vrot.lane.b32.xlu0 %v6666_v34, %s5909_s28  ;;  %v6920_v34 = vpop.permute.xlu0 %1845 }
 0x197   : > { %2376 = vrot.lane.b32.xlu1 %v6688_v28, %s5907_s21 }
 0x199   : > { %v6904_v49 = vpop.permute.xlu1 %1847 }
 0x19a   : > { %v6928_v13 = vpop.permute.xlu0 %2533 }
 0x19b   : > { %2374 = vrot.lane.b32.xlu1 %v6710_v50, %s5907_s21 }
 0x19d   : > { %v6908_v21 = vpop.permute.xlu1 %2531 }
 0x19e   : > { %v6936_v31 = vpop.permute.xlu0 %2515 }
 0x19f   : > { %2380 = vrot.lane.b32.xlu1 %v6654_v10, %s5907_s21 }
 0x1a1   : > { %v6912_v4 = vpop.permute.xlu1 %3163 }
 0x1a2   : > { %v6944_v63 = vpop.permute.xlu0 %2499 }
 0x1a3   : > { %3014 = vrot.lane.b32.xlu1 %v6654_v10, %s5908_s22 }
 0x1a5   : > { %v6916_v44 = vpop.permute.xlu1 %2501 }
 0x1a6   : > { %v6952_v30 = vpop.permute.xlu0 %3161 }
 0x1a7   : > { %2378 = vrot.lane.b32.xlu1 %v6676_v54, %s5907_s21 }
 0x1a9   : > { %v6922_v40 = vpop.permute.xlu1 %3159 }
 0x1aa   : > { %v6961_v58 = vpop.permute.xlu0 %2503 }
 0x1ab   : > { %3012 = vrot.lane.b32.xlu1 %v6676_v54, %s5908_s22 }
 0x1ad   : > { %v6926_v26 = vpop.permute.xlu1 %2505 }
 0x1ae   : > { %v6970_v18 = vpop.permute.xlu0 %3175 }
 0x1af   : > { %2384 = vrot.lane.b32.xlu1 %v6636_v37, %s5907_s21 }
 0x1b1   : > { %v6932_v3 = vpop.permute.xlu1 %3173 }
 0x1b3   : > { %3018 = vrot.lane.b32.xlu1 %v6636_v37, %s5908_s22 }
 0x1b5   : > { %v6938_v7 = vpop.permute.xlu1 %3155 }
 0x1b7   : > { %2382 = vrot.lane.b32.xlu1 %v6643_v61, %s5907_s21 }
 0x1b9   : > { %v6942_v27 = vpop.permute.xlu1 %2509 }
 0x1bb   : > { %3016 = vrot.lane.b32.xlu1 %v6643_v61, %s5908_s22 }
 0x1bd   : > { %v6948_v22 = vpop.permute.xlu1 %3169 }
 0x1bf   : > { %3010 = vrot.lane.b32.xlu1 %v6688_v28, %s5908_s22 }
 0x1c1   : > { %v6954_v25 = vpop.permute.xlu1 %3151 }
 0x1c3   : > { %3008 = vrot.lane.b32.xlu1 %v6710_v50, %s5908_s22 }
 0x1c5   : > { %v1894_v23 = vpop.permute.xlu1 %1893 }
 0x1c6   : > { %5238 = vmatprep.subr.msk.bf16.mxu1 %vm1286_vm1, %v1894_v23 }
 0x1c7   : > { %2992 = vrot.lane.b32.xlu1 %v6717_v14, %s5908_s22  ;;  %4822 = vmatpush3.bf16.xpose.msra.mxu1 %v1940_v16 }
 0x1c8   : > { %5239 = vmatprep.subr.msk.bf16.mxu1 %vm1286_vm1, %v1892_v39  ;;  %v6981_v39 = vpop.permute.xlu0 %3157 }
 0x1c9   : > { %v6966_v29 = vpop.permute.xlu1 %2513 }
 0x1cb   : > { %3006 = vrot.lane.b32.xlu1 %v6722_v0, %s5908_s22  ;;  %v1934_v0 = vsel %vm1286_vm1, %v6824_v38, 0 }
 0x1cc   : > { %v6993_v53 = vpop.permute.xlu0 %2507 }
 0x1cd   : > { %v6972_v35 = vpop.permute.xlu1 %3165 }
 0x1cf   : > { %3004 = vrot.lane.b32.xlu1 %v6740_v20, %s5908_s22  ;;  %4824 = vmatpush3.bf16.xpose.msra.mxu1 %v1937_v1 }
 0x1d0   : > { %5240 = vmatprep.subr.msk.bf16.mxu1 %vm1286_vm1, %v1890_v62  ;;  %v7003_v38 = vpop.permute.xlu0 %3171 }
 0x1d1   : > { %v6979_v23 = vpop.permute.xlu1 %3135 }
 0x1d3   : > { %2988 = vrot.lane.b32.xlu1 %v6747_v11, %s5908_s22  ;;  %v1931_v11 = vsel %vm1286_vm1, %v6772_v12, 0  ;;  %v1928_v12 = vsel %vm1286_vm1, %v6784_v42, 0 }
 0x1d5   : > { %v6985_v16 = vpop.permute.xlu1 %3139 }
 0x1d7   : > { %4826 = vmatpush3.bf16.xpose.msra.mxu1 %v1934_v0  ;;  %3652 = vrot.lane.b32.xlu1 %v6636_v37, %s5909_s28 }
 0x1d8   : > { %5241 = vmatprep.subr.msk.bf16.mxu1 %vm1286_vm1, %v6846_v36 }
 0x1d9   : > { %v6995_v62 = vpop.permute.xlu1 %3143 }
 0x1db   : > { %3650 = vrot.lane.b32.xlu1 %v6643_v61, %s5909_s28  ;;  %v7013_v61 = vpop.permute.xlu0 %3153 }
 0x1dd   : > { %v6999_v1 = vpop.permute.xlu1 %3147 }
 0x1df   : > { %4828 = vmatpush3.bf16.xpose.msra.mxu1 %v1931_v11  ;;  %3634 = vrot.lane.b32.xlu1 %v6650_v32, %s5909_s28  ;;  %v7023_v11 = vpop.permute.xlu0 %2511 }
 0x1e0   : > { %5242 = vmatprep.subr.msk.bf16.mxu1 %vm1286_vm1, %v6852_v45  ;;  %v1925_v45 = vsel %vm1286_vm1, %v6737_v52, 0 }
 0x1e1   : > { %v7009_v37 = vpop.permute.xlu1 %2362 }
 0x1e2   : > { %9213 = vst [vmem:[#allocation11_spill] sm:$0xff] %v7009_v37 }
 0x1e3   : > { %3648 = vrot.lane.b32.xlu1 %v6654_v10, %s5909_s28  ;;  %v7029_v10 = vpop.permute.xlu0 %3167 }
 0x1e5   : > { %v7015_v0 = vpop.permute.xlu1 %2358 }
 0x1e6   : > { %9214 = vst [vmem:[#allocation12_spill] sm:$0xff] %v7015_v0 }
 0x1e7   : > { %4830 = vmatpush3.bf16.xpose.msra.mxu1 %v1928_v12  ;;  %v2546_v12 = vpop.permute.xlu0 %2545 }
 0x1e8   : > { %5243 = vmatprep.subr.msk.bf16.mxu1 %vm1286_vm1, %v6826_v5  ;;  %v1922_v5 = vsel %vm1286_vm1, %v6749_v47, 0 }
 0x1e9   : > { %v7021_v32 = vpop.permute.xlu1 %2354 }
 0x1ea   : > { %9215 = vst [vmem:[#allocation13_spill] sm:$0xff] %v7021_v32 }
 0x1ed   : > { %v2544_v36 = vpop.permute.xlu1 %2543 }
 0x1ef   : > { %4832 = vmatpush3.bf16.xpose.msra.mxu1 %v1925_v45 }
 0x1f0   : > { %5244 = vmatprep.subr.msk.bf16.mxu1 %vm1286_vm1, %v6834_v8  ;;  %v2593_v8 = vsel %vm1286_vm1, %v6806_v9, 0 }
 0x1f1   : > { %v7031_v20 = vpop.permute.xlu1 %3177 }
 0x1f5   : > { %v7033_v42 = vpop.permute.xlu1 %2996 }
 0x1f6   : > { %9216 = vst [vmem:[#allocation14_spill] sm:$0xff] %v7033_v42 }
 0x1f7   : > { %4834 = vmatpush3.bf16.xpose.msra.mxu1 %v1922_v5  ;;  %v2590_v5 = vsel %vm1286_vm1, %v6862_v6, 0 }
 0x1f8   : > { %5245 = vmatprep.subr.msk.bf16.mxu1 %vm1286_vm1, %v2546_v12 }
 0x1f9   : > { %v7038_v14 = vpop.permute.xlu1 %2366 }
 0x1fd   : > { %v7040_v52 = vpop.permute.xlu1 %3000 }
 0x1fe   : > { %9217 = vst [vmem:[#allocation15_spill] sm:$0xff] %v7040_v52  ;;  %4836 = vmatmul.mubr.msk.bf16.vlgmr.msra.gmra.mxu1 %vm1286_vm1, %v6763_v15 }
 0x1ff   : > { %4837 = vmatprep.mubr.msk.bf16.mxu1 %vm1286_vm1, %v6752_v46  ;;  %4916 = vmatpush3.bf16.xpose.msra.mxu1 %v2593_v8 }
 0x200   : > { %5246 = vmatprep.subr.msk.bf16.mxu1 %vm1286_vm1, %v2544_v36  ;;  %v2587_v36 = vsel %vm1286_vm1, %v6786_v59, 0 }
 0x201   : > { %v7049_v47 = vpop.permute.xlu1 %2372 }
 0x202   : > { %9218 = vst [vmem:[#allocation16_spill] sm:$0xff] %v7049_v47 }
 0x205   : > { %v7051_v45 = vpop.permute.xlu1 %2370 }
 0x206   : > { %9219 = vst [vmem:[#allocation17_spill] sm:$0xff] %v7051_v45  ;;  %4838 = vmatmul.mubr.msk.bf16.gmra.mxu1 %vm1286_vm1, %v6752_v46 }
 0x207   : > { %4839 = vmatprep.mubr.msk.bf16.mxu1 %vm1286_vm1, %v6804_v43  ;;  %4918 = vmatpush3.bf16.xpose.msra.mxu1 %v2590_v5 }
 0x208   : > { %5247 = vmatprep.subr.msk.bf16.mxu1 %vm1286_vm1, %v6880_v19  ;;  %v2584_v19 = vsel %vm1286_vm1, %v6832_v41, 0 }
 0x209   : > { %v7061_v15 = vpop.permute.xlu1 %2376 }
 0x20a   : > { %9220 = vst [vmem:[#allocation18_spill] sm:$0xff] %v7061_v15 }
 0x20d   : > { %v7063_v9 = vpop.permute.xlu1 %2374 }
 0x20e   : > { %9221 = vst [vmem:[#allocation19_spill] sm:$0xff] %v7063_v9  ;;  %4840 = vmatmul.mubr.msk.bf16.gmra.mxu1 %vm1286_vm1, %v6804_v43 }
 0x20f   : > { %4841 = vmatprep.mubr.msk.bf16.mxu1 %vm1286_vm1, %v6774_v56  ;;  %4920 = vmatpush3.bf16.xpose.msra.mxu1 %v2587_v36 }
 0x210   : > { %5248 = vmatprep.subr.msk.bf16.mxu1 %vm1286_vm1, %v6886_v33 }
 0x211   : > { %v7073_v46 = vpop.permute.xlu1 %2380 }
 0x215   : > { %v7075_v6 = vpop.permute.xlu1 %3014 }
 0x216   : > { %9222 = vst [vmem:[#allocation20_spill] sm:$0xff] %v7075_v6  ;;  %4842 = vmatmul.mubr.msk.bf16.gmra.mxu1 %vm1286_vm1, %v6774_v56  ;;  %v2581_v56 = vsel %vm1286_vm1, %v6766_v55, 0 }
 0x217   : > { %4843 = vmatprep.mubr.msk.bf16.mxu1 %vm1286_vm1, %v6844_v60  ;;  %4922 = vmatpush3.bf16.xpose.msra.mxu1 %v2584_v19 }
 0x218   : > { %5249 = vmatprep.subr.msk.bf16.mxu1 %vm1286_vm1, %v6870_v57 }
 0x219   : > { %v7085_v59 = vpop.permute.xlu1 %2378 }
 0x21a   : > { %9223 = vst [vmem:[#allocation21_spill] sm:$0xff] %v7085_v59  ;;  %v7087_v43 = vpop.f32.mrf.mxu1 }
 0x21c   : > { %v7089_v33 = vpop.f32.mrf.mxu1 }
 0x21d   : > { %v7091_v12 = vpop.permute.xlu1 %3012  ;;  %v1472_v41 = vmax.f32 %v7087_v43, %v7089_v33 }
 0x21e   : > { %9224 = vst [vmem:[#allocation22_spill] sm:$0xff] %v7091_v12  ;;  %4844 = vmatmul.mubr.msk.bf16.gmra.mxu1 %vm1286_vm1, %v6844_v60  ;;  %v7099_v8 = vpop.f32.mrf.mxu1 }
 0x21f   : > { %4845 = vmatprep.mubr.msk.bf16.mxu1 %vm1286_vm1, %v6794_v17  ;;  %4924 = vmatpush3.bf16.xpose.msra.mxu1 %v2581_v56  ;;  %v2578_v56 = vsel %vm1286_vm1, %v6792_v51, 0 }
 0x220   : > { %5250 = vmatprep.subr.msk.bf16.mxu1 %vm1286_vm1, %v6864_v2  ;;  %1473 = vmax.xlane.f32.xlu0 %v1472_v41  ;;  %v7105_v57 = vpop.f32.mrf.mxu1 }
 0x221   : > { %v2385_v5 = vpop.permute.xlu1 %2384  ;;  %v1475_v36 = vmax.f32 %v7099_v8, %v7105_v57 }
 0x222   : > { %v7109_v55 = vpop.f32.mrf.mxu1  ;;  %4851 = vmatprep.subr.bf16.mxu0 %v2385_v5 }
 0x223   : > { %1476 = vmax.xlane.f32.xlu1 %v1475_v36 }
 0x224   : > { %v7111_v60 = vpop.f32.mrf.mxu1 }
 0x225   : > { %v1478_v19 = vmax.f32 %v7109_v55, %v7111_v60 }
 0x226   : > { %4846 = vmatmul.mubr.msk.bf16.gmra.mxu1 %vm1286_vm1, %v6794_v17  ;;  %v7119_v2 = vpop.f32.mrf.mxu1 }
 0x227   : > { %4847 = vmatprep.mubr.msk.bf16.mxu1 %vm1286_vm1, %v6920_v34  ;;  %4926 = vmatpush3.bf16.xpose.msra.mxu1 %v2578_v56  ;;  %v2575_v56 = vsel %vm1286_vm1, %v6898_v48, 0 }
 0x228   : > { %5251 = vmatprep.subr.msk.bf16.mxu1 %vm1286_vm1, %v6928_v13  ;;  %1479 = vmax.xlane.f32.xlu0 %v1478_v19  ;;  %v7125_v41 = vpop.f32.mrf.mxu1 }
 0x229   : > { %v1481_v5 = vmax.f32 %v7119_v2, %v7125_v41 }
 0x22a   : > { %v7129_v36 = vpop.f32.mrf.mxu1 }
 0x22c   : > { %1482 = vmax.xlane.f32.xlu0 %v1481_v5  ;;  %v7131_v51 = vpop.f32.mrf.mxu1 }
 0x22d   : > { %v1484_v17 = vmax.f32 %v7129_v36, %v7131_v51 }
 0x22e   : > { %4848 = vmatmul.mubr.msk.bf16.gmra.mxu1 %vm1286_vm1, %v6920_v34  ;;  %v7139_v13 = vpop.f32.mrf.mxu1 }
 0x22f   : > { %4849 = vmatprep.mubr.msk.bf16.mxu1 %vm1286_vm1, %v6904_v49  ;;  %4928 = vmatpush3.bf16.xpose.msra.mxu1 %v2575_v56  ;;  %v2572_v56 = vsel %vm1286_vm1, %v6936_v31, 0 }
 0x230   : > { %5252 = vmatprep.subr.msk.bf16.mxu1 %vm1286_vm1, %v6908_v21  ;;  %1485 = vmax.xlane.f32.xlu1 %v1484_v17  ;;  %v7145_v19 = vpop.f32.mrf.mxu1  ;;  %v3180_v17 = vpop.permute.xlu0 %3179 }
 0x231   : > { %v1487_v5 = vmax.f32 %v7139_v13, %v7145_v19 }
 0x232   : > { %v7149_v50 = vpop.f32.mrf.mxu1 }
 0x233   : > { %1488 = vmax.xlane.f32.xlu0 %v1487_v5 }
 0x234   : > { %v7151_v48 = vpop.f32.mrf.mxu1 }
 0x235   : > { %v1490_v34 = vmax.f32 %v7149_v50, %v7151_v48 }
 0x236   : > { %4850 = vmatmul.mubr.msk.bf16.gmra.mxu1 %vm1286_vm1, %v6904_v49  ;;  %v7159_v21 = vpop.f32.mrf.mxu1 }
 0x237   : > { %4930 = vmatpush3.bf16.xpose.msra.mxu1 %v2572_v56  ;;  %4931 = vmatprep.mubr.msk.bf16.mxu1 %vm1286_vm1, %v6944_v63  ;;  %v3227_v56 = vsel %vm1286_vm1, %v6912_v4, 0 }
 0x238   : > { %5253 = vmatprep.subr.msk.bf16.mxu1 %vm1286_vm1, %v3180_v17  ;;  %1491 = vmax.xlane.f32.xlu1 %v1490_v34  ;;  %v7164_v5 = vpop.f32.mrf.mxu1 }
 0x239   : > { %v1493_v42 = vmax.f32 %v7159_v21, %v7164_v5 }
 0x23a   : > { %v7168_v12 = vpop.f32.mrf.mxu1 }
 0x23b   : > { %1494 = vmax.xlane.f32.xlu0 %v1493_v42 }
 0x23c   : > { %v7170_v31 = vpop.f32.mrf.mxu1 }
 0x23d   : > { %v1496_v49 = vmax.f32 %v7168_v12, %v7170_v31 }
 0x23e   : > { %4932 = vmatmul.mubr.msk.bf16.vlgmr.msra.gmra.mxu1 %vm1286_vm1, %v6944_v63  ;;  %v7178_v34 = vpop.f32.mrf.mxu1 }
 0x23f   : > { %4933 = vmatprep.mubr.msk.bf16.mxu1 %vm1286_vm1, %v6916_v44  ;;  %5012 = vmatpush3.bf16.xpose.msra.mxu1 %v3227_v56  ;;  %v3224_v56 = vsel %vm1286_vm1, %v6952_v30, 0 }
 0x240   : > { %5254 = vmatprep.subr.msk.bf16.mxu1 %vm1286_vm1, %v7031_v20  ;;  %1497 = vmax.xlane.f32.xlu1 %v1496_v49  ;;  %v7184_v42 = vpop.f32.mrf.mxu1 }
 0x241   : > { %v1499_v17 = vmax.f32 %v7178_v34, %v7184_v42 }
 0x242   : > { %v7188_v6 = vpop.f32.mrf.mxu1 }
 0x243   : > { %1500 = vmax.xlane.f32.xlu0 %v1499_v17 }
 0x244   : > { %v7190_v4 = vpop.f32.mrf.mxu1 }
 0x245   : > { %v1502_v63 = vmax.f32 %v7188_v6, %v7190_v4 }
 0x246   : > { %4934 = vmatmul.mubr.msk.bf16.gmra.mxu1 %vm1286_vm1, %v6916_v44  ;;  %v7198_v20 = vpop.f32.mrf.mxu1 }
 0x247   : > { %4935 = vmatprep.mubr.msk.bf16.mxu1 %vm1286_vm1, %v6961_v58  ;;  %5014 = vmatpush3.bf16.xpose.msra.mxu1 %v3224_v56  ;;  %v3221_v56 = vsel %vm1286_vm1, %v6922_v40, 0 }
 0x248   : > { %5255 = vmatprep.subr.msk.bf16.mxu1 %vm1286_vm1, %v6970_v18  ;;  %1503 = vmax.xlane.f32.xlu1 %v1502_v63  ;;  %v7204_v49 = vpop.f32.mrf.mxu1 }
 0x249   : > { %v1505_v17 = vmax.f32 %v7198_v20, %v7204_v49 }
 0x24a   : > { %v7208_v52 = vpop.f32.mrf.mxu1 }
 0x24b   : > { %1506 = vmax.xlane.f32.xlu0 %v1505_v17 }
 0x24c   : > { %v7210_v30 = vpop.f32.mrf.mxu1 }
 0x24d   : > { %v1508_v44 = vmax.f32 %v7208_v52, %v7210_v30 }
 0x24e   : > { %4936 = vmatmul.mubr.msk.bf16.gmra.mxu1 %vm1286_vm1, %v6961_v58  ;;  %v7218_v18 = vpop.f32.mrf.mxu1 }
 0x24f   : > { %4937 = vmatprep.mubr.msk.bf16.mxu1 %vm1286_vm1, %v6926_v26  ;;  %5016 = vmatpush3.bf16.xpose.msra.mxu1 %v3221_v56  ;;  %v3218_v56 = vsel %vm1286_vm1, %v6981_v39, 0  ;;  %v3215_v39 = vsel %vm1286_vm1, %v6938_v7, 0  ;;  %v3209_v7 = vsel %vm1286_vm1, %v6954_v25, 0 }
 0x250   : > { %5256 = vmatprep.subr.msk.bf16.mxu1 %vm1286_vm1, %v6932_v3  ;;  %1509 = vmax.xlane.f32.xlu1 %v1508_v44  ;;  %v7224_v63 = vpop.f32.mrf.mxu1 }
 0x251   : > { %v1511_v17 = vmax.f32 %v7218_v18, %v7224_v63 }
 0x252   : > { %v7228_v24 = vpop.f32.mrf.mxu1 }
 0x253   : > { %1512 = vmax.xlane.f32.xlu0 %v1511_v17 }
 0x254   : > { %v7230_v40 = vpop.f32.mrf.mxu1 }
 0x255   : > { %v1514_v58 = vmax.f32 %v7228_v24, %v7230_v40 }
 0x256   : > { %4938 = vmatmul.mubr.msk.bf16.gmra.mxu1 %vm1286_vm1, %v6926_v26  ;;  %v7238_v3 = vpop.f32.mrf.mxu1  ;;  %v3212_v26 = vsel %vm1286_vm1, %v7013_v61, 0 }
 0x257   : > { %4939 = vmatprep.mubr.msk.bf16.mxu1 %vm1286_vm1, %v6993_v53  ;;  %5018 = vmatpush3.bf16.xpose.msra.mxu1 %v3218_v56 }
 0x258   : > { %5257 = vmatprep.subr.msk.bf16.mxu1 %vm1286_vm1, %v7003_v38  ;;  %1515 = vmax.xlane.f32.xlu1 %v1514_v58  ;;  %v7244_v44 = vpop.f32.mrf.mxu1  ;;  %v7282_v38 = vpop.permute.xlu1 %3018 }
 0x259   : > { %v1517_v17 = vmax.f32 %v7238_v3, %v7244_v44  ;;  %9225 = vst [vmem:[#allocation23_spill] sm:$0xff] %v7282_v38 }
 0x25b   : > { %1518 = vmax.xlane.f32.xlu0 %v1517_v17 }
 0x25c   : > { %v7287_v61 = vpop.permute.xlu1 %2382 }
 0x25e   : > { %4940 = vmatmul.mubr.msk.bf16.gmra.mxu1 %vm1286_vm1, %v6993_v53 }
 0x25f   : > { %4941 = vmatprep.mubr.msk.bf16.mxu1 %vm1286_vm1, %v6942_v27  ;;  %5020 = vmatpush3.bf16.xpose.msra.mxu1 %v3215_v39 }
 0x260   : > { %5258 = vmatprep.subr.msk.bf16.mxu1 %vm1286_vm1, %v6948_v22  ;;  %v3150_v22 = vpop.permute.xlu0 %3149 }
 0x264   : > { %v3134_v53 = vpop.permute.xlu0 %3133 }
 0x266   : > { %4942 = vmatmul.mubr.msk.bf16.gmra.mxu1 %vm1286_vm1, %v6942_v27  ;;  %v3206_v27 = vsel %vm1286_vm1, %v3150_v22, 0 }
 0x267   : > { %4943 = vmatprep.mubr.msk.bf16.mxu1 %vm1286_vm1, %v7023_v11  ;;  %5022 = vmatpush3.bf16.xpose.msra.mxu1 %v3212_v26 }
 0x268   : > { %5259 = vmatprep.subr.msk.bf16.mxu1 %vm1286_vm1, %v7029_v10  ;;  %v3138_v25 = vpop.permute.xlu0 %3137 }
 0x26e   : > { %4944 = vmatmul.mubr.msk.bf16.gmra.mxu1 %vm1286_vm1, %v7023_v11 }
 0x26f   : > { %4945 = vmatprep.mubr.msk.bf16.mxu1 %vm1286_vm1, %v6966_v29  ;;  %5024 = vmatpush3.bf16.xpose.msra.mxu1 %v3209_v7 }
 0x270   : > { %5260 = vmatprep.subr.msk.bf16.mxu1 %vm1286_vm1, %v6972_v35  ;;  %v3142_v35 = vpop.permute.xlu0 %3141 }
 0x276   : > { %4946 = vmatmul.mubr.msk.bf16.gmra.mxu1 %vm1286_vm1, %v6966_v29  ;;  %v3146_v29 = vpop.permute.xlu0 %3145 }
 0x277   : > { %5026 = vmatpush3.bf16.xpose.msra.mxu1 %v3206_v27  ;;  %5027 = vmatprep.mubr.msk.bf16.mxu1 %vm1286_vm1, %v3134_v53 }
 0x27a   : > { %v7291_v11 = vpop.permute.xlu0 %2364 }
 0x27e   : > { %5028 = vmatmul.mubr.msk.bf16.vlgmr.msra.gmra.mxu1 %vm1286_vm1, %v3134_v53  ;;  %v7296_v10 = vpop.permute.xlu0 %2360 }
 0x27f   : > { %5029 = vmatprep.mubr.msk.bf16.mxu1 %vm1286_vm1, %v6979_v23  ;;  %9227 = vst [vmem:[#allocation25_spill] sm:$0xff] %v7296_v10 }
 0x282   : > { %v7303_v56 = vpop.permute.xlu0 %2356 }
 0x283   : > { %9229 = vst [vmem:[#allocation27_spill] sm:$0xff] %v7303_v56 }
 0x286   : > { %5030 = vmatmul.mubr.msk.bf16.gmra.mxu1 %vm1286_vm1, %v6979_v23  ;;  %v7294_v23 = vpop.permute.xlu1 %3016 }
 0x287   : > { %5031 = vmatprep.mubr.msk.bf16.mxu1 %vm1286_vm1, %v3138_v25  ;;  %9226 = vst [vmem:[#allocation24_spill] sm:$0xff] %v7294_v23 }
 0x28a   : > { %v7299_v58 = vpop.permute.xlu1 %3010 }
 0x28b   : > { %9228 = vst [vmem:[#allocation26_spill] sm:$0xff] %v7299_v58 }
 0x28e   : > { %5032 = vmatmul.mubr.msk.bf16.gmra.mxu1 %vm1286_vm1, %v3138_v25  ;;  %v7305_v17 = vpop.permute.xlu1 %3008 }
 0x28f   : > { %5033 = vmatprep.mubr.msk.bf16.mxu1 %vm1286_vm1, %v6985_v16  ;;  %9230 = vst [vmem:[#allocation28_spill] sm:$0xff] %v7305_v17 }
 0x292   : > { %v7312_v39 = vpop.permute.xlu1 %2992 }
 0x293   : > { %9231 = vst [vmem:[#allocation29_spill] sm:$0xff] %v7312_v39 }
 0x296   : > { %5034 = vmatmul.mubr.msk.bf16.gmra.mxu1 %vm1286_vm1, %v6985_v16  ;;  %v7310_v16 = vpop.permute.xlu0 %2368  ;;  %v7319_v7 = vpop.permute.xlu1 %3006 }
 0x297   : > { %5035 = vmatprep.mubr.msk.bf16.mxu1 %vm1286_vm1, %v3142_v35  ;;  %9233 = vst [vmem:[#allocation31_spill] sm:$0xff] %v7319_v7 }
 0x29a   : > { %v7315_v26 = vpop.permute.xlu0 %3002 }
 0x29b   : > { %9232 = vst [vmem:[#allocation30_spill] sm:$0xff] %v7315_v26 }
 0x29e   : > { %5036 = vmatmul.mubr.msk.bf16.gmra.mxu1 %vm1286_vm1, %v3142_v35  ;;  %v7321_v22 = vpop.permute.xlu0 %2998 }
 0x29f   : > { %5037 = vmatprep.mubr.msk.bf16.mxu1 %vm1286_vm1, %v6995_v62  ;;  %9234 = vst [vmem:[#allocation32_spill] sm:$0xff] %v7321_v22 }
 0x2a2   : > { %v7327_v27 = vpop.permute.xlu0 %2994 }
 0x2a3   : > { %9236 = vst [vmem:[#allocation34_spill] sm:$0xff] %v7327_v27 }
 0x2a6   : > { %5038 = vmatmul.mubr.msk.bf16.gmra.mxu1 %vm1286_vm1, %v6995_v62  ;;  %v7325_v62 = vpop.permute.xlu1 %3004 }
 0x2a7   : > { %5039 = vmatprep.mubr.msk.bf16.mxu1 %vm1286_vm1, %v3146_v29  ;;  %9235 = vst [vmem:[#allocation33_spill] sm:$0xff] %v7325_v62 }
 0x2aa   : > { %v7329_v53 = vpop.permute.xlu1 %2988 }
 0x2ab   : > { %9237 = vst [vmem:[#allocation35_spill] sm:$0xff] %v7329_v53 }
 0x2ae   : > { %5040 = vmatmul.mubr.msk.bf16.gmra.mxu1 %vm1286_vm1, %v3146_v29  ;;  %v7335_v29 = vpop.permute.xlu0 %2990  ;;  %v7337_v39 = vpop.permute.xlu1 %3652 }
 0x2af   : > { %5041 = vmatprep.mubr.msk.bf16.mxu1 %vm1286_vm1, %v6999_v1  ;;  %9238 = vst [vmem:[#allocation36_spill] sm:$0xff] %v7335_v29  ;;  %9239 = vst [vmem:[#allocation37_spill] sm:$0xff] %v7337_v39 }
 0x2b2   : > { %v7349_v27 = vpop.permute.xlu0 %3636  ;;  %v7351_v58 = vpop.permute.xlu1 %3650 }
 0x2b3   : > { %9240 = vst [vmem:[#allocation38_spill] sm:$0xff] %v7349_v27  ;;  %9241 = vst [vmem:[#allocation39_spill] sm:$0xff] %v7351_v58 }
 0x2b6   : > { %5042 = vmatmul.mubr.msk.bf16.gmra.mxu1 %vm1286_vm1, %v6999_v1  ;;  %v7361_v23 = vpop.permute.xlu0 %3632  ;;  %v7363_v26 = vpop.permute.xlu1 %3634 }
 0x2b7   : > { %9242 = vst [vmem:[#allocation40_spill] sm:$0xff] %v7361_v23  ;;  %9243 = vst [vmem:[#allocation41_spill] sm:$0xff] %v7363_v26 }
 0x2ba   : > { %v7371_v58 = vpop.permute.xlu1 %3648  ;;  %v1474_v32 = vpop.xlane.xlu0 %1473 }
 0x2bb   : > { %9244 = vst [vmem:[#allocation42_spill] sm:$0xff] %v7371_v58  ;;  %v1520_v23 = vsub.f32 %v7087_v43, %v1474_v32  ;;  %v1521_v56 = vsub.f32 %v7089_v33, %v1474_v32 }
 0x2bd   : > { %v1552_v28 = vmul.f32 1.442695, %v1520_v23 }
 0x2be   : > { %v7331_v25 = vpop.f32.mrf.mxu1  ;;  %v1477_v47 = vpop.xlane.xlu1 %1476 }
 0x2bf   : > { %v1480_v58 = vpop.xlane.xlu0 %1479  ;;  %v1522_v9 = vsub.f32 %v7099_v8, %v1477_v47  ;;  %v1523_v43 = vsub.f32 %v7105_v57, %v1477_v47  ;;  %5435 = vpow2.f32 %v1552_v28 }
 0x2c0   : > { %v7333_v35 = vpop.f32.mrf.mxu1  ;;  %v1524_v37 = vsub.f32 %v7109_v55, %v1480_v58  ;;  %v1525_v8 = vsub.f32 %v7111_v60, %v1480_v58 }
 0x2c1   : > { %v2082_v7 = vmax.f32 %v7331_v25, %v7333_v35  ;;  %v1556_v33 = vmul.f32 1.442695, %v1522_v9  ;;  %v1558_v23 = vmul.f32 1.442695, %v1523_v43 }
 0x2c2   : > { %v7341_v17 = vpop.f32.mrf.mxu1  ;;  %v1562_v9 = vmul.f32 1.442695, %v1525_v8 }
 0x2c3   : > { %2083 = vmax.xlane.f32.xlu1 %v2082_v7 }
 0x2c4   : > { %v7343_v1 = vpop.f32.mrf.mxu1 }
 0x2c5   : > { %v2085_v62 = vmax.f32 %v7341_v17, %v7343_v1 }
 0x2c6   : > { %v7347_v53 = vpop.f32.mrf.mxu1 }
 0x2c7   : > { %2086 = vmax.xlane.f32.xlu0 %v2085_v62 }
 0x2c8   : > { %v7353_v29 = vpop.f32.mrf.mxu1 }
 0x2c9   : > { %v2088_v39 = vmax.f32 %v7347_v53, %v7353_v29 }
 0x2ca   : > { %v7357_v22 = vpop.f32.mrf.mxu1 }
 0x2cb   : > { %2089 = vmax.xlane.f32.xlu1 %v2088_v39 }
 0x2cc   : > { %v7359_v7 = vpop.f32.mrf.mxu1 }
 0x2cd   : > { %v2091_v27 = vmax.f32 %v7357_v22, %v7359_v7 }
 0x2ce   : > { %v7367_v38 = vpop.f32.mrf.mxu1 }
 0x2cf   : > { %2092 = vmax.xlane.f32.xlu0 %v2091_v27 }
 0x2d0   : > { %v7369_v62 = vpop.f32.mrf.mxu1 }
 0x2d1   : > { %v2094_v39 = vmax.f32 %v7367_v38, %v7369_v62 }
 0x2d2   : > { %v7375_v45 = vpop.f32.mrf.mxu1 }
 0x2d3   : > { %2095 = vmax.xlane.f32.xlu1 %v2094_v39  ;;  %v1554_v39 = vmul.f32 1.442695, %v1521_v56  ;;  %v1560_v56 = vmul.f32 1.442695, %v1524_v37 }
 0x2d4   : > { %v7378_v26 = vpop.f32.mrf.mxu1 }
 0x2d5   : > { %v2097_v27 = vmax.f32 %v7375_v45, %v7378_v26  ;;  %5437 = vpow2.f32 %v1554_v39  ;;  %v1486_v39 = vpop.xlane.xlu1 %1485 }
 0x2d6   : > { %v7383_v0 = vpop.f32.mrf.mxu1  ;;  %5439 = vpow2.f32 %v1556_v33  ;;  %v1528_v33 = vsub.f32 %v7129_v36, %v1486_v39  ;;  %v7420_v36 = vpop.eup %5435 }
 0x2d7   : > { %2098 = vmax.xlane.f32.xlu0 %v2097_v27  ;;  %v1483_v27 = vpop.xlane.xlu0 %1482  ;;  %5441 = vpow2.f32 %v1558_v23  ;;  %v1529_v23 = vsub.f32 %v7131_v51, %v1486_v39 }
 0x2d8   : > { %v7386_v10 = vpop.f32.mrf.mxu1  ;;  %v1526_v28 = vsub.f32 %v7119_v2, %v1483_v27  ;;  %v1527_v55 = vsub.f32 %v7125_v41, %v1483_v27  ;;  %5443 = vpow2.f32 %v1560_v56 }
 0x2d9   : > { %v2100_v15 = vmax.f32 %v7383_v0, %v7386_v10  ;;  %5445 = vpow2.f32 %v1562_v9  ;;  %v1570_v9 = vmul.f32 1.442695, %v1529_v23 }
 0x2da   : > { %v7391_v32 = vpop.f32.mrf.mxu1  ;;  %v1564_v43 = vmul.f32 1.442695, %v1526_v28  ;;  %v1566_v2 = vmul.f32 1.442695, %v1527_v55  ;;  %v1492_v28 = vpop.xlane.xlu1 %1491 }
 0x2db   : > { %2101 = vmax.xlane.f32.xlu1 %v2100_v15  ;;  %v1489_v8 = vpop.xlane.xlu0 %1488 }
 0x2dc   : > { %v7394_v59 = vpop.f32.mrf.mxu1  ;;  %5447 = vpow2.f32 %v1564_v43  ;;  %v1530_v56 = vsub.f32 %v7139_v13, %v1489_v8  ;;  %v1531_v51 = vsub.f32 %v7145_v19, %v1489_v8  ;;  %v1532_v43 = vsub.f32 %v7149_v50, %v1492_v28 }
 0x2dd   : > { %v2103_v47 = vmax.f32 %v7391_v32, %v7394_v59  ;;  %5449 = vpow2.f32 %v1566_v2 }
 0x2de   : > { %v7399_v57 = vpop.f32.mrf.mxu1  ;;  %v1572_v13 = vmul.f32 1.442695, %v1530_v56  ;;  %v1574_v19 = vmul.f32 1.442695, %v1531_v51 }
 0x2df   : > { %2104 = vmax.xlane.f32.xlu0 %v2103_v47  ;;  %v1568_v47 = vmul.f32 1.442695, %v1528_v33  ;;  %v1533_v33 = vsub.f32 %v7151_v48, %v1492_v28 }
 0x2e0   : > { %v7402_v15 = vpop.f32.mrf.mxu1 }
 0x2e1   : > { %v2106_v60 = vmax.f32 %v7399_v57, %v7402_v15  ;;  %5451 = vpow2.f32 %v1568_v47  ;;  %v1576_v47 = vmul.f32 1.442695, %v1532_v43  ;;  %v1578_v56 = vmul.f32 1.442695, %v1533_v33 }
 0x2e2   : > { %v7407_v58 = vpop.f32.mrf.mxu1  ;;  %v7425_v39 = vpop.eup %5437  ;;  %5453 = vpow2.f32 %v1570_v9 }
 0x2e3   : > { %9245 = vst [vmem:[#allocation43_spill] sm:$0xff] %v7407_v58  ;;  %2107 = vmax.xlane.f32.xlu1 %v2106_v60  ;;  %v7433_v2 = vpop.eup %5439  ;;  %v1616_v8 = vadd.f32 %v7425_v39, %v7420_v36  ;;  %5455 = vpow2.f32 %v1572_v13  ;;  %v1498_v9 = vpop.xlane.xlu1 %1497 }
 0x2e4   : > { %v7410_v37 = vpop.f32.mrf.mxu1  ;;  %5457 = vpow2.f32 %v1574_v19 }
 0x2e5   : > { %9246 = vst [vmem:[#allocation44_spill] sm:$0xff] %v7410_v37  ;;  %v2109_v41 = vmax.f32 %v7407_v58, %v7410_v37  ;;  %5459 = vpow2.f32 %v1576_v47 }
 0x2e6   : > { %v7415_v27 = vpop.f32.mrf.mxu1  ;;  %5461 = vpow2.f32 %v1578_v56 }
 0x2e7   : > { %9247 = vst [vmem:[#allocation45_spill] sm:$0xff] %v7415_v27  ;;  %2110 = vmax.xlane.f32.xlu0 %v2109_v41  ;;  %v1495_v41 = vpop.xlane.xlu0 %1494 }
 0x2e8   : > { %v7418_v60 = vpop.f32.mrf.mxu1  ;;  %v1534_v48 = vsub.f32 %v7159_v21, %v1495_v41  ;;  %v1535_v28 = vsub.f32 %v7164_v5, %v1495_v41  ;;  %v1536_v5 = vsub.f32 %v7168_v12, %v1498_v9  ;;  %v1537_v41 = vsub.f32 %v7170_v31, %v1498_v9 }
 0x2e9   : > { %9248 = vst [vmem:[#allocation46_spill] sm:$0xff] %v7418_v60  ;;  %v2112_v55 = vmax.f32 %v7415_v27, %v7418_v60  ;;  %v7439_v60 = vpop.eup %5441 }
 0x2ea   : > { %v7427_v37 = vpop.f32.mrf.mxu1  ;;  %v1619_v43 = vadd.f32 %v7439_v60, %v7433_v2  ;;  %v1580_v13 = vmul.f32 1.442695, %v1534_v48  ;;  %v1582_v33 = vmul.f32 1.442695, %v1535_v28  ;;  %v1586_v31 = vmul.f32 1.442695, %v1537_v41 }
 0x2eb   : > { %9249 = vst [vmem:[#allocation47_spill] sm:$0xff] %v7427_v37  ;;  %2113 = vmax.xlane.f32.xlu1 %v2112_v55  ;;  %v7447_v55 = vpop.eup %5443  ;;  %v1501_v19 = vpop.xlane.xlu0 %1500 }
 0x2ec   : > { %v7431_v58 = vpop.f32.mrf.mxu1  ;;  %5463 = vpow2.f32 %v1580_v13  ;;  %v1538_v56 = vsub.f32 %v7178_v34, %v1501_v19  ;;  %v1539_v28 = vsub.f32 %v7184_v42, %v1501_v19 }
 0x2ed   : > { %9250 = vst [vmem:[#allocation48_spill] sm:$0xff] %v7431_v58  ;;  %v2115_v23 = vmax.f32 %v7427_v37, %v7431_v58  ;;  %v7453_v58 = vpop.eup %5445  ;;  %5465 = vpow2.f32 %v1582_v33 }
 0x2ee   : > { %v7441_v50 = vpop.f32.mrf.mxu1  ;;  %v1622_v47 = vadd.f32 %v7453_v58, %v7447_v55  ;;  %v1590_v42 = vmul.f32 1.442695, %v1539_v28 }
 0x2ef   : > { %9251 = vst [vmem:[#allocation49_spill] sm:$0xff] %v7441_v50  ;;  %1617 = vadd.xlane.f32.xlu1 %v1616_v8  ;;  %2116 = vmax.xlane.f32.xlu0 %v2115_v23  ;;  %v7461_v8 = vpop.eup %5447 }
 0x2f0   : > { %v7445_v51 = vpop.f32.mrf.mxu1  ;;  %v7467_v48 = vpop.eup %5449 }
 0x2f1   : > { %9252 = vst [vmem:[#allocation50_spill] sm:$0xff] %v7445_v51  ;;  %v2118_v27 = vmax.f32 %v7441_v50, %v7445_v51  ;;  %v1504_v50 = vpop.xlane.xlu1 %1503  ;;  %v1625_v13 = vadd.f32 %v7467_v48, %v7461_v8 }
 0x2f2   : > { %v7455_v21 = vpop.f32.mrf.mxu1  ;;  %v1540_v33 = vsub.f32 %v7188_v6, %v1504_v50 }
 0x2f3   : > { %9253 = vst [vmem:[#allocation51_spill] sm:$0xff] %v7455_v21  ;;  %2119 = vmax.xlane.f32.xlu1 %v2118_v27  ;;  %1620 = vadd.xlane.f32.xlu0 %v1619_v43  ;;  %v1584_v27 = vmul.f32 1.442695, %v1536_v5  ;;  %v7475_v43 = vpop.eup %5451 }
 0x2f4   : > { %v7459_v23 = vpop.f32.mrf.mxu1  ;;  %v7481_v5 = vpop.eup %5453 }
 0x2f5   : > { %9254 = vst [vmem:[#allocation52_spill] sm:$0xff] %v7459_v23  ;;  %v2121_v51 = vmax.f32 %v7455_v21, %v7459_v23  ;;  %5467 = vpow2.f32 %v1584_v27  ;;  %v7488_v19 = vpop.eup %5455  ;;  %v1628_v27 = vadd.f32 %v7481_v5, %v7475_v43 }
 0x2f6   : > { %v7469_v12 = vpop.f32.mrf.mxu1  ;;  %5469 = vpow2.f32 %v1586_v31  ;;  %v1592_v31 = vmul.f32 1.442695, %v1540_v33 }
 0x2f7   : > { %9255 = vst [vmem:[#allocation53_spill] sm:$0xff] %v7469_v12  ;;  %1623 = vadd.xlane.f32.xlu1 %v1622_v47  ;;  %2122 = vmax.xlane.f32.xlu0 %v2121_v51  ;;  %v1588_v51 = vmul.f32 1.442695, %v1538_v56  ;;  %v1541_v47 = vsub.f32 %v7190_v4, %v1504_v50  ;;  %v7495_v56 = vpop.eup %5457 }
 0x2f8   : > { %v7473_v9 = vpop.f32.mrf.mxu1  ;;  %v7499_v6 = vpop.eup %5459 }
 0x2f9   : > { %9256 = vst [vmem:[#allocation54_spill] sm:$0xff] %v7473_v9  ;;  %v2124_v23 = vmax.f32 %v7469_v12, %v7473_v9  ;;  %v1507_v9 = vpop.xlane.xlu0 %1506  ;;  %5471 = vpow2.f32 %v1588_v51  ;;  %v7504_v28 = vpop.eup %5461 }
 0x2fa   : > { %v7483_v34 = vpop.f32.mrf.mxu1  ;;  %5473 = vpow2.f32 %v1590_v42  ;;  %v1542_v4 = vsub.f32 %v7198_v20, %v1507_v9  ;;  %v7513_v42 = vpop.eup %5463 }
 0x2fb   : > { %9257 = vst [vmem:[#allocation55_spill] sm:$0xff] %v7483_v34  ;;  %2125 = vmax.xlane.f32.xlu1 %v2124_v23  ;;  %1626 = vadd.xlane.f32.xlu0 %v1625_v13  ;;  %v1594_v13 = vmul.f32 1.442695, %v1541_v47  ;;  %5475 = vpow2.f32 %v1592_v31 }
 0x2fc   : > { %v7486_v41 = vpop.f32.mrf.mxu1  ;;  %v1596_v20 = vmul.f32 1.442695, %v1542_v4 }
 0x2fd   : > { %9258 = vst [vmem:[#allocation56_spill] sm:$0xff] %v7486_v41  ;;  %v2127_v12 = vmax.f32 %v7483_v34, %v7486_v41  ;;  %v1543_v41 = vsub.f32 %v7204_v49, %v1507_v9  ;;  %v1510_v34 = vpop.xlane.xlu1 %1509  ;;  %v1634_v49 = vadd.f32 %v7504_v28, %v7499_v6  ;;  %v7520_v9 = vpop.eup %5465  ;;  %5477 = vpow2.f32 %v1594_v13 }
 0x2fe   : > { %v7497_v23 = vpop.f32.mrf.mxu1  ;;  %v1544_v33 = vsub.f32 %v7208_v52, %v1510_v34  ;;  %5479 = vpow2.f32 %v1596_v20 }
 0x2ff   : > { %9259 = vst [vmem:[#allocation57_spill] sm:$0xff] %v7497_v23  ;;  %1629 = vadd.xlane.f32.xlu1 %v1628_v27  ;;  %2128 = vmax.xlane.f32.xlu0 %v2127_v12  ;;  %v1631_v12 = vadd.f32 %v7495_v56, %v7488_v19  ;;  %v1598_v27 = vmul.f32 1.442695, %v1543_v41  ;;  %v1637_v41 = vadd.f32 %v7520_v9, %v7513_v42 }
 0x300   : > { %v7502_v50 = vpop.f32.mrf.mxu1  ;;  %v1600_v31 = vmul.f32 1.442695, %v1544_v33 }
 0x301   : > { %9260 = vst [vmem:[#allocation58_spill] sm:$0xff] %v7502_v50  ;;  %v2732_v21 = vmax.f32 %v7497_v23, %v7502_v50  ;;  %v1545_v50 = vsub.f32 %v7210_v30, %v1510_v34  ;;  %v1513_v23 = vpop.xlane.xlu0 %1512  ;;  %5481 = vpow2.f32 %v1598_v27 }
 0x302   : > { %v7511_v51 = vpop.f32.mrf.mxu1  ;;  %v7527_v52 = vpop.eup %5467  ;;  %v1546_v4 = vsub.f32 %v7218_v18, %v1513_v23  ;;  %v1547_v13 = vsub.f32 %v7224_v63, %v1513_v23  ;;  %5483 = vpow2.f32 %v1600_v31 }
 0x303   : > { %9261 = vst [vmem:[#allocation59_spill] sm:$0xff] %v7511_v51  ;;  %2733 = vmax.xlane.f32.xlu1 %v2732_v21  ;;  %1632 = vadd.xlane.f32.xlu0 %v1631_v12  ;;  %v7534_v30 = vpop.eup %5469  ;;  %v1602_v34 = vmul.f32 1.442695, %v1545_v50 }
 0x304   : > { %v7516_v47 = vpop.f32.mrf.mxu1  ;;  %v1604_v20 = vmul.f32 1.442695, %v1546_v4  ;;  %v1640_v50 = vadd.f32 %v7534_v30, %v7527_v52  ;;  %v1606_v23 = vmul.f32 1.442695, %v1547_v13 }
 0x305   : > { %9262 = vst [vmem:[#allocation60_spill] sm:$0xff] %v7516_v47  ;;  %v2735_v21 = vmax.f32 %v7511_v51, %v7516_v47  ;;  %v1516_v47 = vpop.xlane.xlu1 %1515  ;;  %5485 = vpow2.f32 %v1602_v34 }
 0x306   : > { %v7525_v12 = vpop.f32.mrf.mxu1  ;;  %v7541_v18 = vpop.eup %5471  ;;  %v1548_v33 = vsub.f32 %v7228_v24, %v1516_v47  ;;  %v1549_v27 = vsub.f32 %v7230_v40, %v1516_v47  ;;  %5487 = vpow2.f32 %v1604_v20 }
 0x307   : > { %9263 = vst [vmem:[#allocation61_spill] sm:$0xff] %v7525_v12  ;;  %1635 = vadd.xlane.f32.xlu1 %v1634_v49  ;;  %2736 = vmax.xlane.f32.xlu0 %v2735_v21  ;;  %v7548_v63 = vpop.eup %5473  ;;  %5489 = vpow2.f32 %v1606_v23 }
 0x308   : > { %v7530_v37 = vpop.f32.mrf.mxu1  ;;  %v1608_v24 = vmul.f32 1.442695, %v1548_v33  ;;  %v1643_v34 = vadd.f32 %v7548_v63, %v7541_v18  ;;  %v7560_v13 = vpop.eup %5475  ;;  %v1610_v40 = vmul.f32 1.442695, %v1549_v27 }
 0x309   : > { %9264 = vst [vmem:[#allocation62_spill] sm:$0xff] %v7530_v37  ;;  %v2738_v49 = vmax.f32 %v7525_v12, %v7530_v37  ;;  %v1519_v37 = vpop.xlane.xlu0 %1518 }
 0x30a   : > { %v7539_v21 = vpop.f32.mrf.mxu1  ;;  %v1550_v31 = vsub.f32 %v7238_v3, %v1519_v37  ;;  %v1551_v47 = vsub.f32 %v7244_v44, %v1519_v37  ;;  %5491 = vpow2.f32 %v1608_v24 }
 0x30b   : > { %9265 = vst [vmem:[#allocation63_spill] sm:$0xff] %v7539_v21  ;;  %2739 = vmax.xlane.f32.xlu1 %v2738_v49  ;;  %1638 = vadd.xlane.f32.xlu0 %v1637_v41  ;;  %5493 = vpow2.f32 %v1610_v40 }
 0x30c   : > { %v7544_v51 = vpop.f32.mrf.mxu1  ;;  %v1612_v3 = vmul.f32 1.442695, %v1550_v31  ;;  %v1614_v23 = vmul.f32 1.442695, %v1551_v47 }
 0x30d   : > { %9266 = vst [vmem:[#allocation64_spill] sm:$0xff] %v7544_v51  ;;  %v2741_v41 = vmax.f32 %v7539_v21, %v7544_v51 }
 0x30e   : > { %v7553_v49 = vpop.f32.mrf.mxu1  ;;  %5495 = vpow2.f32 %v1612_v3 }
 0x30f   : > { %9267 = vst [vmem:[#allocation65_spill] sm:$0xff] %v7553_v49  ;;  %1641 = vadd.xlane.f32.xlu1 %v1640_v50  ;;  %2742 = vmax.xlane.f32.xlu0 %v2741_v41  ;;  %v7565_v50 = vpop.eup %5477  ;;  %5497 = vpow2.f32 %v1614_v23 }
 0x310   : > { %v7556_v4 = vpop.f32.mrf.mxu1  ;;  %v7571_v41 = vpop.eup %5479  ;;  %v1646_v37 = vadd.f32 %v7565_v50, %v7560_v13 }
 0x311   : > { %9268 = vst [vmem:[#allocation66_spill] sm:$0xff] %v7556_v4  ;;  %v2744_v51 = vmax.f32 %v7553_v49, %v7556_v4  ;;  %v7577_v27 = vpop.eup %5481 }
 0x312   : > { %v7567_v20 = vpop.f32.mrf.mxu1  ;;  %v7583_v24 = vpop.eup %5483 }
 0x313   : > { %9269 = vst [vmem:[#allocation67_spill] sm:$0xff] %v7567_v20  ;;  %2745 = vmax.xlane.f32.xlu1 %v2744_v51  ;;  %1644 = vadd.xlane.f32.xlu0 %v1643_v34  ;;  %v1649_v34 = vadd.f32 %v7577_v27, %v7571_v41  ;;  %v7589_v40 = vpop.eup %5485 }
 0x314   : > { %v7569_v33 = vpop.f32.mrf.mxu1  ;;  %v7595_v3 = vpop.eup %5487  ;;  %v1652_v23 = vadd.f32 %v7589_v40, %v7583_v24 }
 0x315   : > { %9270 = vst [vmem:[#allocation68_spill] sm:$0xff] %v7569_v33  ;;  %v2747_v44 = vmax.f32 %v7567_v20, %v7569_v33  ;;  %9275 = vst [vmem:[#allocation73_spill] sm:$0xff] %v7595_v3 }
 0x316   : > { %v7579_v4 = vpop.f32.mrf.mxu1 }
 0x317   : > { %9271 = vst [vmem:[#allocation69_spill] sm:$0xff] %v7579_v4  ;;  %1647 = vadd.xlane.f32.xlu1 %v1646_v37  ;;  %2748 = vmax.xlane.f32.xlu0 %v2747_v44 }
 0x318   : > { %v7581_v51 = vpop.f32.mrf.mxu1 }
 0x319   : > { %9272 = vst [vmem:[#allocation70_spill] sm:$0xff] %v7581_v51  ;;  %v2750_v31 = vmax.f32 %v7579_v4, %v7581_v51  ;;  %v7601_v51 = vpop.eup %5489 }
 0x31a   : > { %v7591_v47 = vpop.f32.mrf.mxu1  ;;  %v1655_v20 = vadd.f32 %v7601_v51, %v7595_v3 }
 0x31b   : > { %9273 = vst [vmem:[#allocation71_spill] sm:$0xff] %v7591_v47  ;;  %2751 = vmax.xlane.f32.xlu1 %v2750_v31  ;;  %1650 = vadd.xlane.f32.xlu0 %v1649_v34  ;;  %v7607_v31 = vpop.eup %5491 }
 0x31c   : > { %v7593_v37 = vpop.f32.mrf.mxu1  ;;  %9278 = vst [vmem:[#allocation76_spill] sm:$0xff] %v7607_v31 }
 0x31d   : > { %9274 = vst [vmem:[#allocation72_spill] sm:$0xff] %v7593_v37  ;;  %v2753_v44 = vmax.f32 %v7591_v47, %v7593_v37  ;;  %v7613_v37 = vpop.eup %5493 }
 0x31e   : > { %v7603_v4 = vpop.f32.mrf.mxu1  ;;  %9279 = vst [vmem:[#allocation77_spill] sm:$0xff] %v7613_v37  ;;  %v1658_v21 = vadd.f32 %v7613_v37, %v7607_v31 }
 0x31f   : > { %9276 = vst [vmem:[#allocation74_spill] sm:$0xff] %v7603_v4  ;;  %1653 = vadd.xlane.f32.xlu1 %v1652_v23  ;;  %2754 = vmax.xlane.f32.xlu0 %v2753_v44  ;;  %v7619_v23 = vpop.eup %5495 }
 0x320   : > { %v7605_v33 = vpop.f32.mrf.mxu1  ;;  %9282 = vst [vmem:[#allocation80_spill] sm:$0xff] %v7619_v23 }
 0x321   : > { %9277 = vst [vmem:[#allocation75_spill] sm:$0xff] %v7605_v33  ;;  %v2756_v34 = vmax.f32 %v7603_v4, %v7605_v33  ;;  %v7625_v33 = vpop.eup %5497 }
 0x322   : > { %v7615_v47 = vpop.f32.mrf.mxu1  ;;  %9283 = vst [vmem:[#allocation81_spill] sm:$0xff] %v7625_v33 }
 0x323   : > { %9280 = vst [vmem:[#allocation78_spill] sm:$0xff] %v7615_v47  ;;  %2757 = vmax.xlane.f32.xlu1 %v2756_v34  ;;  %1656 = vadd.xlane.f32.xlu0 %v1655_v20  ;;  %v1661_v34 = vadd.f32 %v7625_v33, %v7619_v23 }
 0x324   : > { %v7617_v49 = vpop.f32.mrf.mxu1 }
 0x325   : > { %9281 = vst [vmem:[#allocation79_spill] sm:$0xff] %v7617_v49  ;;  %v2759_v44 = vmax.f32 %v7615_v47, %v7617_v49 }
 0x326   : > { %v7627_v4 = vpop.f32.mrf.mxu1 }
 0x327   : > { %9284 = vst [vmem:[#allocation82_spill] sm:$0xff] %v7627_v4  ;;  %1659 = vadd.xlane.f32.xlu1 %v1658_v21  ;;  %2760 = vmax.xlane.f32.xlu0 %v2759_v44 }
 0x328   : > { %v7629_v12 = vpop.f32.mrf.mxu1 }
 0x329   : > { %9285 = vst [vmem:[#allocation83_spill] sm:$0xff] %v7629_v12  ;;  %v2762_v20 = vmax.f32 %v7627_v4, %v7629_v12 }
 0x32a   : > { %v7635_v3 = vpop.f32.mrf.mxu1 }
 0x32b   : > { %9286 = vst [vmem:[#allocation84_spill] sm:$0xff] %v7635_v3  ;;  %2763 = vmax.xlane.f32.xlu1 %v2762_v20  ;;  %1662 = vadd.xlane.f32.xlu0 %v1661_v34 }
 0x32c   : > { %v7637_v49 = vpop.f32.mrf.mxu1 }
 0x32d   : > { %9287 = vst [vmem:[#allocation85_spill] sm:$0xff] %v7637_v49  ;;  %v2765_v47 = vmax.f32 %v7635_v3, %v7637_v49 }
 0x32e   : > { %v7641_v31 = vpop.f32.mrf.mxu1 }
 0x32f   : > { %9288 = vst [vmem:[#allocation86_spill] sm:$0xff] %v7641_v31  ;;  %2766 = vmax.xlane.f32.xlu0 %v2765_v47 }
 0x330   : > { %v7643_v21 = vpop.f32.mrf.mxu1 }
 0x331   : > { %9289 = vst [vmem:[#allocation87_spill] sm:$0xff] %v7643_v21  ;;  %v2768_v44 = vmax.f32 %v7641_v31, %v7643_v21 }
 0x332   : > { %v7647_v12 = vpop.f32.mrf.mxu1 }
 0x333   : > { %9290 = vst [vmem:[#allocation88_spill] sm:$0xff] %v7647_v12  ;;  %2769 = vmax.xlane.f32.xlu1 %v2768_v44 }
 0x334   : > { %v7649_v4 = vpop.f32.mrf.mxu1 }
 0x335   : > { %9291 = vst [vmem:[#allocation89_spill] sm:$0xff] %v7649_v4  ;;  %v2771_v20 = vmax.f32 %v7647_v12, %v7649_v4 }
 0x336   : > { %v7653_v34 = vpop.f32.mrf.mxu1 }
 0x337   : > { %9292 = vst [vmem:[#allocation90_spill] sm:$0xff] %v7653_v34  ;;  %2772 = vmax.xlane.f32.xlu0 %v2771_v20 }
 0x338   : > { %v7655_v49 = vpop.f32.mrf.mxu1 }
 0x339   : > { %9293 = vst [vmem:[#allocation91_spill] sm:$0xff] %v7655_v49  ;;  %v2774_v47 = vmax.f32 %v7653_v34, %v7655_v49 }
 0x33a   : > { %v7659_v3 = vpop.f32.mrf.mxu1 }
 0x33b   : > { %9294 = vst [vmem:[#allocation92_spill] sm:$0xff] %v7659_v3  ;;  %2775 = vmax.xlane.f32.xlu1 %v2774_v47 }
 0x33c   : > { %v7661_v21 = vpop.f32.mrf.mxu1 }
 0x33d   : > { %9295 = vst [vmem:[#allocation93_spill] sm:$0xff] %v7661_v21  ;;  %v2777_v44 = vmax.f32 %v7659_v3, %v7661_v21 }
 0x33e   : > { %v7665_v31 = vpop.f32.mrf.mxu1 }
 0x33f   : > { %9296 = vst [vmem:[#allocation94_spill] sm:$0xff] %v7665_v31  ;;  %2778 = vmax.xlane.f32.xlu0 %v2777_v44 }
 0x340   : > { %v7667_v4 = vpop.f32.mrf.mxu1 }
 0x341   : > { %9297 = vst [vmem:[#allocation95_spill] sm:$0xff] %v7667_v4  ;;  %v3366_v20 = vmax.f32 %v7665_v31, %v7667_v4 }
 0x342   : > { %v7671_v12 = vpop.f32.mrf.mxu1 }
 0x343   : > { %9298 = vst [vmem:[#allocation96_spill] sm:$0xff] %v7671_v12  ;;  %3367 = vmax.xlane.f32.xlu1 %v3366_v20 }
 0x344   : > { %v7673_v49 = vpop.f32.mrf.mxu1 }
 0x345   : > { %9299 = vst [vmem:[#allocation97_spill] sm:$0xff] %v7673_v49  ;;  %v3369_v47 = vmax.f32 %v7671_v12, %v7673_v49 }
 0x346   : > { %v7677_v34 = vpop.f32.mrf.mxu1 }
 0x347   : > { %9300 = vst [vmem:[#allocation98_spill] sm:$0xff] %v7677_v34  ;;  %3370 = vmax.xlane.f32.xlu0 %v3369_v47 }
 0x348   : > { %v7679_v21 = vpop.f32.mrf.mxu1 }
 0x349   : > { %9301 = vst [vmem:[#allocation99_spill] sm:$0xff] %v7679_v21  ;;  %v3372_v44 = vmax.f32 %v7677_v34, %v7679_v21 }
 0x34a   : > { %v7683_v3 = vpop.f32.mrf.mxu1 }
 0x34b   : > { %9302 = vst [vmem:[#allocation100_spill] sm:$0xff] %v7683_v3  ;;  %3373 = vmax.xlane.f32.xlu1 %v3372_v44 }
 0x34c   : > { %v2084_v4 = vpop.xlane.xlu1 %2083  ;;  %v7685_v31 = vpop.f32.mrf.mxu1 }
 0x34d   : > { %9303 = vst [vmem:[#allocation101_spill] sm:$0xff] %v7685_v31  ;;  %v2130_v20 = vsub.f32 %v7331_v25, %v2084_v4  ;;  %v2131_v23 = vsub.f32 %v7333_v35, %v2084_v4  ;;  %v3375_v49 = vmax.f32 %v7683_v3, %v7685_v31 }
 0x34e   : > { %v7691_v12 = vpop.f32.mrf.mxu1 }
 0x34f   : > { %v2162_v47 = vmul.f32 1.442695, %v2130_v20  ;;  %v2164_v33 = vmul.f32 1.442695, %v2131_v23  ;;  %3376 = vmax.xlane.f32.xlu0 %v3375_v49 }
 0x350   : > { %v7693_v37 = vpop.f32.mrf.mxu1  ;;  %v2087_v21 = vpop.xlane.xlu0 %2086 }
 0x351   : > { %5499 = vpow2.f32 %v2162_v47  ;;  %v3378_v44 = vmax.f32 %v7691_v12, %v7693_v37  ;;  %v2132_v34 = vsub.f32 %v7341_v17, %v2087_v21  ;;  %v2133_v25 = vsub.f32 %v7343_v1, %v2087_v21 }
 0x352   : > { %5501 = vpow2.f32 %v2164_v33  ;;  %v7699_v35 = vpop.f32.mrf.mxu1 }
 0x353   : > { %v2166_v4 = vmul.f32 1.442695, %v2132_v34  ;;  %v2168_v31 = vmul.f32 1.442695, %v2133_v25  ;;  %3379 = vmax.xlane.f32.xlu1 %v3378_v44 }
 0x354   : > { %v2090_v20 = vpop.xlane.xlu1 %2089  ;;  %v7701_v23 = vpop.f32.mrf.mxu1 }
 0x355   : > { %5503 = vpow2.f32 %v2166_v4  ;;  %v2134_v49 = vsub.f32 %v7347_v53, %v2090_v20  ;;  %v2135_v47 = vsub.f32 %v7353_v29, %v2090_v20  ;;  %v3381_v3 = vmax.f32 %v7699_v35, %v7701_v23 }
 0x356   : > { %5505 = vpow2.f32 %v2168_v31  ;;  %v7707_v17 = vpop.f32.mrf.mxu1 }
 0x357   : > { %9304 = vst [vmem:[#allocation102_spill] sm:$0xff] %v7707_v17  ;;  %3382 = vmax.xlane.f32.xlu0 %v3381_v3  ;;  %v2170_v1 = vmul.f32 1.442695, %v2134_v49  ;;  %v2172_v34 = vmul.f32 1.442695, %v2135_v47 }
 0x358   : > { %v7709_v33 = vpop.f32.mrf.mxu1  ;;  %v2093_v21 = vpop.xlane.xlu0 %2092 }
 0x359   : > { %9305 = vst [vmem:[#allocation103_spill] sm:$0xff] %v7709_v33  ;;  %v3384_v44 = vmax.f32 %v7707_v17, %v7709_v33  ;;  %v2136_v25 = vsub.f32 %v7357_v22, %v2093_v21  ;;  %v2137_v53 = vsub.f32 %v7359_v7, %v2093_v21  ;;  %5507 = vpow2.f32 %v2170_v1 }
 0x35a   : > { %v7715_v29 = vpop.f32.mrf.mxu1  ;;  %5509 = vpow2.f32 %v2172_v34 }
 0x35b   : > { %9306 = vst [vmem:[#allocation104_spill] sm:$0xff] %v7715_v29  ;;  %3385 = vmax.xlane.f32.xlu1 %v3384_v44  ;;  %v2174_v31 = vmul.f32 1.442695, %v2136_v25  ;;  %v2176_v3 = vmul.f32 1.442695, %v2137_v53 }
 0x35c   : > { %v7717_v4 = vpop.f32.mrf.mxu1  ;;  %v2096_v20 = vpop.xlane.xlu1 %2095 }
 0x35d   : > { %9307 = vst [vmem:[#allocation105_spill] sm:$0xff] %v7717_v4  ;;  %v3387_v49 = vmax.f32 %v7715_v29, %v7717_v4  ;;  %5511 = vpow2.f32 %v2174_v31  ;;  %v2138_v7 = vsub.f32 %v7367_v38, %v2096_v20  ;;  %v2139_v21 = vsub.f32 %v7369_v62, %v2096_v20 }
 0x35e   : > { %v7721_v47 = vpop.eup %5499  ;;  %v7723_v33 = vpop.f32.mrf.mxu1  ;;  %5513 = vpow2.f32 %v2176_v3 }
 0x35f   : > { %9308 = vst [vmem:[#allocation106_spill] sm:$0xff] %v7721_v47  ;;  %9309 = vst [vmem:[#allocation107_spill] sm:$0xff] %v7723_v33  ;;  %v7725_v22 = vpop.eup %5501  ;;  %3388 = vmax.xlane.f32.xlu0 %v3387_v49  ;;  %v2178_v38 = vmul.f32 1.442695, %v2138_v7  ;;  %v2180_v62 = vmul.f32 1.442695, %v2139_v21 }
 0x360   : > { %v7728_v1 = vpop.f32.mrf.mxu1  ;;  %v2099_v44 = vpop.xlane.xlu0 %2098  ;;  %v2226_v25 = vadd.f32 %v7725_v22, %v7721_v47 }
 0x361   : > { %9310 = vst [vmem:[#allocation108_spill] sm:$0xff] %v7728_v1  ;;  %v3390_v34 = vmax.f32 %v7723_v33, %v7728_v1  ;;  %v2140_v31 = vsub.f32 %v7375_v45, %v2099_v44  ;;  %v2141_v20 = vsub.f32 %v7378_v26, %v2099_v44  ;;  %5515 = vpow2.f32 %v2178_v38 }
 0x362   : > { %v7735_v53 = vpop.eup %5503  ;;  %v7737_v4 = vpop.f32.mrf.mxu1  ;;  %5517 = vpow2.f32 %v2180_v62 }
 0x363   : > { %9311 = vst [vmem:[#allocation109_spill] sm:$0xff] %v7735_v53  ;;  %9312 = vst [vmem:[#allocation110_spill] sm:$0xff] %v7737_v4  ;;  %v7739_v49 = vpop.eup %5505  ;;  %3391 = vmax.xlane.f32.xlu1 %v3390_v34  ;;  %2227 = vadd.xlane.f32.xlu0 %v2226_v25  ;;  %v2182_v29 = vmul.f32 1.442695, %v2140_v31  ;;  %v2184_v7 = vmul.f32 1.442695, %v2141_v20 }
 0x364   : > { %9313 = vst [vmem:[#allocation111_spill] sm:$0xff] %v7739_v49  ;;  %v7742_v3 = vpop.f32.mrf.mxu1  ;;  %v2229_v1 = vadd.f32 %v7739_v49, %v7735_v53  ;;  %v2102_v45 = vpop.xlane.xlu1 %2101 }
 0x365   : > { %9314 = vst [vmem:[#allocation112_spill] sm:$0xff] %v7742_v3  ;;  %v3393_v21 = vmax.f32 %v7737_v4, %v7742_v3  ;;  %5519 = vpow2.f32 %v2182_v29  ;;  %v2143_v62 = vsub.f32 %v7386_v10, %v2102_v45 }
 0x366   : > { %v7747_v33 = vpop.f32.mrf.mxu1  ;;  %v7751_v34 = vpop.eup %5507  ;;  %5521 = vpow2.f32 %v2184_v7 }
 0x367   : > { %9315 = vst [vmem:[#allocation113_spill] sm:$0xff] %v7747_v33  ;;  %2230 = vadd.xlane.f32.xlu0 %v2229_v1  ;;  %9317 = vst [vmem:[#allocation115_spill] sm:$0xff] %v7751_v34  ;;  %v7757_v44 = vpop.eup %5509  ;;  %v2142_v1 = vsub.f32 %v7383_v0, %v2102_v45  ;;  %v2188_v4 = vmul.f32 1.442695, %v2143_v62 }
 0x368   : > { %v7749_v17 = vpop.f32.mrf.mxu1  ;;  %9318 = vst [vmem:[#allocation116_spill] sm:$0xff] %v7757_v44  ;;  %v2105_v20 = vpop.xlane.xlu0 %2104 }
 0x369   : > { %9316 = vst [vmem:[#allocation114_spill] sm:$0xff] %v7749_v17  ;;  %v3396_v26 = vmax.f32 %v7747_v33, %v7749_v17  ;;  %v2232_v17 = vadd.f32 %v7757_v44, %v7751_v34  ;;  %v2144_v29 = vsub.f32 %v7391_v32, %v2105_v20  ;;  %v2145_v7 = vsub.f32 %v7394_v59, %v2105_v20 }
 0x36a   : > { %v7759_v25 = vpop.f32.mrf.mxu1  ;;  %v7764_v31 = vpop.eup %5511 }
 0x36b   : > { %9319 = vst [vmem:[#allocation117_spill] sm:$0xff] %v7759_v25  ;;  %3397 = vmax.xlane.f32.xlu1 %v3396_v26  ;;  %3394 = vmax.xlane.f32.xlu0 %v3393_v21  ;;  %9321 = vst [vmem:[#allocation119_spill] sm:$0xff] %v7764_v31  ;;  %v7769_v33 = vpop.eup %5513  ;;  %v2186_v21 = vmul.f32 1.442695, %v2142_v1  ;;  %v2192_v59 = vmul.f32 1.442695, %v2145_v7 }
 0x36c   : > { %v7762_v38 = vpop.f32.mrf.mxu1  ;;  %9322 = vst [vmem:[#allocation120_spill] sm:$0xff] %v7769_v33  ;;  %v7774_v0 = vpop.xlane.xlu1 %2107  ;;  %v2235_v45 = vadd.f32 %v7769_v33, %v7764_v31 }
 0x36d   : > { %9320 = vst [vmem:[#allocation118_spill] sm:$0xff] %v7762_v38  ;;  %5523 = vpow2.f32 %v2186_v21  ;;  %v3399_v62 = vmax.f32 %v7759_v25, %v7762_v38 }
 0x36e   : > { %v7771_v3 = vpop.f32.mrf.mxu1  ;;  %v7789_v44 = vpop.eup %5515  ;;  %5525 = vpow2.f32 %v2188_v4 }
 0x36f   : > { %9323 = vst [vmem:[#allocation121_spill] sm:$0xff] %v7771_v3  ;;  %2233 = vadd.xlane.f32.xlu0 %v2232_v17  ;;  %v2190_v17 = vmul.f32 1.442695, %v2144_v29  ;;  %9327 = vst [vmem:[#allocation125_spill] sm:$0xff] %v7789_v44 }
 0x370   : > { %v7776_v26 = vpop.f32.mrf.mxu1  ;;  %v7793_v20 = vpop.xlane.xlu0 %2110 }
 0x371   : > { %9324 = vst [vmem:[#allocation122_spill] sm:$0xff] %v7776_v26  ;;  %v3402_v10 = vmax.f32 %v7771_v3, %v7776_v26  ;;  %v7795_v26 = vpop.eup %5517  ;;  %5527 = vpow2.f32 %v2190_v17 }
 0x372   : > { %v7783_v34 = vpop.f32.mrf.mxu1  ;;  %9328 = vst [vmem:[#allocation126_spill] sm:$0xff] %v7795_v26  ;;  %5529 = vpow2.f32 %v2192_v59 }
 0x373   : > { %9325 = vst [vmem:[#allocation123_spill] sm:$0xff] %v7783_v34  ;;  %3403 = vmax.xlane.f32.xlu1 %v3402_v10  ;;  %2236 = vadd.xlane.f32.xlu0 %v2235_v45  ;;  %v7801_v10 = vpop.eup %5519  ;;  %v2238_v45 = vadd.f32 %v7795_v26, %v7789_v44 }
 0x374   : > { %v7785_v32 = vpop.xlane.xlu1 %2113  ;;  %v7787_v1 = vpop.f32.mrf.mxu1  ;;  %9331 = vst [vmem:[#allocation129_spill] sm:$0xff] %v7801_v10 }
 0x375   : > { %9326 = vst [vmem:[#allocation124_spill] sm:$0xff] %v7787_v1  ;;  %v7809_v38 = vpop.eup %5521 }
 0x376   : > { %v7797_v3 = vpop.f32.mrf.mxu1  ;;  %9332 = vst [vmem:[#allocation130_spill] sm:$0xff] %v7809_v38  ;;  %v2241_v25 = vadd.f32 %v7809_v38, %v7801_v10 }
 0x377   : > { %9329 = vst [vmem:[#allocation127_spill] sm:$0xff] %v7797_v3  ;;  %3400 = vmax.xlane.f32.xlu0 %v3399_v62 }
 0x378   : > { %v1618_v21 = vpop.xlane.xlu1 %1617  ;;  %v7799_v29 = vpop.f32.mrf.mxu1 }
 0x379   : > { %9330 = vst [vmem:[#allocation128_spill] sm:$0xff] %v7799_v29  ;;  %v3408_v4 = vmax.f32 %v7797_v3, %v7799_v29  ;;  %v7805_v7 = vpop.xlane.xlu0 %2116  ;;  %5531 = vrcp.f32 %v1618_v21  ;;  %v3405_v3 = vmax.f32 %v7783_v34, %v7787_v1 }
 0x37a   : > { %v7815_v29 = vpop.eup %5523  ;;  %v7831_v10 = vpop.f32.mrf.mxu1 }
 0x37b   : > { %3409 = vmax.xlane.f32.xlu1 %v3408_v4  ;;  %2239 = vadd.xlane.f32.xlu0 %v2238_v45  ;;  %9333 = vst [vmem:[#allocation131_spill] sm:$0xff] %v7815_v29  ;;  %v7821_v26 = vpop.eup %5525 }
 0x37c   : > { %v7811_v62 = vpop.xlane.xlu1 %2119  ;;  %9334 = vst [vmem:[#allocation132_spill] sm:$0xff] %v7821_v26  ;;  %v7837_v31 = vpop.f32.mrf.mxu1 }
 0x37d   : > { %v1621_v17 = vpop.xlane.xlu0 %1620  ;;  %9337 = vst [vmem:[#allocation135_spill] sm:$0xff] %v7837_v31 }
 0x37e   : > { %5533 = vrcp.f32 %v1621_v17  ;;  %v7825_v21 = vpop.eup %5527 }
 0x37f   : > { %2242 = vadd.xlane.f32.xlu0 %v2241_v25  ;;  %9335 = vst [vmem:[#allocation133_spill] sm:$0xff] %v7825_v21  ;;  %v2244_v25 = vadd.f32 %v7821_v26, %v7815_v29  ;;  %v7829_v17 = vpop.eup %5529 }
 0x380   : > { %v1624_v59 = vpop.xlane.xlu1 %1623  ;;  %9336 = vst [vmem:[#allocation134_spill] sm:$0xff] %v7829_v17 }
 0x381   : > { %v7819_v44 = vpop.xlane.xlu0 %2122  ;;  %5535 = vrcp.f32 %v1624_v59 }
 0x383   : > { %3406 = vmax.xlane.f32.xlu0 %v3405_v3  ;;  %v2247_v3 = vadd.f32 %v7829_v17, %v7825_v21 }
 0x384   : > { %v7823_v4 = vpop.xlane.xlu1 %2125 }
 0x385   : > { %v1627_v45 = vpop.xlane.xlu0 %1626 }
 0x386   : > { %5537 = vrcp.f32 %v1627_v45  ;;  %v5532_v38 = vpop.eup %5531 }
 0x387   : > { %2245 = vadd.xlane.f32.xlu0 %v2244_v25  ;;  %v3411_v25 = vmax.f32 %v7831_v10, %v7837_v31  ;;  %v1681_v26 = vmul.f32 %v5532_v38, %v7425_v39  ;;  %v1680_v21 = vmul.f32 %v5532_v38, %v7420_v36  ;;  %v2146_v31 = vsub.f32 %v7399_v57, %v7774_v0 }
 0x388   : > { %v1630_v1 = vpop.xlane.xlu1 %1629 }
 0x389   : > { %v7833_v34 = vpop.xlane.xlu0 %2128  ;;  %5539 = vrcp.f32 %v1630_v1 }
 0x38b   : > { %2248 = vadd.xlane.f32.xlu0 %v2247_v3  ;;  %v5534_v29 = vpop.eup %5533 }
 0x38c   : > { %v7839_v59 = vpop.xlane.xlu1 %2733  ;;  %3646 = vrot.lane.b32.xlu1 %v6676_v54, %s5909_s28  ;;  %v1683_v33 = vmul.f32 %v5534_v29, %v7439_v60  ;;  %v1682_v17 = vmul.f32 %v5534_v29, %v7433_v2  ;;  %v2147_v60 = vsub.f32 %v7402_v15, %v7774_v0  ;;  %v9339_v29 = vld [vmem:[#allocation11_spill] sm:$0xff] }
 0x38d   : > { %v1633_v45 = vpop.xlane.xlu0 %1632 }
 0x38e   : > { %5541 = vrcp.f32 %v1633_v45  ;;  %v1713_v3 = vpack.c.bf16 %v1683_v33, %v1681_v26  ;;  %v1712_v47 = vpack.c.bf16 %v1682_v17, %v1680_v21  ;;  %v5536_v49 = vpop.eup %5535  ;;  %v2196_v1 = vmul.f32 1.442695, %v2147_v60 }
 0x38f   : > { %3412 = vmax.xlane.f32.xlu0 %v3411_v25  ;;  %v1685_v33 = vmul.f32 %v5536_v49, %v7453_v58  ;;  %v1684_v26 = vmul.f32 %v5536_v49, %v7447_v55  ;;  %v9340_v25 = vld [vmem:[#allocation18_spill] sm:$0xff] }
 0x390   : > { %v1636_v53 = vpop.xlane.xlu1 %1635  ;;  %1760 = vmatprep.mubr.bf16.mxu0 %v1713_v3 }
 0x391   : > { %v7849_v54 = vpop.xlane.xlu0 %2736  ;;  %1761 = vmatmul.mubr.bf16.vlgmr.msra.gmra.mxu0 %v1712_v47  ;;  %5543 = vrcp.f32 %v1636_v53  ;;  %v2194_v47 = vmul.f32 1.442695, %v2146_v31 }
 0x392   : > { %4852 = vmatpush3.bf16.msra.mxu0 %v7310_v16 }
 0x393   : > { %v5538_v39 = vpop.eup %5537  ;;  %4853 = vmatprep.subr.bf16.mxu0 %v7287_v61 }
 0x394   : > { %v7856_v36 = vpop.xlane.xlu1 %2739  ;;  %v1687_v38 = vmul.f32 %v5538_v39, %v7467_v48  ;;  %v1686_v57 = vmul.f32 %v5538_v39, %v7461_v8  ;;  %v9343_v39 = vld [vmem:[#allocation5_spill] sm:$0xff] }
 0x395   : > { %v1639_v2 = vpop.xlane.xlu0 %1638 }
 0x396   : > { %4854 = vmatpush3.bf16.msra.mxu0 %v7038_v14  ;;  %5545 = vrcp.f32 %v1639_v2  ;;  %v1715_v16 = vpack.c.bf16 %v1687_v38, %v1685_v33  ;;  %v1714_v0 = vpack.c.bf16 %v1686_v57, %v1684_v26  ;;  %v5540_v58 = vpop.eup %5539  ;;  %v9338_v14 = vld [vmem:[#allocation21_spill] sm:$0xff] }
 0x397   : > { %4855 = vmatprep.subr.bf16.mxu0 %v7073_v46  ;;  %5547 = vpow2.f32 %v2194_v47  ;;  %v1689_v53 = vmul.f32 %v5540_v58, %v7481_v5  ;;  %v1688_v49 = vmul.f32 %v5540_v58, %v7475_v43  ;;  %v9341_v5 = vld [vmem:[#allocation25_spill] sm:$0xff]  ;;  %v9344_v47 = vld [vmem:[#allocation12_spill] sm:$0xff]  ;;  %v9345_v58 = vld [vmem:[#allocation43_spill] sm:$0xff] }
 0x398   : > { %v1642_v15 = vpop.xlane.xlu1 %1641  ;;  %1768 = vmatprep.mubr.bf16.mxu0 %v1715_v16  ;;  %5549 = vpow2.f32 %v2196_v1 }
 0x399   : > { %v7865_v61 = vpop.xlane.xlu0 %2742  ;;  %1769 = vmatmul.mubr.bf16.gmra.mxu0 %v1714_v0  ;;  %5551 = vrcp.f32 %v1642_v15 }
 0x39a   : > { %4856 = vmatpush3.bf16.msra.mxu0 %v7291_v11 }
 0x39b   : > { %v5542_v8 = vpop.eup %5541  ;;  %4857 = vmatprep.subr.bf16.mxu0 %v9338_v14  ;;  %v9347_v14 = vld [vmem:[#allocation16_spill] sm:$0xff] }
 0x39c   : > { %v7868_v55 = vpop.xlane.xlu1 %2745  ;;  %v1691_v46 = vmul.f32 %v5542_v8, %v7495_v56  ;;  %v1690_v31 = vmul.f32 %v5542_v8, %v7488_v19  ;;  %v9342_v19 = vld [vmem:[#allocation19_spill] sm:$0xff]  ;;  %v2148_v8 = vsub.f32 %v9345_v58, %v7793_v20 }
 0x39d   : > { %v1645_v48 = vpop.xlane.xlu0 %1644 }
 0x39e   : > { %4858 = vmatpush3.bf16.msra.mxu0 %v9339_v29  ;;  %5553 = vrcp.f32 %v1645_v48  ;;  %v1717_v21 = vpack.c.bf16 %v1691_v46, %v1689_v53  ;;  %v1716_v17 = vpack.c.bf16 %v1690_v31, %v1688_v49  ;;  %v5544_v3 = vpop.eup %5543  ;;  %v9348_v48 = vld [vmem:[#allocation47_spill] sm:$0xff]  ;;  %v9349_v46 = vld [vmem:[#allocation48_spill] sm:$0xff] }
 0x39f   : > { %4859 = vmatprep.subr.bf16.mxu0 %v9340_v25  ;;  %v1693_v2 = vmul.f32 %v5544_v3, %v7504_v28  ;;  %v1692_v38 = vmul.f32 %v5544_v3, %v7499_v6  ;;  %v9346_v28 = vld [vmem:[#allocation44_spill] sm:$0xff]  ;;  %v2152_v53 = vsub.f32 %v9348_v48, %v7805_v7  ;;  %v2153_v49 = vsub.f32 %v9349_v46, %v7805_v7  ;;  %v9350_v31 = vld [vmem:[#allocation27_spill] sm:$0xff] }
 0x3a0   : > { %v1648_v11 = vpop.xlane.xlu1 %1647  ;;  %1776 = vmatprep.mubr.bf16.mxu0 %v1717_v21  ;;  %v2198_v21 = vmul.f32 1.442695, %v2148_v8 }
 0x3a1   : > { %v7877_v45 = vpop.xlane.xlu0 %2748  ;;  %1777 = vmatmul.mubr.bf16.gmra.mxu0 %v1716_v17  ;;  %5555 = vrcp.f32 %v1648_v11  ;;  %v9351_v17 = vld [vmem:[#allocation17_spill] sm:$0xff] }
 0x3a2   : > { %4860 = vmatpush3.bf16.msra.mxu0 %v9341_v5 }
 0x3a3   : > { %v5546_v43 = vpop.eup %5545  ;;  %4861 = vmatprep.subr.bf16.mxu0 %v9342_v19 }
 0x3a4   : > { %v7880_v56 = vpop.xlane.xlu1 %2751  ;;  %v1695_v33 = vmul.f32 %v5546_v43, %v7520_v9  ;;  %v1694_v26 = vmul.f32 %v5546_v43, %v7513_v42  ;;  %v7889_v57 = vpop.eup %5547  ;;  %v2149_v9 = vsub.f32 %v9346_v28, %v7793_v20 }
 0x3a5   : > { %v1651_v60 = vpop.xlane.xlu0 %1650  ;;  %3644 = vrot.lane.b32.xlu0 %v9343_v39, %s5909_s28  ;;  %v7892_v0 = vpop.eup %5549  ;;  %v2208_v39 = vmul.f32 1.442695, %v2153_v49 }
 0x3a6   : > { %4862 = vmatpush3.bf16.msra.mxu0 %v9344_v47  ;;  %5557 = vrcp.f32 %v1651_v60  ;;  %v1719_v1 = vpack.c.bf16 %v1695_v33, %v1693_v2  ;;  %v1718_v15 = vpack.c.bf16 %v1694_v26, %v1692_v38  ;;  %v5552_v42 = vpop.eup %5551  ;;  %v2200_v11 = vmul.f32 1.442695, %v2149_v9  ;;  %v9352_v2 = vld [vmem:[#allocation13_spill] sm:$0xff]  ;;  %v9354_v47 = vld [vmem:[#allocation52_spill] sm:$0xff] }
 0x3a7   : > { %4863 = vmatprep.subr.bf16.mxu0 %v9347_v14  ;;  %v1697_v3 = vmul.f32 %v5552_v42, %v7534_v30  ;;  %v2250_v5 = vadd.f32 %v7892_v0, %v7889_v57  ;;  %v1696_v7 = vmul.f32 %v5552_v42, %v7527_v52  ;;  %v2206_v60 = vmul.f32 1.442695, %v2152_v53  ;;  %v9353_v30 = vld [vmem:[#allocation51_spill] sm:$0xff]  ;;  %v9357_v14 = vld [vmem:[#allocation56_spill] sm:$0xff] }
 0x3a8   : > { %v1654_v16 = vpop.xlane.xlu1 %1653  ;;  %1784 = vmatprep.mubr.bf16.mxu0 %v1719_v1  ;;  %v2156_v26 = vsub.f32 %v9353_v30, %v7819_v44  ;;  %v2157_v1 = vsub.f32 %v9354_v47, %v7819_v44  ;;  %v2161_v44 = vsub.f32 %v9357_v14, %v7833_v34 }
 0x3a9   : > { %v7899_v6 = vpop.xlane.xlu0 %2754  ;;  %1785 = vmatmul.mubr.bf16.gmra.mxu0 %v1718_v15  ;;  %5559 = vrcp.f32 %v1654_v16  ;;  %v9356_v15 = vld [vmem:[#allocation55_spill] sm:$0xff] }
 0x3aa   : > { %4864 = vmatpush3.bf16.msra.mxu0 %v9350_v31  ;;  %v2160_v58 = vsub.f32 %v9356_v15, %v7833_v34  ;;  %v2214_v28 = vmul.f32 1.442695, %v2156_v26  ;;  %v2216_v9 = vmul.f32 1.442695, %v2157_v1  ;;  %v9359_v34 = vld [vmem:[#allocation58_spill] sm:$0xff] }
 0x3ab   : > { %v5554_v29 = vpop.eup %5553  ;;  %4865 = vmatprep.subr.bf16.mxu0 %v9351_v17  ;;  %v9358_v17 = vld [vmem:[#allocation57_spill] sm:$0xff] }
 0x3ac   : > { %v7907_v20 = vpop.xlane.xlu1 %2757  ;;  %v1699_v43 = vmul.f32 %v5554_v29, %v7548_v63  ;;  %v1698_v19 = vmul.f32 %v5554_v29, %v7541_v18  ;;  %v9355_v63 = vld [vmem:[#allocation23_spill] sm:$0xff]  ;;  %v2222_v31 = vmul.f32 1.442695, %v2160_v58 }
 0x3ad   : > { %v1657_v25 = vpop.xlane.xlu0 %1656 }
 0x3ae   : > { %4866 = vmatpush3.bf16.msra.mxu0 %v9352_v2  ;;  %5561 = vrcp.f32 %v1657_v25  ;;  %v1721_v33 = vpack.c.bf16 %v1699_v43, %v1697_v3  ;;  %v1720_v38 = vpack.c.bf16 %v1698_v19, %v1696_v7  ;;  %v5556_v18 = vpop.eup %5555  ;;  %v2780_v25 = vsub.f32 %v9358_v17, %v7839_v59 }
 0x3af   : > { %5563 = vpow2.f32 %v2198_v21  ;;  %4947 = vmatprep.subr.bf16.mxu0 %v9355_v63  ;;  %v1701_v48 = vmul.f32 %v5556_v18, %v7565_v50  ;;  %v1700_v46 = vmul.f32 %v5556_v18, %v7560_v13  ;;  %v2781_v3 = vsub.f32 %v9359_v34, %v7839_v59 }
 0x3b0   : > { %2251 = vadd.xlane.f32.xlu1 %v2250_v5  ;;  %5565 = vpow2.f32 %v2200_v11  ;;  %1792 = vmatprep.mubr.bf16.mxu0 %v1721_v33  ;;  %v1660_v16 = vpop.xlane.xlu1 %1659  ;;  %v2224_v11 = vmul.f32 1.442695, %v2161_v44  ;;  %v2812_v7 = vmul.f32 1.442695, %v2780_v25  ;;  %v9362_v33 = vld [vmem:[#allocation73_spill] sm:$0xff]  ;;  %v9371_v25 = vld [vmem:[#allocation76_spill] sm:$0xff] }
 0x3b1   : > { %v7921_v52 = vpop.xlane.xlu0 %2760  ;;  %5567 = vpow2.f32 %v2206_v60  ;;  %1793 = vmatmul.mubr.bf16.gmra.mxu0 %v1720_v38  ;;  %v2814_v19 = vmul.f32 1.442695, %v2781_v3  ;;  %v9372_v3 = vld [vmem:[#allocation80_spill] sm:$0xff] }
 0x3b2   : > { %5569 = vpow2.f32 %v2208_v39 }
 0x3b3   : > { %v5558_v8 = vpop.eup %5557  ;;  %5571 = vrcp.f32 %v1660_v16  ;;  %v9363_v16 = vld [vmem:[#allocation61_spill] sm:$0xff] }
 0x3b4   : > { %v1703_v53 = vmul.f32 %v5558_v8, %v7577_v27  ;;  %v1702_v49 = vmul.f32 %v5558_v8, %v7571_v41  ;;  %v9360_v27 = vld [vmem:[#allocation59_spill] sm:$0xff]  ;;  %v9361_v41 = vld [vmem:[#allocation60_spill] sm:$0xff] }
 0x3b5   : > { %v1663_v42 = vpop.xlane.xlu0 %1662  ;;  %v2782_v13 = vsub.f32 %v9360_v27, %v7849_v54  ;;  %v2783_v5 = vsub.f32 %v9361_v41, %v7849_v54 }
 0x3b6   : > { %5573 = vrcp.f32 %v1663_v42  ;;  %v1723_v29 = vpack.c.bf16 %v1703_v53, %v1701_v48  ;;  %v1722_v21 = vpack.c.bf16 %v1702_v49, %v1700_v46  ;;  %v5560_v50 = vpop.eup %5559  ;;  %v9367_v48 = vld [vmem:[#allocation63_spill] sm:$0xff]  ;;  %v9368_v46 = vld [vmem:[#allocation64_spill] sm:$0xff] }
 0x3b7   : > { %5575 = vpow2.f32 %v2214_v28  ;;  %v1705_v39 = vmul.f32 %v5560_v50, %v7589_v40  ;;  %v1704_v2 = vmul.f32 %v5560_v50, %v7583_v24  ;;  %v2816_v26 = vmul.f32 1.442695, %v2782_v13  ;;  %v9365_v24 = vld [vmem:[#allocation4_spill] sm:$0xff]  ;;  %v9366_v28 = vld [vmem:[#allocation45_spill] sm:$0xff]  ;;  %v9373_v13 = vld [vmem:[#allocation46_spill] sm:$0xff] }
 0x3b8   : > { %5577 = vpow2.f32 %v2216_v9  ;;  %1800 = vmatprep.mubr.bf16.mxu0 %v1723_v29  ;;  %v2818_v54 = vmul.f32 1.442695, %v2783_v5  ;;  %v2784_v40 = vsub.f32 %v9363_v16, %v7856_v36  ;;  %v2150_v9 = vsub.f32 %v9366_v28, %v7785_v32  ;;  %v9369_v29 = vld [vmem:[#allocation77_spill] sm:$0xff]  ;;  %v9377_v16 = vld [vmem:[#allocation50_spill] sm:$0xff] }
 0x3b9   : > { %1801 = vmatmul.mubr.bf16.gmra.mxu0 %v1722_v21  ;;  %5579 = vpow2.f32 %v2222_v31  ;;  %v2786_v53 = vsub.f32 %v9367_v48, %v7865_v61  ;;  %v2787_v49 = vsub.f32 %v9368_v46, %v7865_v61  ;;  %v2151_v41 = vsub.f32 %v9373_v13, %v7785_v32  ;;  %v9376_v32 = vld [vmem:[#allocation66_spill] sm:$0xff] }
 0x3ba   : > { %5581 = vpow2.f32 %v2224_v11  ;;  %v2820_v44 = vmul.f32 1.442695, %v2784_v40  ;;  %v9370_v11 = vld [vmem:[#allocation81_spill] sm:$0xff]  ;;  %v2202_v5 = vmul.f32 1.442695, %v2150_v9  ;;  %v2155_v40 = vsub.f32 %v9377_v16, %v7811_v62  ;;  %v9381_v48 = vld [vmem:[#allocation54_spill] sm:$0xff] }
 0x3bb   : > { %v5562_v43 = vpop.eup %5561  ;;  %5583 = vpow2.f32 %v2812_v7 }
 0x3bc   : > { %v7939_v60 = vpop.eup %5563  ;;  %v1707_v59 = vmul.f32 %v5562_v43, %v7601_v51  ;;  %v1706_v38 = vmul.f32 %v5562_v43, %v9362_v33  ;;  %v9364_v51 = vld [vmem:[#allocation62_spill] sm:$0xff]  ;;  %5585 = vpow2.f32 %v2814_v19  ;;  %v9374_v43 = vld [vmem:[#allocation49_spill] sm:$0xff] }
 0x3bd   : > { %v7945_v30 = vpop.eup %5565  ;;  %v2785_v15 = vsub.f32 %v9364_v51, %v7856_v36  ;;  %5587 = vpow2.f32 %v2816_v26  ;;  %v2154_v7 = vsub.f32 %v9374_v43, %v7811_v62  ;;  %v2826_v26 = vmul.f32 1.442695, %v2787_v49  ;;  %v9385_v43 = vld [vmem:[#allocation72_spill] sm:$0xff] }
 0x3be   : > { %v7947_v47 = vpop.eup %5567  ;;  %v1725_v1 = vpack.c.bf16 %v1707_v59, %v1705_v39  ;;  %v1724_v63 = vpack.c.bf16 %v1706_v38, %v1704_v2  ;;  %v2253_v58 = vadd.f32 %v7945_v30, %v7939_v60  ;;  %5589 = vpow2.f32 %v2818_v54  ;;  %v9375_v2 = vld [vmem:[#allocation65_spill] sm:$0xff] }
 0x3bf   : > { %v7949_v18 = vpop.eup %5569  ;;  %v2822_v42 = vmul.f32 1.442695, %v2785_v15  ;;  %5591 = vpow2.f32 %v2820_v44  ;;  %v2824_v59 = vmul.f32 1.442695, %v2786_v53  ;;  %v2788_v33 = vsub.f32 %v9375_v2, %v7868_v55  ;;  %v9378_v15 = vld [vmem:[#allocation53_spill] sm:$0xff] }
 0x3c0   : > { %1808 = vmatprep.mubr.bf16.mxu0 %v1725_v1  ;;  %v5572_v8 = vpop.eup %5571  ;;  %v2259_v14 = vadd.f32 %v7949_v18, %v7947_v47  ;;  %v2789_v54 = vsub.f32 %v9376_v32, %v7868_v55  ;;  %v2210_v51 = vmul.f32 1.442695, %v2154_v7  ;;  %v2159_v53 = vsub.f32 %v9381_v48, %v7823_v4 }
 0x3c1   : > { %3630 = vrot.lane.b32.xlu1 %v9365_v24, %s5909_s28  ;;  %1809 = vmatmul.mubr.bf16.gmra.mxu0 %v1724_v63  ;;  %v1709_v21 = vmul.f32 %v5572_v8, %v9369_v29  ;;  %v1708_v34 = vmul.f32 %v5572_v8, %v9371_v25  ;;  %5593 = vpow2.f32 %v2822_v42  ;;  %v2204_v63 = vmul.f32 1.442695, %v2151_v41  ;;  %v9379_v8 = vld [vmem:[#allocation67_spill] sm:$0xff]  ;;  %v9382_v29 = vld [vmem:[#allocation69_spill] sm:$0xff]  ;;  %v9383_v25 = vld [vmem:[#allocation70_spill] sm:$0xff] }
 0x3c2   : > { %5595 = vpow2.f32 %v2202_v5  ;;  %v2158_v24 = vsub.f32 %v9378_v15, %v7823_v4  ;;  %v2790_v55 = vsub.f32 %v9379_v8, %v7877_v45  ;;  %v2830_v9 = vmul.f32 1.442695, %v2789_v54  ;;  %v9389_v15 = vld [vmem:[#allocation79_spill] sm:$0xff] }
 0x3c3   : > { %v5574_v36 = vpop.eup %5573  ;;  %5597 = vpow2.f32 %v2824_v59  ;;  %v2212_v42 = vmul.f32 1.442695, %v2155_v40  ;;  %v2220_v5 = vmul.f32 1.442695, %v2159_v53  ;;  %v2795_v7 = vsub.f32 %v9385_v43, %v7899_v6 }
 0x3c4   : > { %2254 = vadd.xlane.f32.xlu0 %v2253_v58  ;;  %v7967_v31 = vpop.eup %5575  ;;  %v1711_v17 = vmul.f32 %v5574_v36, %v9370_v11  ;;  %v1710_v50 = vmul.f32 %v5574_v36, %v9372_v3  ;;  %v2828_v58 = vmul.f32 1.442695, %v2788_v33  ;;  %5599 = vpow2.f32 %v2826_v26  ;;  %v8009_v11 = vpop.xlane.xlu0 %2766  ;;  %v9387_v33 = vld [vmem:[#allocation75_spill] sm:$0xff] }
 0x3c5   : > { %v7973_v27 = vpop.eup %5577  ;;  %5601 = vpow2.f32 %v2204_v63  ;;  %v2218_v49 = vmul.f32 1.442695, %v2158_v24  ;;  %v2764_v3 = vpop.xlane.xlu1 %2763  ;;  %v2797_v26 = vsub.f32 %v9387_v33, %v7907_v20  ;;  %v2799_v24 = vsub.f32 %v9389_v15, %v7921_v52  ;;  %v9398_v15 = vld [vmem:[#allocation90_spill] sm:$0xff] }
 0x3c6   : > { %v1727_v61 = vpack.c.bf16 %v1711_v17, %v1709_v21  ;;  %v1726_v19 = vpack.c.bf16 %v1710_v50, %v1708_v34  ;;  %v7979_v39 = vpop.eup %5579  ;;  %v2265_v1 = vadd.f32 %v7973_v27, %v7967_v31  ;;  %5603 = vpow2.f32 %v2210_v51  ;;  %v9384_v50 = vld [vmem:[#allocation71_spill] sm:$0xff] }
 0x3c7   : > { %v7983_v38 = vpop.eup %5581  ;;  %v2792_v21 = vsub.f32 %v9382_v29, %v7880_v56  ;;  %5605 = vpow2.f32 %v2828_v58  ;;  %v2832_v17 = vmul.f32 1.442695, %v2790_v55  ;;  %v2793_v34 = vsub.f32 %v9383_v25, %v7880_v56  ;;  %v9390_v58 = vld [vmem:[#allocation82_spill] sm:$0xff]  ;;  %v9393_v25 = vld [vmem:[#allocation85_spill] sm:$0xff] }
 0x3c8   : > { %2260 = vadd.xlane.f32.xlu0 %v2259_v14  ;;  %1816 = vmatprep.mubr.bf16.mxu0 %v1727_v61  ;;  %v7995_v28 = vpop.eup %5583  ;;  %v9380_v14 = vld [vmem:[#allocation68_spill] sm:$0xff]  ;;  %v2271_v62 = vadd.f32 %v7983_v38, %v7979_v39  ;;  %5607 = vpow2.f32 %v2830_v9  ;;  %v2794_v13 = vsub.f32 %v9384_v50, %v7899_v6  ;;  %v8023_v56 = vpop.xlane.xlu0 %2772  ;;  %v9388_v6 = vld [vmem:[#allocation78_spill] sm:$0xff]  ;;  %v2842_v51 = vmul.f32 1.442695, %v2795_v7  ;;  %v9395_v7 = vld [vmem:[#allocation87_spill] sm:$0xff] }
 0x3c9   : > { %1817 = vmatmul.mubr.bf16.gmra.mxu0 %v1726_v19  ;;  %v2791_v36 = vsub.f32 %v9380_v14, %v7877_v45  ;;  %v8001_v44 = vpop.eup %5585  ;;  %5609 = vpow2.f32 %v2212_v42  ;;  %v2836_v61 = vmul.f32 1.442695, %v2792_v21  ;;  %v9386_v19 = vld [vmem:[#allocation74_spill] sm:$0xff]  ;;  %v2838_v2 = vmul.f32 1.442695, %v2793_v34  ;;  %v2770_v32 = vpop.xlane.xlu1 %2769 }
 0x3ca   : > { %v8005_v46 = vpop.eup %5587  ;;  %v2876_v41 = vadd.f32 %v8001_v44, %v7995_v28  ;;  %5611 = vpow2.f32 %v2218_v49  ;;  %v2796_v59 = vsub.f32 %v9386_v19, %v7907_v20  ;;  %v2798_v63 = vsub.f32 %v9388_v6, %v7921_v52  ;;  %v9392_v52 = vld [vmem:[#allocation84_spill] sm:$0xff]  ;;  %v9394_v50 = vld [vmem:[#allocation86_spill] sm:$0xff] }
 0x3cb   : > { %v8011_v45 = vpop.eup %5589  ;;  %v2834_v4 = vmul.f32 1.442695, %v2791_v36  ;;  %5613 = vpow2.f32 %v2832_v17  ;;  %v2800_v8 = vsub.f32 %v9390_v58, %v2764_v3  ;;  %v2846_v14 = vmul.f32 1.442695, %v2797_v26  ;;  %v9391_v36 = vld [vmem:[#allocation83_spill] sm:$0xff] }
 0x3cc   : > { %2266 = vadd.xlane.f32.xlu0 %v2265_v1  ;;  %v8027_v54 = vpop.eup %5591  ;;  %v2840_v1 = vmul.f32 1.442695, %v2794_v13  ;;  %v2879_v16 = vadd.f32 %v8011_v45, %v8005_v46  ;;  %v2844_v20 = vmul.f32 1.442695, %v2796_v59  ;;  %v8038_v55 = vpop.xlane.xlu0 %2778  ;;  %v2848_v53 = vmul.f32 1.442695, %v2798_v63 }
 0x3cd   : > { %5615 = vpow2.f32 %v2834_v4  ;;  %v2776_v42 = vpop.xlane.xlu1 %2775  ;;  %v2802_v49 = vsub.f32 %v9392_v52, %v8009_v11  ;;  %v2850_v17 = vmul.f32 1.442695, %v2799_v24  ;;  %v2803_v34 = vsub.f32 %v9393_v25, %v8009_v11  ;;  %v9397_v63 = vld [vmem:[#allocation89_spill] sm:$0xff]  ;;  %v9400_v52 = vld [vmem:[#allocation92_spill] sm:$0xff] }
 0x3ce   : > { %v8033_v40 = vpop.eup %5593  ;;  %5617 = vpow2.f32 %v2220_v5  ;;  %v2804_v13 = vsub.f32 %v9394_v50, %v2770_v32  ;;  %v2808_v24 = vsub.f32 %v9398_v15, %v2776_v42 }
 0x3cf   : > { %5619 = vpow2.f32 %v2836_v61  ;;  %v8040_v9 = vpop.eup %5595  ;;  %v2882_v29 = vadd.f32 %v8033_v40, %v8027_v54  ;;  %v2805_v61 = vsub.f32 %v9395_v7, %v2770_v32  ;;  %v2856_v11 = vmul.f32 1.442695, %v2802_v49 }
 0x3d0   : > { %2272 = vadd.xlane.f32.xlu0 %v2271_v62  ;;  %5621 = vpow2.f32 %v2838_v2  ;;  %v2801_v62 = vsub.f32 %v9391_v36, %v2764_v3  ;;  %v8043_v48 = vpop.eup %5597  ;;  %v2852_v3 = vmul.f32 1.442695, %v2800_v8  ;;  %v9396_v2 = vld [vmem:[#allocation88_spill] sm:$0xff]  ;;  %v2858_v6 = vmul.f32 1.442695, %v2803_v34  ;;  %v9401_v34 = vld [vmem:[#allocation93_spill] sm:$0xff] }
 0x3d1   : > { %5623 = vpow2.f32 %v2840_v1  ;;  %v8049_v21 = vpop.eup %5599  ;;  %v3368_v19 = vpop.xlane.xlu1 %3367  ;;  %v2806_v33 = vsub.f32 %v9396_v2, %v8023_v56  ;;  %v2860_v32 = vmul.f32 1.442695, %v2804_v13  ;;  %v2862_v8 = vmul.f32 1.442695, %v2805_v61 }
 0x3d2   : > { %5625 = vpow2.f32 %v2842_v51  ;;  %v8053_v4 = vpop.eup %5601  ;;  %v2854_v43 = vmul.f32 1.442695, %v2801_v62  ;;  %v2885_v26 = vadd.f32 %v8049_v21, %v8043_v48  ;;  %v2810_v49 = vsub.f32 %v9400_v52, %v8038_v55  ;;  %v9407_v52 = vld [vmem:[#allocation99_spill] sm:$0xff] }
 0x3d3   : > { %5627 = vpow2.f32 %v2844_v20  ;;  %v8058_v5 = vpop.eup %5603  ;;  %v2868_v13 = vmul.f32 1.442695, %v2808_v24 }
 0x3d4   : > { %2877 = vadd.xlane.f32.xlu0 %v2876_v41  ;;  %v8056_v41 = vpop.xlane.xlu0 %3370  ;;  %5629 = vpow2.f32 %v2846_v14  ;;  %v8061_v59 = vpop.eup %5605  ;;  %v9399_v14 = vld [vmem:[#allocation91_spill] sm:$0xff] }
 0x3d5   : > { %5631 = vpow2.f32 %v2848_v53  ;;  %v8067_v1 = vpop.eup %5607  ;;  %v2809_v36 = vsub.f32 %v9399_v14, %v2776_v42  ;;  %v3374_v62 = vpop.xlane.xlu1 %3373  ;;  %v2256_v42 = vadd.f32 %v8053_v4, %v8040_v9 }
 0x3d6   : > { %5633 = vpow2.f32 %v2850_v17  ;;  %v8071_v51 = vpop.eup %5609 }
 0x3d7   : > { %5635 = vpow2.f32 %v2852_v3  ;;  %v8076_v58 = vpop.eup %5611  ;;  %v2811_v3 = vsub.f32 %v9401_v34, %v8038_v55  ;;  %v2870_v2 = vmul.f32 1.442695, %v2809_v36 }
 0x3d8   : > { %2880 = vadd.xlane.f32.xlu0 %v2879_v16  ;;  %v2807_v16 = vsub.f32 %v9397_v63, %v8023_v56  ;;  %v8074_v20 = vpop.xlane.xlu0 %3376  ;;  %5637 = vpow2.f32 %v2854_v43  ;;  %v8079_v53 = vpop.eup %5613  ;;  %v2864_v56 = vmul.f32 1.442695, %v2806_v33  ;;  %v9402_v43 = vld [vmem:[#allocation94_spill] sm:$0xff]  ;;  %v9404_v33 = vld [vmem:[#allocation95_spill] sm:$0xff]  ;;  %v2872_v63 = vmul.f32 1.442695, %v2810_v49 }
 0x3d9   : > { %5639 = vpow2.f32 %v2856_v11  ;;  %v3414_v7 = vsub.f32 %v9402_v43, %v3368_v19  ;;  %v2874_v14 = vmul.f32 1.442695, %v2811_v3 }
 0x3da   : > { %v8085_v17 = vpop.eup %5615  ;;  %5641 = vpow2.f32 %v2858_v6  ;;  %v2866_v25 = vmul.f32 1.442695, %v2807_v16  ;;  %v9405_v16 = vld [vmem:[#allocation98_spill] sm:$0xff] }
 0x3db   : > { %v8091_v50 = vpop.eup %5617  ;;  %5643 = vpow2.f32 %v2860_v32  ;;  %v3418_v32 = vsub.f32 %v9405_v16, %v3374_v62  ;;  %v2891_v15 = vadd.f32 %v8085_v17, %v8079_v53 }
 0x3dc   : > { %2883 = vadd.xlane.f32.xlu0 %v2882_v29  ;;  %v2888_v29 = vadd.f32 %v8067_v1, %v8061_v59  ;;  %v8096_v11 = vpop.eup %5619  ;;  %5645 = vpow2.f32 %v2862_v8  ;;  %v3380_v6 = vpop.xlane.xlu1 %3379  ;;  %v3419_v8 = vsub.f32 %v9407_v52, %v3374_v62 }
 0x3dd   : > { %9403 = vst [vmem:[#allocation21_spill] sm:$0xff] %v8096_v11  ;;  %v8099_v55 = vpop.eup %5621  ;;  %5647 = vpow2.f32 %v2864_v56  ;;  %v3422_v56 = vsub.f32 %v7691_v12, %v3380_v6  ;;  %v3454_v62 = vmul.f32 1.442695, %v3418_v32  ;;  %v3423_v3 = vsub.f32 %v7693_v37, %v3380_v6  ;;  %v9413_v37 = vld [vmem:[#allocation96_spill] sm:$0xff]  ;;  %v9415_v32 = vld [vmem:[#allocation97_spill] sm:$0xff] }
 0x3de   : > { %v8104_v24 = vpop.eup %5623  ;;  %5649 = vpow2.f32 %v2866_v25  ;;  %v3456_v12 = vmul.f32 1.442695, %v3419_v8  ;;  %v3416_v6 = vsub.f32 %v9413_v37, %v8056_v41 }
 0x3df   : > { %9406 = vst [vmem:[#allocation11_spill] sm:$0xff] %v8104_v24  ;;  %v8109_v36 = vpop.eup %5625  ;;  %5651 = vpow2.f32 %v2868_v13  ;;  %v2894_v13 = vadd.f32 %v8099_v55, %v8096_v11  ;;  %v9492_v11 = vld [vmem:[#allocation108_spill] sm:$0xff] }
 0x3e0   : > { %2886 = vadd.xlane.f32.xlu0 %v2885_v26  ;;  %v8094_v61 = vpop.xlane.xlu0 %3382  ;;  %v3415_v26 = vsub.f32 %v9404_v33, %v3368_v19  ;;  %v2262_v19 = vadd.f32 %v8071_v51, %v8058_v5  ;;  %v8114_v34 = vpop.eup %5627  ;;  %5653 = vpow2.f32 %v2870_v2  ;;  %v3462_v2 = vmul.f32 1.442695, %v3422_v56 }
 0x3e1   : > { %9408 = vst [vmem:[#allocation18_spill] sm:$0xff] %v8114_v34  ;;  %v8116_v25 = vpop.eup %5629  ;;  %5655 = vpow2.f32 %v2872_v63  ;;  %v2897_v52 = vadd.f32 %v8109_v36, %v8104_v24 }
 0x3e2   : > { %9409 = vst [vmem:[#allocation25_spill] sm:$0xff] %v8116_v25  ;;  %v8121_v43 = vpop.eup %5631  ;;  %5657 = vpow2.f32 %v2874_v14  ;;  %v3464_v14 = vmul.f32 1.442695, %v3423_v3 }
 0x3e3   : > { %9410 = vst [vmem:[#allocation19_spill] sm:$0xff] %v8121_v43  ;;  %v8125_v33 = vpop.eup %5633 }
 0x3e4   : > { %2889 = vadd.xlane.f32.xlu0 %v2888_v29  ;;  %v3446_v29 = vmul.f32 1.442695, %v3414_v7  ;;  %v2268_v7 = vadd.f32 %v8091_v50, %v8076_v58  ;;  %9411 = vst [vmem:[#allocation5_spill] sm:$0xff] %v8125_v33  ;;  %v8127_v63 = vpop.eup %5635 }
 0x3e5   : > { %2257 = vadd.xlane.f32.xlu1 %v2256_v42  ;;  %v3448_v42 = vmul.f32 1.442695, %v3415_v26  ;;  %9412 = vst [vmem:[#allocation12_spill] sm:$0xff] %v8127_v63  ;;  %v8131_v16 = vpop.eup %5637 }
 0x3e6   : > { %5659 = vpow2.f32 %v3446_v29  ;;  %9414 = vst [vmem:[#allocation43_spill] sm:$0xff] %v8131_v16  ;;  %v8137_v8 = vpop.eup %5639 }
 0x3e7   : > { %5661 = vpow2.f32 %v3448_v42  ;;  %9416 = vst [vmem:[#allocation44_spill] sm:$0xff] %v8137_v8  ;;  %v8141_v29 = vpop.eup %5641 }
 0x3e8   : > { %2892 = vadd.xlane.f32.xlu0 %v2891_v15  ;;  %v8112_v49 = vpop.xlane.xlu0 %3388  ;;  %v3417_v15 = vsub.f32 %v9415_v32, %v8056_v41  ;;  %5663 = vpow2.f32 %v3454_v62  ;;  %9417 = vst [vmem:[#allocation16_spill] sm:$0xff] %v8141_v29  ;;  %v8143_v42 = vpop.eup %5643  ;;  %v9419_v41 = vld [vmem:[#allocation100_spill] sm:$0xff] }
 0x3e9   : > { %2263 = vadd.xlane.f32.xlu1 %v2262_v19  ;;  %5665 = vpow2.f32 %v3456_v12  ;;  %v2900_v19 = vadd.f32 %v8116_v25, %v8114_v34  ;;  %9418 = vst [vmem:[#allocation47_spill] sm:$0xff] %v8143_v42  ;;  %v3420_v62 = vsub.f32 %v9419_v41, %v8074_v20  ;;  %v8147_v3 = vpop.eup %5645  ;;  %v9421_v12 = vld [vmem:[#allocation101_spill] sm:$0xff]  ;;  %v2909_v41 = vadd.f32 %v8141_v29, %v8137_v8  ;;  %v9490_v34 = vld [vmem:[#allocation107_spill] sm:$0xff] }
 0x3ea   : > { %5667 = vpow2.f32 %v3462_v2  ;;  %9420 = vst [vmem:[#allocation48_spill] sm:$0xff] %v8147_v3  ;;  %v3421_v37 = vsub.f32 %v9421_v12, %v8074_v20  ;;  %v2903_v2 = vadd.f32 %v8125_v33, %v8121_v43  ;;  %v8153_v32 = vpop.eup %5647 }
 0x3eb   : > { %9422 = vst [vmem:[#allocation27_spill] sm:$0xff] %v8153_v32  ;;  %v3458_v20 = vmul.f32 1.442695, %v3420_v62 }
 0x3ec   : > { %2895 = vadd.xlane.f32.xlu0 %v2894_v13  ;;  %v2228_v26 = vpop.xlane.xlu0 %2227  ;;  %v3450_v13 = vmul.f32 1.442695, %v3416_v6  ;;  %v2906_v6 = vadd.f32 %v8131_v16, %v8127_v63 }
 0x3ed   : > { %2269 = vadd.xlane.f32.xlu1 %v2268_v7  ;;  %5669 = vrcp.f32 %v2228_v26  ;;  %v3452_v7 = vmul.f32 1.442695, %v3417_v15  ;;  %v3424_v26 = vsub.f32 %v7699_v35, %v8094_v61  ;;  %v3425_v35 = vsub.f32 %v7701_v23, %v8094_v61 }
 0x3ee   : > { %5671 = vpow2.f32 %v3464_v14 }
 0x3ef   : > { %v3468_v23 = vmul.f32 1.442695, %v3425_v35 }
 0x3f0   : > { %2898 = vadd.xlane.f32.xlu0 %v2897_v52  ;;  %v2231_v56 = vpop.xlane.xlu0 %2230  ;;  %v8157_v52 = vpop.eup %5649 }
 0x3f1   : > { %2901 = vadd.xlane.f32.xlu1 %v2900_v19  ;;  %5673 = vrcp.f32 %v2231_v56  ;;  %9423 = vst [vmem:[#allocation17_spill] sm:$0xff] %v8157_v52  ;;  %v8163_v19 = vpop.eup %5651  ;;  %v3460_v56 = vmul.f32 1.442695, %v3421_v37  ;;  %v2915_v37 = vadd.f32 %v8157_v52, %v8153_v32  ;;  %v9475_v52 = vld [vmem:[#allocation3_spill] sm:$0xff] }
 0x3f2   : > { %9424 = vst [vmem:[#allocation13_spill] sm:$0xff] %v8163_v19  ;;  %5675 = vpow2.f32 %v3450_v13  ;;  %v8165_v14 = vpop.eup %5653  ;;  %v3466_v13 = vmul.f32 1.442695, %v3424_v26 }
 0x3f3   : > { %9425 = vst [vmem:[#allocation51_spill] sm:$0xff] %v8165_v14  ;;  %5677 = vpow2.f32 %v3452_v7  ;;  %v8169_v12 = vpop.eup %5655  ;;  %v2918_v61 = vadd.f32 %v8165_v14, %v8163_v19 }
 0x3f4   : > { %2904 = vadd.xlane.f32.xlu0 %v2903_v2  ;;  %v8161_v15 = vpop.xlane.xlu0 %3394  ;;  %9426 = vst [vmem:[#allocation52_spill] sm:$0xff] %v8169_v12  ;;  %v2912_v2 = vadd.f32 %v8147_v3, %v8143_v42  ;;  %v8175_v63 = vpop.eup %5657  ;;  %5679 = vpow2.f32 %v3458_v20 }
 0x3f5   : > { %2907 = vadd.xlane.f32.xlu1 %v2906_v6  ;;  %9427 = vst [vmem:[#allocation23_spill] sm:$0xff] %v8175_v63  ;;  %v8177_v6 = vpop.eup %5659  ;;  %5681 = vpow2.f32 %v3460_v56  ;;  %v2921_v56 = vadd.f32 %v8175_v63, %v8169_v12  ;;  %v9436_v12 = vld [vmem:[#allocation106_spill] sm:$0xff] }
 0x3f6   : > { %9428 = vst [vmem:[#allocation55_spill] sm:$0xff] %v8177_v6  ;;  %v8179_v7 = vpop.eup %5661  ;;  %5683 = vpow2.f32 %v3466_v13 }
 0x3f7   : > { %9429 = vst [vmem:[#allocation56_spill] sm:$0xff] %v8179_v7  ;;  %v8183_v8 = vpop.eup %5663 }
 0x3f8   : > { %2910 = vadd.xlane.f32.xlu0 %v2909_v41  ;;  %v2234_v62 = vpop.xlane.xlu0 %2233  ;;  %9430 = vst [vmem:[#allocation57_spill] sm:$0xff] %v8183_v8  ;;  %v8187_v42 = vpop.eup %5665 }
 0x3f9   : > { %2913 = vadd.xlane.f32.xlu1 %v2912_v2  ;;  %9431 = vst [vmem:[#allocation58_spill] sm:$0xff] %v8187_v42  ;;  %v8189_v41 = vpop.eup %5667  ;;  %5685 = vrcp.f32 %v2234_v62  ;;  %v3516_v35 = vadd.f32 %v8187_v42, %v8183_v8  ;;  %v9434_v62 = vld [vmem:[#allocation111_spill] sm:$0xff] }
 0x3fa   : > { %9432 = vst [vmem:[#allocation59_spill] sm:$0xff] %v8189_v41  ;;  %v5670_v20 = vpop.eup %5669 }
 0x3fb   : > { %v8193_v2 = vpop.eup %5671  ;;  %v2290_v63 = vmul.f32 %v5670_v20, %v9436_v12 }
 0x3fc   : > { %2916 = vadd.xlane.f32.xlu0 %v2915_v37  ;;  %v2237_v26 = vpop.xlane.xlu0 %2236  ;;  %9433 = vst [vmem:[#allocation60_spill] sm:$0xff] %v8193_v2  ;;  %v2291_v37 = vmul.f32 %v5670_v20, %v7725_v22  ;;  %v9442_v20 = vld [vmem:[#allocation24_spill] sm:$0xff] }
 0x3fd   : > { %2919 = vadd.xlane.f32.xlu1 %v2918_v61  ;;  %5687 = vrcp.f32 %v2237_v26  ;;  %v3510_v26 = vadd.f32 %v8179_v7, %v8177_v6  ;;  %v9450_v6 = vld [vmem:[#allocation119_spill] sm:$0xff]  ;;  %v9451_v7 = vld [vmem:[#allocation32_spill] sm:$0xff] }
 0x3fe   : > { %5689 = vpow2.f32 %v3468_v23  ;;  %v5674_v19 = vpop.eup %5673  ;;  %v9437_v23 = vld [vmem:[#allocation109_spill] sm:$0xff] }
 0x3ff   : > { %v2293_v61 = vmul.f32 %v5674_v19, %v9434_v62  ;;  %v8201_v14 = vpop.eup %5675  ;;  %v2292_v32 = vmul.f32 %v5674_v19, %v9437_v23  ;;  %v9441_v19 = vld [vmem:[#allocation30_spill] sm:$0xff]  ;;  %v9445_v23 = vld [vmem:[#allocation116_spill] sm:$0xff] }
 0x400   : > { %2922 = vadd.xlane.f32.xlu0 %v2921_v56  ;;  %v8197_v13 = vpop.xlane.xlu0 %3400  ;;  %9435 = vst [vmem:[#allocation73_spill] sm:$0xff] %v8201_v14  ;;  %v8207_v3 = vpop.eup %5677  ;;  %v3522_v56 = vadd.f32 %v8193_v2, %v8189_v41 }
 0x401   : > { %3517 = vadd.xlane.f32.xlu1 %v3516_v35  ;;  %9438 = vst [vmem:[#allocation61_spill] sm:$0xff] %v8207_v3  ;;  %v2323_v8 = vpack.c.bf16 %v2293_v61, %v2291_v37  ;;  %v2322_v35 = vpack.c.bf16 %v2292_v32, %v2290_v63  ;;  %v8211_v62 = vpop.eup %5679  ;;  %v3513_v42 = vadd.f32 %v8207_v3, %v8201_v14 }
 0x402   : > { %9439 = vst [vmem:[#allocation62_spill] sm:$0xff] %v8211_v62  ;;  %v8215_v12 = vpop.eup %5681 }
 0x403   : > { %2434 = vmatprep.mubr.bf16.mxu0 %v2323_v8  ;;  %9440 = vst [vmem:[#allocation4_spill] sm:$0xff] %v8215_v12  ;;  %v8219_v61 = vpop.eup %5683  ;;  %v3519_v8 = vadd.f32 %v8215_v12, %v8211_v62 }
 0x404   : > { %3511 = vadd.xlane.f32.xlu0 %v3510_v26  ;;  %v2240_v22 = vpop.xlane.xlu0 %2239  ;;  %2435 = vmatmul.mubr.bf16.vlgmr.msra.gmra.mxu0 %v2322_v35  ;;  %9443 = vst [vmem:[#allocation45_spill] sm:$0xff] %v8219_v61  ;;  %v9444_v26 = vld [vmem:[#allocation15_spill] sm:$0xff] }
 0x405   : > { %3523 = vadd.xlane.f32.xlu1 %v3522_v56  ;;  %4948 = vmatpush3.bf16.msra.mxu0 %v9441_v19  ;;  %5691 = vrcp.f32 %v2240_v22  ;;  %v9447_v19 = vld [vmem:[#allocation20_spill] sm:$0xff]  ;;  %v9449_v22 = vld [vmem:[#allocation115_spill] sm:$0xff] }
 0x406   : > { %4949 = vmatprep.subr.bf16.mxu0 %v9442_v20  ;;  %v5686_v63 = vpop.eup %5685  ;;  %v9448_v20 = vld [vmem:[#allocation120_spill] sm:$0xff] }
 0x407   : > { %v2295_v56 = vmul.f32 %v5686_v63, %v9445_v23  ;;  %v2294_v2 = vmul.f32 %v5686_v63, %v9449_v22 }
 0x408   : > { %3514 = vadd.xlane.f32.xlu0 %v3513_v42  ;;  %v2243_v37 = vpop.xlane.xlu0 %2242 }
 0x409   : > { %4950 = vmatpush3.bf16.msra.mxu0 %v9444_v26  ;;  %5693 = vrcp.f32 %v2243_v37  ;;  %v9452_v26 = vld [vmem:[#allocation22_spill] sm:$0xff] }
 0x40a   : > { %v5688_v32 = vpop.eup %5687  ;;  %4951 = vmatprep.subr.bf16.mxu0 %v9447_v19  ;;  %v9454_v19 = vld [vmem:[#allocation26_spill] sm:$0xff] }
 0x40b   : > { %v8225_v35 = vpop.eup %5689  ;;  %v2297_v41 = vmul.f32 %v5688_v32, %v9448_v20  ;;  %v2296_v14 = vmul.f32 %v5688_v32, %v9450_v6  ;;  %v9460_v20 = vld [vmem:[#allocation125_spill] sm:$0xff] }
 0x40c   : > { %9446 = vst [vmem:[#allocation63_spill] sm:$0xff] %v8225_v35  ;;  %3520 = vadd.xlane.f32.xlu0 %v3519_v8  ;;  %v8228_v42 = vpop.xlane.xlu0 %3406  ;;  %v3525_v37 = vadd.f32 %v8225_v35, %v8219_v61  ;;  %v9453_v8 = vld [vmem:[#allocation14_spill] sm:$0xff]  ;;  %v9474_v35 = vld [vmem:[#allocation37_spill] sm:$0xff] }
 0x40d   : > { %v2325_v62 = vpack.c.bf16 %v2297_v41, %v2295_v56  ;;  %v2324_v12 = vpack.c.bf16 %v2296_v14, %v2294_v2  ;;  %4952 = vmatpush3.bf16.msra.mxu0 %v9451_v7  ;;  %v9455_v14 = vld [vmem:[#allocation6_spill] sm:$0xff]  ;;  %v9457_v2 = vld [vmem:[#allocation28_spill] sm:$0xff] }
 0x40e   : > { %4953 = vmatprep.subr.bf16.mxu0 %v9452_v26  ;;  %v9456_v7 = vld [vmem:[#allocation34_spill] sm:$0xff] }
 0x40f   : > { %2442 = vmatprep.mubr.bf16.mxu0 %v2325_v62  ;;  %v9458_v62 = vld [vmem:[#allocation126_spill] sm:$0xff] }
 0x410   : > { %v2246_v23 = vpop.xlane.xlu0 %2245  ;;  %3526 = vadd.xlane.f32.xlu0 %v3525_v37  ;;  %2443 = vmatmul.mubr.bf16.gmra.mxu0 %v2324_v12  ;;  %v9459_v56 = vld [vmem:[#allocation130_spill] sm:$0xff]  ;;  %v9461_v37 = vld [vmem:[#allocation129_spill] sm:$0xff] }
 0x411   : > { %4954 = vmatpush3.bf16.msra.mxu0 %v9453_v8  ;;  %5695 = vrcp.f32 %v2246_v23  ;;  %v9462_v23 = vld [vmem:[#allocation7_spill] sm:$0xff]  ;;  %v9463_v8 = vld [vmem:[#allocation29_spill] sm:$0xff] }
 0x412   : > { %4955 = vmatprep.subr.bf16.mxu0 %v9454_v19  ;;  %v5692_v6 = vpop.eup %5691 }
 0x413   : > { %v2299_v32 = vmul.f32 %v5692_v6, %v9458_v62  ;;  %v2298_v22 = vmul.f32 %v5692_v6, %v9460_v20  ;;  %v9467_v20 = vld [vmem:[#allocation102_spill] sm:$0xff] }
 0x414   : > { %v2249_v63 = vpop.xlane.xlu0 %2248 }
 0x415   : > { %5697 = vrcp.f32 %v2249_v63  ;;  %4956 = vmatpush3.bf16.msra.mxu0 %v9456_v7  ;;  %v3386_v7 = vpop.xlane.xlu1 %3385 }
 0x416   : > { %3642 = vrot.lane.b32.xlu1 %v9455_v14, %s5909_s28  ;;  %v5694_v41 = vpop.eup %5693  ;;  %4957 = vmatprep.subr.bf16.mxu0 %v9457_v2  ;;  %v9464_v14 = vld [vmem:[#allocation31_spill] sm:$0xff]  ;;  %v9465_v2 = vld [vmem:[#allocation36_spill] sm:$0xff] }
 0x417   : > { %v2301_v12 = vmul.f32 %v5694_v41, %v9459_v56  ;;  %v2300_v26 = vmul.f32 %v5694_v41, %v9461_v37  ;;  %v9466_v56 = vld [vmem:[#allocation33_spill] sm:$0xff]  ;;  %v3426_v41 = vsub.f32 %v9467_v20, %v3386_v7  ;;  %v9468_v37 = vld [vmem:[#allocation35_spill] sm:$0xff] }
 0x419   : > { %4958 = vmatpush3.bf16.msra.mxu0 %v9463_v8  ;;  %v2327_v19 = vpack.c.bf16 %v2301_v12, %v2299_v32  ;;  %v2326_v63 = vpack.c.bf16 %v2300_v26, %v2298_v22  ;;  %v9470_v8 = vld [vmem:[#allocation134_spill] sm:$0xff]  ;;  %v9471_v12 = vld [vmem:[#allocation131_spill] sm:$0xff]  ;;  %v9472_v26 = vld [vmem:[#allocation133_spill] sm:$0xff] }
 0x41a   : > { %3626 = vrot.lane.b32.xlu1 %v9462_v23, %s5909_s28  ;;  %4959 = vmatprep.subr.bf16.mxu0 %v9464_v14  ;;  %v9469_v23 = vld [vmem:[#allocation132_spill] sm:$0xff] }
 0x41b   : > { %2450 = vmatprep.mubr.bf16.mxu0 %v2327_v19 }
 0x41c   : > { %2451 = vmatmul.mubr.bf16.gmra.mxu0 %v2326_v63  ;;  %v9473_v63 = vld [vmem:[#allocation103_spill] sm:$0xff] }
 0x41d   : > { %4960 = vmatpush3.bf16.msra.mxu0 %v9465_v2  ;;  %v3427_v14 = vsub.f32 %v9473_v63, %v3386_v7  ;;  %v9478_v7 = vld [vmem:[#allocation105_spill] sm:$0xff] }
 0x41e   : > { %v5696_v62 = vpop.eup %5695  ;;  %4961 = vmatprep.subr.bf16.mxu0 %v9466_v56  ;;  %v3470_v56 = vmul.f32 1.442695, %v3426_v41 }
 0x41f   : > { %v2303_v61 = vmul.f32 %v5696_v62, %v9469_v23  ;;  %v2302_v22 = vmul.f32 %v5696_v62, %v9471_v12  ;;  %v3472_v20 = vmul.f32 1.442695, %v3427_v14  ;;  %v9477_v62 = vld [vmem:[#allocation104_spill] sm:$0xff]  ;;  %v3392_v23 = vpop.xlane.xlu1 %3391 }
 0x420   : > { %5699 = vpow2.f32 %v3470_v56  ;;  %v3430_v29 = vsub.f32 %v9490_v34, %v3392_v23 }
 0x421   : > { %4962 = vmatpush3.bf16.msra.mxu0 %v9468_v37  ;;  %v9476_v37 = vld [vmem:[#allocation8_spill] sm:$0xff]  ;;  %5701 = vpow2.f32 %v3472_v20 }
 0x422   : > { %v5698_v6 = vpop.eup %5697  ;;  %5043 = vmatprep.subr.bf16.mxu0 %v9474_v35  ;;  %v3429_v35 = vsub.f32 %v9478_v7, %v8112_v49  ;;  %v9484_v7 = vld [vmem:[#allocation10_spill] sm:$0xff] }
 0x423   : > { %v2305_v32 = vmul.f32 %v5698_v6, %v9470_v8  ;;  %v2304_v19 = vmul.f32 %v5698_v6, %v9472_v26  ;;  %v3428_v6 = vsub.f32 %v9477_v62, %v8112_v49  ;;  %v8269_v8 = vpop.xlane.xlu1 %3397  ;;  %v8279_v26 = vpop.xlane.xlu0 %3412 }
 0x424   : > { %v3476_v41 = vmul.f32 1.442695, %v3429_v35 }
 0x425   : > { %v2329_v2 = vpack.c.bf16 %v2305_v32, %v2303_v61  ;;  %v2328_v3 = vpack.c.bf16 %v2304_v19, %v2302_v22  ;;  %v3474_v61 = vmul.f32 1.442695, %v3428_v6 }
 0x426   : > { %3628 = vrot.lane.b32.xlu0 %v9475_v52, %s5909_s28 }
 0x427   : > { %2458 = vmatprep.mubr.bf16.mxu0 %v2329_v2  ;;  %5703 = vpow2.f32 %v3474_v61  ;;  %v3404_v32 = vpop.xlane.xlu1 %3403  ;;  %v8289_v2 = vpop.permute.xlu0 %3644 }
 0x428   : > { %2459 = vmatmul.mubr.bf16.gmra.mxu0 %v2328_v3  ;;  %5705 = vpow2.f32 %v3476_v41 }
 0x42a   : > { %3640 = vrot.lane.b32.xlu0 %v9476_v37, %s5909_s28  ;;  %v9483_v37 = vld [vmem:[#allocation9_spill] sm:$0xff] }
 0x42b   : > { %v8277_v22 = vpop.xlane.xlu1 %3409 }
 0x42d   : > { %v8271_v52 = vpop.eup %5699 }
 0x42e   : > { %9479 = vst [vmem:[#allocation64_spill] sm:$0xff] %v8271_v52  ;;  %v8273_v3 = vpop.eup %5701 }
 0x42f   : > { %9480 = vst [vmem:[#allocation77_spill] sm:$0xff] %v8273_v3  ;;  %v3528_v12 = vadd.f32 %v8273_v3, %v8271_v52  ;;  %v8285_v63 = vpop.permute.xlu1 %3646 }
 0x434   : > { %v8281_v49 = vpop.eup %5703 }
 0x435   : > { %9481 = vst [vmem:[#allocation81_spill] sm:$0xff] %v8281_v49  ;;  %v8283_v19 = vpop.eup %5705 }
 0x436   : > { %9482 = vst [vmem:[#allocation76_spill] sm:$0xff] %v8283_v19  ;;  %v3531_v14 = vadd.f32 %v8283_v19, %v8281_v49 }
 0x439   : > { %v2252_v56 = vpop.xlane.xlu1 %2251 }
 0x43a   : > { %5707 = vrcp.f32 %v2252_v56 }
 0x43e   : > { %3529 = vadd.xlane.f32.xlu1 %v3528_v12 }
 0x449   : > { %3532 = vadd.xlane.f32.xlu0 %v3531_v14  ;;  %v5708_v14 = vpop.eup %5707 }
 0x44a   : > { %v2307_v19 = vmul.f32 %v5708_v14, %v7892_v0  ;;  %v2306_v16 = vmul.f32 %v5708_v14, %v7889_v57  ;;  %v3431_v0 = vsub.f32 %v9492_v11, %v3392_v23  ;;  %v9494_v57 = vld [vmem:[#allocation121_spill] sm:$0xff]  ;;  %v9498_v11 = vld [vmem:[#allocation127_spill] sm:$0xff] }
 0x44b   : > { %v3438_v14 = vsub.f32 %v9494_v57, %v3404_v32  ;;  %v3442_v23 = vsub.f32 %v9498_v11, %v8277_v22 }
 0x44d   : > { %v2255_v20 = vpop.xlane.xlu0 %2254 }
 0x44e   : > { %5709 = vrcp.f32 %v2255_v20 }
 0x44f   : > { %3638 = vrot.lane.b32.xlu1 %v9483_v37, %s5909_s28  ;;  %v9488_v37 = vld [vmem:[#allocation110_spill] sm:$0xff] }
 0x450   : > { %v3432_v49 = vsub.f32 %v9488_v37, %v8161_v15 }
 0x451   : > { %v8293_v62 = vpop.xlane.xlu0 %2260  ;;  %v4771_v6 = vpop.f32.mrf.mxu0 }
 0x453   : > { %3622 = vrot.lane.b32.xlu1 %v9484_v7, %s5909_s28  ;;  %v4772_v35 = vpop.f32.mrf.mxu0 }
 0x454   : > { %v8299_v41 = vadd.f32 %v4772_v35, %v4771_v6  ;;  %v9489_v35 = vld [vmem:[#allocation112_spill] sm:$0xff] }
 0x455   : > { %v8297_v61 = vpop.xlane.xlu0 %2266  ;;  %v8301_v12 = vpop.f32.mrf.mxu0 }
 0x456   : > { %9485 = vst [vmem:[#allocation80_spill] sm:$0xff] %v8299_v41  ;;  %9486 = vst [vmem:[#allocation46_spill] sm:$0xff] %v8301_v12  ;;  %v3433_v41 = vsub.f32 %v9489_v35, %v8161_v15 }
 0x457   : > { %v8303_v56 = vpop.f32.mrf.mxu0 }
 0x458   : > { %9487 = vst [vmem:[#allocation49_spill] sm:$0xff] %v8303_v56  ;;  %v3484_v15 = vmul.f32 1.442695, %v3433_v41 }
 0x459   : > { %v8305_v20 = vpop.xlane.xlu0 %2272  ;;  %v4777_v3 = vpop.f32.mrf.mxu0 }
 0x45b   : > { %v5710_v52 = vpop.eup %5709  ;;  %v4778_v12 = vpop.f32.mrf.mxu0 }
 0x45c   : > { %v2309_v7 = vmul.f32 %v5710_v52, %v7945_v30  ;;  %v2308_v6 = vmul.f32 %v5710_v52, %v7939_v60  ;;  %v8318_v43 = vadd.f32 %v4778_v12, %v4777_v3  ;;  %v3482_v30 = vmul.f32 1.442695, %v3432_v49  ;;  %v9495_v60 = vld [vmem:[#allocation2_spill] sm:$0xff]  ;;  %v9499_v49 = vld [vmem:[#allocation128_spill] sm:$0xff] }
 0x45d   : > { %v8315_v56 = vpop.xlane.xlu0 %2877  ;;  %v8321_v33 = vpop.f32.mrf.mxu0  ;;  %v9496_v52 = vld [vmem:[#allocation122_spill] sm:$0xff]  ;;  %v3480_v3 = vmul.f32 1.442695, %v3431_v0 }
 0x45e   : > { %9491 = vst [vmem:[#allocation65_spill] sm:$0xff] %v8318_v43  ;;  %v2331_v37 = vpack.c.bf16 %v2309_v7, %v2307_v19  ;;  %v2330_v25 = vpack.c.bf16 %v2308_v6, %v2306_v16  ;;  %9493 = vst [vmem:[#allocation66_spill] sm:$0xff] %v8321_v33  ;;  %v3439_v35 = vsub.f32 %v9496_v52, %v3404_v32  ;;  %v3478_v16 = vmul.f32 1.442695, %v3430_v29 }
 0x45f   : > { %3624 = vrot.lane.b32.xlu0 %v9495_v60, %s5909_s28  ;;  %v8327_v24 = vpop.f32.mrf.mxu0  ;;  %v3443_v19 = vsub.f32 %v9499_v49, %v8277_v22  ;;  %5711 = vpow2.f32 %v3482_v30  ;;  %v3494_v7 = vmul.f32 1.442695, %v3438_v14  ;;  %v3502_v29 = vmul.f32 1.442695, %v3442_v23  ;;  %v9503_v22 = vld [vmem:[#allocation114_spill] sm:$0xff]  ;;  %v9505_v23 = vld [vmem:[#allocation117_spill] sm:$0xff] }
 0x460   : > { %2466 = vmatprep.mubr.bf16.mxu0 %v2331_v37  ;;  %9497 = vst [vmem:[#allocation50_spill] sm:$0xff] %v8327_v24  ;;  %5713 = vpow2.f32 %v3484_v15  ;;  %v3496_v41 = vmul.f32 1.442695, %v3439_v35  ;;  %v3435_v30 = vsub.f32 %v9503_v22, %v8269_v8  ;;  %v8349_v35 = vpop.permute.xlu1 %3630 }
 0x461   : > { %2467 = vmatmul.mubr.bf16.gmra.mxu0 %v2330_v25  ;;  %v8329_v34 = vpop.xlane.xlu0 %2880  ;;  %v4783_v12 = vpop.f32.mrf.mxu0  ;;  %5715 = vpow2.f32 %v3478_v16  ;;  %v9500_v25 = vld [vmem:[#allocation113_spill] sm:$0xff]  ;;  %v3504_v0 = vmul.f32 1.442695, %v3443_v19 }
 0x462   : > { %v3434_v37 = vsub.f32 %v9500_v25, %v8269_v8  ;;  %5717 = vpow2.f32 %v3480_v3  ;;  %v3488_v11 = vmul.f32 1.442695, %v3435_v30  ;;  %v3436_v3 = vsub.f32 %v9505_v23, %v8197_v13  ;;  %v9506_v8 = vld [vmem:[#allocation118_spill] sm:$0xff] }
 0x463   : > { %v4784_v6 = vpop.f32.mrf.mxu0  ;;  %5719 = vpow2.f32 %v3494_v7  ;;  %v3437_v49 = vsub.f32 %v9506_v8, %v8197_v13  ;;  %v9510_v13 = vld [vmem:[#allocation124_spill] sm:$0xff] }
 0x464   : > { %v8339_v57 = vadd.f32 %v4784_v6, %v4783_v12  ;;  %5721 = vpow2.f32 %v3496_v41  ;;  %v3486_v52 = vmul.f32 1.442695, %v3434_v37  ;;  %v3490_v25 = vmul.f32 1.442695, %v3436_v3  ;;  %v9509_v37 = vld [vmem:[#allocation123_spill] sm:$0xff] }
 0x465   : > { %v8335_v32 = vpop.xlane.xlu0 %2883  ;;  %v8341_v60 = vpop.f32.mrf.mxu0  ;;  %5723 = vpow2.f32 %v3502_v29  ;;  %v3440_v29 = vsub.f32 %v9509_v37, %v8228_v42  ;;  %v3441_v22 = vsub.f32 %v9510_v13, %v8228_v42  ;;  %v3444_v3 = vsub.f32 %v7831_v10, %v8279_v26 }
 0x466   : > { %9501 = vst [vmem:[#allocation53_spill] sm:$0xff] %v8339_v57  ;;  %9502 = vst [vmem:[#allocation67_spill] sm:$0xff] %v8341_v60  ;;  %5725 = vpow2.f32 %v3504_v0 }
 0x467   : > { %v8345_v14 = vpop.f32.mrf.mxu0  ;;  %5727 = vrcp.f32 %v8293_v62  ;;  %v3492_v62 = vmul.f32 1.442695, %v3437_v49  ;;  %v3498_v42 = vmul.f32 1.442695, %v3440_v29  ;;  %v3500_v37 = vmul.f32 1.442695, %v3441_v22 }
 0x468   : > { %9504 = vst [vmem:[#allocation68_spill] sm:$0xff] %v8345_v14  ;;  %5729 = vpow2.f32 %v3486_v52 }
 0x469   : > { %v8347_v15 = vpop.xlane.xlu0 %2886  ;;  %v4789_v16 = vpop.f32.mrf.mxu0 }
 0x46b   : > { %v4790_v19 = vpop.f32.mrf.mxu0 }
 0x46c   : > { %v8358_v7 = vadd.f32 %v4790_v19, %v4789_v16  ;;  %v8364_v0 = vpop.eup %5711 }
 0x46d   : > { %v8356_v12 = vpop.xlane.xlu0 %2889  ;;  %v8360_v6 = vpop.f32.mrf.mxu0 }
 0x46e   : > { %9507 = vst [vmem:[#allocation54_spill] sm:$0xff] %v8358_v7  ;;  %v2258_v41 = vpop.xlane.xlu1 %2257  ;;  %9508 = vst [vmem:[#allocation69_spill] sm:$0xff] %v8360_v6  ;;  %v8373_v16 = vpop.eup %5713 }
 0x46f   : > { %5731 = vrcp.f32 %v2258_v41  ;;  %v8369_v30 = vpop.f32.mrf.mxu0 }
 0x470   : > { %5733 = vpow2.f32 %v3488_v11  ;;  %9511 = vst [vmem:[#allocation70_spill] sm:$0xff] %v8369_v30  ;;  %v8375_v11 = vpop.eup %5715  ;;  %v3537_v30 = vadd.f32 %v8373_v16, %v8364_v0 }
 0x471   : > { %5735 = vrcp.f32 %v8297_v61  ;;  %v8371_v52 = vpop.xlane.xlu0 %2892  ;;  %v4795_v8 = vpop.f32.mrf.mxu0  ;;  %v9512_v61 = vld [vmem:[#allocation135_spill] sm:$0xff] }
 0x472   : > { %v2264_v23 = vpop.xlane.xlu1 %2263  ;;  %v8379_v49 = vpop.eup %5717  ;;  %v3445_v19 = vsub.f32 %v9512_v61, %v8279_v26  ;;  %v3506_v26 = vmul.f32 1.442695, %v3444_v3 }
 0x473   : > { %5737 = vrcp.f32 %v2264_v23  ;;  %v8383_v41 = vpop.eup %5719  ;;  %v4796_v13 = vpop.f32.mrf.mxu0 }
 0x474   : > { %5739 = vpow2.f32 %v3490_v25  ;;  %v8389_v10 = vpop.eup %5721  ;;  %v8392_v23 = vadd.f32 %v4796_v13, %v4795_v8  ;;  %v3508_v22 = vmul.f32 1.442695, %v3445_v19 }
 0x475   : > { %5741 = vpow2.f32 %v3492_v62  ;;  %v8385_v7 = vpop.xlane.xlu0 %2895  ;;  %v8394_v29 = vpop.eup %5723 }
 0x476   : > { %5743 = vrcp.f32 %v8305_v20  ;;  %9513 = vst [vmem:[#allocation71_spill] sm:$0xff] %v8392_v23  ;;  %v2270_v25 = vpop.xlane.xlu1 %2269  ;;  %v4798_v61 = vpop.f32.mrf.mxu0  ;;  %v3546_v20 = vadd.f32 %v8389_v10, %v8383_v41 }
 0x477   : > { %5745 = vrcp.f32 %v2270_v25  ;;  %3538 = vadd.xlane.f32.xlu1 %v3537_v30  ;;  %v8396_v62 = vpop.eup %5725 }
 0x478   : > { %5747 = vpow2.f32 %v3498_v42  ;;  %v5728_v6 = vpop.eup %5727  ;;  %v4799_v57 = vpop.f32.mrf.mxu0  ;;  %v3534_v42 = vadd.f32 %v8379_v49, %v8375_v11  ;;  %v3552_v19 = vadd.f32 %v8396_v62, %v8394_v29 }
 0x479   : > { %5749 = vpow2.f32 %v3500_v37  ;;  %v8398_v14 = vpop.xlane.xlu0 %2898  ;;  %v8402_v8 = vadd.f32 %v4799_v57, %v4798_v61  ;;  %v8404_v13 = vpop.eup %5729  ;;  %v2313_v37 = vmul.f32 %v5728_v6, %v7949_v18 }
 0x47a   : > { %5751 = vpow2.f32 %v3506_v26  ;;  %v4801_v3 = vpop.f32.mrf.mxu0 }
 0x47b   : > { %9514 = vst [vmem:[#allocation72_spill] sm:$0xff] %v8402_v8  ;;  %3547 = vadd.xlane.f32.xlu1 %v3546_v20  ;;  %5753 = vpow2.f32 %v3508_v22  ;;  %v2312_v22 = vmul.f32 %v5728_v6, %v7947_v47 }
 0x47c   : > { %v5732_v30 = vpop.eup %5731  ;;  %5755 = vrcp.f32 %v8329_v34  ;;  %v4802_v57 = vpop.f32.mrf.mxu0 }
 0x47d   : > { %v8411_v25 = vpop.eup %5733  ;;  %v8414_v61 = vpop.xlane.xlu0 %2904  ;;  %v2311_v26 = vmul.f32 %v5732_v30, %v8053_v4  ;;  %v2310_v20 = vmul.f32 %v5732_v30, %v8040_v9  ;;  %v8419_v43 = vadd.f32 %v4802_v57, %v4801_v3  ;;  %5757 = vrcp.f32 %v8315_v56 }
 0x47e   : > { %v5736_v60 = vpop.eup %5735  ;;  %v4804_v24 = vpop.f32.mrf.mxu0  ;;  %3535 = vadd.xlane.f32.xlu0 %v3534_v42  ;;  %v3540_v47 = vadd.f32 %v8411_v25, %v8404_v13  ;;  %5759 = vrcp.f32 %v8347_v15 }
 0x47f   : > { %3553 = vadd.xlane.f32.xlu1 %v3552_v19  ;;  %v2333_v18 = vpack.c.bf16 %v2313_v37, %v2311_v26  ;;  %v2332_v33 = vpack.c.bf16 %v2312_v22, %v2310_v20  ;;  %v2317_v6 = vmul.f32 %v5736_v60, %v7973_v27  ;;  %v8434_v57 = vpop.xlane.xlu1 %2901  ;;  %5761 = vrcp.f32 %v8335_v32 }
 0x480   : > { %v5738_v34 = vpop.eup %5737  ;;  %v4805_v8 = vpop.f32.mrf.mxu0  ;;  %5763 = vrcp.f32 %v8371_v52 }
 0x481   : > { %v8422_v23 = vpop.eup %5739  ;;  %2474 = vmatprep.mubr.bf16.mxu0 %v2333_v18  ;;  %v8424_v4 = vpop.xlane.xlu0 %2910  ;;  %v2315_v9 = vmul.f32 %v5738_v34, %v8071_v51  ;;  %v8432_v3 = vadd.f32 %v4805_v8, %v4804_v24  ;;  %v2314_v26 = vmul.f32 %v5738_v34, %v8058_v5  ;;  %v2316_v18 = vmul.f32 %v5736_v60, %v7967_v31 }
 0x482   : > { %v8430_v56 = vpop.eup %5741  ;;  %2475 = vmatmul.mubr.bf16.gmra.mxu0 %v2332_v33  ;;  %v4807_v42 = vpop.f32.mrf.mxu0  ;;  %3541 = vadd.xlane.f32.xlu0 %v3540_v47  ;;  %5765 = vrcp.f32 %v8356_v12 }
 0x483   : > { %v5744_v30 = vpop.eup %5743  ;;  %v2335_v19 = vpack.c.bf16 %v2317_v6, %v2315_v9  ;;  %v3543_v24 = vadd.f32 %v8430_v56, %v8422_v23  ;;  %v2334_v47 = vpack.c.bf16 %v2316_v18, %v2314_v26  ;;  %5767 = vrcp.f32 %v8398_v14 }
 0x484   : > { %v5746_v37 = vpop.eup %5745  ;;  %v4808_v51 = vpop.f32.mrf.mxu0  ;;  %v2321_v15 = vmul.f32 %v5744_v30, %v7983_v38  ;;  %5769 = vrcp.f32 %v8385_v7 }
 0x485   : > { %v8437_v20 = vpop.eup %5747  ;;  %2482 = vmatprep.mubr.bf16.mxu0 %v2335_v19  ;;  %v8440_v27 = vpop.xlane.xlu0 %2916  ;;  %v2319_v33 = vmul.f32 %v5746_v37, %v8091_v50  ;;  %v8447_v22 = vadd.f32 %v4808_v51, %v4807_v42  ;;  %v2318_v26 = vmul.f32 %v5746_v37, %v8076_v58  ;;  %5771 = vrcp.f32 %v8414_v61 }
 0x486   : > { %v8445_v8 = vpop.eup %5749  ;;  %v4810_v5 = vpop.f32.mrf.mxu0  ;;  %3544 = vadd.xlane.f32.xlu0 %v3543_v24  ;;  %5773 = vrcp.f32 %v8434_v57 }
 0x487   : > { %9515 = vst [vmem:[#allocation74_spill] sm:$0xff] %v8447_v22  ;;  %v8452_v34 = vpop.eup %5751  ;;  %v3549_v50 = vadd.f32 %v8445_v8, %v8437_v20  ;;  %v2337_v19 = vpack.c.bf16 %v2321_v15, %v2319_v33  ;;  %v8458_v51 = vpop.xlane.xlu1 %2907  ;;  %5775 = vrcp.f32 %v8424_v4  ;;  %v9523_v4 = vld [vmem:[#allocation5_spill] sm:$0xff] }
 0x488   : > { %v8454_v9 = vpop.eup %5753  ;;  %v4811_v6 = vpop.f32.mrf.mxu0  ;;  %5777 = vrcp.f32 %v8458_v51 }
 0x489   : > { %v5756_v42 = vpop.eup %5755  ;;  %v8460_v31 = vadd.f32 %v4811_v6, %v4810_v5  ;;  %v8462_v60 = vpop.xlane.xlu0 %2922  ;;  %v3555_v33 = vadd.f32 %v8454_v9, %v8452_v34  ;;  %v2320_v5 = vmul.f32 %v5744_v30, %v7979_v39  ;;  %5779 = vrcp.f32 %v8440_v27 }
 0x48a   : > { %2483 = vmatmul.mubr.bf16.gmra.mxu0 %v2334_v47  ;;  %v4813_v32 = vpop.f32.mrf.mxu0  ;;  %3550 = vadd.xlane.f32.xlu0 %v3549_v50  ;;  %v5758_v38 = vpop.eup %5757  ;;  %v2943_v18 = vmul.f32 %v5756_v42, %v8011_v45  ;;  %v2942_v39 = vmul.f32 %v5756_v42, %v8005_v46 }
 0x48b   : > { %9516 = vst [vmem:[#allocation75_spill] sm:$0xff] %v8460_v31  ;;  %2490 = vmatprep.mubr.bf16.mxu0 %v2337_v19  ;;  %v2941_v6 = vmul.f32 %v5758_v38, %v8001_v44  ;;  %v8474_v50 = vpop.xlane.xlu1 %2913  ;;  %v2336_v58 = vpack.c.bf16 %v2320_v5, %v2318_v26  ;;  %v5760_v22 = vpop.eup %5759  ;;  %v2940_v44 = vmul.f32 %v5758_v38, %v7995_v28  ;;  %v9517_v5 = vld [vmem:[#allocation38_spill] sm:$0xff]  ;;  %v9519_v38 = vld [vmem:[#allocation41_spill] sm:$0xff] }
 0x48c   : > { %v4814_v24 = vpop.f32.mrf.mxu0  ;;  %v5762_v45 = vpop.eup %5761  ;;  %v2947_v12 = vmul.f32 %v5760_v22, %v8049_v21  ;;  %v9518_v21 = vld [vmem:[#allocation39_spill] sm:$0xff]  ;;  %v2946_v28 = vmul.f32 %v5760_v22, %v8043_v48  ;;  %v9521_v22 = vld [vmem:[#allocation40_spill] sm:$0xff]  ;;  %5781 = vrcp.f32 %v8474_v50 }
 0x48d   : > { %v8469_v15 = vadd.f32 %v4814_v24, %v4813_v32  ;;  %v8476_v52 = vpop.xlane.xlu0 %3511  ;;  %v2973_v19 = vpack.c.bf16 %v2943_v18, %v2941_v6  ;;  %v2945_v26 = vmul.f32 %v5762_v45, %v8033_v40  ;;  %v2972_v24 = vpack.c.bf16 %v2942_v39, %v2940_v44  ;;  %v5764_v18 = vpop.eup %5763  ;;  %v9520_v6 = vld [vmem:[#allocation42_spill] sm:$0xff]  ;;  %v9529_v50 = vld [vmem:[#allocation43_spill] sm:$0xff] }
 0x48e   : > { %v4816_v47 = vpop.f32.mrf.mxu0  ;;  %3556 = vadd.xlane.f32.xlu0 %v3555_v33  ;;  %v2951_v40 = vmul.f32 %v5764_v18, %v8085_v17  ;;  %v2944_v42 = vmul.f32 %v5762_v45, %v8027_v54  ;;  %v2950_v17 = vmul.f32 %v5764_v18, %v8079_v53  ;;  %5783 = vrcp.f32 %v8462_v60 }
 0x48f   : > { %v8484_v30 = vpop.xlane.xlu1 %2919  ;;  %v2975_v33 = vpack.c.bf16 %v2947_v12, %v2945_v26  ;;  %v5766_v46 = vpop.eup %5765 }
 0x490   : > { %v4817_v37 = vpop.f32.mrf.mxu0  ;;  %v2948_v57 = vmul.f32 %v5766_v46, %v8061_v59  ;;  %5785 = vrcp.f32 %v8484_v30 }
 0x491   : > { %v8478_v31 = vadd.f32 %v4817_v37, %v4816_v47  ;;  %v8487_v32 = vpop.xlane.xlu0 %3514  ;;  %v2949_v47 = vmul.f32 %v5766_v46, %v8067_v1 }
 0x492   : > { %2491 = vmatmul.mubr.bf16.gmra.mxu0 %v2336_v58  ;;  %v2974_v58 = vpack.c.bf16 %v2946_v28, %v2944_v42  ;;  %v2976_v12 = vpack.c.bf16 %v2950_v17, %v2948_v57  ;;  %v9527_v42 = vld [vmem:[#allocation16_spill] sm:$0xff]  ;;  %5787 = vrcp.f32 %v8487_v32  ;;  %v9531_v57 = vld [vmem:[#allocation17_spill] sm:$0xff]  ;;  %v9536_v32 = vld [vmem:[#allocation47_spill] sm:$0xff] }
 0x493   : > { %3068 = vmatprep.mubr.bf16.mxu0 %v2973_v19  ;;  %v8491_v14 = vpop.xlane.xlu1 %3517  ;;  %v2977_v37 = vpack.c.bf16 %v2951_v40, %v2949_v47  ;;  %v5768_v19 = vpop.eup %5767  ;;  %v9526_v40 = vld [vmem:[#allocation19_spill] sm:$0xff]  ;;  %v9528_v47 = vld [vmem:[#allocation18_spill] sm:$0xff]  ;;  %v9530_v17 = vld [vmem:[#allocation44_spill] sm:$0xff]  ;;  %5789 = vrcp.f32 %v8476_v52 }
 0x494   : > { %v5770_v54 = vpop.eup %5769  ;;  %v2955_v1 = vmul.f32 %v5768_v19, %v8109_v36  ;;  %v9522_v36 = vld [vmem:[#allocation11_spill] sm:$0xff] }
 0x495   : > { %v8496_v7 = vpop.xlane.xlu0 %3520  ;;  %v2953_v45 = vmul.f32 %v5770_v54, %v8099_v55  ;;  %v5772_v26 = vpop.eup %5771  ;;  %v2954_v59 = vmul.f32 %v5768_v19, %v9522_v36  ;;  %v9524_v55 = vld [vmem:[#allocation21_spill] sm:$0xff]  ;;  %v9534_v36 = vld [vmem:[#allocation27_spill] sm:$0xff] }
 0x496   : > { %v5774_v53 = vpop.eup %5773  ;;  %v2958_v27 = vmul.f32 %v5772_v26, %v9526_v40  ;;  %5791 = vrcp.f32 %v8496_v7  ;;  %v9538_v40 = vld [vmem:[#allocation52_spill] sm:$0xff] }
 0x497   : > { %v8504_v48 = vpop.xlane.xlu1 %3523  ;;  %5793 = vrcp.f32 %v8491_v14 }
 0x499   : > { %v8506_v61 = vpop.xlane.xlu0 %3526 }
 0x49a   : > { %3069 = vmatmul.mubr.bf16.vlgmr.msra.gmra.mxu0 %v2972_v24  ;;  %v2952_v24 = vmul.f32 %v5770_v54, %v9524_v55  ;;  %5795 = vrcp.f32 %v8506_v61 }
 0x49b   : > { %5044 = vmatpush3.bf16.msra.mxu0 %v9517_v5  ;;  %3076 = vmatprep.mubr.bf16.mxu0 %v2975_v33  ;;  %v3643_v39 = vpop.permute.xlu1 %3642  ;;  %v9525_v33 = vld [vmem:[#allocation25_spill] sm:$0xff]  ;;  %5797 = vrcp.f32 %v8504_v48  ;;  %v9545_v48 = vld [vmem:[#allocation58_spill] sm:$0xff] }
 0x49c   : > { %5045 = vmatprep.subr.bf16.mxu0 %v9518_v21  ;;  %v2957_v18 = vmul.f32 %v5774_v53, %v9525_v33  ;;  %v2978_v5 = vpack.c.bf16 %v2954_v59, %v2952_v24  ;;  %v5776_v21 = vpop.eup %5775  ;;  %v9537_v24 = vld [vmem:[#allocation51_spill] sm:$0xff] }
 0x49d   : > { %v3629_v44 = vpop.permute.xlu0 %3628  ;;  %v5778_v28 = vpop.eup %5777 }
 0x49f   : > { %5046 = vmatpush3.bf16.msra.mxu0 %v9519_v38  ;;  %v3627_v51 = vpop.permute.xlu1 %3626  ;;  %v2963_v38 = vmul.f32 %v5776_v21, %v9527_v42 }
 0x4a0   : > { %5047 = vmatprep.subr.bf16.mxu0 %v9520_v6  ;;  %v2956_v6 = vmul.f32 %v5774_v53, %v9528_v47  ;;  %v9539_v47 = vld [vmem:[#allocation61_spill] sm:$0xff] }
 0x4a2   : > { %3077 = vmatmul.mubr.bf16.gmra.mxu0 %v2974_v58  ;;  %v2961_v58 = vmul.f32 %v5778_v28, %v9529_v50  ;;  %v9540_v50 = vld [vmem:[#allocation13_spill] sm:$0xff] }
 0x4a3   : > { %5048 = vmatpush3.bf16.msra.mxu0 %v9521_v22  ;;  %3084 = vmatprep.mubr.bf16.mxu0 %v2977_v37  ;;  %v2980_v37 = vpack.c.bf16 %v2958_v27, %v2956_v6  ;;  %v5780_v22 = vpop.eup %5779 }
 0x4a4   : > { %5049 = vmatprep.subr.bf16.mxu0 %v8285_v63  ;;  %v2979_v63 = vpack.c.bf16 %v2955_v1, %v2953_v45  ;;  %v2983_v19 = vpack.c.bf16 %v2963_v38, %v2961_v58  ;;  %v5782_v54 = vpop.eup %5781  ;;  %v2962_v1 = vmul.f32 %v5776_v21, %v9530_v17  ;;  %v2967_v60 = vmul.f32 %v5780_v22, %v9531_v57  ;;  %v9532_v45 = vld [vmem:[#allocation12_spill] sm:$0xff] }
 0x4a5   : > { %v2966_v59 = vmul.f32 %v5780_v22, %v9534_v36  ;;  %v2964_v55 = vmul.f32 %v5782_v54, %v9536_v32  ;;  %v9541_v22 = vld [vmem:[#allocation56_spill] sm:$0xff] }
 0x4a7   : > { %5050 = vmatpush3.bf16.msra.mxu0 %v8349_v35  ;;  %v2959_v35 = vmul.f32 %v5772_v26, %v9523_v4  ;;  %v5784_v26 = vpop.eup %5783  ;;  %v9535_v4 = vld [vmem:[#allocation23_spill] sm:$0xff] }
 0x4a8   : > { %5051 = vmatprep.subr.bf16.mxu0 %v8289_v2  ;;  %v3641_v2 = vpop.permute.xlu0 %3640  ;;  %v5786_v53 = vpop.eup %5785  ;;  %v2970_v27 = vmul.f32 %v5784_v26, %v9538_v40 }
 0x4a9   : > { %v2981_v46 = vpack.c.bf16 %v2959_v35, %v2957_v18  ;;  %v2971_v35 = vmul.f32 %v5784_v26, %v9535_v4  ;;  %v2984_v18 = vpack.c.bf16 %v2966_v59, %v2964_v55  ;;  %v2968_v58 = vmul.f32 %v5786_v53, %v9540_v50  ;;  %v9543_v59 = vld [vmem:[#allocation4_spill] sm:$0xff] }
 0x4aa   : > { %3085 = vmatmul.mubr.bf16.gmra.mxu0 %v2976_v12  ;;  %v9533_v12 = vld [vmem:[#allocation48_spill] sm:$0xff] }
 0x4ab   : > { %5052 = vmatpush3.bf16.msra.mxu0 %v3629_v44  ;;  %3092 = vmatprep.mubr.bf16.mxu0 %v2979_v63  ;;  %v2965_v30 = vmul.f32 %v5782_v54, %v9533_v12  ;;  %v2986_v7 = vpack.c.bf16 %v2970_v27, %v2968_v58  ;;  %v9547_v27 = vld [vmem:[#allocation63_spill] sm:$0xff] }
 0x4ac   : > { %5053 = vmatprep.subr.bf16.mxu0 %v3643_v39  ;;  %v2960_v39 = vmul.f32 %v5778_v28, %v9532_v45 }
 0x4ad   : > { %v2985_v63 = vpack.c.bf16 %v2967_v60, %v2965_v30 }
 0x4ae   : > { %v2982_v44 = vpack.c.bf16 %v2962_v1, %v2960_v39 }
 0x4af   : > { %5054 = vmatpush3.bf16.msra.mxu0 %v3627_v51 }
 0x4b0   : > { %5055 = vmatprep.subr.bf16.mxu0 %v3641_v2  ;;  %v2969_v2 = vmul.f32 %v5786_v53, %v9537_v24  ;;  %v9542_v53 = vld [vmem:[#allocation73_spill] sm:$0xff] }
 0x4b2   : > { %3093 = vmatmul.mubr.bf16.gmra.mxu0 %v2978_v5  ;;  %v2987_v52 = vpack.c.bf16 %v2971_v35, %v2969_v2  ;;  %v5788_v5 = vpop.eup %5787  ;;  %v9544_v35 = vld [vmem:[#allocation55_spill] sm:$0xff] }
 0x4b3   : > { %3100 = vmatprep.mubr.bf16.mxu0 %v2981_v46  ;;  %v5790_v21 = vpop.eup %5789  ;;  %v3577_v6 = vmul.f32 %v5788_v5, %v9539_v47  ;;  %v3576_v36 = vmul.f32 %v5788_v5, %v9542_v53 }
 0x4b4   : > { %v3575_v54 = vmul.f32 %v5790_v21, %v9541_v22  ;;  %v5792_v39 = vpop.eup %5791 }
 0x4b5   : > { %v5794_v26 = vpop.eup %5793  ;;  %v3581_v4 = vmul.f32 %v5792_v39, %v9543_v59 }
 0x4b6   : > { %v3607_v1 = vpack.c.bf16 %v3577_v6, %v3575_v54  ;;  %v3579_v55 = vmul.f32 %v5794_v26, %v9545_v48  ;;  %v9549_v6 = vld [vmem:[#allocation60_spill] sm:$0xff] }
 0x4b7   : > { %v9555_v48 = vld [vmem:[#allocation64_spill] sm:$0xff] }
 0x4ba   : > { %3101 = vmatmul.mubr.bf16.gmra.mxu0 %v2980_v37 }
 0x4bb   : > { %3108 = vmatprep.mubr.bf16.mxu0 %v2983_v19 }
 0x4c2   : > { %3109 = vmatmul.mubr.bf16.gmra.mxu0 %v2982_v44 }
 0x4c3   : > { %3116 = vmatprep.mubr.bf16.mxu0 %v2985_v63 }
 0x4c4   : > { %v4867_v51 = vpop.f32.mrf.mxu0 }
 0x4c6   : > { %v4868_v33 = vpop.f32.mrf.mxu0 }
 0x4c7   : > { %v4869_v42 = vadd.f32 %v4868_v33, %v4867_v51  ;;  %v3530_v37 = vpop.xlane.xlu1 %3529  ;;  %v3574_v51 = vmul.f32 %v5790_v21, %v9544_v35  ;;  %v3609_v33 = vpack.c.bf16 %v3581_v4, %v3579_v55 }
 0x4c8   : > { %v4870_v46 = vpop.f32.mrf.mxu0 }
 0x4c9   : > { %v3606_v24 = vpack.c.bf16 %v3576_v36, %v3574_v51  ;;  %v9554_v51 = vld [vmem:[#allocation81_spill] sm:$0xff] }
 0x4ca   : > { %3117 = vmatmul.mubr.bf16.gmra.mxu0 %v2984_v18  ;;  %v4871_v28 = vpop.f32.mrf.mxu0  ;;  %v5796_v18 = vpop.eup %5795 }
 0x4cb   : > { %3124 = vmatprep.mubr.bf16.mxu0 %v2987_v52  ;;  %v4872_v38 = vadd.f32 %v4871_v28, %v4870_v46  ;;  %v3639_v60 = vpop.permute.xlu1 %3638  ;;  %v5798_v5 = vpop.eup %5797  ;;  %v9546_v46 = vld [vmem:[#allocation62_spill] sm:$0xff]  ;;  %v3585_v21 = vmul.f32 %v5796_v18, %v9547_v27 }
 0x4cc   : > { %v3580_v28 = vmul.f32 %v5792_v39, %v9546_v46  ;;  %v3583_v50 = vmul.f32 %v5798_v5, %v9549_v6 }
 0x4cd   : > { %v5307_v19 = vpack.i.bf16 %v4872_v38, %v4869_v42  ;;  %v9548_v42 = vld [vmem:[#allocation57_spill] sm:$0xff] }
 0x4ce   : > { %v3578_v38 = vmul.f32 %v5794_v26, %v9548_v42  ;;  %v3611_v22 = vpack.c.bf16 %v3585_v21, %v3583_v50 }
 0x4cf   : > { %5308 = vrot.lane.b32.xlu1 %v5307_v19, %s5910_s27  ;;  %v3623_v32 = vpop.permute.xlu1 %3622 }
 0x4d0   : > { %v4873_v17 = vpop.f32.mrf.mxu0  ;;  %v3608_v19 = vpack.c.bf16 %v3580_v28, %v3578_v38 }
 0x4d2   : > { %3125 = vmatmul.mubr.bf16.gmra.mxu0 %v2986_v7  ;;  %v4874_v14 = vpop.f32.mrf.mxu0  ;;  %v3533_v57 = vpop.xlane.xlu0 %3532 }
 0x4d3   : > { %3702 = vmatprep.mubr.bf16.mxu0 %v3607_v1  ;;  %v4875_v44 = vadd.f32 %v4874_v14, %v4873_v17  ;;  %5799 = vrcp.f32 %v3533_v57  ;;  %v9550_v14 = vld [vmem:[#allocation45_spill] sm:$0xff] }
 0x4d4   : > { %v4876_v45 = vpop.f32.mrf.mxu0  ;;  %5801 = vrcp.f32 %v3530_v37  ;;  %v3584_v57 = vmul.f32 %v5796_v18, %v9550_v14 }
 0x4d6   : > { %v4877_v12 = vpop.f32.mrf.mxu0  ;;  %v3625_v30 = vpop.permute.xlu0 %3624 }
 0x4d7   : > { %v4878_v63 = vadd.f32 %v4877_v12, %v4876_v45  ;;  %5056 = vmatpush3.bf16.msra.mxu0 %v3625_v30  ;;  %v9551_v45 = vld [vmem:[#allocation76_spill] sm:$0xff]  ;;  %v9552_v12 = vld [vmem:[#allocation59_spill] sm:$0xff] }
 0x4d8   : > { %5057 = vmatprep.subr.bf16.mxu0 %v3639_v60  ;;  %v3582_v30 = vmul.f32 %v5798_v5, %v9552_v12 }
 0x4d9   : > { %v5312_v61 = vpack.i.bf16 %v4878_v63, %v4875_v44  ;;  %v9553_v63 = vld [vmem:[#allocation77_spill] sm:$0xff] }
 0x4da   : > { %v3610_v53 = vpack.c.bf16 %v3584_v57, %v3582_v30 }
 0x4db   : > { %5313 = vrot.lane.b32.xlu0 %v5312_v61, %s5910_s27  ;;  %5058 = vmatpush3.bf16.msra.mxu0 %v3623_v32 }
 0x4dc   : > { %v4879_v2 = vpop.f32.mrf.mxu0 }
 0x4de   : > { %3703 = vmatmul.mubr.bf16.vlgmr.msra.gmra.mxu0 %v3606_v24  ;;  %v4880_v52 = vpop.f32.mrf.mxu0 }
 0x4df   : > { %3710 = vmatprep.mubr.bf16.mxu0 %v3609_v33  ;;  %v4881_v58 = vadd.f32 %v4880_v52, %v4879_v2 }
 0x4e0   : > { %v4882_v40 = vpop.f32.mrf.mxu0  ;;  %v5800_v54 = vpop.eup %5799 }
 0x4e1   : > { %v5802_v1 = vpop.eup %5801  ;;  %v3589_v39 = vmul.f32 %v5800_v54, %v9551_v45  ;;  %v3588_v32 = vmul.f32 %v5800_v54, %v9554_v51 }
 0x4e2   : > { %v4883_v47 = vpop.f32.mrf.mxu0  ;;  %v3587_v26 = vmul.f32 %v5802_v1, %v9553_v63  ;;  %v3586_v55 = vmul.f32 %v5802_v1, %v9555_v48 }
 0x4e3   : > { %v4884_v37 = vadd.f32 %v4883_v47, %v4882_v40 }
 0x4e4   : > { %v3613_v61 = vpack.c.bf16 %v3589_v39, %v3587_v26  ;;  %v3612_v24 = vpack.c.bf16 %v3588_v32, %v3586_v55 }
 0x4e5   : > { %v5317_v7 = vpack.i.bf16 %v4884_v37, %v4881_v58 }
 0x4e6   : > { %3711 = vmatmul.mubr.bf16.gmra.mxu0 %v3608_v19 }
 0x4e7   : > { %3718 = vmatprep.mubr.bf16.mxu0 %v3611_v22  ;;  %5318 = vrot.lane.b32.xlu0 %v5317_v7, %s5910_s27 }
 0x4e8   : > { %v4885_v17 = vpop.f32.mrf.mxu0 }
 0x4ea   : > { %v4886_v60 = vpop.f32.mrf.mxu0 }
 0x4eb   : > { %v4887_v59 = vadd.f32 %v4886_v60, %v4885_v17 }
 0x4ec   : > { %v4888_v44 = vpop.f32.mrf.mxu0 }
 0x4ee   : > { %v4889_v36 = vpop.f32.mrf.mxu0  ;;  %3719 = vmatmul.mubr.bf16.gmra.mxu0 %v3610_v53 }
 0x4ef   : > { %v4890_v4 = vadd.f32 %v4889_v36, %v4888_v44  ;;  %3726 = vmatprep.mubr.bf16.mxu0 %v3613_v61 }
 0x4f1   : > { %v5322_v35 = vpack.i.bf16 %v4890_v4, %v4887_v59 }
 0x4f3   : > { %5323 = vrot.lane.b32.xlu1 %v5322_v35, %s5910_s27 }
 0x4f6   : > { %3727 = vmatmul.mubr.bf16.gmra.mxu0 %v3612_v24 }
 0x500   : > { %v3539_v2 = vpop.xlane.xlu1 %3538 }
 0x501   : > { %5803 = vrcp.f32 %v3539_v2 }
 0x504   : > { %v3548_v52 = vpop.xlane.xlu1 %3547 }
 0x507   : > { %v3536_v33 = vpop.xlane.xlu0 %3535 }
 0x508   : > { %5805 = vrcp.f32 %v3536_v33  ;;  %v3554_v40 = vpop.xlane.xlu1 %3553 }
 0x50b   : > { %v3542_v18 = vpop.xlane.xlu0 %3541 }
 0x50c   : > { %5807 = vrcp.f32 %v3542_v18 }
 0x50e   : > { %v5804_v46 = vpop.eup %5803 }
 0x50f   : > { %v3545_v5 = vpop.xlane.xlu0 %3544  ;;  %v3593_v42 = vmul.f32 %v5804_v46, %v8373_v16  ;;  %v3592_v47 = vmul.f32 %v5804_v46, %v8364_v0 }
 0x510   : > { %5809 = vrcp.f32 %v3545_v5 }
 0x511   : > { %5811 = vrcp.f32 %v3548_v52 }
 0x513   : > { %v3551_v28 = vpop.xlane.xlu0 %3550 }
 0x514   : > { %5813 = vrcp.f32 %v3551_v28 }
 0x515   : > { %v5806_v27 = vpop.eup %5805  ;;  %5815 = vrcp.f32 %v3554_v40 }
 0x516   : > { %v3591_v21 = vmul.f32 %v5806_v27, %v8379_v49  ;;  %v3590_v38 = vmul.f32 %v5806_v27, %v8375_v11 }
 0x517   : > { %v3557_v6 = vpop.xlane.xlu0 %3556 }
 0x518   : > { %5817 = vrcp.f32 %v3557_v6  ;;  %v3615_v50 = vpack.c.bf16 %v3593_v42, %v3591_v21  ;;  %v3614_v58 = vpack.c.bf16 %v3592_v47, %v3590_v38 }
 0x519   : > { %v5808_v37 = vpop.eup %5807 }
 0x51a   : > { %3734 = vmatprep.mubr.bf16.mxu0 %v3615_v50  ;;  %v3595_v22 = vmul.f32 %v5808_v37, %v8411_v25  ;;  %v3594_v49 = vmul.f32 %v5808_v37, %v8404_v13 }
 0x51b   : > { %3735 = vmatmul.mubr.bf16.gmra.mxu0 %v3614_v58 }
 0x51d   : > { %v5810_v19 = vpop.eup %5809 }
 0x51e   : > { %v3597_v54 = vmul.f32 %v5810_v19, %v8430_v56  ;;  %v3596_v16 = vmul.f32 %v5810_v19, %v8422_v23  ;;  %v5812_v11 = vpop.eup %5811 }
 0x51f   : > { %v3599_v57 = vmul.f32 %v5812_v11, %v8389_v10  ;;  %v3598_v63 = vmul.f32 %v5812_v11, %v8383_v41 }
 0x520   : > { %v3617_v0 = vpack.c.bf16 %v3597_v54, %v3595_v22  ;;  %v3616_v17 = vpack.c.bf16 %v3596_v16, %v3594_v49 }
 0x521   : > { %v4891_v7 = vpop.f32.mrf.mxu0  ;;  %v5814_v1 = vpop.eup %5813 }
 0x522   : > { %3742 = vmatprep.mubr.bf16.mxu0 %v3617_v0  ;;  %v3601_v60 = vmul.f32 %v5814_v1, %v8445_v8  ;;  %v5816_v45 = vpop.eup %5815  ;;  %v3600_v13 = vmul.f32 %v5814_v1, %v8437_v20 }
 0x523   : > { %v4892_v14 = vpop.f32.mrf.mxu0  ;;  %3743 = vmatmul.mubr.bf16.gmra.mxu0 %v3616_v17  ;;  %v3603_v26 = vmul.f32 %v5816_v45, %v8396_v62  ;;  %v3602_v20 = vmul.f32 %v5816_v45, %v8394_v29 }
 0x524   : > { %v3619_v39 = vpack.c.bf16 %v3601_v60, %v3599_v57  ;;  %v4893_v30 = vadd.f32 %v4892_v14, %v4891_v7  ;;  %v3618_v53 = vpack.c.bf16 %v3600_v13, %v3598_v63 }
 0x525   : > { %v4894_v25 = vpop.f32.mrf.mxu0  ;;  %v5818_v56 = vpop.eup %5817 }
 0x526   : > { %3750 = vmatprep.mubr.bf16.mxu0 %v3619_v39  ;;  %v3605_v12 = vmul.f32 %v5818_v56, %v8454_v9  ;;  %v3604_v36 = vmul.f32 %v5818_v56, %v8452_v34 }
 0x527   : > { %v4895_v23 = vpop.f32.mrf.mxu0 }
 0x528   : > { %v4896_v44 = vadd.f32 %v4895_v23, %v4894_v25  ;;  %v3621_v8 = vpack.c.bf16 %v3605_v12, %v3603_v26  ;;  %v3620_v61 = vpack.c.bf16 %v3604_v36, %v3602_v20 }
 0x52a   : > { %v5327_v10 = vpack.i.bf16 %v4896_v44, %v4893_v30 }
 0x52b   : > { %3751 = vmatmul.mubr.bf16.gmra.mxu0 %v3618_v53 }
 0x52c   : > { %5328 = vrot.lane.b32.xlu0 %v5327_v10, %s5910_s27  ;;  %3758 = vmatprep.mubr.bf16.mxu0 %v3621_v8 }
 0x533   : > { %3759 = vmatmul.mubr.bf16.gmra.mxu0 %v3620_v61 }
 0x542   : > { %v4897_v9 = vpop.f32.mrf.mxu0 }
 0x544   : > { %v4898_v59 = vpop.f32.mrf.mxu0 }
 0x545   : > { %v4899_v41 = vadd.f32 %v4898_v59, %v4897_v9 }
 0x546   : > { %v4900_v4 = vpop.f32.mrf.mxu0 }
 0x548   : > { %v4901_v35 = vpop.f32.mrf.mxu0 }
 0x549   : > { %v4902_v51 = vadd.f32 %v4901_v35, %v4900_v4 }
 0x54a   : > { %v4903_v62 = vpop.f32.mrf.mxu0 }
 0x54b   : > { %v5332_v32 = vpack.i.bf16 %v4902_v51, %v4899_v41 }
 0x54c   : > { %v4904_v48 = vpop.f32.mrf.mxu0 }
 0x54d   : > { %v8583_v55 = vadd.f32 %v4904_v48, %v4903_v62  ;;  %5333 = vrot.lane.b32.xlu1 %v5332_v32, %s5910_s27  ;;  %v8608_v32 = vpop.permute.xlu0 %5313 }
 0x54e   : > { %v4906_v24 = vpop.f32.mrf.mxu0 }
 0x550   : > { %v4907_v2 = vpop.f32.mrf.mxu0 }
 0x551   : > { %v8586_v34 = vadd.f32 %v4907_v2, %v4906_v24 }
 0x552   : > { %v4909_v29 = vpop.f32.mrf.mxu0 }
 0x553   : > { %v5382_v33 = vpack.i.bf16 %v8586_v34, %v8583_v55 }
 0x554   : > { %v4910_v18 = vpop.f32.mrf.mxu0 }
 0x555   : > { %v8590_v52 = vadd.f32 %v4910_v18, %v4909_v29 }
 0x556   : > { %v4912_v5 = vpop.f32.mrf.mxu0 }
 0x558   : > { %v4913_v46 = vpop.f32.mrf.mxu0 }
 0x559   : > { %v8592_v28 = vadd.f32 %v4913_v46, %v4912_v5  ;;  %v8612_v29 = vpop.permute.xlu0 %5318 }
 0x55a   : > { %v4963_v40 = vpop.f32.mrf.mxu0 }
 0x55b   : > { %v5392_v27 = vpack.i.bf16 %v8592_v28, %v8590_v52 }
 0x55c   : > { %v4964_v21 = vpop.f32.mrf.mxu0 }
 0x55d   : > { %v4965_v47 = vadd.f32 %v4964_v21, %v4963_v40 }
 0x55e   : > { %v4966_v42 = vpop.f32.mrf.mxu0 }
 0x560   : > { %v4967_v38 = vpop.f32.mrf.mxu0 }
 0x561   : > { %v4968_v6 = vadd.f32 %v4967_v38, %v4966_v42  ;;  %v5433_v42 = vld [vmem:[%s9063_s6 + $0x8] sm:$0xff]   ;;  %v9556_v38 = vld [vmem:[#allocation72_spill] sm:$0xff] }
 0x562   : > { %v4969_v50 = vpop.f32.mrf.mxu0  ;;  %5209 = vmatprep.subr.bf16.mxu1 %v5433_v42 }
 0x563   : > { %v5337_v58 = vpack.i.bf16 %v4968_v6, %v4965_v47  ;;  %v9557_v6 = vld [vmem:[#allocation71_spill] sm:$0xff]  ;;  %5210 = vmatpush3.bf16.msra.mxu1 %v5433_v42 }
 0x564   : > { %v4970_v37 = vpop.f32.mrf.mxu0 }
 0x565   : > { %5338 = vrot.lane.b32.xlu1 %v5337_v58, %s5911_s30  ;;  %v4971_v54 = vadd.f32 %v4970_v37, %v4969_v50 }
 0x566   : > { %v4972_v19 = vpop.f32.mrf.mxu0 }
 0x568   : > { %v4973_v22 = vpop.f32.mrf.mxu0 }
 0x569   : > { %v4974_v49 = vadd.f32 %v4973_v22, %v4972_v19 }
 0x56a   : > { %v4975_v16 = vpop.f32.mrf.mxu0 }
 0x56b   : > { %v5342_v11 = vpack.i.bf16 %v4974_v49, %v4971_v54 }
 0x56c   : > { %v4976_v7 = vpop.f32.mrf.mxu0 }
 0x56d   : > { %5343 = vrot.lane.b32.xlu1 %v5342_v11, %s5911_s30  ;;  %v4977_v1 = vadd.f32 %v4976_v7, %v4975_v16  ;;  %v5434_v16 = vld [vmem:[%s9063_s6] sm:$0xff]  }
 0x56e   : > { %v4978_v0 = vpop.f32.mrf.mxu0  ;;  %5211 = vmatprep.subr.bf16.mxu1 %v5434_v16 }
 0x56f   : > { %5212 = vmatpush3.bf16.msra.mxu1 %v5434_v16 }
 0x570   : > { %v4979_v17 = vpop.f32.mrf.mxu0 }
 0x571   : > { %v4980_v14 = vadd.f32 %v4979_v17, %v4978_v0 }
 0x572   : > { %v4981_v57 = vpop.f32.mrf.mxu0 }
 0x573   : > { %v5347_v60 = vpack.i.bf16 %v4980_v14, %v4977_v1 }
 0x574   : > { %v4982_v45 = vpop.f32.mrf.mxu0 }
 0x575   : > { %5348 = vrot.lane.b32.xlu0 %v5347_v60, %s5911_s30  ;;  %v4983_v56 = vadd.f32 %v4982_v45, %v4981_v57 }
 0x576   : > { %v4984_v25 = vpop.f32.mrf.mxu0 }
 0x578   : > { %v4985_v39 = vpop.f32.mrf.mxu0 }
 0x579   : > { %v4986_v13 = vadd.f32 %v4985_v39, %v4984_v25 }
 0x57a   : > { %v4987_v23 = vpop.f32.mrf.mxu0 }
 0x57b   : > { %v5352_v12 = vpack.i.bf16 %v4986_v13, %v4983_v56 }
 0x57c   : > { %v4988_v30 = vpop.f32.mrf.mxu0 }
 0x57d   : > { %5353 = vrot.lane.b32.xlu1 %v5352_v12, %s5911_s30  ;;  %v4989_v17 = vadd.f32 %v4988_v30, %v4987_v23 }
 0x57e   : > { %v4990_v44 = vpop.f32.mrf.mxu0 }
 0x580   : > { %v4991_v63 = vpop.f32.mrf.mxu0 }
 0x581   : > { %v4992_v11 = vadd.f32 %v4991_v63, %v4990_v44 }
 0x582   : > { %v4993_v26 = vpop.f32.mrf.mxu0 }
 0x583   : > { %v5362_v14 = vpack.i.bf16 %v4992_v11, %v4989_v17 }
 0x584   : > { %v4994_v10 = vpop.f32.mrf.mxu0 }
 0x585   : > { %v4995_v12 = vadd.f32 %v4994_v10, %v4993_v26 }
 0x586   : > { %v4996_v53 = vpop.f32.mrf.mxu0 }
 0x588   : > { %v4997_v8 = vpop.f32.mrf.mxu0 }
 0x589   : > { %v4998_v39 = vadd.f32 %v4997_v8, %v4996_v53 }
 0x58a   : > { %v4999_v36 = vpop.f32.mrf.mxu0 }
 0x58b   : > { %v5372_v23 = vpack.i.bf16 %v4998_v39, %v4995_v12 }
 0x58c   : > { %v5000_v20 = vpop.f32.mrf.mxu0 }
 0x58d   : > { %v8600_v61 = vadd.f32 %v5000_v20, %v4999_v36  ;;  %v8634_v20 = vpop.permute.xlu1 %5308 }
 0x58e   : > { %v5002_v9 = vpop.f32.mrf.mxu0  ;;  %v5310_v39 = vunpack.i.l.bf16 %v8634_v20 }
 0x590   : > { %v5003_v59 = vpop.f32.mrf.mxu0 }
 0x591   : > { %v8602_v4 = vadd.f32 %v5003_v59, %v5002_v9  ;;  %v8637_v53 = vpop.permute.xlu1 %5323 }
 0x592   : > { %v5005_v35 = vpop.f32.mrf.mxu0 }
 0x593   : > { %v5402_v41 = vpack.i.bf16 %v8602_v4, %v8600_v61 }
 0x594   : > { %v5006_v51 = vpop.f32.mrf.mxu0 }
 0x595   : > { %v8606_v62 = vadd.f32 %v5006_v51, %v5005_v35 }
 0x596   : > { %v5008_v48 = vpop.f32.mrf.mxu0 }
 0x598   : > { %v5009_v24 = vpop.f32.mrf.mxu0 }
 0x599   : > { %v8610_v2 = vadd.f32 %v5009_v24, %v5008_v48 }
 0x59b   : > { %v5412_v18 = vpack.i.bf16 %v8610_v2, %v8606_v62 }
 0x59e   : > { %v5329_v5 = vpop.permute.xlu0 %5328  ;;  %v5059_v46 = vpop.f32.mrf.mxu0 }
 0x59f   : > { %v5331_v40 = vunpack.i.h.bf16 %v5329_v5  ;;  %v5330_v21 = vunpack.i.l.bf16 %v5329_v5 }
 0x5a0   : > { %v5060_v58 = vpop.f32.mrf.mxu0 }
 0x5a1   : > { %v8621_v47 = vsel %vm1286_vm1, %v9556_v38, %v5331_v40  ;;  %v8625_v50 = vsel %vm1286_vm1, %v9557_v6, %v5330_v21  ;;  %v5061_v22 = vadd.f32 %v5060_v58, %v5059_v46 }
 0x5a2   : > { %v5062_v37 = vpop.f32.mrf.mxu0 }
 0x5a4   : > { %v5063_v19 = vpop.f32.mrf.mxu0 }
 0x5a5   : > { %v5064_v54 = vadd.f32 %v5063_v19, %v5062_v37 }
 0x5a6   : > { %v5065_v49 = vpop.f32.mrf.mxu0 }
 0x5a7   : > { %v5357_v7 = vpack.i.bf16 %v5064_v54, %v5061_v22 }
 0x5a8   : > { %v5066_v0 = vpop.f32.mrf.mxu0 }
 0x5a9   : > { %5358 = vrot.lane.b32.xlu0 %v5357_v7, %s5912_s26  ;;  %v5067_v60 = vadd.f32 %v5066_v0, %v5065_v49 }
 0x5aa   : > { %v5068_v1 = vpop.f32.mrf.mxu0 }
 0x5ac   : > { %v5069_v57 = vpop.f32.mrf.mxu0 }
 0x5ad   : > { %v5070_v45 = vadd.f32 %v5069_v57, %v5068_v1  ;;  %5363 = vrot.lane.b32.xlu0 %v5362_v14, %s5911_s30 }
 0x5ae   : > { %v5071_v25 = vpop.f32.mrf.mxu0 }
 0x5af   : > { %v5367_v56 = vpack.i.bf16 %v5070_v45, %v5067_v60 }
 0x5b0   : > { %v5072_v13 = vpop.f32.mrf.mxu0 }
 0x5b1   : > { %5368 = vrot.lane.b32.xlu1 %v5367_v56, %s5912_s26  ;;  %v5073_v63 = vadd.f32 %v5072_v13, %v5071_v25  ;;  %v5311_v25 = vunpack.i.h.bf16 %v8634_v20  ;;  %v9559_v56 = vld [vmem:[#allocation49_spill] sm:$0xff] }
 0x5b2   : > { %v5074_v44 = vpop.f32.mrf.mxu0 }
 0x5b4   : > { %v5075_v30 = vpop.f32.mrf.mxu0 }
 0x5b5   : > { %v5076_v36 = vadd.f32 %v5075_v30, %v5074_v44  ;;  %5373 = vrot.lane.b32.xlu1 %v5372_v23, %s5911_s30  ;;  %v9560_v30 = vld [vmem:[#allocation80_spill] sm:$0xff] }
 0x5b6   : > { %v5077_v9 = vpop.f32.mrf.mxu0 }
 0x5b7   : > { %v5377_v59 = vpack.i.bf16 %v5076_v36, %v5073_v63  ;;  %v3959_v63 = vsel %vm1286_vm1, %v9560_v30, %v5310_v39  ;;  %v5326_v39 = vunpack.i.h.bf16 %v8637_v53  ;;  %v9569_v30 = vld [vmem:[#allocation54_spill] sm:$0xff] }
 0x5b8   : > { %v5078_v35 = vpop.f32.mrf.mxu0 }
 0x5b9   : > { %5378 = vrot.lane.b32.xlu0 %v5377_v59, %s5912_s26  ;;  %v5079_v10 = vadd.f32 %v5078_v35, %v5077_v9 }
 0x5ba   : > { %v5080_v8 = vpop.f32.mrf.mxu0 }
 0x5bc   : > { %v5081_v26 = vpop.f32.mrf.mxu0 }
 0x5bd   : > { %v5082_v51 = vadd.f32 %v5081_v26, %v5080_v8  ;;  %5383 = vrot.lane.b32.xlu0 %v5382_v33, %s5910_s27 }
 0x5bf   : > { %v5334_v48 = vpop.permute.xlu1 %5333  ;;  %v5387_v24 = vpack.i.bf16 %v5082_v51, %v5079_v10  ;;  %v5316_v51 = vunpack.i.h.bf16 %v8608_v32 }
 0x5c0   : > { %v5336_v5 = vunpack.i.h.bf16 %v5334_v48  ;;  %v5335_v46 = vunpack.i.l.bf16 %v5334_v48  ;;  %v5315_v48 = vunpack.i.l.bf16 %v8608_v32 }
 0x5c1   : > { %5388 = vrot.lane.b32.xlu1 %v5387_v24, %s5912_s26 }
 0x5c2   : > { %v8645_v40 = vsel %vm1286_vm1, %v8432_v3, %v5336_v5  ;;  %v8649_v21 = vsel %vm1286_vm1, %v8419_v43, %v5335_v46  ;;  %v9561_v46 = vld [vmem:[#allocation66_spill] sm:$0xff] }
 0x5c5   : > { %5393 = vrot.lane.b32.xlu1 %v5392_v27, %s5910_s27 }
 0x5d7   : > { %v5339_v60 = vpop.permute.xlu1 %5338 }
 0x5d8   : > { %v5341_v62 = vunpack.i.h.bf16 %v5339_v60  ;;  %v5340_v2 = vunpack.i.l.bf16 %v5339_v60 }
 0x5da   : > { %v3976_v20 = vsel %vm3975_vm2, %v3959_v63, %v5340_v2 }
 0x5db   : > { %v5083_v55 = vpop.f32.mrf.mxu0 }
 0x5dd   : > { %v5084_v34 = vpop.f32.mrf.mxu0 }
 0x5de   : > { %v5085_v38 = vadd.f32 %v5084_v34, %v5083_v55  ;;  %v9562_v55 = vld [vmem:[#allocation50_spill] sm:$0xff] }
 0x5df   : > { %v5086_v33 = vpop.f32.mrf.mxu0  ;;  %v5344_v12 = vpop.permute.xlu1 %5343  ;;  %v4782_v34 = vadd.f32 %v9562_v55, %v9561_v46 }
 0x5e0   : > { %v5346_v24 = vunpack.i.h.bf16 %v5344_v12  ;;  %v5345_v5 = vunpack.i.l.bf16 %v5344_v12 }
 0x5e1   : > { %v5087_v42 = vpop.f32.mrf.mxu0 }
 0x5e2   : > { %v5088_v6 = vadd.f32 %v5087_v42, %v5086_v33  ;;  %v3962_v42 = vsel %vm1286_vm1, %v4782_v34, %v5316_v51 }
 0x5e3   : > { %v5089_v58 = vpop.f32.mrf.mxu0 }
 0x5e4   : > { %v5397_v3 = vpack.i.bf16 %v5088_v6, %v5085_v38  ;;  %v9563_v38 = vld [vmem:[#allocation65_spill] sm:$0xff] }
 0x5e5   : > { %v5090_v37 = vpop.f32.mrf.mxu0  ;;  %v3961_v6 = vsel %vm1286_vm1, %v9563_v38, %v5315_v48 }
 0x5e6   : > { %5398 = vrot.lane.b32.xlu0 %v5397_v3, %s5912_s26  ;;  %v5091_v22 = vadd.f32 %v5090_v37, %v5089_v58  ;;  %v3978_v37 = vsel %vm3975_vm2, %v3961_v6, %v5345_v5 }
 0x5e7   : > { %v5092_v43 = vpop.f32.mrf.mxu0  ;;  %v5349_v45 = vpop.permute.xlu0 %5348 }
 0x5e9   : > { %v5093_v19 = vpop.f32.mrf.mxu0 }
 0x5ea   : > { %v5094_v54 = vadd.f32 %v5093_v19, %v5092_v43  ;;  %5403 = vrot.lane.b32.xlu0 %v5402_v41, %s5911_s30  ;;  %v3979_v43 = vsel %vm3975_vm2, %v3962_v42, %v5346_v24 }
 0x5eb   : > { %v5095_v52 = vpop.f32.mrf.mxu0 }
 0x5ec   : > { %v5407_v28 = vpack.i.bf16 %v5094_v54, %v5091_v22 }
 0x5ed   : > { %v5096_v27 = vpop.f32.mrf.mxu0 }
 0x5ee   : > { %5408 = vrot.lane.b32.xlu1 %v5407_v28, %s5912_s26  ;;  %v5097_v11 = vadd.f32 %v5096_v27, %v5095_v52  ;;  %v5321_v52 = vunpack.i.h.bf16 %v8612_v29  ;;  %v5320_v28 = vunpack.i.l.bf16 %v8612_v29  ;;  %v5351_v27 = vunpack.i.h.bf16 %v5349_v45 }
 0x5ef   : > { %v5098_v49 = vpop.f32.mrf.mxu0  ;;  %v5354_v26 = vpop.permute.xlu1 %5353 }
 0x5f0   : > { %v5356_v2 = vunpack.i.h.bf16 %v5354_v26 }
 0x5f1   : > { %v5099_v16 = vpop.f32.mrf.mxu0 }
 0x5f2   : > { %v5100_v7 = vadd.f32 %v5099_v16, %v5098_v49  ;;  %5413 = vrot.lane.b32.xlu1 %v5412_v18, %s5911_s30  ;;  %v9558_v18 = vld [vmem:[#allocation46_spill] sm:$0xff]  ;;  %v5350_v49 = vunpack.i.l.bf16 %v5349_v45  ;;  %v9564_v16 = vld [vmem:[#allocation67_spill] sm:$0xff] }
 0x5f3   : > { %v5101_v0 = vpop.f32.mrf.mxu0  ;;  %v4776_v13 = vadd.f32 %v9559_v56, %v9558_v18  ;;  %v5355_v18 = vunpack.i.l.bf16 %v5354_v26  ;;  %v9567_v56 = vld [vmem:[#allocation69_spill] sm:$0xff] }
 0x5f4   : > { %v5417_v17 = vpack.i.bf16 %v5100_v7, %v5097_v11  ;;  %v9565_v11 = vld [vmem:[#allocation68_spill] sm:$0xff] }
 0x5f5   : > { %v5102_v1 = vpop.f32.mrf.mxu0  ;;  %v3960_v23 = vsel %vm1286_vm1, %v4776_v13, %v5311_v25  ;;  %v4788_v7 = vadd.f32 %v9565_v11, %v9564_v16  ;;  %v9568_v13 = vld [vmem:[#allocation70_spill] sm:$0xff]  ;;  %v9570_v11 = vld [vmem:[#allocation75_spill] sm:$0xff] }
 0x5f6   : > { %5418 = vrot.lane.b32.xlu0 %v5417_v17, %s5912_s26  ;;  %v5103_v41 = vadd.f32 %v5102_v1, %v5101_v0  ;;  %v3977_v59 = vsel %vm3975_vm2, %v3960_v23, %v5341_v62  ;;  %v9566_v1 = vld [vmem:[#allocation53_spill] sm:$0xff]  ;;  %v5325_v62 = vunpack.i.l.bf16 %v8637_v53  ;;  %v4794_v12 = vadd.f32 %v9568_v13, %v9567_v56 }
 0x5f7   : > { %v5104_v61 = vpop.f32.mrf.mxu0  ;;  %v3964_v17 = vsel %vm1286_vm1, %v4788_v7, %v5321_v52 }
 0x5f8   : > { %v3966_v23 = vsel %vm1286_vm1, %v4794_v12, %v5326_v39  ;;  %v3965_v63 = vsel %vm1286_vm1, %v9569_v30, %v5325_v62 }
 0x5f9   : > { %v5105_v4 = vpop.f32.mrf.mxu0 }
 0x5fa   : > { %v5106_v14 = vadd.f32 %v5105_v4, %v5104_v61  ;;  %v3963_v61 = vsel %vm1286_vm1, %v9566_v1, %v5320_v28 }
 0x5fc   : > { %v5422_v57 = vpack.i.bf16 %v5106_v14, %v5103_v41  ;;  %v3980_v14 = vsel %vm3975_vm2, %v3963_v61, %v5350_v49 }
 0x5fe   : > { %5423 = vrot.lane.b32.xlu1 %v5422_v57, %s5912_s26  ;;  %v3981_v57 = vsel %vm3975_vm2, %v3964_v17, %v5351_v27 }
 0x61b   : > { %v5359_v44 = vpop.permute.xlu0 %5358 }
 0x61c   : > { %v5361_v36 = vunpack.i.h.bf16 %v5359_v44  ;;  %v5360_v9 = vunpack.i.l.bf16 %v5359_v44 }
 0x61e   : > { %v3994_v35 = vsel %vm3992_vm3, %v3977_v59, %v5361_v36  ;;  %v3993_v8 = vsel %vm3992_vm3, %v3976_v20, %v5360_v9  ;;  %v3983_v59 = vsel %vm3975_vm2, %v3966_v23, %v5356_v2  ;;  %v3982_v20 = vsel %vm3975_vm2, %v3965_v63, %v5355_v18 }
 0x61f   : > { %v4009_v10 = vpack.c.bf16 %v3994_v35, %v3993_v8  ;;  %v5364_v22 = vpop.permute.xlu0 %5363 }
 0x620   : > { %v5365_v51 = vunpack.i.l.bf16 %v5364_v22 }
 0x621   : > { %5213 = vmatprep.mubr.msk.bf16.mxu1 %vm553_vm0, %v4009_v10  ;;  %v5366_v10 = vunpack.i.h.bf16 %v5364_v22 }
 0x622   : > { %v3984_v46 = vsel %vm3975_vm2, %v8625_v50, %v5365_v51 }
 0x623   : > { %v5369_v33 = vpop.permute.xlu1 %5368  ;;  %v3985_v55 = vsel %vm3975_vm2, %v8621_v47, %v5366_v10 }
 0x624   : > { %v5371_v58 = vunpack.i.h.bf16 %v5369_v33  ;;  %v5370_v3 = vunpack.i.l.bf16 %v5369_v33 }
 0x626   : > { %v3995_v32 = vsel %vm3992_vm3, %v3978_v37, %v5370_v3  ;;  %v3996_v19 = vsel %vm3992_vm3, %v3979_v43, %v5371_v58 }
 0x627   : > { %v4010_v54 = vpack.c.bf16 %v3996_v19, %v3995_v32  ;;  %v5374_v45 = vpop.permute.xlu1 %5373 }
 0x628   : > { %v5376_v6 = vunpack.i.h.bf16 %v5374_v45  ;;  %v5375_v58 = vunpack.i.l.bf16 %v5374_v45 }
 0x629   : > { %5214 = vmatmul.mubr.msk.bf16.vlgmr.msra.gmra.mxu1 %vm553_vm0, %v4010_v54 }
 0x62a   : > { %v3987_v32 = vsel %vm3975_vm2, %v8645_v40, %v5376_v6  ;;  %v3986_v50 = vsel %vm3975_vm2, %v8649_v21, %v5375_v58  ;;  %v9571_v40 = vld [vmem:[#allocation74_spill] sm:$0xff] }
 0x62b   : > { %v5379_v0 = vpop.permute.xlu0 %5378 }
 0x62c   : > { %v5381_v4 = vunpack.i.h.bf16 %v5379_v0  ;;  %v5380_v41 = vunpack.i.l.bf16 %v5379_v0 }
 0x62e   : > { %v3997_v29 = vsel %vm3992_vm3, %v3980_v14, %v5380_v41  ;;  %v3998_v60 = vsel %vm3992_vm3, %v3981_v57, %v5381_v4 }
 0x62f   : > { %v4011_v25 = vpack.c.bf16 %v3998_v60, %v3997_v29  ;;  %v5384_v26 = vpop.permute.xlu0 %5383 }
 0x630   : > { %v5386_v52 = vunpack.i.h.bf16 %v5384_v26  ;;  %v5385_v28 = vunpack.i.l.bf16 %v5384_v26 }
 0x631   : > { %5217 = vmatprep.mubr.msk.bf16.mxu1 %vm553_vm0, %v4011_v25 }
 0x632   : > { %v3972_v7 = vsel %vm1286_vm1, %v9570_v11, %v5386_v52  ;;  %v3971_v0 = vsel %vm1286_vm1, %v9571_v40, %v5385_v28  ;;  %v5857_v52 = vld [vmem:[%s6089_s12 + $0x38] sm:$0xff] }
 0x633   : > { %v5389_v44 = vpop.permute.xlu1 %5388 }
 0x634   : > { %v5391_v36 = vunpack.i.h.bf16 %v5389_v44  ;;  %v5390_v9 = vunpack.i.l.bf16 %v5389_v44 }
 0x636   : > { %v4000_v53 = vsel %vm3992_vm3, %v3983_v59, %v5391_v36  ;;  %v3999_v35 = vsel %vm3992_vm3, %v3982_v20, %v5390_v9  ;;  %v5851_v9 = vld [vmem:[%s6089_s12 + $0x10] sm:$0xff] }
 0x637   : > { %v4012_v8 = vpack.c.bf16 %v4000_v53, %v3999_v35  ;;  %v5394_v42 = vpop.permute.xlu1 %5393  ;;  %v5852_v35 = vld [vmem:[%s6089_s12] sm:$0xff] }
 0x638   : > { %v5396_v29 = vunpack.i.h.bf16 %v5394_v42  ;;  %v5395_v60 = vunpack.i.l.bf16 %v5394_v42 }
 0x639   : > { %5218 = vmatmul.mubr.msk.bf16.gmra.mxu1 %vm553_vm0, %v4012_v8 }
 0x63a   : > { %v3974_v62 = vsel %vm1286_vm1, %v8478_v31, %v5396_v29  ;;  %v3973_v2 = vsel %vm1286_vm1, %v8469_v15, %v5395_v60  ;;  %v8751_v31 = vld [vmem:[%s9064_s7] ss:$0 sm:$0xff] }
 0x658   : > { %v5399_v48 = vpop.permute.xlu0 %5398 }
 0x659   : > { %v5401_v24 = vunpack.i.h.bf16 %v5399_v48  ;;  %v5400_v5 = vunpack.i.l.bf16 %v5399_v48 }
 0x65b   : > { %v4001_v34 = vsel %vm3992_vm3, %v3984_v46, %v5400_v5  ;;  %v4002_v33 = vsel %vm3992_vm3, %v3985_v55, %v5401_v24  ;;  %v5853_v24 = vld [vmem:[%s6089_s12 + $0x18] sm:$0xff]  ;;  %v5854_v46 = vld [vmem:[%s6089_s12 + $0x8] sm:$0xff] }
 0x65c   : > { %v4013_v38 = vpack.c.bf16 %v4002_v33, %v4001_v34  ;;  %v5404_v47 = vpop.permute.xlu0 %5403 }
 0x65d   : > { %v5406_v27 = vunpack.i.h.bf16 %v5404_v47  ;;  %v5405_v49 = vunpack.i.l.bf16 %v5404_v47 }
 0x65e   : > { %5221 = vmatprep.mubr.msk.bf16.mxu1 %vm553_vm0, %v4013_v38 }
 0x65f   : > { %v3988_v1 = vsel %vm3975_vm2, %v3971_v0, %v5405_v49  ;;  %v3989_v61 = vsel %vm3975_vm2, %v3972_v7, %v5406_v27  ;;  %v5858_v49 = vld [vmem:[%s6089_s12 + $0x28] sm:$0xff] }
 0x660   : > { %v5409_v3 = vpop.permute.xlu1 %5408 }
 0x661   : > { %v5411_v37 = vunpack.i.h.bf16 %v5409_v3  ;;  %v5410_v43 = vunpack.i.l.bf16 %v5409_v3  ;;  %v5855_v3 = vld [vmem:[%s6089_s12 + $0x30] sm:$0xff] }
 0x663   : > { %v4004_v19 = vsel %vm3992_vm3, %v3987_v32, %v5411_v37  ;;  %v4003_v22 = vsel %vm3992_vm3, %v3986_v50, %v5410_v43  ;;  %v5856_v50 = vld [vmem:[%s6089_s12 + $0x20] sm:$0xff] }
 0x664   : > { %v4014_v54 = vpack.c.bf16 %v4004_v19, %v4003_v22  ;;  %v5414_v4 = vpop.permute.xlu1 %5413 }
 0x665   : > { %v5416_v45 = vunpack.i.h.bf16 %v5414_v4  ;;  %v5415_v25 = vunpack.i.l.bf16 %v5414_v4 }
 0x666   : > { %5222 = vmatmul.mubr.msk.bf16.gmra.mxu1 %vm553_vm0, %v4014_v54 }
 0x667   : > { %v3991_v13 = vsel %vm3975_vm2, %v3974_v62, %v5416_v45  ;;  %v3990_v12 = vsel %vm3975_vm2, %v3973_v2, %v5415_v25  ;;  %v5861_v25 = vld [vmem:[%s6089_s12 + $0x58] sm:$0xff]  ;;  %v5862_v2 = vld [vmem:[%s6089_s12 + $0x48] sm:$0xff] }
 0x668   : > { %v5419_v16 = vpop.permute.xlu0 %5418 }
 0x669   : > { %v5421_v21 = vunpack.i.h.bf16 %v5419_v16  ;;  %v5420_v17 = vunpack.i.l.bf16 %v5419_v16 }
 0x66b   : > { %v4005_v41 = vsel %vm3992_vm3, %v3988_v1, %v5420_v17  ;;  %v4006_v14 = vsel %vm3992_vm3, %v3989_v61, %v5421_v21  ;;  %v5859_v1 = vld [vmem:[%s6089_s12 + $0x50] sm:$0xff] }
 0x66c   : > { %v4015_v57 = vpack.c.bf16 %v4006_v14, %v4005_v41  ;;  %v5860_v14 = vld [vmem:[%s6089_s12 + $0x40] sm:$0xff] }
 0x66e   : > { %5225 = vmatprep.mubr.msk.bf16.mxu1 %vm553_vm0, %v4015_v57 }
 0x670   : > { %v5424_v39 = vpop.permute.xlu1 %5423 }
 0x671   : > { %v5426_v18 = vunpack.i.h.bf16 %v5424_v39  ;;  %v5425_v56 = vunpack.i.l.bf16 %v5424_v39 }
 0x673   : > { %v4008_v44 = vsel %vm3992_vm3, %v3991_v13, %v5426_v18  ;;  %v4007_v23 = vsel %vm3992_vm3, %v3990_v12, %v5425_v56 }
 0x674   : > { %v4016_v30 = vpack.c.bf16 %v4008_v44, %v4007_v23 }
 0x676   : > { %5226 = vmatmul.mubr.msk.bf16.gmra.mxu1 %vm553_vm0, %v4016_v30 }
 0x6e9   : > { %v5215_v15 = vpop.f32.mrf.mxu1 }
 0x6ea   : > { %v4102_v63 = vadd.f32 %v5215_v15, %v8751_v31 }
 0x6eb   : > { %v4093_v36 = vpop.f32.mrf.mxu1 }
 0x6ec   : > { %v8755_v59 = vadd.f32 %v5851_v9, %v4102_v63  ;;  %v4094_v20 = vadd.f32 %v8751_v31, %v4093_v36  ;;  %v5863_v36 = vld [vmem:[%s6089_s12 + $0x60] sm:$0xff] }
 0x6ed   : > { %v5216_v53 = vpop.f32.mrf.mxu1 }
 0x6ee   : > { %v8759_v8 = vadd.f32 %v5852_v35, %v4094_v20  ;;  %v4105_v26 = vadd.f32 %v5216_v53, %v8751_v31  ;;  %v4178_v10 = vsel %vm553_vm0, %v8755_v59, 0.0  ;;  %v5864_v53 = vld [vmem:[%s6089_s12 + $0x70] sm:$0xff] }
 0x6ef   : > { %4179 = vadd.xlane.f32.xlu0 %v4178_v10  ;;  %v4096_v51 = vpop.f32.mrf.mxu1 }
 0x6f0   : > { %v4097_v48 = vadd.f32 %v8751_v31, %v4096_v51  ;;  %v8766_v5 = vadd.f32 %v5853_v24, %v4105_v26  ;;  %v4172_v34 = vsel %vm553_vm0, %v8759_v8, 0.0 }
 0x6f2   : > { %v8769_v55 = vadd.f32 %v5854_v46, %v4097_v48  ;;  %v4181_v42 = vsel %vm553_vm0, %v8766_v5, 0.0  ;;  %v5865_v48 = vld [vmem:[%s6089_s12 + $0x68] sm:$0xff]  ;;  %v5866_v46 = vld [vmem:[%s6089_s12 + $0x78] sm:$0xff] }
 0x6f3   : > { %4173 = vadd.xlane.f32.xlu0 %v4172_v34 }
 0x6f4   : > { %v4175_v33 = vsel %vm553_vm0, %v8769_v55, 0.0 }
 0x6f5   : > { %4176 = vadd.xlane.f32.xlu1 %v4175_v33 }
 0x6f7   : > { %4182 = vadd.xlane.f32.xlu0 %v4181_v42 }
 0x6f9   : > { %v5219_v38 = vpop.f32.mrf.mxu1 }
 0x6fa   : > { %v4118_v6 = vadd.f32 %v5219_v38, %v8751_v31 }
 0x6fb   : > { %v4109_v58 = vpop.f32.mrf.mxu1 }
 0x6fc   : > { %v8779_v37 = vadd.f32 %v5855_v3, %v4118_v6  ;;  %v4110_v43 = vadd.f32 %v8751_v31, %v4109_v58 }
 0x6fd   : > { %v5220_v32 = vpop.f32.mrf.mxu1 }
 0x6fe   : > { %v8783_v47 = vadd.f32 %v5856_v50, %v4110_v43  ;;  %v4121_v19 = vadd.f32 %v5220_v32, %v8751_v31  ;;  %v4190_v22 = vsel %vm553_vm0, %v8779_v37, 0.0 }
 0x6ff   : > { %v4112_v54 = vpop.f32.mrf.mxu1  ;;  %4191 = vadd.xlane.f32.xlu1 %v4190_v22 }
 0x700   : > { %v8789_v28 = vadd.f32 %v5857_v52, %v4121_v19  ;;  %v4113_v27 = vadd.f32 %v8751_v31, %v4112_v54  ;;  %v4184_v11 = vsel %vm553_vm0, %v8783_v47, 0.0 }
 0x702   : > { %v8793_v16 = vadd.f32 %v5858_v49, %v4113_v27  ;;  %v4193_v7 = vsel %vm553_vm0, %v8789_v28, 0.0 }
 0x703   : > { %4185 = vadd.xlane.f32.xlu1 %v4184_v11  ;;  %4194 = vadd.xlane.f32.xlu0 %v4193_v7 }
 0x704   : > { %v4187_v40 = vsel %vm553_vm0, %v8793_v16, 0.0 }
 0x707   : > { %4188 = vadd.xlane.f32.xlu0 %v4187_v40 }
 0x726   : > { %v5223_v0 = vpop.f32.mrf.mxu1 }
 0x727   : > { %v4134_v21 = vadd.f32 %v5223_v0, %v8751_v31 }
 0x728   : > { %v4125_v17 = vpop.f32.mrf.mxu1 }
 0x729   : > { %v8803_v61 = vadd.f32 %v5859_v1, %v4134_v21  ;;  %v4126_v4 = vadd.f32 %v8751_v31, %v4125_v17 }
 0x72a   : > { %v5224_v41 = vpop.f32.mrf.mxu1 }
 0x72b   : > { %v8807_v57 = vadd.f32 %v5860_v14, %v4126_v4  ;;  %v4137_v29 = vadd.f32 %v5224_v41, %v8751_v31  ;;  %v4202_v60 = vsel %vm553_vm0, %v8803_v61, 0.0 }
 0x72c   : > { %v4128_v45 = vpop.f32.mrf.mxu1  ;;  %4203 = vadd.xlane.f32.xlu1 %v4202_v60 }
 0x72d   : > { %v8813_v39 = vadd.f32 %v5861_v25, %v4137_v29  ;;  %v4129_v62 = vadd.f32 %v8751_v31, %v4128_v45  ;;  %v4196_v56 = vsel %vm553_vm0, %v8807_v57, 0.0 }
 0x72f   : > { %v8817_v18 = vadd.f32 %v5862_v2, %v4129_v62  ;;  %v4205_v13 = vsel %vm553_vm0, %v8813_v39, 0.0 }
 0x730   : > { %4197 = vadd.xlane.f32.xlu1 %v4196_v56  ;;  %4206 = vadd.xlane.f32.xlu0 %v4205_v13 }
 0x731   : > { %v4199_v12 = vsel %vm553_vm0, %v8817_v18, 0.0 }
 0x734   : > { %4200 = vadd.xlane.f32.xlu0 %v4199_v12 }
 0x736   : > { %v5227_v44 = vpop.f32.mrf.mxu1 }
 0x737   : > { %v4150_v30 = vadd.f32 %v5227_v44, %v8751_v31 }
 0x738   : > { %v4141_v23 = vpop.f32.mrf.mxu1 }
 0x739   : > { %v4142_v15 = vadd.f32 %v8751_v31, %v4141_v23  ;;  %v8831_v35 = vadd.f32 %v5864_v53, %v4150_v30 }
 0x73a   : > { %v5228_v63 = vpop.f32.mrf.mxu1 }
 0x73b   : > { %v8828_v9 = vadd.f32 %v5863_v36, %v4142_v15  ;;  %v4153_v26 = vadd.f32 %v5228_v63, %v8751_v31  ;;  %v4214_v33 = vsel %vm553_vm0, %v8831_v35, 0.0 }
 0x73c   : > { %v4144_v20 = vpop.f32.mrf.mxu1 }
 0x73d   : > { %v4145_v10 = vadd.f32 %v8751_v31, %v4144_v20  ;;  %v4208_v51 = vsel %vm553_vm0, %v8828_v9, 0.0  ;;  %v8841_v34 = vadd.f32 %v5866_v46, %v4153_v26 }
 0x73e   : > { %4209 = vadd.xlane.f32.xlu1 %v4208_v51 }
 0x73f   : > { %v8838_v24 = vadd.f32 %v5865_v48, %v4145_v10  ;;  %v4217_v31 = vsel %vm553_vm0, %v8841_v34, 0.0 }
 0x741   : > { %v4211_v42 = vsel %vm553_vm0, %v8838_v24, 0.0 }
 0x742   : > { %4215 = vadd.xlane.f32.xlu1 %v4214_v33  ;;  %4212 = vadd.xlane.f32.xlu0 %v4211_v42 }
 0x746   : > { %4218 = vadd.xlane.f32.xlu0 %v4217_v31 }
 0x778   : > { %v4180_v38 = vpop.xlane.xlu0 %4179 }
 0x779   : > { %v4223_v6 = vmul.f32 0.03125, %v4180_v38 }
 0x77b   : > { %v8850_v58 = vsub.f32 %v8755_v59, %v4223_v6 }
 0x77c   : > { %v4174_v3 = vpop.xlane.xlu0 %4173 }
 0x77d   : > { %v4221_v43 = vmul.f32 0.03125, %v4174_v3  ;;  %v4255_v32 = vmul.f32 %v8850_v58, %v8850_v58 }
 0x77e   : > { %v4177_v50 = vpop.xlane.xlu1 %4176 }
 0x77f   : > { %v8855_v19 = vsub.f32 %v8759_v8, %v4221_v43  ;;  %v4222_v22 = vmul.f32 0.03125, %v4177_v50  ;;  %v4275_v54 = vsel %vm553_vm0, %v4255_v32, 0.0 }
 0x780   : > { %4276 = vadd.xlane.f32.xlu1 %v4275_v54  ;;  %v4183_v52 = vpop.xlane.xlu0 %4182 }
 0x781   : > { %v4224_v27 = vmul.f32 0.03125, %v4183_v52  ;;  %v4253_v49 = vmul.f32 %v8855_v19, %v8855_v19  ;;  %v8861_v59 = vsub.f32 %v8769_v55, %v4222_v22 }
 0x783   : > { %v8864_v11 = vsub.f32 %v8766_v5, %v4224_v27  ;;  %v4269_v7 = vsel %vm553_vm0, %v4253_v49, 0.0  ;;  %v4254_v0 = vmul.f32 %v8861_v59, %v8861_v59 }
 0x784   : > { %4270 = vadd.xlane.f32.xlu1 %v4269_v7 }
 0x785   : > { %v4256_v8 = vmul.f32 %v8864_v11, %v8864_v11  ;;  %v4272_v5 = vsel %vm553_vm0, %v4254_v0, 0.0 }
 0x787   : > { %v4278_v40 = vsel %vm553_vm0, %v4256_v8, 0.0 }
 0x788   : > { %v4192_v21 = vpop.xlane.xlu1 %4191  ;;  %4279 = vadd.xlane.f32.xlu0 %v4278_v40 }
 0x789   : > { %v4227_v17 = vmul.f32 0.03125, %v4192_v21 }
 0x78b   : > { %v8873_v55 = vsub.f32 %v8779_v37, %v4227_v17 }
 0x78c   : > { %v4186_v1 = vpop.xlane.xlu1 %4185  ;;  %4273 = vadd.xlane.f32.xlu0 %v4272_v5  ;;  %v4195_v4 = vpop.xlane.xlu0 %4194 }
 0x78d   : > { %v4225_v41 = vmul.f32 0.03125, %v4186_v1  ;;  %v4228_v14 = vmul.f32 0.03125, %v4195_v4  ;;  %v4259_v29 = vmul.f32 %v8873_v55, %v8873_v55 }
 0x78f   : > { %v8879_v60 = vsub.f32 %v8783_v47, %v4225_v41  ;;  %v8882_v45 = vsub.f32 %v8789_v28, %v4228_v14  ;;  %v4287_v25 = vsel %vm553_vm0, %v4259_v29, 0.0 }
 0x790   : > { %4288 = vadd.xlane.f32.xlu1 %v4287_v25  ;;  %v4189_v37 = vpop.xlane.xlu0 %4188 }
 0x791   : > { %v4226_v62 = vmul.f32 0.03125, %v4189_v37  ;;  %v4257_v2 = vmul.f32 %v8879_v60, %v8879_v60  ;;  %v4260_v56 = vmul.f32 %v8882_v45, %v8882_v45 }
 0x793   : > { %v8890_v13 = vsub.f32 %v8793_v16, %v4226_v62  ;;  %v4281_v47 = vsel %vm553_vm0, %v4257_v2, 0.0  ;;  %v4290_v12 = vsel %vm553_vm0, %v4260_v56, 0.0 }
 0x794   : > { %4282 = vadd.xlane.f32.xlu1 %v4281_v47  ;;  %4291 = vadd.xlane.f32.xlu0 %v4290_v12 }
 0x795   : > { %v4258_v28 = vmul.f32 %v8890_v13, %v8890_v13 }
 0x797   : > { %v4284_v44 = vsel %vm553_vm0, %v4258_v28, 0.0 }
 0x798   : > { %4285 = vadd.xlane.f32.xlu0 %v4284_v44  ;;  %v8948_v44 = vld [vmem:[%s9065_s8] ss:$0 sm:$0xff] }
 0x7b5   : > { %v4204_v23 = vpop.xlane.xlu1 %4203 }
 0x7b6   : > { %v4231_v30 = vmul.f32 0.03125, %v4204_v23 }
 0x7b8   : > { %v8898_v15 = vsub.f32 %v8803_v61, %v4231_v30 }
 0x7b9   : > { %v4198_v63 = vpop.xlane.xlu1 %4197  ;;  %v4207_v16 = vpop.xlane.xlu0 %4206 }
 0x7ba   : > { %v4229_v36 = vmul.f32 0.03125, %v4198_v63  ;;  %v4232_v20 = vmul.f32 0.03125, %v4207_v16  ;;  %v4263_v53 = vmul.f32 %v8898_v15, %v8898_v15  ;;  %v8954_v63 = vld [vmem:[%s9066_s9] ss:$0 sm:$0xff] }
 0x7bc   : > { %v8903_v26 = vsub.f32 %v8807_v57, %v4229_v36  ;;  %v8906_v10 = vsub.f32 %v8813_v39, %v4232_v20  ;;  %v4299_v51 = vsel %vm553_vm0, %v4263_v53, 0.0 }
 0x7bd   : > { %4300 = vadd.xlane.f32.xlu1 %v4299_v51  ;;  %v4201_v48 = vpop.xlane.xlu0 %4200 }
 0x7be   : > { %v4230_v46 = vmul.f32 0.03125, %v4201_v48  ;;  %v4261_v61 = vmul.f32 %v8903_v26, %v8903_v26  ;;  %v4264_v33 = vmul.f32 %v8906_v10, %v8906_v10 }
 0x7c0   : > { %v8914_v42 = vsub.f32 %v8817_v18, %v4230_v46  ;;  %v4293_v57 = vsel %vm553_vm0, %v4261_v61, 0.0  ;;  %v4302_v31 = vsel %vm553_vm0, %v4264_v33, 0.0 }
 0x7c1   : > { %4294 = vadd.xlane.f32.xlu1 %v4293_v57  ;;  %4303 = vadd.xlane.f32.xlu0 %v4302_v31 }
 0x7c2   : > { %v4262_v39 = vmul.f32 %v8914_v42, %v8914_v42 }
 0x7c4   : > { %v4296_v38 = vsel %vm553_vm0, %v4262_v39, 0.0 }
 0x7c5   : > { %4297 = vadd.xlane.f32.xlu0 %v4296_v38 }
 0x7c7   : > { %v4210_v6 = vpop.xlane.xlu1 %4209 }
 0x7c8   : > { %v4233_v3 = vmul.f32 0.03125, %v4210_v6 }
 0x7ca   : > { %v8922_v43 = vsub.f32 %v8828_v9, %v4233_v3 }
 0x7cb   : > { %v4216_v32 = vpop.xlane.xlu1 %4215  ;;  %v4213_v18 = vpop.xlane.xlu0 %4212 }
 0x7cc   : > { %v4235_v50 = vmul.f32 0.03125, %v4216_v32  ;;  %v4234_v22 = vmul.f32 0.03125, %v4213_v18  ;;  %v4265_v54 = vmul.f32 %v8922_v43, %v8922_v43 }
 0x7ce   : > { %v8927_v52 = vsub.f32 %v8831_v35, %v4235_v50  ;;  %v8930_v27 = vsub.f32 %v8838_v24, %v4234_v22  ;;  %v4305_v49 = vsel %vm553_vm0, %v4265_v54, 0.0 }
 0x7cf   : > { %4306 = vadd.xlane.f32.xlu1 %v4305_v49  ;;  %v4219_v7 = vpop.xlane.xlu0 %4218 }
 0x7d0   : > { %v4236_v8 = vmul.f32 0.03125, %v4219_v7  ;;  %v4267_v9 = vmul.f32 %v8927_v52, %v8927_v52  ;;  %v4266_v40 = vmul.f32 %v8930_v27, %v8930_v27 }
 0x7d2   : > { %v8938_v0 = vsub.f32 %v8841_v34, %v4236_v8  ;;  %v4311_v35 = vsel %vm553_vm0, %v4267_v9, 0.0  ;;  %v4308_v21 = vsel %vm553_vm0, %v4266_v40, 0.0 }
 0x7d3   : > { %4312 = vadd.xlane.f32.xlu1 %v4311_v35  ;;  %4309 = vadd.xlane.f32.xlu0 %v4308_v21 }
 0x7d4   : > { %v4268_v24 = vmul.f32 %v8938_v0, %v8938_v0 }
 0x7d6   : > { %v4314_v17 = vsel %vm553_vm0, %v4268_v24, 0.0 }
 0x7d7   : > { %4315 = vadd.xlane.f32.xlu0 %v4314_v17 }
 0x809   : > { %v4277_v5 = vpop.xlane.xlu1 %4276 }
 0x80a   : > { %v4319_v1 = vmul.f32 0.03125, %v4277_v5 }
 0x80c   : > { %v4335_v4 = vadd.f32 1e-05, %v4319_v1 }
 0x80d   : > { %v4271_v41 = vpop.xlane.xlu1 %4270 }
 0x80e   : > { %5819 = vrsqrt.f32 %v4335_v4  ;;  %v4317_v14 = vmul.f32 0.03125, %v4271_v41 }
 0x810   : > { %v4333_v34 = vadd.f32 1e-05, %v4317_v14 }
 0x811   : > { %v4280_v29 = vpop.xlane.xlu0 %4279 }
 0x812   : > { %5821 = vrsqrt.f32 %v4333_v34  ;;  %v4320_v25 = vmul.f32 0.03125, %v4280_v29 }
 0x814   : > { %v4336_v37 = vadd.f32 1e-05, %v4320_v25 }
 0x815   : > { %v4274_v62 = vpop.xlane.xlu0 %4273 }
 0x816   : > { %5823 = vrsqrt.f32 %v4336_v37  ;;  %v4318_v2 = vmul.f32 0.03125, %v4274_v62 }
 0x818   : > { %v4334_v56 = vadd.f32 1e-05, %v4318_v2 }
 0x819   : > { %v4289_v47 = vpop.xlane.xlu1 %4288 }
 0x81a   : > { %5825 = vrsqrt.f32 %v4334_v56  ;;  %v4323_v12 = vmul.f32 0.03125, %v4289_v47 }
 0x81b   : > { %v5820_v28 = vpop.eup %5819 }
 0x81c   : > { %v4367_v23 = vmul.f32 %v5820_v28, %v8850_v58  ;;  %v4339_v30 = vadd.f32 1e-05, %v4323_v12 }
 0x81d   : > { %v4283_v16 = vpop.xlane.xlu1 %4282  ;;  %v4292_v36 = vpop.xlane.xlu0 %4291 }
 0x81e   : > { %v4389_v20 = vmul.f32 %v8948_v44, %v4367_v23  ;;  %5827 = vrsqrt.f32 %v4339_v30  ;;  %v4321_v53 = vmul.f32 0.03125, %v4283_v16  ;;  %v4324_v51 = vmul.f32 0.03125, %v4292_v36 }
 0x81f   : > { %v5822_v48 = vpop.eup %5821 }
 0x820   : > { %v4411_v58 = vadd.f32 %v8954_v63, %v4389_v20  ;;  %v4365_v46 = vmul.f32 %v5822_v48, %v8855_v19  ;;  %v4337_v61 = vadd.f32 1e-05, %v4321_v53  ;;  %v4340_v33 = vadd.f32 1e-05, %v4324_v51 }
 0x821   : > { %v4286_v57 = vpop.xlane.xlu0 %4285 }
 0x822   : > { %4427 = vst.msk [vmem:[%s8962_s11 + $0x10] sm:$0xff] %vm553_vm0, %v4411_v58  ;;  %v4387_v31 = vmul.f32 %v8948_v44, %v4365_v46  ;;  %5829 = vrsqrt.f32 %v4337_v61  ;;  %v4322_v39 = vmul.f32 0.03125, %v4286_v57 }
 0x823   : > { %v5824_v38 = vpop.eup %5823  ;;  %5831 = vrsqrt.f32 %v4340_v33 }
 0x824   : > { %v4409_v6 = vadd.f32 %v8954_v63, %v4387_v31  ;;  %v4368_v3 = vmul.f32 %v5824_v38, %v8864_v11  ;;  %v4338_v32 = vadd.f32 1e-05, %v4322_v39 }
 0x826   : > { %4425 = vst.msk [vmem:[%s8962_s11] sm:$0xff] %vm553_vm0, %v4409_v6  ;;  %v4390_v19 = vmul.f32 %v8948_v44, %v4368_v3  ;;  %5833 = vrsqrt.f32 %v4338_v32 }
 0x827   : > { %v5826_v18 = vpop.eup %5825 }
 0x828   : > { %v4412_v50 = vadd.f32 %v8954_v63, %v4390_v19  ;;  %v4366_v22 = vmul.f32 %v5826_v18, %v8861_v59 }
 0x82a   : > { %4428 = vst.msk [vmem:[%s8962_s11 + $0x18] sm:$0xff] %vm553_vm0, %v4412_v50  ;;  %v4388_v54 = vmul.f32 %v8948_v44, %v4366_v22 }
 0x82b   : > { %v5828_v49 = vpop.eup %5827 }
 0x82c   : > { %v4410_v7 = vadd.f32 %v8954_v63, %v4388_v54  ;;  %v4371_v11 = vmul.f32 %v5828_v49, %v8873_v55 }
 0x82e   : > { %4426 = vst.msk [vmem:[%s8962_s11 + $0x8] sm:$0xff] %vm553_vm0, %v4410_v7  ;;  %v4393_v8 = vmul.f32 %v8948_v44, %v4371_v11 }
 0x82f   : > { %v5830_v9 = vpop.eup %5829 }
 0x830   : > { %v5832_v40 = vpop.eup %5831  ;;  %v4415_v59 = vadd.f32 %v8954_v63, %v4393_v8  ;;  %v4369_v35 = vmul.f32 %v5830_v9, %v8879_v60 }
 0x831   : > { %v4372_v21 = vmul.f32 %v5832_v40, %v8882_v45 }
 0x832   : > { %4431 = vst.msk [vmem:[%s8962_s11 + $0x30] sm:$0xff] %vm553_vm0, %v4415_v59  ;;  %v4391_v24 = vmul.f32 %v8948_v44, %v4369_v35 }
 0x833   : > { %v5834_v17 = vpop.eup %5833  ;;  %v4394_v55 = vmul.f32 %v8948_v44, %v4372_v21 }
 0x834   : > { %v4413_v5 = vadd.f32 %v8954_v63, %v4391_v24  ;;  %v4370_v1 = vmul.f32 %v5834_v17, %v8890_v13 }
 0x835   : > { %v4416_v4 = vadd.f32 %v8954_v63, %v4394_v55 }
 0x836   : > { %4429 = vst.msk [vmem:[%s8962_s11 + $0x20] sm:$0xff] %vm553_vm0, %v4413_v5  ;;  %v4392_v41 = vmul.f32 %v8948_v44, %v4370_v1 }
 0x837   : > { %4432 = vst.msk [vmem:[%s8962_s11 + $0x38] sm:$0xff] %vm553_vm0, %v4416_v4 }
 0x838   : > { %v4414_v60 = vadd.f32 %v8954_v63, %v4392_v41 }
 0x83a   : > { %4430 = vst.msk [vmem:[%s8962_s11 + $0x28] sm:$0xff] %vm553_vm0, %v4414_v60 }
 0x846   : > { %v4301_v45 = vpop.xlane.xlu1 %4300 }
 0x847   : > { %v4327_v14 = vmul.f32 0.03125, %v4301_v45 }
 0x849   : > { %v4343_v34 = vadd.f32 1e-05, %v4327_v14 }
 0x84a   : > { %v4295_v29 = vpop.xlane.xlu1 %4294  ;;  %v4304_v25 = vpop.xlane.xlu0 %4303 }
 0x84b   : > { %5835 = vrsqrt.f32 %v4343_v34  ;;  %v4325_v37 = vmul.f32 0.03125, %v4295_v29  ;;  %v4328_v13 = vmul.f32 0.03125, %v4304_v25 }
 0x84d   : > { %v4341_v62 = vadd.f32 1e-05, %v4325_v37  ;;  %v4344_v2 = vadd.f32 1e-05, %v4328_v13 }
 0x84e   : > { %v4298_v56 = vpop.xlane.xlu0 %4297 }
 0x84f   : > { %5837 = vrsqrt.f32 %v4341_v62  ;;  %v4326_v47 = vmul.f32 0.03125, %v4298_v56 }
 0x850   : > { %5839 = vrsqrt.f32 %v4344_v2 }
 0x851   : > { %v4342_v12 = vadd.f32 1e-05, %v4326_v47 }
 0x853   : > { %5841 = vrsqrt.f32 %v4342_v12 }
 0x858   : > { %v5836_v28 = vpop.eup %5835  ;;  %v4307_v23 = vpop.xlane.xlu1 %4306 }
 0x859   : > { %v4375_v30 = vmul.f32 %v5836_v28, %v8898_v15  ;;  %v4329_v16 = vmul.f32 0.03125, %v4307_v23 }
 0x85b   : > { %v4397_v36 = vmul.f32 %v8948_v44, %v4375_v30  ;;  %v4345_v20 = vadd.f32 1e-05, %v4329_v16 }
 0x85c   : > { %v5838_v53 = vpop.eup %5837  ;;  %v4313_v51 = vpop.xlane.xlu1 %4312 }
 0x85d   : > { %v4310_v48 = vpop.xlane.xlu0 %4309  ;;  %v5840_v58 = vpop.eup %5839  ;;  %v4419_v46 = vadd.f32 %v8954_v63, %v4397_v36  ;;  %v4373_v61 = vmul.f32 %v5838_v53, %v8903_v26  ;;  %5843 = vrsqrt.f32 %v4345_v20  ;;  %v4331_v33 = vmul.f32 0.03125, %v4313_v51 }
 0x85e   : > { %v4376_v57 = vmul.f32 %v5840_v58, %v8906_v10  ;;  %v4330_v31 = vmul.f32 0.03125, %v4310_v48 }
 0x85f   : > { %4435 = vst.msk [vmem:[%s8962_s11 + $0x50] sm:$0xff] %vm553_vm0, %v4419_v46  ;;  %v4395_v15 = vmul.f32 %v8948_v44, %v4373_v61  ;;  %v4347_v39 = vadd.f32 1e-05, %v4331_v33 }
 0x860   : > { %v5842_v38 = vpop.eup %5841  ;;  %v4398_v6 = vmul.f32 %v8948_v44, %v4376_v57  ;;  %v4346_v3 = vadd.f32 1e-05, %v4330_v31 }
 0x861   : > { %v4316_v32 = vpop.xlane.xlu0 %4315  ;;  %v4417_v26 = vadd.f32 %v8954_v63, %v4395_v15  ;;  %v4374_v19 = vmul.f32 %v5842_v38, %v8914_v42  ;;  %5845 = vrsqrt.f32 %v4347_v39 }
 0x862   : > { %v4332_v18 = vmul.f32 0.03125, %v4316_v32  ;;  %v4420_v10 = vadd.f32 %v8954_v63, %v4398_v6  ;;  %5847 = vrsqrt.f32 %v4346_v3 }
 0x863   : > { %4433 = vst.msk [vmem:[%s8962_s11 + $0x40] sm:$0xff] %vm553_vm0, %v4417_v26  ;;  %v4396_v50 = vmul.f32 %v8948_v44, %v4374_v19 }
 0x864   : > { %v4348_v22 = vadd.f32 1e-05, %v4332_v18  ;;  %4436 = vst.msk [vmem:[%s8962_s11 + $0x58] sm:$0xff] %vm553_vm0, %v4420_v10 }
 0x865   : > { %v4418_v54 = vadd.f32 %v8954_v63, %v4396_v50 }
 0x866   : > { %5849 = vrsqrt.f32 %v4348_v22 }
 0x867   : > { %4434 = vst.msk [vmem:[%s8962_s11 + $0x48] sm:$0xff] %vm553_vm0, %v4418_v54 }
 0x86a   : > { %v5844_v42 = vpop.eup %5843 }
 0x86b   : > { %v4377_v49 = vmul.f32 %v5844_v42, %v8922_v43 }
 0x86d   : > { %v4399_v7 = vmul.f32 %v8948_v44, %v4377_v49 }
 0x86e   : > { %v5846_v11 = vpop.eup %5845 }
 0x86f   : > { %v5848_v8 = vpop.eup %5847  ;;  %v4421_v9 = vadd.f32 %v8954_v63, %v4399_v7  ;;  %v4379_v40 = vmul.f32 %v5846_v11, %v8927_v52 }
 0x870   : > { %v4378_v59 = vmul.f32 %v5848_v8, %v8930_v27 }
 0x871   : > { %4437 = vst.msk [vmem:[%s8962_s11 + $0x60] sm:$0xff] %vm553_vm0, %v4421_v9  ;;  %v4401_v35 = vmul.f32 %v8948_v44, %v4379_v40 }
 0x872   : > { %v4400_v24 = vmul.f32 %v8948_v44, %v4378_v59 }
 0x873   : > { %v5850_v21 = vpop.eup %5849  ;;  %v4423_v43 = vadd.f32 %v8954_v63, %v4401_v35 }
 0x874   : > { %v4380_v17 = vmul.f32 %v5850_v21, %v8938_v0  ;;  %v4422_v55 = vadd.f32 %v8954_v63, %v4400_v24 }
 0x875   : > { %4439 = vst.msk [vmem:[%s8962_s11 + $0x70] sm:$0xff] %vm553_vm0, %v4423_v43 }
 0x876   : > { %v4402_v5 = vmul.f32 %v8948_v44, %v4380_v17  ;;  %4438 = vst.msk [vmem:[%s8962_s11 + $0x68] sm:$0xff] %vm553_vm0, %v4422_v55 }
 0x878   : > { %v4424_v52 = vadd.f32 %v8954_v63, %v4402_v5 }
 0x87a   : > { %4440 = vst.msk [vmem:[%s8962_s11 + $0x78] sm:$0xff] %vm553_vm0, %v4424_v52 }
 0x87b PF: > { %s20_s17 = sadd.s32 1, %s5905_s17   ;;  %s9572_s13 = smov %s5897_s15 }
 0x87c   : > { %p17_p7 = scmp.ge.s32.totalorder %s20_s17, 6   ;;  %s9573_s14 = smov %s5901_s16 }
 0x87d   : > { %s9574_s15 = smov %s9577_s18  ;;  %s9575_s16 = smov %s9581_s19 }
 0x87e   :  { %19 = sbr.rel (!%p17_p7) target bundleno = 3 (0x3), region = 100 }

// kernel: detr_forward.15
= control target key start
LH: loop header
LB: loop body
LE: loop exit
PB: predicated region body
PF: predicated region fallthrough
CT: control target
= control target key end

     0   :  { %v292_v0 = vmov 0.0   ;;  %vm293_vm0 = vmmov 0   ;;  %vm53_vm1 = vcmask 261120   ;;  %vm133_vm2 = vcmask 523264   ;;  %s383_s1 = inlined_call_operand.vmem [shape: bf16[32,64], index: 1, kind: input, shape index: {}]   ;;  %s384_s0 = inlined_call_operand.vmem [shape: f32[16,32], index: 0, kind: input, shape index: {}]   ;;  %s385_s3 = inlined_call_operand.vmem [shape: bf16[64,32], index: 3, kind: input, shape index: {}]   ;;  %s386_s2 = inlined_call_operand.vmem [shape: f32[1,64], index: 2, kind: input, shape index: {}]   ;;  %s387_s4 = inlined_call_operand.vmem [shape: f32[1,32], index: 4, kind: input, shape index: {}]   ;;  %s388_s5 = inlined_call_operand.vmem [shape: f32[1,32], index: 5, kind: input, shape index: {}]   ;;  %s389_s6 = inlined_call_operand.vmem [shape: f32[1,32], index: 6, kind: input, shape index: {}]   ;;  %s390_s7 = inlined_call_operand.vmem [shape: f32[16,32], index: 7, kind: output, shape index: {}]  }
   0x1   :  { %260 = vmatprep.subr.bf16.mxu0 %v292_v0  ;;  %v282_v1 = vld [vmem:[%s383_s1 + $0x8] sm:$0xff]   ;;  %264 = vmatprep.mubr.msk.bf16.mxu0 %vm293_vm0, %v292_v0  ;;  %v283_v2 = vld [vmem:[%s383_s1] sm:$0xff]   ;;  %v284_v5 = vld [vmem:[%s385_s3 + $0x18] sm:$0xff]  }
   0x2   :  { %268 = vmatprep.subr.bf16.mxu1 %v292_v0  ;;  %276 = vmatprep.mubr.msk.bf16.mxu1 %vm293_vm0, %v292_v0  ;;  %v27_v3 = vld [vmem:[%s384_s0] sm:$0xff]  ;;  %v28_v4 = vld [vmem:[%s384_s0 + $0x8] sm:$0xff]  ;;  %v285_v7 = vld [vmem:[%s385_s3 + $0x10] sm:$0xff]  }
   0x3   :  { %261 = vmatpush3.bf16.msra.mxu0 %v282_v1  ;;  %v29_v6 = vpack.c.bf16 %v28_v4, %v27_v3  ;;  %269 = vmatpush3.bf16.msra.mxu1 %v284_v5  ;;  %v286_v8 = vld [vmem:[%s385_s3 + $0x8] sm:$0xff]   ;;  %v287_v9 = vld [vmem:[%s385_s3] sm:$0xff]  }
   0x4   :  { %262 = vmatprep.subr.bf16.mxu0 %v292_v0  ;;  %270 = vmatprep.subr.bf16.mxu1 %v292_v0  ;;  %v240_v10 = vld [vmem:[%s386_s2] ss:$0 sm:$0xff] }
   0x5   :  { %v249_v21 = vld [vmem:[%s387_s4] ss:$0 sm:$0xff] }
   0x6   :  { %v250_v48 = vld [vmem:[%s388_s5] ss:$0 sm:$0xff] }
   0x7   :  { %263 = vmatpush3.bf16.msra.mxu0 %v283_v2  ;;  %271 = vmatpush3.bf16.msra.mxu1 %v285_v7  ;;  %v251_v50 = vld [vmem:[%s389_s6] ss:$0 sm:$0xff] }
   0x8   :  { %272 = vmatprep.subr.bf16.mxu1 %v292_v0 }
   0xa   :  { %265 = vmatmul.mubr.msk.bf16.vlgmr.msra.gmra.mxu0 %vm53_vm1, %v29_v6 }
   0xb   :  { %273 = vmatpush3.bf16.msra.mxu1 %v286_v8 }
   0xc   :  { %274 = vmatprep.subr.bf16.mxu1 %v292_v0 }
   0xf   :  { %275 = vmatpush3.bf16.msra.mxu1 %v287_v9 }
  0xca   :  { %v91_v11 = vpop.f32.mrf.mxu0 }
  0xcb   :  { %v92_v13 = vadd.f32 %v240_v10, %v91_v11 }
  0xcc   :  { %v266_v12 = vpop.f32.mrf.mxu0 }
  0xcd   :  { %v98_v17 = vmax.f32 %v92_v13, 0.0 }
  0xce   :  { %v94_v14 = vpop.f32.mrf.mxu0 }
  0xcf   :  { %v95_v15 = vadd.f32 %v240_v10, %v94_v14 }
  0xd0   :  { %v267_v16 = vpop.f32.mrf.mxu0 }
  0xd1   :  { %v99_v18 = vmax.f32 %v95_v15, 0.0 }
  0xd3   :  { %v100_v19 = vpack.c.bf16 %v99_v18, %v98_v17 }
  0xd5   :  { %277 = vmatmul.mubr.msk.bf16.vlgmr.msra.gmra.mxu1 %vm133_vm2, %v100_v19 }
 0x195   :  { %v171_v20 = vpop.f32.mrf.mxu1 }
 0x196   :  { %v178_v22 = vadd.f32 %v171_v20, %v27_v3 }
 0x197   :  { %v278_v23 = vpop.f32.mrf.mxu1 }
 0x198   :  { %v187_v24 = vadd.f32 %v249_v21, %v178_v22 }
 0x199   :  { %v174_v25 = vpop.f32.mrf.mxu1 }
 0x19a   :  { %v179_v26 = vadd.f32 %v174_v25, %v28_v4  ;;  %v191_v27 = vsel %vm53_vm1, %v187_v24, 0.0 }
 0x19b   :  { %192 = vadd.xlane.f32.xlu0 %v191_v27  ;;  %v279_v28 = vpop.f32.mrf.mxu1 }
 0x19c   :  { %v188_v29 = vadd.f32 %v249_v21, %v179_v26 }
 0x19e   :  { %v194_v30 = vsel %vm53_vm1, %v188_v29, 0.0 }
 0x19f   :  { %195 = vadd.xlane.f32.xlu0 %v194_v30 }
 0x224   :  { %v193_v31 = vpop.xlane.xlu0 %192 }
 0x225   :  { %v198_v32 = vmul.f32 0.03125, %v193_v31 }
 0x227   :  { %v200_v33 = vsub.f32 %v187_v24, %v198_v32 }
 0x228   :  { %v196_v34 = vpop.xlane.xlu0 %195 }
 0x229   :  { %v199_v35 = vmul.f32 0.03125, %v196_v34  ;;  %v202_v36 = vmul.f32 %v200_v33, %v200_v33 }
 0x22b   :  { %v201_v37 = vsub.f32 %v188_v29, %v199_v35  ;;  %v204_v38 = vsel %vm53_vm1, %v202_v36, 0.0 }
 0x22c   :  { %205 = vadd.xlane.f32.xlu1 %v204_v38 }
 0x22d   :  { %v203_v39 = vmul.f32 %v201_v37, %v201_v37 }
 0x22f   :  { %v207_v40 = vsel %vm53_vm1, %v203_v39, 0.0 }
 0x230   :  { %208 = vadd.xlane.f32.xlu1 %v207_v40 }
 0x2b5   :  { %v206_v41 = vpop.xlane.xlu1 %205 }
 0x2b6   :  { %v210_v42 = vmul.f32 0.03125, %v206_v41 }
 0x2b8   :  { %v212_v43 = vadd.f32 1e-05, %v210_v42 }
 0x2b9   :  { %v209_v44 = vpop.xlane.xlu1 %208 }
 0x2ba   :  { %288 = vrsqrt.f32 %v212_v43  ;;  %v211_v45 = vmul.f32 0.03125, %v209_v44 }
 0x2bc   :  { %v213_v46 = vadd.f32 1e-05, %v211_v45 }
 0x2be   :  { %290 = vrsqrt.f32 %v213_v46 }
 0x2c7   :  { %v289_v47 = vpop.eup %288 }
 0x2c8   :  { %v216_v49 = vmul.f32 %v289_v47, %v200_v33 }
 0x2ca   :  { %v224_v51 = vmul.f32 %v250_v48, %v216_v49 }
 0x2cb   :  { %v291_v52 = vpop.eup %290 }
 0x2cc   :  { %v232_v53 = vadd.f32 %v251_v50, %v224_v51  ;;  %v217_v54 = vmul.f32 %v291_v52, %v201_v37 }
 0x2ce   :  { %234 = vst.msk [vmem:[%s390_s7] sm:$0xff] %vm53_vm1, %v232_v53  ;;  %v225_v55 = vmul.f32 %v250_v48, %v217_v54 }
 0x2d0   :  { %v233_v56 = vadd.f32 %v251_v50, %v225_v55 }
 0x2d2   :  { %235 = vst.msk [vmem:[%s390_s7 + $0x8] sm:$0xff] %vm53_vm1, %v233_v56 }

// kernel: detr_forward.14
= control target key start
LH: loop header
LB: loop body
LE: loop exit
PB: predicated region body
PF: predicated region fallthrough
CT: control target
= control target key end

     0   :  { %s2769_s13 = smov 0   ;;  %s2771_s14 = smov 0   ;;  %s3630_s0 = inlined_call_operand.vmem [shape: f32[2,8,32], index: 0, kind: input, shape index: {}]   ;;  %s3631_s1 = inlined_call_operand.vmem [shape: f32[8,32], index: 1, kind: input, shape index: {}]   ;;  %s3632_s2 = inlined_call_operand.vmem [shape: f32[2,256,32], index: 2, kind: input, shape index: {}]   ;;  %s3633_s3 = inlined_call_operand.vmem [shape: f32[256,32], index: 3, kind: input, shape index: {}]   ;;  %s3634_s4 = inlined_call_operand.vmem [shape: bf16[3,32,32], index: 4, kind: input, shape index: {}]   ;;  %s3635_s5 = inlined_call_operand.vmem [shape: f32[3,1,32], index: 5, kind: input, shape index: {}]   ;;  %s3636_s6 = inlined_call_operand.vmem [shape: bf16[32,32], index: 6, kind: input, shape index: {}]   ;;  %s3637_s7 = inlined_call_operand.vmem [shape: f32[1,32], index: 7, kind: input, shape index: {}]   ;;  %s3638_s8 = inlined_call_operand.vmem [shape: f32[1,32], index: 8, kind: input, shape index: {}]   ;;  %s3639_s9 = inlined_call_operand.vmem [shape: f32[1,32], index: 9, kind: input, shape index: {}]   ;;  %s3640_s10 = inlined_call_operand.vmem [shape: f32[2,8,32], index: 10, kind: output, shape index: {}]  }
   0x1   :  { %s2773_s15 = smov 0  }
   0x2 LB: > { %s32_s16 = sadd.s32 1, %s2700_s14  ;;  %p2223_p0 = scmp.ge.s32.totalorder %s2704_s15, 1  ;;  %s2704_s15 = sphi %s2773_s15, %s20_s15   ;;  %s2700_s14 = sphi %s2771_s14, %s3642_s14   ;;  %s2696_s13 = sphi %s2769_s13, %s3641_s13  }
   0x3   : > { %p34_p1 = scmp.ge.s32.totalorder %s32_s16, 2  ;;  %p349_p2 = scmp.lt.s32.totalorder %s2704_s15, 3 }
   0x5   : > { %s3644_s16 = smov (%p34_p1, %s32_s16), 0  ;;  %p350_p3 = pnand %p2223_p0, %p349_p2 }
   0x6   : > { %p400_p4 = scmp.lt.s32.totalorder (!%p350_p3), %s2696_s13, 1  ;;  %s2709_s26 = smov (!%p350_p3), 112  }
   0x7   : > { %353 = sbr.rel (%p350_p3) target bundleno = 2945 (0xb81), region = 60  ;;  %s2710_s27 = smov (!%p350_p3), 104  }
   0x8   : > { %s2711_s28 = smov (!%p350_p3), 8   ;;  %s2712_s29 = smov (!%p350_p3), 16  }
   0x9   : > { %s2713_s18 = smov (!%p350_p3), 24  }
   0xc   : > { %v2647_v0 = vld [vmem:[%s3634_s4 + $0x18] sm:$0xff]   ;;  %v2648_v1 = vld [vmem:[%s3634_s4 + $0x10] sm:$0xff]   ;;  %s3646_s13 = smov (!%p400_p4, %s2696_s13), 1  ;;  %v2706_v2 = vmov 0.0   ;;  %v527_v3 = vld [vmem:[%s3633_s3] sm:$0xff]  ;;  %vm2707_vm0 = vmmov 0  }
   0xd   : > { %2503 = vmatprep.subr.bf16.mxu1 %v2647_v0  ;;  %2495 = vmatprep.subr.bf16.mxu0 %v2706_v2  ;;  %s2292_s21 = sshll.u32 %s3646_s13, 8  ;;  %v528_v4 = vld [vmem:[%s3633_s3 + $0x8] sm:$0xff]  ;;  %v529_v5 = vld [vmem:[%s3633_s3 + $0x10] sm:$0xff]  ;;  %v530_v6 = vld [vmem:[%s3633_s3 + $0x18] sm:$0xff]  ;;  %vm483_vm1 = vcmask 261120   ;;  %s2224_s22 = sshll.u32 %s3646_s13, 3 }
   0xe   : > { %2504 = vmatpush3.bf16.msra.mxu1 %v2647_v0  ;;  %2499 = vmatprep.mubr.msk.bf16.mxu0 %vm2707_vm0, %v2706_v2  ;;  %s2811_s30 = scalar_lea.vmem %s3632_s2, %s2292_s21  ;;  %v531_v7 = vld [vmem:[%s3633_s3 + $0x20] sm:$0xff]  ;;  %v532_v8 = vld [vmem:[%s3633_s3 + $0x28] sm:$0xff]  ;;  %v533_v22 = vld [vmem:[%s3633_s3 + $0x30] sm:$0xff]  ;;  %s2915_s25 = scalar_lea.vmem %s3630_s0, %s2224_s22  ;;  %vm1131_vm2 = vcmask 64512   ;;  %vm2020_vm3 = vcmask 130048   ;;  %vm2022_vm4 = vcmask 195584  }
   0xf   : > { %2505 = vmatprep.subr.bf16.mxu1 %v2648_v1  ;;  %v2823_v9 = vld [vmem:[%s2811_s30] sm:$0xff]  ;;  %v2826_v10 = vld [vmem:[%s2811_s30 + $0x8] sm:$0xff]  ;;  %v2829_v11 = vld [vmem:[%s2811_s30 + $0x10] sm:$0xff]  ;;  %s2708_s21 = smov 120  }
  0x10   : > { %v559_v12 = vadd.f32 %v527_v3, %v2823_v9  ;;  %v560_v13 = vadd.f32 %v528_v4, %v2826_v10  ;;  %v2834_v14 = vld [vmem:[%s2811_s30 + $0x18] sm:$0xff]  ;;  %v561_v15 = vadd.f32 %v529_v5, %v2829_v11  ;;  %v2838_v16 = vld [vmem:[%s2811_s30 + $0x20] sm:$0xff]  ;;  %v2841_v17 = vld [vmem:[%s2811_s30 + $0x28] sm:$0xff] }
  0x11   : > { %v562_v18 = vadd.f32 %v530_v6, %v2834_v14  ;;  %v842_v19 = vpack.c.bf16 %v2834_v14, %v2829_v11  ;;  %v563_v20 = vadd.f32 %v531_v7, %v2838_v16  ;;  %v564_v21 = vadd.f32 %v532_v8, %v2841_v17  ;;  %v534_v23 = vld [vmem:[%s3633_s3 + $0x38] sm:$0xff]  ;;  %v2855_v25 = vld [vmem:[%s2811_s30 + $0x30] sm:$0xff]  ;;  %v535_v27 = vld [vmem:[%s3633_s3 + $0x40] sm:$0xff] }
  0x12   : > { %2506 = vmatpush3.bf16.msra.mxu1 %v2648_v1  ;;  %v591_v24 = vpack.c.bf16 %v560_v13, %v559_v12  ;;  %v2858_v26 = vld [vmem:[%s2811_s30 + $0x38] sm:$0xff]  ;;  %v2864_v30 = vld [vmem:[%s2811_s30 + $0x40] sm:$0xff]  ;;  %v2867_v31 = vld [vmem:[%s2811_s30 + $0x48] sm:$0xff]  ;;  %v565_v33 = vadd.f32 %v533_v22, %v2855_v25  ;;  %v841_v8 = vpack.c.bf16 %v2826_v10, %v2823_v9 }
  0x13   : > { %v592_v28 = vpack.c.bf16 %v562_v18, %v561_v15  ;;  %v593_v29 = vpack.c.bf16 %v564_v21, %v563_v20  ;;  %v536_v32 = vld [vmem:[%s3633_s3 + $0x48] sm:$0xff]  ;;  %v566_v34 = vadd.f32 %v534_v23, %v2858_v26  ;;  %v567_v35 = vadd.f32 %v535_v27, %v2864_v30  ;;  %v537_v38 = vld [vmem:[%s3633_s3 + $0x50] sm:$0xff]  ;;  %v538_v39 = vld [vmem:[%s3633_s3 + $0x58] sm:$0xff] }
  0x14   : > { %2507 = vmatprep.mubr.msk.bf16.mxu1 %vm483_vm1, %v591_v24  ;;  %v568_v36 = vadd.f32 %v536_v32, %v2867_v31  ;;  %v2886_v41 = vld [vmem:[%s2811_s30 + $0x50] sm:$0xff]  ;;  %v2889_v42 = vld [vmem:[%s2811_s30 + $0x58] sm:$0xff]  ;;  %v2892_v43 = vld [vmem:[%s2811_s30 + $0x60] sm:$0xff] }
  0x15   : > { %2508 = vmatmul.mubr.msk.bf16.vlgmr.msra.gmra.mxu1 %vm483_vm1, %v592_v28  ;;  %v594_v37 = vpack.c.bf16 %v566_v34, %v565_v33  ;;  %v2895_v44 = vld [vmem:[%s2811_s30 + $0x68] sm:$0xff]  ;;  %v539_v45 = vld [vmem:[%s3633_s3 + $0x60] sm:$0xff]  ;;  %v569_v47 = vadd.f32 %v537_v38, %v2886_v41  ;;  %v570_v48 = vadd.f32 %v538_v39, %v2889_v42  ;;  %v2918_v51 = vld [vmem:[%s2811_s30 + $0x70] sm:$0xff] }
  0x16   : > { %2511 = vmatprep.mubr.msk.bf16.mxu1 %vm483_vm1, %v593_v29  ;;  %v595_v40 = vpack.c.bf16 %v568_v36, %v567_v35  ;;  %v540_v46 = vld [vmem:[%s3633_s3 + $0x68] sm:$0xff]  ;;  %v571_v49 = vadd.f32 %v539_v45, %v2892_v43  ;;  %v2921_v52 = vld [vmem:[%s2811_s30 + $0x78] sm:$0xff]  ;;  %v541_v53 = vld [vmem:[%s3633_s3 + $0x70] sm:$0xff]  ;;  %v847_v11 = vpack.c.bf16 %v2895_v44, %v2892_v43 }
  0x17   : > { %v572_v50 = vadd.f32 %v540_v46, %v2895_v44  ;;  %v542_v54 = vld [vmem:[%s3633_s3 + $0x78] sm:$0xff]  ;;  %v596_v55 = vpack.c.bf16 %v570_v48, %v569_v47  ;;  %v2930_v56 = vld [vmem:[%s2811_s30 + $0x80] sm:$0xff]  ;;  %v2933_v57 = vld [vmem:[%s2811_s30 + $0x88] sm:$0xff]  ;;  %v573_v3 = vadd.f32 %v541_v53, %v2918_v51  ;;  %v848_v14 = vpack.c.bf16 %v2921_v52, %v2918_v51 }
  0x18   : > { %v543_v58 = vld [vmem:[%s3633_s3 + $0x80] sm:$0xff]  ;;  %v544_v59 = vld [vmem:[%s3633_s3 + $0x88] sm:$0xff]  ;;  %v574_v4 = vadd.f32 %v542_v54, %v2921_v52  ;;  %v2961_v13 = vld [vmem:[%s2811_s30 + $0x90] sm:$0xff] }
  0x19   : > { %v2649_v60 = vld [vmem:[%s3634_s4 + $0x8] sm:$0xff]   ;;  %v597_v61 = vpack.c.bf16 %v572_v50, %v571_v49  ;;  %v2650_v62 = vld [vmem:[%s3634_s4] sm:$0xff]   ;;  %v575_v5 = vadd.f32 %v543_v58, %v2930_v56  ;;  %v576_v6 = vadd.f32 %v544_v59, %v2933_v57  ;;  %v2964_v15 = vld [vmem:[%s2811_s30 + $0x98] sm:$0xff] }
  0x1a   : > { %v424_v63 = vld [vmem:[%s2915_s25] sm:$0xff]  ;;  %2496 = vmatpush3.bf16.msra.mxu0 %v2649_v60  ;;  %v598_v12 = vpack.c.bf16 %v574_v4, %v573_v3  ;;  %v545_v20 = vld [vmem:[%s3633_s3 + $0x90] sm:$0xff]  ;;  %v546_v21 = vld [vmem:[%s3633_s3 + $0x98] sm:$0xff] }
  0x1b   : > { %v457_v0 = vld [vmem:[%s3631_s1] sm:$0xff]  ;;  %2497 = vmatprep.subr.bf16.mxu0 %v2706_v2  ;;  %v599_v18 = vpack.c.bf16 %v576_v6, %v575_v5  ;;  %v2977_v9 = vld [vmem:[%s2811_s30 + $0xa8] sm:$0xff]  ;;  %v577_v24 = vadd.f32 %v545_v20, %v2961_v13  ;;  %v578_v27 = vadd.f32 %v546_v21, %v2964_v15  ;;  %v2993_v33 = vld [vmem:[%s2811_s30 + $0xb0] sm:$0xff] }
  0x1c   : > { %v458_v1 = vadd.f32 %v457_v0, %v424_v63  ;;  %v2973_v22 = vld [vmem:[%s2811_s30 + $0xa0] sm:$0xff]  ;;  %v548_v23 = vld [vmem:[%s3633_s3 + $0xa8] sm:$0xff]  ;;  %v2996_v34 = vld [vmem:[%s2811_s30 + $0xb8] sm:$0xff] }
  0x1d   : > { %2512 = vmatmul.mubr.msk.bf16.gmra.mxu1 %vm483_vm1, %v594_v37  ;;  %v547_v10 = vld [vmem:[%s3633_s3 + $0xa0] sm:$0xff]  ;;  %v580_v29 = vadd.f32 %v548_v23, %v2977_v9  ;;  %v600_v32 = vpack.c.bf16 %v578_v27, %v577_v24  ;;  %v549_v36 = vld [vmem:[%s3633_s3 + $0xb0] sm:$0xff]  ;;  %v550_v37 = vld [vmem:[%s3633_s3 + $0xb8] sm:$0xff]  ;;  %v843_v27 = vpack.c.bf16 %v2841_v17, %v2838_v16  ;;  %v849_v16 = vpack.c.bf16 %v2933_v57, %v2930_v56 }
  0x1e   : > { %2515 = vmatprep.mubr.msk.bf16.mxu1 %vm483_vm1, %v595_v40  ;;  %v459_v7 = vpack.c.bf16 %v458_v1, %v458_v1  ;;  %2498 = vmatpush3.bf16.msra.mxu0 %v2650_v62  ;;  %v579_v28 = vadd.f32 %v547_v10, %v2973_v22  ;;  %v3005_v38 = vld [vmem:[%s2811_s30 + $0xc0] sm:$0xff]  ;;  %v3008_v39 = vld [vmem:[%s2811_s30 + $0xc8] sm:$0xff]  ;;  %v581_v46 = vadd.f32 %v549_v36, %v2993_v33  ;;  %v451_v53 = vld [vmem:[%s2811_s30 + $0xd0] sm:$0xff] }
  0x1f   : > { %v551_v40 = vld [vmem:[%s3633_s3 + $0xc0] sm:$0xff]  ;;  %v552_v45 = vld [vmem:[%s3633_s3 + $0xc8] sm:$0xff]  ;;  %v582_v47 = vadd.f32 %v550_v37, %v2996_v34  ;;  %v452_v54 = vld [vmem:[%s2811_s30 + $0xd8] sm:$0xff]  ;;  %v850_v17 = vpack.c.bf16 %v2964_v15, %v2961_v13 }
  0x20   : > { %v601_v35 = vpack.c.bf16 %v580_v29, %v579_v28  ;;  %v583_v48 = vadd.f32 %v551_v40, %v3005_v38  ;;  %v584_v49 = vadd.f32 %v552_v45, %v3008_v39  ;;  %v553_v58 = vld [vmem:[%s3633_s3 + $0xd0] sm:$0xff]  ;;  %v554_v59 = vld [vmem:[%s3633_s3 + $0xd8] sm:$0xff]  ;;  %v453_v60 = vld [vmem:[%s2811_s30 + $0xe0] sm:$0xff]  ;;  %v844_v28 = vpack.c.bf16 %v2858_v26, %v2855_v25 }
  0x21   : > { %2500 = vmatmul.mubr.msk.bf16.vlgmr.msra.gmra.mxu0 %vm483_vm1, %v459_v7  ;;  %v602_v50 = vpack.c.bf16 %v582_v47, %v581_v46  ;;  %v555_v62 = vld [vmem:[%s3633_s3 + $0xe0] sm:$0xff]  ;;  %v556_v63 = vld [vmem:[%s3633_s3 + $0xe8] sm:$0xff]  ;;  %v585_v0 = vadd.f32 %v553_v58, %v451_v53  ;;  %v586_v1 = vadd.f32 %v554_v59, %v452_v54  ;;  %v455_v6 = vld [vmem:[%s2811_s30 + $0xf0] sm:$0xff]  ;;  %v845_v29 = vpack.c.bf16 %v2867_v31, %v2864_v30 }
  0x22   : > { %2543 = vmatprep.mubr.msk.bf16.mxu0 %vm483_vm1, %v841_v8  ;;  %v587_v3 = vadd.f32 %v555_v62, %v453_v60  ;;  %v456_v8 = vld [vmem:[%s2811_s30 + $0xf8] sm:$0xff]  ;;  %v2651_v23 = vld [vmem:[%s3634_s4 + $0x28] sm:$0xff]   ;;  %v2652_v24 = vld [vmem:[%s3634_s4 + $0x20] sm:$0xff]   ;;  %v852_v25 = vpack.c.bf16 %v2996_v34, %v2993_v33  ;;  %v853_v26 = vpack.c.bf16 %v3008_v39, %v3005_v38  ;;  %v854_v30 = vpack.c.bf16 %v452_v54, %v451_v53 }
  0x23   : > { %v604_v5 = vpack.c.bf16 %v586_v1, %v585_v0  ;;  %2539 = vmatprep.subr.bf16.mxu0 %v2651_v23  ;;  %v3100_v43 = vld [vmem:[%s3635_s5 + $0x1] ss:$0 sm:$0xff]  ;;  %v2228_v39 = vld [vmem:[%s3635_s5] ss:$0 sm:$0xff] }
  0x24   : > { %2540 = vmatpush3.bf16.msra.mxu0 %v2651_v23 }
  0x25   : > { %2516 = vmatmul.mubr.msk.bf16.gmra.mxu1 %vm483_vm1, %v596_v55  ;;  %v603_v55 = vpack.c.bf16 %v584_v49, %v583_v48  ;;  %2541 = vmatprep.subr.bf16.mxu0 %v2652_v24 }
  0x26   : > { %2519 = vmatprep.mubr.msk.bf16.mxu1 %vm483_vm1, %v597_v61  ;;  %v454_v61 = vld [vmem:[%s2811_s30 + $0xe8] sm:$0xff] }
  0x27   : > { %v588_v4 = vadd.f32 %v556_v63, %v454_v61  ;;  %v855_v31 = vpack.c.bf16 %v454_v61, %v453_v60 }
  0x28   : > { %2542 = vmatpush3.bf16.msra.mxu0 %v2652_v24 }
  0x29   : > { %v605_v7 = vpack.c.bf16 %v588_v4, %v587_v3 }
  0x2b   : > { %2544 = vmatmul.mubr.msk.bf16.vlgmr.msra.gmra.mxu0 %vm483_vm1, %v842_v19  ;;  %v851_v19 = vpack.c.bf16 %v2977_v9, %v2973_v22 }
  0x2c   : > { %2547 = vmatprep.mubr.msk.bf16.mxu0 %vm483_vm1, %v843_v27 }
  0x2d   : > { %2520 = vmatmul.mubr.msk.bf16.gmra.mxu1 %vm483_vm1, %v598_v12  ;;  %v557_v12 = vld [vmem:[%s3633_s3 + $0xf0] sm:$0xff] }
  0x2e   : > { %2523 = vmatprep.mubr.msk.bf16.mxu1 %vm483_vm1, %v599_v18  ;;  %v558_v18 = vld [vmem:[%s3633_s3 + $0xf8] sm:$0xff]  ;;  %v589_v20 = vadd.f32 %v557_v12, %v455_v6 }
  0x2f   : > { %v590_v21 = vadd.f32 %v558_v18, %v456_v8 }
  0x31   : > { %v606_v10 = vpack.c.bf16 %v590_v21, %v589_v20 }
  0x33   : > { %2548 = vmatmul.mubr.msk.bf16.gmra.mxu0 %vm483_vm1, %v844_v28 }
  0x34   : > { %2551 = vmatprep.mubr.msk.bf16.mxu0 %vm483_vm1, %v845_v29 }
  0x35   : > { %2524 = vmatmul.mubr.msk.bf16.gmra.mxu1 %vm483_vm1, %v600_v32  ;;  %v846_v32 = vpack.c.bf16 %v2889_v42, %v2886_v41  ;;  %v856_v41 = vpack.c.bf16 %v456_v8, %v455_v6 }
  0x36   : > { %2527 = vmatprep.mubr.msk.bf16.mxu1 %vm483_vm1, %v601_v35 }
  0x3b   : > { %2552 = vmatmul.mubr.msk.bf16.gmra.mxu0 %vm483_vm1, %v846_v32 }
  0x3c   : > { %2555 = vmatprep.mubr.msk.bf16.mxu0 %vm483_vm1, %v847_v11 }
  0x3d   : > { %2528 = vmatmul.mubr.msk.bf16.gmra.mxu1 %vm483_vm1, %v602_v50 }
  0x3e   : > { %2531 = vmatprep.mubr.msk.bf16.mxu1 %vm483_vm1, %v603_v55 }
  0x43   : > { %2556 = vmatmul.mubr.msk.bf16.gmra.mxu0 %vm483_vm1, %v848_v14 }
  0x44   : > { %2559 = vmatprep.mubr.msk.bf16.mxu0 %vm483_vm1, %v849_v16 }
  0x45   : > { %2532 = vmatmul.mubr.msk.bf16.gmra.mxu1 %vm483_vm1, %v604_v5 }
  0x46   : > { %2535 = vmatprep.mubr.msk.bf16.mxu1 %vm483_vm1, %v605_v7 }
  0x4b   : > { %2560 = vmatmul.mubr.msk.bf16.gmra.mxu0 %vm483_vm1, %v850_v17 }
  0x4c   : > { %2563 = vmatprep.mubr.msk.bf16.mxu0 %vm483_vm1, %v851_v19 }
  0x4d   : > { %2536 = vmatmul.mubr.msk.bf16.gmra.mxu1 %vm483_vm1, %v606_v10 }
  0x53   : > { %2564 = vmatmul.mubr.msk.bf16.gmra.mxu0 %vm483_vm1, %v852_v25 }
  0x54   : > { %2567 = vmatprep.mubr.msk.bf16.mxu0 %vm483_vm1, %v853_v26 }
  0x5b   : > { %2568 = vmatmul.mubr.msk.bf16.gmra.mxu0 %vm483_vm1, %v854_v30 }
  0x5c   : > { %2571 = vmatprep.mubr.msk.bf16.mxu0 %vm483_vm1, %v855_v31 }
  0x63   : > { %2572 = vmatmul.mubr.msk.bf16.gmra.mxu0 %vm483_vm1, %v856_v41 }
  0xd5   : > { %v2509_v42 = vpop.f32.mrf.mxu1 }
  0xd6   : > { %v723_v52 = vadd.f32 %v2509_v42, %v3100_v43 }
  0xd7   : > { %v714_v44 = vpop.f32.mrf.mxu1 }
  0xd8   : > { %v715_v13 = vadd.f32 %v3100_v43, %v714_v44 }
  0xd9   : > { %v2510_v51 = vpop.f32.mrf.mxu1 }
  0xda   : > { %v726_v56 = vadd.f32 %v2510_v51, %v3100_v43 }
  0xdb   : > { %v717_v57 = vpop.f32.mrf.mxu1 }
  0xdc   : > { %v3105_v15 = vpack.c.bf16 %v726_v56, %v723_v52  ;;  %v718_v22 = vadd.f32 %v3100_v43, %v717_v57 }
  0xdd   : > { %v3108_v9 = vpop.f32.mrf.mxu1 }
  0xde   : > { %v3110_v33 = vpack.c.bf16 %v718_v22, %v715_v13 }
  0xdf   : > { %v3112_v34 = vpop.f32.mrf.mxu1 }
  0xe1   : > { %v3114_v35 = vpop.f32.mrf.mxu1  ;;  %v521_v45 = vpop.f32.mrf.mxu0 }
  0xe2   : > { %v522_v47 = vadd.f32 %v2228_v39, %v521_v45  ;;  %v742_v57 = vadd.f32 %v3114_v35, %v3100_v43 }
  0xe3   : > { %v3116_v36 = vpop.f32.mrf.mxu1  ;;  %v2501_v48 = vpop.f32.mrf.mxu0 }
  0xe4   : > { %v3121_v50 = vpack.c.bf16 %v522_v47, %v522_v47  ;;  %v734_v45 = vadd.f32 %v3100_v43, %v3116_v36 }
  0xe5   : > { %v2517_v37 = vpop.f32.mrf.mxu1  ;;  %v524_v53 = vpop.f32.mrf.mxu0 }
  0xe6   : > { %2348 = vmatprep.mubr.msk.bf16.mxu1 %vm1131_vm2, %v3121_v50  ;;  %v755_v25 = vadd.f32 %v2517_v37, %v3100_v43  ;;  %v739_v37 = vadd.f32 %v3108_v9, %v3100_v43  ;;  %v731_v9 = vadd.f32 %v3100_v43, %v3112_v34 }
  0xe7   : > { %v746_v38 = vpop.f32.mrf.mxu1  ;;  %v2502_v55 = vpop.f32.mrf.mxu0 }
  0xe8   : > { %v747_v51 = vadd.f32 %v3100_v43, %v746_v38 }
  0xe9   : > { %v2518_v40 = vpop.f32.mrf.mxu1 }
  0xea   : > { %v758_v14 = vadd.f32 %v2518_v40, %v3100_v43  ;;  %v3190_v40 = vpack.c.bf16 %v742_v57, %v739_v37 }
  0xeb   : > { %v749_v46 = vpop.f32.mrf.mxu1 }
  0xec   : > { %v3160_v41 = vpack.c.bf16 %v758_v14, %v755_v25  ;;  %v750_v42 = vadd.f32 %v3100_v43, %v749_v46 }
  0xed   : > { %v2521_v49 = vpop.f32.mrf.mxu1 }
  0xee   : > { %v771_v59 = vadd.f32 %v2521_v49, %v3100_v43  ;;  %v3176_v13 = vpack.c.bf16 %v750_v42, %v747_v51  ;;  %v3206_v49 = vpack.c.bf16 %v734_v45, %v731_v9  ;;  %v1151_v34 = vsel %vm1131_vm2, %v3160_v41, 0 }
  0xef   : > { %v762_v54 = vpop.f32.mrf.mxu1 }
  0xf0   : > { %v763_v62 = vadd.f32 %v3100_v43, %v762_v54 }
  0xf1   : > { %v2522_v58 = vpop.f32.mrf.mxu1 }
  0xf2   : > { %v774_v60 = vadd.f32 %v2522_v58, %v3100_v43 }
  0xf3   : > { %v765_v61 = vpop.f32.mrf.mxu1 }
  0xf4   : > { %v3128_v63 = vpack.c.bf16 %v774_v60, %v771_v59  ;;  %v766_v0 = vadd.f32 %v3100_v43, %v765_v61 }
  0xf5   : > { %v3131_v1 = vpop.f32.mrf.mxu1 }
  0xf6   : > { %v3133_v3 = vpack.c.bf16 %v766_v0, %v763_v62  ;;  %1314 = vrot.lane.b32.xlu0 %v3128_v63, %s2708_s21  ;;  %v1157_v31 = vsel %vm1131_vm2, %v3128_v63, 0  ;;  %v787_v55 = vadd.f32 %v3131_v1, %v3100_v43  ;;  %v1148_v62 = vsel %vm1131_vm2, %v3176_v13, 0 }
  0xf7   : > { %v3137_v4 = vpop.f32.mrf.mxu1  ;;  %v1142_v0 = vsel %vm1131_vm2, %v3206_v49, 0  ;;  %v1139_v1 = vsel %vm1131_vm2, %v3105_v15, 0 }
  0xf8   : > { %1312 = vrot.lane.b32.xlu1 %v3133_v3, %s2708_s21  ;;  %v1154_v35 = vsel %vm1131_vm2, %v3133_v3, 0  ;;  %v779_v60 = vadd.f32 %v3100_v43, %v3137_v4  ;;  %v1136_v4 = vsel %vm1131_vm2, %v3110_v33, 0 }
  0xf9   : > { %v2526_v5 = vpop.f32.mrf.mxu1 }
  0xfa   : > { %v790_v53 = vadd.f32 %v2526_v5, %v3100_v43  ;;  %v2545_v5 = vpop.f32.mrf.mxu0 }
  0xfb   : > { %v3141_v6 = vpop.f32.mrf.mxu1 }
  0xfc   : > { %v3224_v58 = vpack.c.bf16 %v790_v53, %v787_v55  ;;  %v782_v59 = vadd.f32 %v3100_v43, %v3141_v6  ;;  %v3263_v6 = vld [vmem:[%s3635_s5 + $0x2] ss:$0 sm:$0xff] }
  0xfd   : > { %v2529_v7 = vpop.f32.mrf.mxu1 }
  0xfe   : > { %v803_v46 = vadd.f32 %v2529_v7, %v3100_v43  ;;  %v3234_v61 = vpack.c.bf16 %v782_v59, %v779_v60  ;;  %v964_v7 = vpop.f32.mrf.mxu0 }
  0xff   : > { %v794_v8 = vpop.f32.mrf.mxu1 }
 0x100   : > { %v795_v36 = vadd.f32 %v3100_v43, %v794_v8  ;;  %v973_v8 = vadd.f32 %v2545_v5, %v3263_v6 }
 0x101   : > { %v2530_v12 = vpop.f32.mrf.mxu1 }
 0x102   : > { %v806_v38 = vadd.f32 %v2530_v12, %v3100_v43  ;;  %v2546_v12 = vpop.f32.mrf.mxu0 }
 0x103   : > { %v797_v18 = vpop.f32.mrf.mxu1 }
 0x104   : > { %v3201_v47 = vpack.c.bf16 %v806_v38, %v803_v46  ;;  %v798_v48 = vadd.f32 %v3100_v43, %v797_v18  ;;  %v965_v18 = vadd.f32 %v3263_v6, %v964_v7 }
 0x105   : > { %v2533_v20 = vpop.f32.mrf.mxu1 }
 0x106   : > { %v819_v44 = vadd.f32 %v2533_v20, %v3100_v43  ;;  %v3212_v54 = vpack.c.bf16 %v798_v48, %v795_v36  ;;  %v976_v20 = vadd.f32 %v2546_v12, %v3263_v6 }
 0x107   : > { %v810_v21 = vpop.f32.mrf.mxu1 }
 0x108   : > { %v811_v22 = vadd.f32 %v3100_v43, %v810_v21  ;;  %v967_v21 = vpop.f32.mrf.mxu0 }
 0x109   : > { %v2534_v10 = vpop.f32.mrf.mxu1 }
 0x10a   : > { %v822_v26 = vadd.f32 %v2534_v10, %v3100_v43  ;;  %v3270_v10 = vpack.c.bf16 %v976_v20, %v973_v8 }
 0x10b   : > { %v813_v23 = vpop.f32.mrf.mxu1 }
 0x10c   : > { %v3169_v52 = vpack.c.bf16 %v822_v26, %v819_v44  ;;  %v814_v56 = vadd.f32 %v3100_v43, %v813_v23  ;;  %v968_v23 = vadd.f32 %v3263_v6, %v967_v21 }
 0x10d   : > { %v2537_v24 = vpop.f32.mrf.mxu1 }
 0x10e   : > { %v835_v29 = vadd.f32 %v2537_v24, %v3100_v43  ;;  %v3184_v39 = vpack.c.bf16 %v814_v56, %v811_v22  ;;  %v2549_v24 = vpop.f32.mrf.mxu0 }
 0x10f   : > { %v826_v27 = vpop.f32.mrf.mxu1 }
 0x110   : > { %v827_v16 = vadd.f32 %v3100_v43, %v826_v27  ;;  %v3273_v27 = vpack.c.bf16 %v968_v23, %v965_v18 }
 0x111   : > { %v2538_v28 = vpop.f32.mrf.mxu1 }
 0x112   : > { %v838_v32 = vadd.f32 %v2538_v28, %v3100_v43  ;;  %v980_v28 = vpop.f32.mrf.mxu0 }
 0x113   : > { %v829_v11 = vpop.f32.mrf.mxu1 }
 0x114   : > { %v3147_v17 = vpack.c.bf16 %v838_v32, %v835_v29  ;;  %v830_v19 = vadd.f32 %v3100_v43, %v829_v11  ;;  %v1145_v43 = vsel %vm1131_vm2, %v3190_v40, 0  ;;  %v989_v29 = vadd.f32 %v2549_v24, %v3263_v6  ;;  %v2550_v32 = vpop.f32.mrf.mxu0 }
 0x115   : > { %v981_v11 = vadd.f32 %v3263_v6, %v980_v28  ;;  %v992_v14 = vadd.f32 %v2550_v32, %v3263_v6 }
 0x116   : > { %v3152_v30 = vpack.c.bf16 %v830_v19, %v827_v16  ;;  %1330 = vrot.lane.b32.xlu0 %v3147_v17, %s2708_s21  ;;  %2583 = vmatprep.subr.msk.bf16.mxu1 %vm1131_vm2, %v3147_v17  ;;  %v983_v16 = vpop.f32.mrf.mxu0 }
 0x117   : > { %2333 = vmatpush3.bf16.xpose.msra.mxu1 %v1157_v31  ;;  %v3278_v19 = vpack.c.bf16 %v992_v14, %v989_v29  ;;  %v984_v25 = vadd.f32 %v3263_v6, %v983_v16 }
 0x118   : > { %2584 = vmatprep.subr.msk.bf16.mxu1 %vm1131_vm2, %v3152_v30  ;;  %1328 = vrot.lane.b32.xlu1 %v3152_v30, %s2708_s21  ;;  %v2553_v26 = vpop.f32.mrf.mxu0 }
 0x119   : > { %v3281_v31 = vpack.c.bf16 %v984_v25, %v981_v11 }
 0x11a   : > { %1310 = vrot.lane.b32.xlu0 %v3160_v41, %s2708_s21  ;;  %v996_v42 = vpop.f32.mrf.mxu0 }
 0x11c   : > { %1326 = vrot.lane.b32.xlu1 %v3169_v52, %s2708_s21  ;;  %v2554_v44 = vpop.f32.mrf.mxu0 }
 0x11e   : > { %1308 = vrot.lane.b32.xlu0 %v3176_v13, %s2708_s21  ;;  %v999_v51 = vpop.f32.mrf.mxu0 }
 0x11f   : > { %2335 = vmatpush3.bf16.xpose.msra.mxu1 %v1154_v35 }
 0x120   : > { %1324 = vrot.lane.b32.xlu1 %v3184_v39, %s2708_s21  ;;  %2585 = vmatprep.subr.msk.bf16.mxu1 %vm1131_vm2, %v3169_v52  ;;  %v2557_v56 = vpop.f32.mrf.mxu0 }
 0x121   : > { %v1021_v22 = vadd.f32 %v2557_v56, %v3263_v6 }
 0x122   : > { %1306 = vrot.lane.b32.xlu0 %v3190_v40, %s2708_s21  ;;  %v1012_v57 = vpop.f32.mrf.mxu0 }
 0x123   : > { %v1013_v29 = vadd.f32 %v3263_v6, %v1012_v57  ;;  %v1005_v57 = vadd.f32 %v2553_v26, %v3263_v6 }
 0x124   : > { %1322 = vrot.lane.b32.xlu1 %v3201_v47, %s2708_s21  ;;  %v2558_v37 = vpop.f32.mrf.mxu0 }
 0x125   : > { %v1024_v38 = vadd.f32 %v2558_v37, %v3263_v6 }
 0x126   : > { %1304 = vrot.lane.b32.xlu0 %v3206_v49, %s2708_s21  ;;  %v1015_v35 = vpop.f32.mrf.mxu0 }
 0x127   : > { %2337 = vmatpush3.bf16.xpose.msra.mxu1 %v1151_v34  ;;  %v3285_v45 = vpack.c.bf16 %v1024_v38, %v1021_v22  ;;  %v1016_v32 = vadd.f32 %v3263_v6, %v1015_v35  ;;  %v1008_v35 = vadd.f32 %v2554_v44, %v3263_v6  ;;  %v997_v44 = vadd.f32 %v3263_v6, %v996_v42 }
 0x128   : > { %1320 = vrot.lane.b32.xlu1 %v3212_v54, %s2708_s21  ;;  %2586 = vmatprep.subr.msk.bf16.mxu1 %vm1131_vm2, %v3184_v39  ;;  %v3287_v46 = vpop.f32.mrf.mxu0 }
 0x12a   : > { %1302 = vrot.lane.b32.xlu0 %v3105_v15, %s2708_s21  ;;  %v3291_v9 = vpop.f32.mrf.mxu0 }
 0x12c   : > { %1318 = vrot.lane.b32.xlu1 %v3224_v58, %s2708_s21  ;;  %v3293_v48 = vpop.f32.mrf.mxu0 }
 0x12e   : > { %1300 = vrot.lane.b32.xlu0 %v3110_v33, %s2708_s21  ;;  %v3295_v36 = vpop.f32.mrf.mxu0 }
 0x12f   : > { %2339 = vmatpush3.bf16.xpose.msra.mxu1 %v1148_v62 }
 0x130   : > { %1316 = vrot.lane.b32.xlu1 %v3234_v61, %s2708_s21  ;;  %2587 = vmatprep.subr.msk.bf16.mxu1 %vm1131_vm2, %v3201_v47  ;;  %v2565_v53 = vpop.f32.mrf.mxu0 }
 0x132   : > { %1282 = vrot.lane.b32.xlu0 %v3121_v50, %s2708_s21  ;;  %v1044_v34 = vpop.f32.mrf.mxu0 }
 0x134   : > { %v2566_v55 = vpop.f32.mrf.mxu0 }
 0x136   : > { %1471 = vrot.lane.b32.xlu0 %v3285_v45, %s2708_s21  ;;  %v1047_v59 = vpop.f32.mrf.mxu0 }
 0x137   : > { %2341 = vmatpush3.bf16.xpose.msra.mxu1 %v1145_v43 }
 0x138   : > { %2588 = vmatprep.subr.msk.bf16.mxu1 %vm1131_vm2, %v3212_v54  ;;  %v2569_v60 = vpop.f32.mrf.mxu0 }
 0x139   : > { %v1069_v14 = vadd.f32 %v2569_v60, %v3263_v6 }
 0x13a   : > { %v1060_v62 = vpop.f32.mrf.mxu0 }
 0x13c   : > { %v2570_v43 = vpop.f32.mrf.mxu0 }
 0x13d   : > { %v1072_v16 = vadd.f32 %v2570_v43, %v3263_v6  ;;  %v1061_v43 = vadd.f32 %v3263_v6, %v1060_v62  ;;  %v1053_v62 = vadd.f32 %v2565_v53, %v3263_v6  ;;  %v1045_v53 = vadd.f32 %v3263_v6, %v1044_v34 }
 0x13f   : > { %2343 = vmatpush3.bf16.xpose.msra.mxu1 %v1142_v0 }
 0x140   : > { %2589 = vmatprep.subr.msk.bf16.mxu1 %vm1131_vm2, %v3224_v58 }
 0x147   : > { %2345 = vmatpush3.bf16.xpose.msra.mxu1 %v1139_v1  ;;  %v1063_v1 = vpop.f32.mrf.mxu0 }
 0x148   : > { %2590 = vmatprep.subr.msk.bf16.mxu1 %vm1131_vm2, %v3234_v61 }
 0x149   : > { %v2573_v5 = vpop.f32.mrf.mxu0 }
 0x14a   : > { %v1085_v20 = vadd.f32 %v2573_v5, %v3263_v6  ;;  %v3320_v5 = vpack.c.bf16 %v1072_v16, %v1069_v14 }
 0x14b   : > { %v1076_v12 = vpop.f32.mrf.mxu0 }
 0x14c   : > { %v1077_v24 = vadd.f32 %v3263_v6, %v1076_v12 }
 0x14d   : > { %v2574_v21 = vpop.f32.mrf.mxu0 }
 0x14e   : > { %v1088_v28 = vadd.f32 %v2574_v21, %v3263_v6 }
 0x14f   : > { %2347 = vmatpush3.bf16.xpose.msra.mxu1 %v1136_v4  ;;  %v1079_v11 = vpop.f32.mrf.mxu0 }
 0x150   : > { %v3307_v25 = vpack.c.bf16 %v1088_v28, %v1085_v20  ;;  %v1080_v56 = vadd.f32 %v3263_v6, %v1079_v11  ;;  %v1040_v28 = vadd.f32 %v3293_v48, %v3263_v6  ;;  %v1029_v11 = vadd.f32 %v3263_v6, %v3291_v9 }
 0x152   : > { %v3310_v37 = vpack.c.bf16 %v1080_v56, %v1077_v24  ;;  %2350 = vmatprep.subr.bf16.mxu0 %v3307_v25 }
 0x153   : > { %2351 = vmatpush3.bf16.msra.mxu0 %v3285_v45 }
 0x154   : > { %2352 = vmatprep.subr.bf16.mxu0 %v3310_v37  ;;  %1485 = vrot.lane.b32.xlu0 %v3310_v37, %s2708_s21 }
 0x156   : > { %2349 = vmatmul.mubr.msk.bf16.vlgmr.msra.gmra.mxu1 %vm1131_vm2, %v3121_v50 }
 0x168   : > { %v1315_v0 = vpop.permute.xlu0 %1314 }
 0x169   : > { %v1357_v8 = vsel %vm1131_vm2, %v1315_v0, 0  ;;  %v3316_v0 = vpack.c.bf16 %v1016_v32, %v1013_v29 }
 0x16a   : > { %v1313_v4 = vpop.permute.xlu1 %1312 }
 0x16b   : > { %v1354_v38 = vsel %vm1131_vm2, %v1313_v4, 0  ;;  %v3328_v4 = vpack.c.bf16 %v1008_v35, %v1005_v57  ;;  %2353 = vmatpush3.bf16.msra.mxu0 %v3316_v0  ;;  %1469 = vrot.lane.b32.xlu0 %v3316_v0, %s2708_s21 }
 0x16c   : > { %2354 = vmatprep.subr.bf16.mxu0 %v3320_v5 }
 0x16f   : > { %2355 = vmatpush3.bf16.msra.mxu0 %v3328_v4 }
 0x188   : > { %v1331_v7 = vpop.permute.xlu0 %1330 }
 0x189   : > { %2591 = vmatprep.subr.msk.bf16.mxu1 %vm1131_vm2, %v1331_v7  ;;  %v1064_v7 = vadd.f32 %v3263_v6, %v1063_v1  ;;  %v1056_v1 = vadd.f32 %v2566_v55, %v3263_v6  ;;  %v1048_v55 = vadd.f32 %v3263_v6, %v1047_v59 }
 0x18a   : > { %v1329_v18 = vpop.permute.xlu1 %1328  ;;  %2373 = vmatpush3.bf16.xpose.msra.mxu1 %v1357_v8  ;;  %v1000_v8 = vadd.f32 %v3263_v6, %v999_v51 }
 0x18b   : > { %2592 = vmatprep.subr.msk.bf16.mxu1 %vm1131_vm2, %v1329_v18  ;;  %v3334_v12 = vpack.c.bf16 %v1064_v7, %v1061_v43  ;;  %v3344_v21 = vpack.c.bf16 %v1056_v1, %v1053_v62  ;;  %v3354_v29 = vpack.c.bf16 %v1048_v55, %v1045_v53 }
 0x18c   : > { %v1311_v23 = vpop.permute.xlu0 %1310  ;;  %v3340_v20 = vpack.c.bf16 %v1000_v8, %v997_v44 }
 0x18d   : > { %v1351_v42 = vsel %vm1131_vm2, %v1311_v23, 0  ;;  %2356 = vmatprep.subr.bf16.mxu0 %v3334_v12  ;;  %v1037_v23 = vadd.f32 %v3287_v46, %v3263_v6  ;;  %v1032_v46 = vadd.f32 %v3263_v6, %v3295_v36 }
 0x18e   : > { %v1327_v60 = vpop.permute.xlu1 %1326  ;;  %2357 = vmatpush3.bf16.msra.mxu0 %v3340_v20 }
 0x18f   : > { %2358 = vmatprep.subr.bf16.mxu0 %v3344_v21  ;;  %v3361_v14 = vpack.c.bf16 %v1040_v28, %v1037_v23  ;;  %v3369_v16 = vpack.c.bf16 %v1032_v46, %v1029_v11 }
 0x190   : > { %v1309_v22 = vpop.permute.xlu0 %1308 }
 0x191   : > { %v1348_v59 = vsel %vm1131_vm2, %v1309_v22, 0 }
 0x192   : > { %2375 = vmatpush3.bf16.xpose.msra.mxu1 %v1354_v38  ;;  %v1325_v51 = vpop.permute.xlu1 %1324  ;;  %2359 = vmatpush3.bf16.msra.mxu0 %v3278_v19 }
 0x193   : > { %2593 = vmatprep.subr.msk.bf16.mxu1 %vm1131_vm2, %v1327_v60  ;;  %2360 = vmatprep.subr.bf16.mxu0 %v3354_v29 }
 0x194   : > { %v1307_v26 = vpop.permute.xlu0 %1306 }
 0x195   : > { %v1345_v9 = vsel %vm1131_vm2, %v1307_v26, 0 }
 0x196   : > { %v1323_v32 = vpop.permute.xlu1 %1322  ;;  %2361 = vmatpush3.bf16.msra.mxu0 %v3281_v31 }
 0x197   : > { %2362 = vmatprep.subr.bf16.mxu0 %v3361_v14 }
 0x198   : > { %v1305_v18 = vpop.permute.xlu0 %1304 }
 0x199   : > { %v1342_v6 = vsel %vm1131_vm2, %v1305_v18, 0 }
 0x19a   : > { %2377 = vmatpush3.bf16.xpose.msra.mxu1 %v1351_v42  ;;  %2363 = vmatpush3.bf16.msra.mxu0 %v3270_v10  ;;  %v1321_v56 = vpop.permute.xlu1 %1320 }
 0x19b   : > { %2594 = vmatprep.subr.msk.bf16.mxu1 %vm1131_vm2, %v1325_v51  ;;  %2364 = vmatprep.subr.bf16.mxu0 %v3369_v16 }
 0x19c   : > { %v1303_v24 = vpop.permute.xlu0 %1302 }
 0x19d   : > { %v1339_v22 = vsel %vm1131_vm2, %v1303_v24, 0 }
 0x19e   : > { %2365 = vmatpush3.bf16.msra.mxu0 %v3273_v27  ;;  %v1319_v36 = vpop.permute.xlu1 %1318 }
 0x1a0   : > { %v1301_v34 = vpop.permute.xlu0 %1300 }
 0x1a1   : > { %v1336_v57 = vsel %vm1131_vm2, %v1301_v34, 0 }
 0x1a2   : > { %2379 = vmatpush3.bf16.xpose.msra.mxu1 %v1348_v59  ;;  %v1317_v38 = vpop.permute.xlu1 %1316 }
 0x1a3   : > { %2595 = vmatprep.subr.msk.bf16.mxu1 %vm1131_vm2, %v1323_v32 }
 0x1a4   : > { %v1283_v48 = vpop.permute.xlu0 %1282 }
 0x1a5   : > { %2388 = vmatprep.mubr.msk.bf16.mxu1 %vm1131_vm2, %v1283_v48 }
 0x1a8   : > { %v1472_v32 = vpop.permute.xlu0 %1471 }
 0x1aa   : > { %2381 = vmatpush3.bf16.xpose.msra.mxu1 %v1345_v9 }
 0x1ab   : > { %2596 = vmatprep.subr.msk.bf16.mxu1 %vm1131_vm2, %v1321_v56 }
 0x1b2   : > { %2383 = vmatpush3.bf16.xpose.msra.mxu1 %v1342_v6 }
 0x1b3   : > { %2597 = vmatprep.subr.msk.bf16.mxu1 %vm1131_vm2, %v1319_v36 }
 0x1ba   : > { %2385 = vmatpush3.bf16.xpose.msra.mxu1 %v1339_v22 }
 0x1bb   : > { %2598 = vmatprep.subr.msk.bf16.mxu1 %vm1131_vm2, %v1317_v38 }
 0x1c2   : > { %2387 = vmatpush3.bf16.xpose.msra.mxu1 %v1336_v57 }
 0x1c6   : > { %v1486_v11 = vpop.permute.xlu0 %1485 }
 0x1c9   : > { %2389 = vmatmul.mubr.msk.bf16.vlgmr.msra.gmra.mxu1 %vm1131_vm2, %v1283_v48 }
 0x1dd   : > { %v1470_v46 = vpop.permute.xlu0 %1469 }
 0x216   : > { %v1217_v35 = vpop.f32.mrf.mxu1 }
 0x218   : > { %v1219_v60 = vpop.f32.mrf.mxu1 }
 0x219   : > { %v1224_v43 = vmax.f32 %v1217_v35, %v1219_v60 }
 0x21a   : > { %v1221_v7 = vpop.f32.mrf.mxu1 }
 0x21b   : > { %1225 = vmax.xlane.f32.xlu1 %v1224_v43 }
 0x21c   : > { %v1222_v26 = vpop.f32.mrf.mxu1 }
 0x22c   : > { %1487 = vrot.lane.b32.xlu1 %v3307_v25, %s2708_s21 }
 0x230   : > { %1477 = vrot.lane.b32.xlu1 %v3354_v29, %s2708_s21 }
 0x234   : > { %1457 = vrot.lane.b32.xlu1 %v3273_v27, %s2708_s21 }
 0x289   : > { %v1417_v44 = vpop.f32.mrf.mxu1 }
 0x28b   : > { %v1419_v8 = vpop.f32.mrf.mxu1 }
 0x28c   : > { %v1424_v62 = vmax.f32 %v1417_v44, %v1419_v8 }
 0x28d   : > { %v1421_v1 = vpop.f32.mrf.mxu1 }
 0x28e   : > { %1425 = vmax.xlane.f32.xlu0 %v1424_v62 }
 0x28f   : > { %v1422_v18 = vpop.f32.mrf.mxu1 }
 0x2a4   : > { %v1226_v42 = vpop.xlane.xlu1 %1225  ;;  %1483 = vrot.lane.b32.xlu0 %v3320_v5, %s2708_s21 }
 0x2a5   : > { %v1227_v53 = vsub.f32 %v1217_v35, %v1226_v42  ;;  %v1228_v55 = vsub.f32 %v1219_v60, %v1226_v42 }
 0x2a7   : > { %v1229_v24 = vmul.f32 1.442695, %v1227_v53  ;;  %v1231_v23 = vmul.f32 1.442695, %v1228_v55 }
 0x2a8   : > { %v1488_v51 = vpop.permute.xlu1 %1487  ;;  %1467 = vrot.lane.b32.xlu0 %v3328_v4, %s2708_s21 }
 0x2a9   : > { %2390 = vmatprep.subr.bf16.mxu0 %v1488_v51  ;;  %2655 = vpow2.f32 %v1229_v24 }
 0x2aa   : > { %2657 = vpow2.f32 %v1231_v23 }
 0x2b6   : > { %v2656_v28 = vpop.eup %2655 }
 0x2b7   : > { %v2658_v34 = vpop.eup %2657 }
 0x2b8   : > { %v1233_v59 = vadd.f32 %v2658_v34, %v2656_v28 }
 0x2c7   : > { %1234 = vadd.xlane.f32.xlu0 %v1233_v59 }
 0x2dd   : > { %1481 = vrot.lane.b32.xlu0 %v3334_v12, %s2708_s21 }
 0x2e1   : > { %1465 = vrot.lane.b32.xlu0 %v3340_v20, %s2708_s21 }
 0x2e5   : > { %1479 = vrot.lane.b32.xlu0 %v3344_v21, %s2708_s21 }
 0x2e9   : > { %1463 = vrot.lane.b32.xlu0 %v3278_v19, %s2708_s21 }
 0x2ed   : > { %1461 = vrot.lane.b32.xlu0 %v3281_v31, %s2708_s21 }
 0x2f1   : > { %1475 = vrot.lane.b32.xlu0 %v3361_v14, %s2708_s21 }
 0x2f5   : > { %1459 = vrot.lane.b32.xlu0 %v3270_v10, %s2708_s21 }
 0x2f9   : > { %1473 = vrot.lane.b32.xlu0 %v3369_v16, %s2708_s21 }
 0x2fd   : > { %1561 = vrot.lane.b32.xlu0 %v3128_v63, %s2709_s26 }
 0x301   : > { %1559 = vrot.lane.b32.xlu0 %v3133_v3, %s2709_s26 }
 0x305   : > { %1557 = vrot.lane.b32.xlu0 %v3160_v41, %s2709_s26 }
 0x309   : > { %1555 = vrot.lane.b32.xlu0 %v3176_v13, %s2709_s26 }
 0x30d   : > { %1553 = vrot.lane.b32.xlu0 %v3190_v40, %s2709_s26 }
 0x311   : > { %1551 = vrot.lane.b32.xlu0 %v3206_v49, %s2709_s26 }
 0x315   : > { %1549 = vrot.lane.b32.xlu0 %v3105_v15, %s2709_s26 }
 0x317   : > { %v1426_v48 = vpop.xlane.xlu0 %1425 }
 0x318   : > { %v1427_v9 = vsub.f32 %v1417_v44, %v1426_v48  ;;  %v1428_v56 = vsub.f32 %v1419_v8, %v1426_v48 }
 0x319   : > { %1547 = vrot.lane.b32.xlu0 %v3110_v33, %s2709_s26 }
 0x31a   : > { %v1429_v6 = vmul.f32 1.442695, %v1427_v9  ;;  %v1431_v36 = vmul.f32 1.442695, %v1428_v56 }
 0x31b   : > { %v1484_v35 = vpop.permute.xlu0 %1483 }
 0x31c   : > { %2659 = vpow2.f32 %v1429_v6 }
 0x31d   : > { %2661 = vpow2.f32 %v1431_v36  ;;  %1545 = vrot.lane.b32.xlu0 %v3121_v50, %s2709_s26 }
 0x31f   : > { %v1468_v60 = vpop.permute.xlu0 %1467 }
 0x321   : > { %1718 = vrot.lane.b32.xlu0 %v3307_v25, %s2709_s26 }
 0x325   : > { %1702 = vrot.lane.b32.xlu0 %v3285_v45, %s2709_s26 }
 0x329   : > { %v3431_v22 = vpop.eup %2659  ;;  %1700 = vrot.lane.b32.xlu0 %v3316_v0, %s2709_s26 }
 0x32a   : > { %v3435_v38 = vpop.eup %2661 }
 0x32b   : > { %v1433_v57 = vadd.f32 %v3435_v38, %v3431_v22 }
 0x32d   : > { %1434 = vadd.xlane.f32.xlu1 %v1433_v57  ;;  %1696 = vrot.lane.b32.xlu0 %v3340_v20, %s2709_s26 }
 0x331   : > { %1694 = vrot.lane.b32.xlu0 %v3278_v19, %s2709_s26 }
 0x335   : > { %1692 = vrot.lane.b32.xlu0 %v3281_v31, %s2709_s26 }
 0x339   : > { %1690 = vrot.lane.b32.xlu0 %v3270_v10, %s2709_s26 }
 0x33d   : > { %1688 = vrot.lane.b32.xlu0 %v3273_v27, %s2709_s26 }
 0x33e   : > { %1577 = vrot.lane.b32.xlu1 %v3147_v17, %s2709_s26 }
 0x342   : > { %1575 = vrot.lane.b32.xlu1 %v3152_v30, %s2709_s26 }
 0x346   : > { %1573 = vrot.lane.b32.xlu1 %v3169_v52, %s2709_s26 }
 0x34a   : > { %1571 = vrot.lane.b32.xlu1 %v3184_v39, %s2709_s26 }
 0x34e   : > { %1569 = vrot.lane.b32.xlu1 %v3201_v47, %s2709_s26 }
 0x350   : > { %v1235_v43 = vpop.xlane.xlu0 %1234 }
 0x351   : > { %2663 = vrcp.f32 %v1235_v43 }
 0x352   : > { %1567 = vrot.lane.b32.xlu1 %v3212_v54, %s2709_s26 }
 0x354   : > { %v1482_v7 = vpop.permute.xlu0 %1481 }
 0x356   : > { %1565 = vrot.lane.b32.xlu1 %v3224_v58, %s2709_s26 }
 0x358   : > { %v1466_v26 = vpop.permute.xlu0 %1465 }
 0x35a   : > { %1563 = vrot.lane.b32.xlu1 %v3234_v61, %s2709_s26 }
 0x35c   : > { %v1480_v44 = vpop.permute.xlu0 %1479 }
 0x35e   : > { %v2664_v8 = vpop.eup %2663 }
 0x35f   : > { %v1238_v62 = vmul.f32 %v2664_v8, %v2658_v34  ;;  %v1237_v1 = vmul.f32 %v2664_v8, %v2656_v28  ;;  %v1478_v34 = vpop.permute.xlu1 %1477 }
 0x360   : > { %v1464_v18 = vpop.permute.xlu0 %1463 }
 0x361   : > { %v1240_v42 = vpack.c.bf16 %v1238_v62, %v1238_v62  ;;  %v1239_v51 = vpack.c.bf16 %v1237_v1, %v1237_v1 }
 0x363   : > { %1273 = vmatprep.mubr.bf16.mxu0 %v1240_v42 }
 0x364   : > { %v1462_v53 = vpop.permute.xlu0 %1461  ;;  %1274 = vmatmul.mubr.bf16.vlgmr.msra.gmra.mxu0 %v1239_v51 }
 0x365   : > { %2391 = vmatpush3.bf16.msra.mxu0 %v1472_v32  ;;  %v1458_v32 = vpop.permute.xlu1 %1457 }
 0x366   : > { %2392 = vmatprep.subr.bf16.mxu0 %v1486_v11 }
 0x368   : > { %v1476_v55 = vpop.permute.xlu0 %1475 }
 0x369   : > { %2393 = vmatpush3.bf16.msra.mxu0 %v1470_v46 }
 0x36a   : > { %2394 = vmatprep.subr.bf16.mxu0 %v1484_v35 }
 0x36c   : > { %v1460_v24 = vpop.permute.xlu0 %1459 }
 0x36d   : > { %2395 = vmatpush3.bf16.msra.mxu0 %v1468_v60 }
 0x36e   : > { %2396 = vmatprep.subr.bf16.mxu0 %v1482_v7 }
 0x370   : > { %v1474_v23 = vpop.permute.xlu0 %1473 }
 0x371   : > { %2397 = vmatpush3.bf16.msra.mxu0 %v1466_v26 }
 0x372   : > { %2398 = vmatprep.subr.bf16.mxu0 %v1480_v44 }
 0x374   : > { %v1562_v59 = vpop.permute.xlu0 %1561 }
 0x375   : > { %2399 = vmatpush3.bf16.msra.mxu0 %v1464_v18  ;;  %v1604_v1 = vsel %vm1131_vm2, %v1562_v59, 0 }
 0x376   : > { %2400 = vmatprep.subr.bf16.mxu0 %v1478_v34 }
 0x378   : > { %v1560_v28 = vpop.permute.xlu0 %1559 }
 0x379   : > { %2401 = vmatpush3.bf16.msra.mxu0 %v1462_v53  ;;  %v1601_v42 = vsel %vm1131_vm2, %v1560_v28, 0 }
 0x37a   : > { %2402 = vmatprep.subr.bf16.mxu0 %v1476_v55 }
 0x37c   : > { %v1558_v48 = vpop.permute.xlu0 %1557 }
 0x37d   : > { %2403 = vmatpush3.bf16.msra.mxu0 %v1460_v24 }
 0x37e   : > { %2404 = vmatprep.subr.bf16.mxu0 %v1474_v23 }
 0x380   : > { %v1556_v11 = vpop.permute.xlu0 %1555 }
 0x381   : > { %2405 = vmatpush3.bf16.msra.mxu0 %v1458_v32  ;;  %v1595_v53 = vsel %vm1131_vm2, %v1556_v11, 0 }
 0x384   : > { %v1554_v46 = vpop.permute.xlu0 %1553 }
 0x385   : > { %v1592_v24 = vsel %vm1131_vm2, %v1554_v46, 0 }
 0x388   : > { %v1552_v9 = vpop.permute.xlu0 %1551 }
 0x389   : > { %v1589_v59 = vsel %vm1131_vm2, %v1552_v9, 0 }
 0x38c   : > { %v1550_v56 = vpop.permute.xlu0 %1549 }
 0x38d   : > { %v1586_v28 = vsel %vm1131_vm2, %v1550_v56, 0 }
 0x390   : > { %v1548_v6 = vpop.permute.xlu0 %1547 }
 0x391   : > { %v1583_v32 = vsel %vm1131_vm2, %v1548_v6, 0 }
 0x394   : > { %v1546_v36 = vpop.permute.xlu0 %1545 }
 0x398   : > { %v1719_v57 = vpop.permute.xlu0 %1718 }
 0x399   : > { %2430 = vmatprep.subr.bf16.mxu1 %v1719_v57 }
 0x39c   : > { %v1703_v35 = vpop.permute.xlu0 %1702 }
 0x39d   : > { %2431 = vmatpush3.bf16.msra.mxu1 %v1703_v35 }
 0x3b6   : > { %v1435_v60 = vpop.xlane.xlu1 %1434 }
 0x3b7   : > { %2665 = vrcp.f32 %v1435_v60 }
 0x3ba   : > { %v1578_v43 = vpop.permute.xlu1 %1577 }
 0x3bb   : > { %2599 = vmatprep.subr.msk.bf16.mxu0 %vm1131_vm2, %v1578_v43 }
 0x3be   : > { %v1576_v18 = vpop.permute.xlu1 %1575 }
 0x3c2   : > { %v1574_v51 = vpop.permute.xlu1 %1573 }
 0x3c4   : > { %v2666_v7 = vpop.eup %2665 }
 0x3c5   : > { %v1438_v26 = vmul.f32 %v2666_v7, %v3435_v38  ;;  %v1437_v44 = vmul.f32 %v2666_v7, %v3431_v22  ;;  %v1598_v22 = vsel %vm1131_vm2, %v1558_v48, 0 }
 0x3c6   : > { %v1572_v38 = vpop.permute.xlu1 %1571 }
 0x3c7   : > { %v1440_v8 = vpack.c.bf16 %v1438_v26, %v1438_v26  ;;  %v1439_v62 = vpack.c.bf16 %v1437_v44, %v1437_v44 }
 0x3c9   : > { %1537 = vmatprep.mubr.bf16.mxu0 %v1440_v8 }
 0x3ca   : > { %1538 = vmatmul.mubr.bf16.vlgmr.msra.gmra.mxu0 %v1439_v62  ;;  %v1570_v55 = vpop.permute.xlu1 %1569 }
 0x3cb   : > { %2413 = vmatpush3.bf16.xpose.msra.mxu0 %v1604_v1  ;;  %2428 = vmatprep.mubr.msk.bf16.mxu0 %vm1131_vm2, %v1546_v36 }
 0x3cc   : > { %2600 = vmatprep.subr.msk.bf16.mxu0 %vm1131_vm2, %v1576_v18 }
 0x3ce   : > { %v1568_v23 = vpop.permute.xlu1 %1567 }
 0x3d2   : > { %v1566_v34 = vpop.permute.xlu1 %1565 }
 0x3d3   : > { %2415 = vmatpush3.bf16.xpose.msra.mxu0 %v1601_v42 }
 0x3d4   : > { %2601 = vmatprep.subr.msk.bf16.mxu0 %vm1131_vm2, %v1574_v51 }
 0x3d6   : > { %v1564_v48 = vpop.permute.xlu1 %1563 }
 0x3db   : > { %2417 = vmatpush3.bf16.xpose.msra.mxu0 %v1598_v22 }
 0x3dc   : > { %2602 = vmatprep.subr.msk.bf16.mxu0 %vm1131_vm2, %v1572_v38 }
 0x3e3   : > { %2419 = vmatpush3.bf16.xpose.msra.mxu0 %v1595_v53 }
 0x3e4   : > { %2603 = vmatprep.subr.msk.bf16.mxu0 %vm1131_vm2, %v1570_v55 }
 0x3eb   : > { %2421 = vmatpush3.bf16.xpose.msra.mxu0 %v1592_v24 }
 0x3ec   : > { %2604 = vmatprep.subr.msk.bf16.mxu0 %vm1131_vm2, %v1568_v23 }
 0x3f3   : > { %2423 = vmatpush3.bf16.xpose.msra.mxu0 %v1589_v59 }
 0x3f4   : > { %2605 = vmatprep.subr.msk.bf16.mxu0 %vm1131_vm2, %v1566_v34 }
 0x3fb   : > { %2425 = vmatpush3.bf16.xpose.msra.mxu0 %v1586_v28 }
 0x3fc   : > { %2606 = vmatprep.subr.msk.bf16.mxu0 %vm1131_vm2, %v1564_v48 }
 0x403   : > { %2427 = vmatpush3.bf16.xpose.msra.mxu0 %v1583_v32 }
 0x40a   : > { %2429 = vmatmul.mubr.msk.bf16.vlgmr.msra.gmra.mxu0 %vm1131_vm2, %v1546_v36 }
 0x424   : > { %v2366_v11 = vpop.f32.mrf.mxu0 }
 0x426   : > { %v2367_v46 = vpop.f32.mrf.mxu0 }
 0x427   : > { %v3485_v57 = vadd.f32 %v2367_v46, %v2366_v11 }
 0x428   : > { %v2369_v9 = vpop.f32.mrf.mxu0 }
 0x42a   : > { %v2370_v35 = vpop.f32.mrf.mxu0 }
 0x48a   : > { %v2406_v60 = vpop.f32.mrf.mxu0 }
 0x48c   : > { %v2407_v43 = vpop.f32.mrf.mxu0 }
 0x48d   : > { %v3487_v7 = vadd.f32 %v2407_v43, %v2406_v60 }
 0x48e   : > { %v2409_v56 = vpop.f32.mrf.mxu0 }
 0x490   : > { %v2410_v26 = vpop.f32.mrf.mxu0 }
 0x4ca   : > { %v1664_v44 = vpop.f32.mrf.mxu0 }
 0x4cc   : > { %v1666_v8 = vpop.f32.mrf.mxu0 }
 0x4cd   : > { %v1671_v62 = vmax.f32 %v1664_v44, %v1666_v8 }
 0x4ce   : > { %v1668_v1 = vpop.f32.mrf.mxu0 }
 0x4cf   : > { %1672 = vmax.xlane.f32.xlu1 %v1671_v62 }
 0x4d0   : > { %v1669_v6 = vpop.f32.mrf.mxu0 }
 0x4e0   : > { %1716 = vrot.lane.b32.xlu1 %v3310_v37, %s2709_s26 }
 0x4e4   : > { %1714 = vrot.lane.b32.xlu1 %v3320_v5, %s2709_s26 }
 0x4e8   : > { %1698 = vrot.lane.b32.xlu1 %v3328_v4, %s2709_s26 }
 0x4ec   : > { %1712 = vrot.lane.b32.xlu1 %v3334_v12, %s2709_s26 }
 0x4f0   : > { %1710 = vrot.lane.b32.xlu1 %v3344_v21, %s2709_s26 }
 0x4f4   : > { %1708 = vrot.lane.b32.xlu1 %v3354_v29, %s2709_s26 }
 0x4f8   : > { %1706 = vrot.lane.b32.xlu1 %v3361_v14, %s2709_s26 }
 0x4fc   : > { %1704 = vrot.lane.b32.xlu1 %v3369_v16, %s2709_s26 }
 0x500   : > { %1792 = vrot.lane.b32.xlu1 %v3128_v63, %s2710_s27  ;;  %v1701_v63 = vpop.permute.xlu0 %1700 }
 0x504   : > { %1790 = vrot.lane.b32.xlu1 %v3133_v3, %s2710_s27 }
 0x508   : > { %1788 = vrot.lane.b32.xlu1 %v3160_v41, %s2710_s27 }
 0x50c   : > { %1786 = vrot.lane.b32.xlu1 %v3176_v13, %s2710_s27 }
 0x510   : > { %1784 = vrot.lane.b32.xlu1 %v3190_v40, %s2710_s27 }
 0x514   : > { %1782 = vrot.lane.b32.xlu1 %v3206_v49, %s2710_s27  ;;  %v1697_v49 = vpop.permute.xlu0 %1696 }
 0x518   : > { %1780 = vrot.lane.b32.xlu1 %v3105_v15, %s2710_s27 }
 0x51c   : > { %1778 = vrot.lane.b32.xlu1 %v3110_v33, %s2710_s27 }
 0x520   : > { %1776 = vrot.lane.b32.xlu1 %v3121_v50, %s2710_s27 }
 0x524   : > { %1949 = vrot.lane.b32.xlu1 %v3307_v25, %s2710_s27 }
 0x528   : > { %1947 = vrot.lane.b32.xlu1 %v3310_v37, %s2710_s27 }
 0x52c   : > { %1929 = vrot.lane.b32.xlu1 %v3328_v4, %s2710_s27 }
 0x530   : > { %1927 = vrot.lane.b32.xlu1 %v3340_v20, %s2710_s27 }
 0x534   : > { %1925 = vrot.lane.b32.xlu1 %v3278_v19, %s2710_s27 }
 0x538   : > { %1923 = vrot.lane.b32.xlu1 %v3281_v31, %s2710_s27  ;;  %v1695_v31 = vpop.permute.xlu0 %1694 }
 0x53c   : > { %1921 = vrot.lane.b32.xlu1 %v3270_v10, %s2710_s27  ;;  %v1693_v36 = vpop.permute.xlu0 %1692 }
 0x540   : > { %v1691_v42 = vpop.permute.xlu0 %1690 }
 0x544   : > { %v1689_v38 = vpop.permute.xlu0 %1688 }
 0x558   : > { %v1673_v15 = vpop.xlane.xlu1 %1672 }
 0x559   : > { %v1674_v33 = vsub.f32 %v1664_v44, %v1673_v15  ;;  %v1675_v50 = vsub.f32 %v1666_v8, %v1673_v15 }
 0x55b   : > { %v1676_v3 = vmul.f32 1.442695, %v1674_v33  ;;  %v1678_v41 = vmul.f32 1.442695, %v1675_v50 }
 0x55c   : > { %v1717_v13 = vpop.permute.xlu1 %1716 }
 0x55d   : > { %2667 = vpow2.f32 %v1676_v3  ;;  %2432 = vmatprep.subr.bf16.mxu1 %v1717_v13 }
 0x55e   : > { %2669 = vpow2.f32 %v1678_v41  ;;  %2433 = vmatpush3.bf16.msra.mxu1 %v1701_v63 }
 0x560   : > { %v1715_v40 = vpop.permute.xlu1 %1714 }
 0x561   : > { %2434 = vmatprep.subr.bf16.mxu1 %v1715_v40 }
 0x564   : > { %v1699_v19 = vpop.permute.xlu1 %1698 }
 0x565   : > { %2435 = vmatpush3.bf16.msra.mxu1 %v1699_v19 }
 0x568   : > { %v1713_v25 = vpop.permute.xlu1 %1712 }
 0x569   : > { %2436 = vmatprep.subr.bf16.mxu1 %v1713_v25 }
 0x56a   : > { %v2668_v10 = vpop.eup %2667  ;;  %2437 = vmatpush3.bf16.msra.mxu1 %v1697_v49 }
 0x56b   : > { %v2670_v37 = vpop.eup %2669 }
 0x56c   : > { %v1711_v4 = vpop.permute.xlu1 %1710  ;;  %v1680_v20 = vadd.f32 %v2670_v37, %v2668_v10 }
 0x56d   : > { %2438 = vmatprep.subr.bf16.mxu1 %v1711_v4 }
 0x56e   : > { %1681 = vadd.xlane.f32.xlu0 %v1680_v20  ;;  %2439 = vmatpush3.bf16.msra.mxu1 %v1695_v31 }
 0x570   : > { %v1709_v18 = vpop.permute.xlu1 %1708 }
 0x571   : > { %2440 = vmatprep.subr.bf16.mxu1 %v1709_v18 }
 0x572   : > { %2441 = vmatpush3.bf16.msra.mxu1 %v1693_v36 }
 0x574   : > { %v1707_v51 = vpop.permute.xlu1 %1706 }
 0x575   : > { %2442 = vmatprep.subr.bf16.mxu1 %v1707_v51 }
 0x576   : > { %2443 = vmatpush3.bf16.msra.mxu1 %v1691_v42 }
 0x578   : > { %v1705_v22 = vpop.permute.xlu1 %1704 }
 0x579   : > { %2444 = vmatprep.subr.bf16.mxu1 %v1705_v22 }
 0x57a   : > { %2445 = vmatpush3.bf16.msra.mxu1 %v1689_v38 }
 0x57c   : > { %v1793_v53 = vpop.permute.xlu1 %1792 }
 0x57d   : > { %v1835_v9 = vsel %vm1131_vm2, %v1793_v53, 0 }
 0x580   : > { %v1791_v55 = vpop.permute.xlu1 %1790 }
 0x584   : > { %1808 = vrot.lane.b32.xlu0 %v3147_v17, %s2710_s27  ;;  %v1789_v24 = vpop.permute.xlu1 %1788 }
 0x585   : > { %v1829_v60 = vsel %vm1131_vm2, %v1789_v24, 0 }
 0x588   : > { %1806 = vrot.lane.b32.xlu0 %v3152_v30, %s2710_s27  ;;  %v1787_v23 = vpop.permute.xlu1 %1786 }
 0x589   : > { %v1826_v56 = vsel %vm1131_vm2, %v1787_v23, 0 }
 0x58c   : > { %1804 = vrot.lane.b32.xlu0 %v3169_v52, %s2710_s27  ;;  %v1785_v59 = vpop.permute.xlu1 %1784 }
 0x58d   : > { %v1823_v44 = vsel %vm1131_vm2, %v1785_v59, 0 }
 0x590   : > { %1802 = vrot.lane.b32.xlu0 %v3184_v39, %s2710_s27  ;;  %v1783_v34 = vpop.permute.xlu1 %1782 }
 0x591   : > { %v1820_v62 = vsel %vm1131_vm2, %v1783_v34, 0 }
 0x594   : > { %1800 = vrot.lane.b32.xlu0 %v3201_v47, %s2710_s27  ;;  %v1781_v28 = vpop.permute.xlu1 %1780 }
 0x595   : > { %v1817_v6 = vsel %vm1131_vm2, %v1781_v28, 0 }
 0x598   : > { %1798 = vrot.lane.b32.xlu0 %v3212_v54, %s2710_s27  ;;  %v1779_v17 = vpop.permute.xlu1 %1778 }
 0x599   : > { %v1814_v33 = vsel %vm1131_vm2, %v1779_v17, 0 }
 0x59c   : > { %1796 = vrot.lane.b32.xlu0 %v3224_v58, %s2710_s27  ;;  %v1777_v30 = vpop.permute.xlu1 %1776 }
 0x5a0   : > { %1794 = vrot.lane.b32.xlu0 %v3234_v61, %s2710_s27  ;;  %v1950_v52 = vpop.permute.xlu1 %1949  ;;  %v1832_v61 = vsel %vm1131_vm2, %v1791_v55, 0 }
 0x5a1   : > { %2470 = vmatprep.subr.bf16.mxu0 %v1950_v52 }
 0x5f7   : > { %v1682_v48 = vpop.xlane.xlu0 %1681 }
 0x5f8   : > { %2671 = vrcp.f32 %v1682_v48  ;;  %v2654_v48 = vld [vmem:[%s3636_s6] sm:$0xff]  }
 0x5fb   : > { %v1809_v39 = vpop.permute.xlu0 %1808 }
 0x5fc   : > { %2607 = vmatprep.subr.msk.bf16.mxu1 %vm1131_vm2, %v1809_v39 }
 0x5ff   : > { %v1807_v58 = vpop.permute.xlu0 %1806 }
 0x603   : > { %v1805_v35 = vpop.permute.xlu0 %1804 }
 0x605   : > { %v2672_v47 = vpop.eup %2671 }
 0x606   : > { %v1685_v32 = vmul.f32 %v2672_v47, %v2670_v37  ;;  %v1684_v11 = vmul.f32 %v2672_v47, %v2668_v10 }
 0x607   : > { %v1803_v43 = vpop.permute.xlu0 %1802 }
 0x608   : > { %v1687_v46 = vpack.c.bf16 %v1685_v32, %v1685_v32  ;;  %v1686_v54 = vpack.c.bf16 %v1684_v11, %v1684_v11 }
 0x60a   : > { %1768 = vmatprep.mubr.bf16.mxu1 %v1687_v46 }
 0x60b   : > { %1769 = vmatmul.mubr.bf16.vlgmr.msra.gmra.mxu1 %v1686_v54  ;;  %v1801_v26 = vpop.permute.xlu0 %1800 }
 0x60c   : > { %2453 = vmatpush3.bf16.xpose.msra.mxu1 %v1835_v9  ;;  %2468 = vmatprep.mubr.msk.bf16.mxu1 %vm1131_vm2, %v1777_v30 }
 0x60d   : > { %2608 = vmatprep.subr.msk.bf16.mxu1 %vm1131_vm2, %v1807_v58 }
 0x60f   : > { %v1799_v8 = vpop.permute.xlu0 %1798 }
 0x613   : > { %v1797_v1 = vpop.permute.xlu0 %1796 }
 0x614   : > { %2455 = vmatpush3.bf16.xpose.msra.mxu1 %v1832_v61 }
 0x615   : > { %2609 = vmatprep.subr.msk.bf16.mxu1 %vm1131_vm2, %v1805_v35 }
 0x617   : > { %v1795_v15 = vpop.permute.xlu0 %1794 }
 0x61c   : > { %2457 = vmatpush3.bf16.xpose.msra.mxu1 %v1829_v60 }
 0x61d   : > { %2610 = vmatprep.subr.msk.bf16.mxu1 %vm1131_vm2, %v1803_v43  ;;  %v2284_v43 = vld [vmem:[%s3637_s7] ss:$0 sm:$0xff] }
 0x624   : > { %2459 = vmatpush3.bf16.xpose.msra.mxu1 %v1826_v56 }
 0x625   : > { %2611 = vmatprep.subr.msk.bf16.mxu1 %vm1131_vm2, %v1801_v26 }
 0x62c   : > { %2461 = vmatpush3.bf16.xpose.msra.mxu1 %v1823_v44 }
 0x62d   : > { %2612 = vmatprep.subr.msk.bf16.mxu1 %vm1131_vm2, %v1799_v8  ;;  %v2681_v8 = vld [vmem:[%s2915_s25] sm:$0xff] }
 0x634   : > { %2463 = vmatpush3.bf16.xpose.msra.mxu1 %v1820_v62 }
 0x635   : > { %2613 = vmatprep.subr.msk.bf16.mxu1 %vm1131_vm2, %v1797_v1 }
 0x63c   : > { %2465 = vmatpush3.bf16.xpose.msra.mxu1 %v1817_v6 }
 0x63d   : > { %2614 = vmatprep.subr.msk.bf16.mxu1 %vm1131_vm2, %v1795_v15 }
 0x644   : > { %2467 = vmatpush3.bf16.xpose.msra.mxu1 %v1814_v33 }
 0x64b   : > { %2469 = vmatmul.mubr.msk.bf16.vlgmr.msra.gmra.mxu1 %vm1131_vm2, %v1777_v30 }
 0x6cb   : > { %v2446_v50 = vpop.f32.mrf.mxu1 }
 0x6cd   : > { %v2447_v63 = vpop.f32.mrf.mxu1 }
 0x6ce   : > { %v2448_v3 = vadd.f32 %v2447_v63, %v2446_v50 }
 0x6cf   : > { %v2449_v41 = vpop.f32.mrf.mxu1 }
 0x6d1   : > { %v2450_v13 = vpop.f32.mrf.mxu1 }
 0x70b   : > { %v1895_v40 = vpop.f32.mrf.mxu1 }
 0x70d   : > { %v1897_v49 = vpop.f32.mrf.mxu1 }
 0x70e   : > { %v1902_v19 = vmax.f32 %v1895_v40, %v1897_v49 }
 0x70f   : > { %v1899_v31 = vpop.f32.mrf.mxu1 }
 0x710   : > { %1903 = vmax.xlane.f32.xlu0 %v1902_v19  ;;  %v2288_v19 = vld [vmem:[%s3638_s8] ss:$0 sm:$0xff] }
 0x711   : > { %v1900_v25 = vpop.f32.mrf.mxu1 }
 0x712   : > { %v2289_v25 = vld [vmem:[%s3639_s9] ss:$0 sm:$0xff] }
 0x726   : > { %1933 = vrot.lane.b32.xlu0 %v3285_v45, %s2710_s27  ;;  %v1948_v45 = vpop.permute.xlu1 %1947 }
 0x72a   : > { %1931 = vrot.lane.b32.xlu0 %v3316_v0, %s2710_s27 }
 0x72e   : > { %1945 = vrot.lane.b32.xlu0 %v3320_v5, %s2710_s27 }
 0x732   : > { %1943 = vrot.lane.b32.xlu0 %v3334_v12, %s2710_s27 }
 0x736   : > { %1941 = vrot.lane.b32.xlu0 %v3344_v21, %s2710_s27  ;;  %v1930_v21 = vpop.permute.xlu1 %1929 }
 0x73a   : > { %1939 = vrot.lane.b32.xlu0 %v3354_v29, %s2710_s27 }
 0x73e   : > { %1937 = vrot.lane.b32.xlu0 %v3361_v14, %s2710_s27  ;;  %v1928_v14 = vpop.permute.xlu1 %1927 }
 0x742   : > { %1935 = vrot.lane.b32.xlu0 %v3369_v16, %s2710_s27 }
 0x746   : > { %2008 = vrot.lane.b32.xlu0 %v3487_v7, %s2711_s28  ;;  %v1926_v7 = vpop.permute.xlu1 %1925  ;;  %s422_s28 = scalar_lea.vmem %s3640_s10, %s2224_s22 }
 0x74a   : > { %v1924_v22 = vpop.permute.xlu1 %1923 }
 0x74e   : > { %v1922_v55 = vpop.permute.xlu1 %1921 }
 0x799   : > { %v1904_v0 = vpop.xlane.xlu0 %1903 }
 0x79a   : > { %v1905_v5 = vsub.f32 %v1895_v40, %v1904_v0  ;;  %v1906_v10 = vsub.f32 %v1897_v49, %v1904_v0 }
 0x79c   : > { %v1907_v12 = vmul.f32 1.442695, %v1905_v5  ;;  %v1909_v37 = vmul.f32 1.442695, %v1906_v10 }
 0x79d   : > { %v1934_v4 = vpop.permute.xlu0 %1933 }
 0x79e   : > { %2673 = vpow2.f32 %v1907_v12  ;;  %2471 = vmatpush3.bf16.msra.mxu0 %v1934_v4 }
 0x79f   : > { %2675 = vpow2.f32 %v1909_v37  ;;  %2472 = vmatprep.subr.bf16.mxu0 %v1948_v45 }
 0x7a1   : > { %v1932_v29 = vpop.permute.xlu0 %1931 }
 0x7a2   : > { %2473 = vmatpush3.bf16.msra.mxu0 %v1932_v29 }
 0x7a5   : > { %v1946_v20 = vpop.permute.xlu0 %1945 }
 0x7a6   : > { %2474 = vmatprep.subr.bf16.mxu0 %v1946_v20 }
 0x7a7   : > { %2475 = vmatpush3.bf16.msra.mxu0 %v1930_v21 }
 0x7a9   : > { %v1944_v16 = vpop.permute.xlu0 %1943 }
 0x7aa   : > { %2476 = vmatprep.subr.bf16.mxu0 %v1944_v16 }
 0x7ab   : > { %v2674_v36 = vpop.eup %2673  ;;  %2477 = vmatpush3.bf16.msra.mxu0 %v1928_v14 }
 0x7ac   : > { %v2676_v18 = vpop.eup %2675 }
 0x7ad   : > { %v1942_v42 = vpop.permute.xlu0 %1941  ;;  %v1911_v51 = vadd.f32 %v2676_v18, %v2674_v36 }
 0x7ae   : > { %2478 = vmatprep.subr.bf16.mxu0 %v1942_v42 }
 0x7af   : > { %1912 = vadd.xlane.f32.xlu1 %v1911_v51  ;;  %2479 = vmatpush3.bf16.msra.mxu0 %v1926_v7 }
 0x7b1   : > { %v1940_v38 = vpop.permute.xlu0 %1939 }
 0x7b2   : > { %2480 = vmatprep.subr.bf16.mxu0 %v1940_v38 }
 0x7b3   : > { %2481 = vmatpush3.bf16.msra.mxu0 %v1924_v22 }
 0x7b5   : > { %v1938_v53 = vpop.permute.xlu0 %1937 }
 0x7b6   : > { %2482 = vmatprep.subr.bf16.mxu0 %v1938_v53 }
 0x7b7   : > { %2483 = vmatpush3.bf16.msra.mxu0 %v1922_v55 }
 0x7b9   : > { %v1936_v24 = vpop.permute.xlu0 %1935 }
 0x7ba   : > { %2484 = vmatprep.subr.bf16.mxu0 %v1936_v24 }
 0x7bd   : > { %v2009_v54 = vpop.permute.xlu0 %2008 }
 0x7be   : > { %v2019_v58 = vsel %vm1131_vm2, %v3485_v57, %v2009_v54 }
 0x7c0   : > { %1919 = vrot.lane.b32.xlu1 %v3273_v27, %s2710_s27  ;;  %v2653_v27 = vld [vmem:[%s3636_s6 + $0x8] sm:$0xff]  }
 0x7c4   : > { %2012 = vrot.lane.b32.xlu1 %v2448_v3, %s2712_s29 }
 0x838   : > { %v1913_v23 = vpop.xlane.xlu1 %1912 }
 0x839   : > { %2677 = vrcp.f32 %v1913_v23 }
 0x83c   : > { %v1920_v59 = vpop.permute.xlu1 %1919 }
 0x83d   : > { %2485 = vmatpush3.bf16.msra.mxu0 %v1920_v59 }
 0x83e   : > { %2575 = vmatprep.subr.bf16.mxu0 %v2706_v2 }
 0x840   : > { %v2013_v9 = vpop.permute.xlu1 %2012 }
 0x841   : > { %v2021_v61 = vsel %vm2020_vm3, %v2019_v58, %v2013_v9 }
 0x846   : > { %v2678_v34 = vpop.eup %2677 }
 0x847   : > { %v1916_v28 = vmul.f32 %v2678_v34, %v2676_v18  ;;  %v1915_v17 = vmul.f32 %v2678_v34, %v2674_v36 }
 0x849   : > { %v1918_v30 = vpack.c.bf16 %v1916_v28, %v1916_v28  ;;  %v1917_v52 = vpack.c.bf16 %v1915_v17, %v1915_v17 }
 0x84b   : > { %1999 = vmatprep.mubr.bf16.mxu0 %v1918_v30 }
 0x84c   : > { %2000 = vmatmul.mubr.bf16.vlgmr.msra.gmra.mxu0 %v1917_v52 }
 0x84d   : > { %2579 = vmatprep.mubr.msk.bf16.mxu0 %vm2707_vm0, %v2706_v2  ;;  %2576 = vmatpush3.bf16.msra.mxu0 %v2653_v27 }
 0x84e   : > { %2577 = vmatprep.subr.bf16.mxu0 %v2706_v2 }
 0x851   : > { %2578 = vmatpush3.bf16.msra.mxu0 %v2654_v48 }
 0x90c   : > { %v2486_v39 = vpop.f32.mrf.mxu0 }
 0x90e   : > { %v2487_v47 = vpop.f32.mrf.mxu0 }
 0x90f   : > { %v2488_v32 = vadd.f32 %v2487_v47, %v2486_v39 }
 0x910   : > { %v2489_v11 = vpop.f32.mrf.mxu0 }
 0x911   : > { %2016 = vrot.lane.b32.xlu0 %v2488_v32, %s2713_s18 }
 0x912   : > { %v2490_v46 = vpop.f32.mrf.mxu0 }
 0x983   : > { %v2017_v35 = vpop.permute.xlu0 %2016 }
 0x984   : > { %v2023_v60 = vsel %vm2022_vm4, %v2021_v61, %v2017_v35 }
 0x985   : > { %v2024_v2 = vpack.c.bf16 %v2023_v60, %v2023_v60 }
 0x987   : > { %2580 = vmatmul.mubr.msk.bf16.vlgmr.msra.gmra.mxu0 %vm483_vm1, %v2024_v2 }
 0xa47   : > { %v2080_v56 = vpop.f32.mrf.mxu0 }
 0xa48   : > { %v2081_v26 = vadd.f32 %v2284_v43, %v2080_v56 }
 0xa49   : > { %v2581_v44 = vpop.f32.mrf.mxu0 }
 0xa4a   : > { %v2086_v62 = vadd.f32 %v2681_v8, %v2081_v26 }
 0xa4b   : > { %v2083_v1 = vpop.f32.mrf.mxu0 }
 0xa4c   : > { %v2087_v6 = vsel %vm483_vm1, %v2086_v62, 0.0 }
 0xa4d   : > { %2088 = vadd.xlane.f32.xlu1 %v2087_v6  ;;  %v2582_v57 = vpop.f32.mrf.mxu0 }
 0xad6   : > { %v2089_v15 = vpop.xlane.xlu1 %2088 }
 0xad7   : > { %v2091_v33 = vmul.f32 0.03125, %v2089_v15 }
 0xad9   : > { %v2092_v50 = vsub.f32 %v2086_v62, %v2091_v33 }
 0xadb   : > { %v2093_v63 = vmul.f32 %v2092_v50, %v2092_v50 }
 0xadd   : > { %v2094_v3 = vsel %vm483_vm1, %v2093_v63, 0.0 }
 0xade   : > { %2095 = vadd.xlane.f32.xlu0 %v2094_v3 }
 0xb67   : > { %v2096_v41 = vpop.xlane.xlu0 %2095 }
 0xb68   : > { %v2097_v13 = vmul.f32 0.03125, %v2096_v41 }
 0xb6a   : > { %v2098_v40 = vadd.f32 1e-05, %v2097_v13 }
 0xb6c   : > { %2679 = vrsqrt.f32 %v2098_v40 }
 0xb79   : > { %v2680_v49 = vpop.eup %2679 }
 0xb7a   : > { %v2100_v31 = vmul.f32 %v2680_v49, %v2092_v50 }
 0xb7c   : > { %v2107_v45 = vmul.f32 %v2288_v19, %v2100_v31 }
 0xb7e   : > { %v2114_v0 = vadd.f32 %v2289_v25, %v2107_v45 }
 0xb80   : > { %2115 = vst.msk [vmem:[%s422_s28] sm:$0xff] %vm483_vm1, %v2114_v0 }
 0xb81 PF: > { %s20_s15 = sadd.s32 1, %s2704_s15   ;;  %s3641_s13 = smov %s2700_s14 }
 0xb82   : > { %p17_p5 = scmp.ge.s32.totalorder %s20_s15, 4   ;;  %s3642_s14 = smov %s3644_s16 }
 0xb84   :  { %19 = sbr.rel (!%p17_p5) target bundleno = 2 (0x2), region = 100 }

// kernel: detr_forward.19
= control target key start
LH: loop header
LB: loop body
LE: loop exit
PB: predicated region body
PF: predicated region fallthrough
CT: control target
= control target key end

     0   :  { %vm45_vm0 = vcmask 261120   ;;  %v473_v14 = vmov 0.0   ;;  %vm474_vm1 = vmmov 0   ;;  %vm157_vm2 = vcmask 39936   ;;  %s624_s0 = inlined_call_operand.vmem [shape: f32[16,32], index: 0, kind: input, shape index: {}]   ;;  %s625_s3 = inlined_call_operand.vmem [shape: bf16[32,5], index: 3, kind: input, shape index: {}]   ;;  %s626_s5 = inlined_call_operand.vmem [shape: bf16[32,32], index: 5, kind: input, shape index: {}]   ;;  %s627_s1 = inlined_call_operand.vmem [shape: f32[1,32], index: 1, kind: input, shape index: {}]   ;;  %s628_s2 = inlined_call_operand.vmem [shape: f32[1,32], index: 2, kind: input, shape index: {}]   ;;  %s629_s7 = inlined_call_operand.vmem [shape: bf16[32,32], index: 7, kind: input, shape index: {}]   ;;  %s630_s4 = inlined_call_operand.vmem [shape: f32[1,5], index: 4, kind: input, shape index: {}]   ;;  %s631_s6 = inlined_call_operand.vmem [shape: f32[1,32], index: 6, kind: input, shape index: {}]   ;;  %s632_s11 = inlined_call_operand.vmem [shape: f32[16,5], index: 11, kind: output, shape index: {0}]   ;;  %s633_s9 = inlined_call_operand.vmem [shape: bf16[32,4], index: 9, kind: input, shape index: {}]   ;;  %s634_s8 = inlined_call_operand.vmem [shape: f32[1,32], index: 8, kind: input, shape index: {}]   ;;  %s635_s10 = inlined_call_operand.vmem [shape: f32[1,4], index: 10, kind: input, shape index: {}]   ;;  %s636_s12 = inlined_call_operand.vmem [shape: f32[16,4], index: 12, kind: output, shape index: {1}]  }
   0x1   :  { %v41_v0 = vld [vmem:[%s624_s0] sm:$0xff]  ;;  %v42_v1 = vld [vmem:[%s624_s0 + $0x8] sm:$0xff]  ;;  %419 = vmatprep.subr.bf16.mxu0 %v473_v14  ;;  %427 = vmatprep.subr.bf16.mxu1 %v473_v14  ;;  %vm376_vm3 = vcmask 31744  }
   0x2   :  { %v46_v2 = vsel %vm45_vm0, %v41_v0, 0.0  ;;  %v49_v3 = vsel %vm45_vm0, %v42_v1, 0.0  ;;  %v453_v15 = vld [vmem:[%s625_s3 + $0x8] sm:$0xff]   ;;  %423 = vmatprep.mubr.msk.bf16.mxu0 %vm474_vm1, %v473_v14  ;;  %431 = vmatprep.mubr.msk.bf16.mxu1 %vm474_vm1, %v473_v14  ;;  %v455_v17 = vld [vmem:[%s625_s3] sm:$0xff]  }
   0x3   :  { %47 = vadd.xlane.f32.xlu0 %v46_v2  ;;  %v454_v16 = vld [vmem:[%s626_s5 + $0x8] sm:$0xff]   ;;  %420 = vmatpush3.bf16.msra.mxu0 %v453_v15  ;;  %v456_v18 = vld [vmem:[%s626_s5] sm:$0xff]  }
   0x4   :  { %428 = vmatpush3.bf16.msra.mxu1 %v454_v16  ;;  %421 = vmatprep.subr.bf16.mxu0 %v473_v14  ;;  %v387_v27 = vld [vmem:[%s627_s1] ss:$0 sm:$0xff]  ;;  %v457_v36 = vld [vmem:[%s629_s7 + $0x8] sm:$0xff]  }
   0x5   :  { %429 = vmatprep.subr.bf16.mxu1 %v473_v14  ;;  %v388_v31 = vld [vmem:[%s628_s2] ss:$0 sm:$0xff]  ;;  %v459_v55 = vld [vmem:[%s633_s9 + $0x8] sm:$0xff]  }
   0x6   :  { %v458_v37 = vld [vmem:[%s629_s7] sm:$0xff]  }
   0x7   :  { %50 = vadd.xlane.f32.xlu0 %v49_v3  ;;  %422 = vmatpush3.bf16.msra.mxu0 %v455_v17  ;;  %v389_v38 = vld [vmem:[%s630_s4] ss:$0 sm:$0xff] }
   0x8   :  { %430 = vmatpush3.bf16.msra.mxu1 %v456_v18  ;;  %435 = vmatprep.subr.bf16.mxu0 %v473_v14  ;;  %v393_v40 = vld [vmem:[%s631_s6] ss:$0 sm:$0xff] }
   0x9   :  { %443 = vmatprep.subr.bf16.mxu1 %v473_v14  ;;  %v460_v56 = vld [vmem:[%s633_s9] sm:$0xff]  }
   0xa   :  { %v397_v57 = vld [vmem:[%s634_s8] ss:$0 sm:$0xff] }
   0xb   :  { %v401_v3 = vld [vmem:[%s635_s10] ss:$0 sm:$0xff] }
  0x8c   :  { %v48_v4 = vpop.xlane.xlu0 %47 }
  0x8d   :  { %v53_v5 = vmul.f32 0.03125, %v48_v4 }
  0x8f   :  { %v55_v6 = vsub.f32 %v41_v0, %v53_v5 }
  0x90   :  { %v51_v7 = vpop.xlane.xlu0 %50 }
  0x91   :  { %v54_v8 = vmul.f32 0.03125, %v51_v7  ;;  %v57_v9 = vmul.f32 %v55_v6, %v55_v6 }
  0x93   :  { %v56_v10 = vsub.f32 %v42_v1, %v54_v8  ;;  %v59_v11 = vsel %vm45_vm0, %v57_v9, 0.0 }
  0x94   :  { %60 = vadd.xlane.f32.xlu1 %v59_v11 }
  0x95   :  { %v58_v12 = vmul.f32 %v56_v10, %v56_v10 }
  0x97   :  { %v62_v13 = vsel %vm45_vm0, %v58_v12, 0.0 }
  0x98   :  { %63 = vadd.xlane.f32.xlu1 %v62_v13 }
 0x11d   :  { %v61_v19 = vpop.xlane.xlu1 %60 }
 0x11e   :  { %v65_v20 = vmul.f32 0.03125, %v61_v19 }
 0x120   :  { %v67_v21 = vadd.f32 1e-05, %v65_v20 }
 0x121   :  { %v64_v22 = vpop.xlane.xlu1 %63 }
 0x122   :  { %461 = vrsqrt.f32 %v67_v21  ;;  %v66_v23 = vmul.f32 0.03125, %v64_v22 }
 0x124   :  { %v68_v24 = vadd.f32 1e-05, %v66_v23 }
 0x126   :  { %463 = vrsqrt.f32 %v68_v24 }
 0x12f   :  { %v462_v25 = vpop.eup %461 }
 0x130   :  { %v71_v26 = vmul.f32 %v462_v25, %v55_v6 }
 0x132   :  { %v79_v30 = vmul.f32 %v387_v27, %v71_v26 }
 0x133   :  { %v464_v28 = vpop.eup %463 }
 0x134   :  { %v72_v29 = vmul.f32 %v464_v28, %v56_v10  ;;  %v87_v33 = vadd.f32 %v388_v31, %v79_v30 }
 0x136   :  { %v80_v32 = vmul.f32 %v387_v27, %v72_v29 }
 0x138   :  { %v88_v34 = vadd.f32 %v388_v31, %v80_v32 }
 0x13a   :  { %v89_v35 = vpack.c.bf16 %v88_v34, %v87_v33 }
 0x13c   :  { %424 = vmatmul.mubr.msk.bf16.vlgmr.msra.gmra.mxu0 %vm45_vm0, %v89_v35  ;;  %432 = vmatmul.mubr.msk.bf16.vlgmr.msra.gmra.mxu1 %vm45_vm0, %v89_v35 }
 0x13d   :  { %439 = vmatprep.mubr.msk.bf16.mxu0 %vm474_vm1, %v473_v14  ;;  %447 = vmatprep.mubr.msk.bf16.mxu1 %vm474_vm1, %v473_v14 }
 0x13e   :  { %436 = vmatpush3.bf16.msra.mxu0 %v457_v36  ;;  %444 = vmatpush3.bf16.msra.mxu1 %v459_v55 }
 0x13f   :  { %437 = vmatprep.subr.bf16.mxu0 %v473_v14  ;;  %445 = vmatprep.subr.bf16.mxu1 %v473_v14 }
 0x142   :  { %438 = vmatpush3.bf16.msra.mxu0 %v458_v37  ;;  %446 = vmatpush3.bf16.msra.mxu1 %v460_v56 }
 0x1fc   :  { %v150_v39 = vpop.f32.mrf.mxu0  ;;  %v217_v41 = vpop.f32.mrf.mxu1 }
 0x1fd   :  { %v151_v42 = vadd.f32 %v389_v38, %v150_v39  ;;  %v218_v45 = vadd.f32 %v393_v40, %v217_v41 }
 0x1fe   :  { %v425_v43 = vpop.f32.mrf.mxu0  ;;  %v433_v44 = vpop.f32.mrf.mxu1 }
 0x1ff   :  { %158 = vst.msk [vmem:[%s632_s11] sm:$0xff] %vm157_vm2, %v151_v42  ;;  %v224_v52 = vmax.f32 %v218_v45, 0.0 }
 0x200   :  { %v153_v46 = vpop.f32.mrf.mxu0  ;;  %v220_v47 = vpop.f32.mrf.mxu1 }
 0x201   :  { %v154_v48 = vadd.f32 %v389_v38, %v153_v46  ;;  %v221_v49 = vadd.f32 %v393_v40, %v220_v47 }
 0x202   :  { %v426_v50 = vpop.f32.mrf.mxu0  ;;  %v434_v51 = vpop.f32.mrf.mxu1 }
 0x203   :  { %159 = vst.msk [vmem:[%s632_s11 + $0x8] sm:$0xff] %vm157_vm2, %v154_v48  ;;  %v225_v53 = vmax.f32 %v221_v49, 0.0 }
 0x205   :  { %v226_v54 = vpack.c.bf16 %v225_v53, %v224_v52 }
 0x207   :  { %440 = vmatmul.mubr.msk.bf16.vlgmr.msra.gmra.mxu0 %vm45_vm0, %v226_v54 }
 0x2c7   :  { %v287_v58 = vpop.f32.mrf.mxu0 }
 0x2c8   :  { %v288_v60 = vadd.f32 %v397_v57, %v287_v58 }
 0x2c9   :  { %v441_v59 = vpop.f32.mrf.mxu0 }
 0x2ca   :  { %v294_v0 = vmax.f32 %v288_v60, 0.0 }
 0x2cb   :  { %v290_v61 = vpop.f32.mrf.mxu0 }
 0x2cc   :  { %v291_v62 = vadd.f32 %v397_v57, %v290_v61 }
 0x2cd   :  { %v442_v63 = vpop.f32.mrf.mxu0 }
 0x2ce   :  { %v295_v1 = vmax.f32 %v291_v62, 0.0 }
 0x2d0   :  { %v296_v2 = vpack.c.bf16 %v295_v1, %v294_v0 }
 0x2d2   :  { %448 = vmatmul.mubr.msk.bf16.vlgmr.msra.gmra.mxu1 %vm45_vm0, %v296_v2 }
 0x392   :  { %v357_v4 = vpop.f32.mrf.mxu1 }
 0x393   :  { %v358_v5 = vadd.f32 %v401_v3, %v357_v4 }
 0x394   :  { %v449_v6 = vpop.f32.mrf.mxu1 }
 0x395   :  { %v405_v7 = vmul.f32 -1.442695, %v358_v5 }
 0x396   :  { %v360_v8 = vpop.f32.mrf.mxu1 }
 0x397   :  { %465 = vpow2.f32 %v405_v7  ;;  %v361_v9 = vadd.f32 %v401_v3, %v360_v8 }
 0x398   :  { %v450_v10 = vpop.f32.mrf.mxu1 }
 0x399   :  { %v406_v11 = vmul.f32 -1.442695, %v361_v9 }
 0x39b   :  { %467 = vpow2.f32 %v406_v11 }
 0x3a4   :  { %v466_v12 = vpop.eup %465 }
 0x3a5   :  { %v370_v13 = vadd.f32 1.0, %v466_v12 }
 0x3a7   :  { %469 = vrcp.f32 %v370_v13 }
 0x3a8   :  { %v468_v14 = vpop.eup %467 }
 0x3a9   :  { %v371_v15 = vadd.f32 1.0, %v468_v14 }
 0x3ab   :  { %471 = vrcp.f32 %v371_v15 }
 0x3b4   :  { %v470_v16 = vpop.eup %469 }
 0x3b5   :  { %377 = vst.msk [vmem:[%s636_s12] sm:$0xff] %vm376_vm3, %v470_v16 }
 0x3b8   :  { %v472_v17 = vpop.eup %471 }
 0x3b9   :  { %378 = vst.msk [vmem:[%s636_s12 + $0x8] sm:$0xff] %vm376_vm3, %v472_v17 }

</bundles_post_ra>
